<compile_context>
chip_gen: v5e
topology: v5e:2x2
jax: 0.10.0
libtpu: 0.0.40
codegen_flags: <defaults>
</compile_context>

<pallas_src>
import functools

import jax
import jax.numpy as jnp
from jax.experimental import pallas as pl
from jax.experimental.pallas import tpu as pltpu


def _round_up(x, m):
    return (x + m - 1) // m * m


def _basic_block_kernel(x_ref, w1_ref, s1_ref, b1_ref, w2_ref, s2_ref, b2_ref,
                        o_ref, mid_ref, p1_ref, p2_ref, *, tile_h, W, Cp):
    """One (batch, row-tile) grid step.

    x_ref  : (1, H+4, Wp, Cp)     bf16  spatially pre-padded input (+ residual)
    w*_ref : (3, 3*Cp, Cp)        bf16  conv weights, layout [dy, dx*Cp+cin, cout]
    s*,b*  : (1, Cp)              f32   folded BN scale / bias
    o_ref  : (1, tile_h, W, Cp)   bf16  output tile (rows r0 .. r0+tile_h-1)
    mid_ref: (tile_h+2, Wmid, Cp) bf16  conv1 activation + zero column border
    p1_ref : (tile_h+4, W, 3*Cp)  bf16  dx-packed patches for conv1
    p2_ref : (tile_h+2, W, 3*Cp)  bf16  dx-packed patches for conv2
    """
    f32 = jnp.float32
    bf16 = jnp.bfloat16
    h = pl.program_id(1)
    r0 = pl.multiple_of(h * tile_h, tile_h)   # first output row of this tile

    # -------- conv1 patches: pack the 3 dx taps along lanes (pure copies) ----
    for dx in range(3):
        p1_ref[:, :, dx * Cp:(dx + 1) * Cp] = \
            x_ref[0, pl.ds(r0, tile_h + 4), pl.ds(dx, W), :]

    # -------- conv1 = 3 accumulated matmuls, K = 3*Cp; row shifts are free ---
    mid = None
    for dy in range(3):
        part = jnp.einsum("hwk,kc->hwc", p1_ref[dy:dy + tile_h + 2],
                          w1_ref[dy], preferred_element_type=f32)
        mid = part if mid is None else mid + part
    mid = jnp.maximum(mid * s1_ref[...] + b1_ref[...], 0.0)       # BN1 + ReLU

    # -------- stage into halo buffer (bf16); border columns = conv2 zero pad -
    wmid = mid_ref.shape[1]
    mid_ref[:, 0:1, :] = jnp.zeros((tile_h + 2, 1, Cp), bf16)
    mid_ref[:, W + 1:wmid, :] = jnp.zeros((tile_h + 2, wmid - (W + 1), Cp), bf16)
    mid_ref[:, 1:W + 1, :] = mid.astype(bf16)

    # Halo rows outside the image must be zero for conv2 (conv1's own zero
    # padding is NOT conv2's padding).
    @pl.when(h == 0)
    def _():
        mid_ref[0:1, :, :] = jnp.zeros((1, wmid, Cp), bf16)

    @pl.when(h == pl.num_programs(1) - 1)
    def _():
        mid_ref[tile_h + 1:tile_h + 2, :, :] = jnp.zeros((1, wmid, Cp), bf16)

    # -------- conv2 patches + 3 accumulated matmuls ---------------------------
    for dx in range(3):
        p2_ref[:, :, dx * Cp:(dx + 1) * Cp] = mid_ref[:, dx:dx + W, :]

    out = None
    for dy in range(3):
        part = jnp.einsum("hwk,kc->hwc", p2_ref[dy:dy + tile_h],
                          w2_ref[dy], preferred_element_type=f32)
        out = part if out is None else out + part
    out = out * s2_ref[...] + b2_ref[...]                          # BN2

    # Residual: re-read the input tile at the epilogue (not kept live).
    resid = x_ref[0, pl.ds(r0 + 2, tile_h), pl.ds(1, W), :].astype(f32)
    o_ref[...] = jnp.maximum(out + resid, 0.0)[None].astype(o_ref.dtype)


def basic_block(x_nchw, w1_oihw, g1, be1, m1, v1, w2_oihw, g2, be2, m2, v2,
                *, eps=1e-5, tile_h=None):
    """PyTorch-layout wrapper: NCHW input, OIHW weights, BN running stats."""
    N, C, H, W = x_nchw.shape
    Cp = _round_up(max(C, 128), 128)            # lane-dense channel dimension
    if tile_h is None:                          # largest divisor of H up to 32
        tile_h = 1
        for cand in (32, 16, 8, 4, 2, 1):
            if cand <= H and H % cand == 0:
                tile_h = cand
                break
    assert H % tile_h == 0, "H must be divisible by the row tile"
    assert W % 8 == 0, "W must be a multiple of 8 (sublane tiling)"
    Wp = _round_up(W + 2, 8)                    # padded input / halo width
    f32, bf16 = jnp.float32, jnp.bfloat16

    # ---- fold BN into per-channel scale / bias; pad channels with zeros -----
    def fold(g, be, m, v):
        s = g.astype(f32) / jnp.sqrt(v.astype(f32) + eps)
        b = be.astype(f32) - m.astype(f32) * s
        padc = lambda a: jnp.pad(a, (0, Cp - C)).reshape(1, Cp)
        return padc(s), padc(b)

    s1, b1 = fold(g1, be1, m1, v1)
    s2, b2 = fold(g2, be2, m2, v2)

    # ---- weights: OIHW -> HWIO -> channel-pad -> (3, 3*Cp, Cp) bf16 ---------
    def prep_w(w_oihw):
        w = jnp.transpose(w_oihw, (2, 3, 1, 0)).astype(f32)        # (3,3,C,C)
        w = jnp.pad(w, ((0, 0), (0, 0), (0, Cp - C), (0, Cp - C)))
        return w.reshape(3, 3 * Cp, Cp).astype(bf16)   # [dy, dx*Cp+cin, cout]

    w1, w2 = prep_w(w1_oihw), prep_w(w2_oihw)

    # ---- activations: NCHW -> NHWC, bf16, channel-pad, spatial zero pre-pad -
    x = jnp.transpose(x_nchw, (0, 2, 3, 1)).astype(bf16)           # NHWC bf16
    x = jnp.pad(x, ((0, 0), (2, 2), (1, Wp - (W + 1)), (0, Cp - C)))

    grid = (N, H // tile_h)
    kernel = functools.partial(_basic_block_kernel, tile_h=tile_h, W=W, Cp=Cp)

    # ---- VMEM budget: double-buffered blocks + scratch, chip-safe clamp -----
    x_blk = (H + 4) * Wp * Cp * 2
    w_blk = 2 * 3 * 3 * Cp * Cp * 2
    sb_blk = 4 * Cp * 4
    o_blk = tile_h * W * Cp * 2
    scratch_bytes = ((tile_h + 2) * Wp * Cp * 2
                     + (tile_h + 4) * W * 3 * Cp * 2
                     + (tile_h + 2) * W * 3 * Cp * 2)
    vmem_need = 2 * (x_blk + w_blk + sb_blk + o_blk) + scratch_bytes
    vmem_limit = int(min(100 * 2 ** 20, max(32 * 2 ** 20, 2 * vmem_need)))

    tiles = N * (H // tile_h)
    flops = 2 * tiles * ((tile_h + 2) + tile_h) * W * 9 * Cp * Cp
    bytes_accessed = (N * (H + 4) * Wp * Cp * 2 + N * H * W * Cp * 2
                      + 2 * 9 * Cp * Cp * 2 + 4 * Cp * 4)

    out = pl.pallas_call(
        kernel,
        out_shape=jax.ShapeDtypeStruct((N, H, W, Cp), bf16),
        grid=grid,
        in_specs=[
            # full padded image per batch element; re-DMA'd only when n changes
            pl.BlockSpec((1, H + 4, Wp, Cp), lambda n, h: (n, 0, 0, 0)),
            pl.BlockSpec((3, 3 * Cp, Cp), lambda n, h: (0, 0, 0)),
            pl.BlockSpec((1, Cp), lambda n, h: (0, 0)),
            pl.BlockSpec((1, Cp), lambda n, h: (0, 0)),
            pl.BlockSpec((3, 3 * Cp, Cp), lambda n, h: (0, 0, 0)),
            pl.BlockSpec((1, Cp), lambda n, h: (0, 0)),
            pl.BlockSpec((1, Cp), lambda n, h: (0, 0)),
        ],
        out_specs=pl.BlockSpec((1, tile_h, W, Cp), lambda n, h: (n, h, 0, 0)),
        scratch_shapes=[
            pltpu.VMEM((tile_h + 2, Wp, Cp), bf16),          # conv1 act + halo
            pltpu.VMEM((tile_h + 4, W, 3 * Cp), bf16),       # conv1 dx-patches
            pltpu.VMEM((tile_h + 2, W, 3 * Cp), bf16),       # conv2 dx-patches
        ],
        compiler_params=pltpu.CompilerParams(
            dimension_semantics=("parallel", "parallel"),
            vmem_limit_bytes=vmem_limit),
        cost_estimate=pl.CostEstimate(
            flops=flops, transcendentals=0, bytes_accessed=bytes_accessed),
    )(x, w1, s1, b1, w2, s2, b2)

    # TODO(synk): downsample branch of BasicBlock (module uses downsample=None).
    # Drop channel padding, back to NCHW, restore input dtype.
    return jnp.transpose(out[..., :C], (0, 3, 1, 2)).astype(x_nchw.dtype)


# ---------------- plain-JAX reference (NCHW, like PyTorch) ------------------
def ref_basic_block(x_nchw, w1_oihw, g1, be1, m1, v1, w2_oihw, g2, be2, m2, v2,
                    eps=1e-5):
    conv = lambda x, w: jax.lax.conv_general_dilated(
        x, w, window_strides=(1, 1), padding="SAME",
        dimension_numbers=("NCHW", "OIHW", "NCHW"))
    bn = lambda x, g, b, m, v: (x - m[None, :, None, None]) / jnp.sqrt(
        v[None, :, None, None] + eps) * g[None, :, None, None] + b[None, :, None, None]
    out = jax.nn.relu(bn(conv(x_nchw, w1_oihw), g1, be1, m1, v1))
    out = bn(conv(out, w2_oihw), g2, be2, m2, v2)
    return jax.nn.relu(out + x_nchw)


if __name__ == "__main__":
    N, C, H, W = 2, 4, 16, 16   # inplanes = planes = 4, stride = 1, no downsample
    eps = 1e-5

    key = jax.random.PRNGKey(0)
    kx, kw1, kw2, kb1, kb2, km1, km2 = jax.random.split(key, 7)

    x_nchw = jax.random.normal(kx, (N, C, H, W), jnp.float32)
    w1_oihw = jax.random.normal(kw1, (C, C, 3, 3), jnp.float32) * 0.1
    w2_oihw = jax.random.normal(kw2, (C, C, 3, 3), jnp.float32) * 0.1

    gamma1 = jnp.ones((C,), jnp.float32) * 1.1
    beta1 = jax.random.normal(kb1, (C,), jnp.float32) * 0.05
    mean1 = jax.random.normal(km1, (C,), jnp.float32) * 0.1
    var1 = jnp.ones((C,), jnp.float32) * 0.9

    gamma2 = jnp.ones((C,), jnp.float32) * 0.95
    beta2 = jax.random.normal(kb2, (C,), jnp.float32) * 0.05
    mean2 = jax.random.normal(km2, (C,), jnp.float32) * 0.1
    var2 = jnp.ones((C,), jnp.float32) * 1.2

    out = basic_block(x_nchw, w1_oihw, gamma1, beta1, mean1, var1,
                      w2_oihw, gamma2, beta2, mean2, var2, eps=eps)
    out = jax.block_until_ready(out)

    ref = ref_basic_block(x_nchw, w1_oihw, gamma1, beta1, mean1, var1,
                          w2_oihw, gamma2, beta2, mean2, var2, eps)
    ref = jax.block_until_ready(ref)

    assert out.shape == (N, C, H, W)
    max_err = float(jnp.max(jnp.abs(out - ref)))
    # bf16 activations / operands with f32 accumulation -> bf16-level tolerance
    assert jnp.allclose(out, ref, atol=3e-2, rtol=3e-2), max_err
    print("KERNEL_OK")
</pallas_src>

<mosaic_0001>
module attributes {stable_mosaic.version = 11 : i64} {
  func.func @_basic_block_kernel(%arg0: i32, %arg1: i32, %arg2: memref<1x20x24x128xbf16, #tpu.memory_space<vmem>>, %arg3: memref<3x384x128xbf16, #tpu.memory_space<vmem>>, %arg4: memref<1x128xf32, #tpu.memory_space<vmem>>, %arg5: memref<1x128xf32, #tpu.memory_space<vmem>>, %arg6: memref<3x384x128xbf16, #tpu.memory_space<vmem>>, %arg7: memref<1x128xf32, #tpu.memory_space<vmem>>, %arg8: memref<1x128xf32, #tpu.memory_space<vmem>>, %arg9: memref<1x16x16x128xbf16, #tpu.memory_space<vmem>>, %arg10: memref<18x24x128xbf16, #tpu.memory_space<vmem>>, %arg11: memref<20x16x384xbf16, #tpu.memory_space<vmem>>, %arg12: memref<18x16x384xbf16, #tpu.memory_space<vmem>>) attributes {dimension_semantics = [#tpu.dimension_semantics<parallel>, #tpu.dimension_semantics<parallel>], iteration_bounds = array<i64: 2, 1>, scalar_prefetch = 0 : i64, scratch_operands = 3 : i64, tpu.core_type = #tpu.core_type<tc>, window_params = [{transform_indices = @transform_0, window_bounds = array<i64: 1, 20, 24, 128>}, {pipeline_mode = #tpu.pipeline_mode<synchronous>, transform_indices = @transform_1, window_bounds = array<i64: 3, 384, 128>}, {pipeline_mode = #tpu.pipeline_mode<synchronous>, transform_indices = @transform_2, window_bounds = array<i64: 1, 128>}, {pipeline_mode = #tpu.pipeline_mode<synchronous>, transform_indices = @transform_3, window_bounds = array<i64: 1, 128>}, {pipeline_mode = #tpu.pipeline_mode<synchronous>, transform_indices = @transform_4, window_bounds = array<i64: 3, 384, 128>}, {pipeline_mode = #tpu.pipeline_mode<synchronous>, transform_indices = @transform_5, window_bounds = array<i64: 1, 128>}, {pipeline_mode = #tpu.pipeline_mode<synchronous>, transform_indices = @transform_6, window_bounds = array<i64: 1, 128>}, {transform_indices = @transform_7, window_bounds = array<i64: 1, 16, 16, 128>}]} {
    %c16_i32 = arith.constant 16 : i32
    %0 = arith.muli %arg1, %c16_i32 : i32
    %1 = tpu.assume_multiple %0, 16 : i32
    %c0 = arith.constant 0 : index
    %2 = arith.index_cast %1 : i32 to index
    %c0_0 = arith.constant 0 : index
    %c0_1 = arith.constant 0 : index
    %3 = vector.load %arg2[%c0, %2, %c0_0, %c0_1] : memref<1x20x24x128xbf16, #tpu.memory_space<vmem>>, vector<1x20x16x128xbf16>
    %4 = vector.shape_cast %3 : vector<1x20x16x128xbf16> to vector<20x16x128xbf16>
    %c0_2 = arith.constant 0 : index
    %c0_3 = arith.constant 0 : index
    %c0_4 = arith.constant 0 : index
    %5 = vector.load %arg11[%c0_2, %c0_3, %c0_4] : memref<20x16x384xbf16, #tpu.memory_space<vmem>>, vector<20x16x128xbf16>
    tpu.vector_store %arg11[%c0_2, %c0_3, %c0_4], %4 {strides = array<i32>} : memref<20x16x384xbf16, #tpu.memory_space<vmem>>, vector<20x16x128xbf16>,
    %c0_5 = arith.constant 0 : index
    %6 = arith.index_cast %1 : i32 to index
    %c1 = arith.constant 1 : index
    %c0_6 = arith.constant 0 : index
    %7 = vector.load %arg2[%c0_5, %6, %c1, %c0_6] : memref<1x20x24x128xbf16, #tpu.memory_space<vmem>>, vector<1x20x16x128xbf16>
    %8 = vector.shape_cast %7 : vector<1x20x16x128xbf16> to vector<20x16x128xbf16>
    %c0_7 = arith.constant 0 : index
    %c0_8 = arith.constant 0 : index
    %c128 = arith.constant 128 : index
    %9 = vector.load %arg11[%c0_7, %c0_8, %c128] : memref<20x16x384xbf16, #tpu.memory_space<vmem>>, vector<20x16x128xbf16>
    tpu.vector_store %arg11[%c0_7, %c0_8, %c128], %8 {strides = array<i32>} : memref<20x16x384xbf16, #tpu.memory_space<vmem>>, vector<20x16x128xbf16>,
    %c0_9 = arith.constant 0 : index
    %10 = arith.index_cast %1 : i32 to index
    %c2 = arith.constant 2 : index
    %c0_10 = arith.constant 0 : index
    %11 = vector.load %arg2[%c0_9, %10, %c2, %c0_10] : memref<1x20x24x128xbf16, #tpu.memory_space<vmem>>, vector<1x20x16x128xbf16>
    %12 = vector.shape_cast %11 : vector<1x20x16x128xbf16> to vector<20x16x128xbf16>
    %c0_11 = arith.constant 0 : index
    %c0_12 = arith.constant 0 : index
    %c256 = arith.constant 256 : index
    %13 = vector.load %arg11[%c0_11, %c0_12, %c256] : memref<20x16x384xbf16, #tpu.memory_space<vmem>>, vector<20x16x128xbf16>
    tpu.vector_store %arg11[%c0_11, %c0_12, %c256], %12 {strides = array<i32>} : memref<20x16x384xbf16, #tpu.memory_space<vmem>>, vector<20x16x128xbf16>,
    %c0_13 = arith.constant 0 : index
    %c0_14 = arith.constant 0 : index
    %c0_15 = arith.constant 0 : index
    %14 = vector.load %arg11[%c0_13, %c0_14, %c0_15] : memref<20x16x384xbf16, #tpu.memory_space<vmem>>, vector<18x16x384xbf16>
    %c0_16 = arith.constant 0 : index
    %c0_17 = arith.constant 0 : index
    %c0_18 = arith.constant 0 : index
    %15 = vector.load %arg3[%c0_16, %c0_17, %c0_18] : memref<3x384x128xbf16, #tpu.memory_space<vmem>>, vector<1x384x128xbf16>
    %16 = vector.shape_cast %15 : vector<1x384x128xbf16> to vector<384x128xbf16>
    "tpu.trace_start"() <{level = 10 : i32, message = "hwk,kc->hwc"}> : () -> ()
    %cst = arith.constant dense<0.000000e+00> : vector<18x16x128xf32>
    %17 = tpu.matmul %14, %16, %cst {dimension_numbers = #tpu.dot_dimension_numbers<[2], [0], [0, 1], [1], [0, 0, 0, 1, 1, 1], [], []>} : vector<18x16x384xbf16>, vector<384x128xbf16>, vector<18x16x128xf32> -> vector<18x16x128xf32>
    "tpu.trace_stop"() : () -> ()
    %c1_19 = arith.constant 1 : index
    %c0_20 = arith.constant 0 : index
    %c0_21 = arith.constant 0 : index
    %18 = vector.load %arg11[%c1_19, %c0_20, %c0_21] : memref<20x16x384xbf16, #tpu.memory_space<vmem>>, vector<18x16x384xbf16>
    %c1_22 = arith.constant 1 : index
    %c0_23 = arith.constant 0 : index
    %c0_24 = arith.constant 0 : index
    %19 = vector.load %arg3[%c1_22, %c0_23, %c0_24] : memref<3x384x128xbf16, #tpu.memory_space<vmem>>, vector<1x384x128xbf16>
    %20 = vector.shape_cast %19 : vector<1x384x128xbf16> to vector<384x128xbf16>
    "tpu.trace_start"() <{level = 10 : i32, message = "hwk,kc->hwc"}> : () -> ()
    %cst_25 = arith.constant dense<0.000000e+00> : vector<18x16x128xf32>
    %21 = tpu.matmul %18, %20, %cst_25 {dimension_numbers = #tpu.dot_dimension_numbers<[2], [0], [0, 1], [1], [0, 0, 0, 1, 1, 1], [], []>} : vector<18x16x384xbf16>, vector<384x128xbf16>, vector<18x16x128xf32> -> vector<18x16x128xf32>
    "tpu.trace_stop"() : () -> ()
    %22 = arith.addf %17, %21 : vector<18x16x128xf32>
    %c2_26 = arith.constant 2 : index
    %c0_27 = arith.constant 0 : index
    %c0_28 = arith.constant 0 : index
    %23 = vector.load %arg11[%c2_26, %c0_27, %c0_28] : memref<20x16x384xbf16, #tpu.memory_space<vmem>>, vector<18x16x384xbf16>
    %c2_29 = arith.constant 2 : index
    %c0_30 = arith.constant 0 : index
    %c0_31 = arith.constant 0 : index
    %24 = vector.load %arg3[%c2_29, %c0_30, %c0_31] : memref<3x384x128xbf16, #tpu.memory_space<vmem>>, vector<1x384x128xbf16>
    %25 = vector.shape_cast %24 : vector<1x384x128xbf16> to vector<384x128xbf16>
    "tpu.trace_start"() <{level = 10 : i32, message = "hwk,kc->hwc"}> : () -> ()
    %cst_32 = arith.constant dense<0.000000e+00> : vector<18x16x128xf32>
    %26 = tpu.matmul %23, %25, %cst_32 {dimension_numbers = #tpu.dot_dimension_numbers<[2], [0], [0, 1], [1], [0, 0, 0, 1, 1, 1], [], []>} : vector<18x16x384xbf16>, vector<384x128xbf16>, vector<18x16x128xf32> -> vector<18x16x128xf32>
    "tpu.trace_stop"() : () -> ()
    %27 = arith.addf %22, %26 : vector<18x16x128xf32>
    %c0_33 = arith.constant 0 : index
    %c0_34 = arith.constant 0 : index
    %28 = vector.load %arg4[%c0_33, %c0_34] : memref<1x128xf32, #tpu.memory_space<vmem>>, vector<1x128xf32>
    %29 = vector.shape_cast %28 : vector<1x128xf32> to vector<1x1x128xf32>
    %30 = vector.broadcast %29 : vector<1x1x128xf32> to vector<18x16x128xf32>
    %31 = arith.mulf %27, %30 : vector<18x16x128xf32>
    %c0_35 = arith.constant 0 : index
    %c0_36 = arith.constant 0 : index
    %32 = vector.load %arg5[%c0_35, %c0_36] : memref<1x128xf32, #tpu.memory_space<vmem>>, vector<1x128xf32>
    %33 = vector.shape_cast %32 : vector<1x128xf32> to vector<1x1x128xf32>
    %34 = vector.broadcast %33 : vector<1x1x128xf32> to vector<18x16x128xf32>
    %35 = arith.addf %31, %34 : vector<18x16x128xf32>
    %cst_37 = arith.constant 0.000000e+00 : f32
    %36 = vector.broadcast %cst_37 : f32 to vector<18x16x128xf32>
    %37 = arith.maximumf %35, %36 : vector<18x16x128xf32>
    %cst_38 = arith.constant 0.000000e+00 : bf16
    %38 = vector.broadcast %cst_38 : bf16 to vector<18x1x128xbf16>
    %c0_39 = arith.constant 0 : index
    %c0_40 = arith.constant 0 : index
    %c0_41 = arith.constant 0 : index
    %39 = vector.load %arg10[%c0_39, %c0_40, %c0_41] : memref<18x24x128xbf16, #tpu.memory_space<vmem>>, vector<18x1x128xbf16>
    tpu.vector_store %arg10[%c0_39, %c0_40, %c0_41], %38 {strides = array<i32>} : memref<18x24x128xbf16, #tpu.memory_space<vmem>>, vector<18x1x128xbf16>,
    %cst_42 = arith.constant 0.000000e+00 : bf16
    %40 = vector.broadcast %cst_42 : bf16 to vector<18x7x128xbf16>
    %c0_43 = arith.constant 0 : index
    %c17 = arith.constant 17 : index
    %c0_44 = arith.constant 0 : index
    %41 = vector.load %arg10[%c0_43, %c17, %c0_44] : memref<18x24x128xbf16, #tpu.memory_space<vmem>>, vector<18x7x128xbf16>
    tpu.vector_store %arg10[%c0_43, %c17, %c0_44], %40 {strides = array<i32>} : memref<18x24x128xbf16, #tpu.memory_space<vmem>>, vector<18x7x128xbf16>,
    %42 = arith.truncf %37 : vector<18x16x128xf32> to vector<18x16x128xbf16>
    %c0_45 = arith.constant 0 : index
    %c1_46 = arith.constant 1 : index
    %c0_47 = arith.constant 0 : index
    %43 = vector.load %arg10[%c0_45, %c1_46, %c0_47] : memref<18x24x128xbf16, #tpu.memory_space<vmem>>, vector<18x16x128xbf16>
    tpu.vector_store %arg10[%c0_45, %c1_46, %c0_47], %42 {strides = array<i32>} : memref<18x24x128xbf16, #tpu.memory_space<vmem>>, vector<18x16x128xbf16>,
    %c0_i32 = arith.constant 0 : i32
    %44 = arith.cmpi eq, %arg1, %c0_i32 : i32
    %45 = arith.extui %44 : i1 to i32
    %c0_i32_48 = arith.constant 0 : i32
    %46 = arith.cmpi ne, %45, %c0_i32_48 : i32
    scf.if %46 {
      %cst_102 = arith.constant 0.000000e+00 : bf16
      %89 = vector.broadcast %cst_102 : bf16 to vector<1x24x128xbf16>
      %c0_103 = arith.constant 0 : index
      %c0_104 = arith.constant 0 : index
      %c0_105 = arith.constant 0 : index
      %90 = vector.load %arg10[%c0_103, %c0_104, %c0_105] : memref<18x24x128xbf16, #tpu.memory_space<vmem>>, vector<1x24x128xbf16>
      tpu.vector_store %arg10[%c0_103, %c0_104, %c0_105], %89 {strides = array<i32>} : memref<18x24x128xbf16, #tpu.memory_space<vmem>>, vector<1x24x128xbf16>,
    } else {
    }
    %c0_i32_49 = arith.constant 0 : i32
    %47 = arith.cmpi eq, %arg1, %c0_i32_49 : i32
    %48 = arith.extui %47 : i1 to i32
    %c0_i32_50 = arith.constant 0 : i32
    %49 = arith.cmpi ne, %48, %c0_i32_50 : i32
    scf.if %49 {
      %cst_102 = arith.constant 0.000000e+00 : bf16
      %89 = vector.broadcast %cst_102 : bf16 to vector<1x24x128xbf16>
      %c17_103 = arith.constant 17 : index
      %c0_104 = arith.constant 0 : index
      %c0_105 = arith.constant 0 : index
      %90 = vector.load %arg10[%c17_103, %c0_104, %c0_105] : memref<18x24x128xbf16, #tpu.memory_space<vmem>>, vector<1x24x128xbf16>
      tpu.vector_store %arg10[%c17_103, %c0_104, %c0_105], %89 {strides = array<i32>} : memref<18x24x128xbf16, #tpu.memory_space<vmem>>, vector<1x24x128xbf16>,
    } else {
    }
    %c0_51 = arith.constant 0 : index
    %c0_52 = arith.constant 0 : index
    %c0_53 = arith.constant 0 : index
    %50 = vector.load %arg10[%c0_51, %c0_52, %c0_53] : memref<18x24x128xbf16, #tpu.memory_space<vmem>>, vector<18x16x128xbf16>
    %c0_54 = arith.constant 0 : index
    %c0_55 = arith.constant 0 : index
    %c0_56 = arith.constant 0 : index
    %51 = vector.load %arg12[%c0_54, %c0_55, %c0_56] : memref<18x16x384xbf16, #tpu.memory_space<vmem>>, vector<18x16x128xbf16>
    tpu.vector_store %arg12[%c0_54, %c0_55, %c0_56], %50 {strides = array<i32>} : memref<18x16x384xbf16, #tpu.memory_space<vmem>>, vector<18x16x128xbf16>,
    %c0_57 = arith.constant 0 : index
    %c1_58 = arith.constant 1 : index
    %c0_59 = arith.constant 0 : index
    %52 = vector.load %arg10[%c0_57, %c1_58, %c0_59] : memref<18x24x128xbf16, #tpu.memory_space<vmem>>, vector<18x16x128xbf16>
    %c0_60 = arith.constant 0 : index
    %c0_61 = arith.constant 0 : index
    %c128_62 = arith.constant 128 : index
    %53 = vector.load %arg12[%c0_60, %c0_61, %c128_62] : memref<18x16x384xbf16, #tpu.memory_space<vmem>>, vector<18x16x128xbf16>
    tpu.vector_store %arg12[%c0_60, %c0_61, %c128_62], %52 {strides = array<i32>} : memref<18x16x384xbf16, #tpu.memory_space<vmem>>, vector<18x16x128xbf16>,
    %c0_63 = arith.constant 0 : index
    %c2_64 = arith.constant 2 : index
    %c0_65 = arith.constant 0 : index
    %54 = vector.load %arg10[%c0_63, %c2_64, %c0_65] : memref<18x24x128xbf16, #tpu.memory_space<vmem>>, vector<18x16x128xbf16>
    %c0_66 = arith.constant 0 : index
    %c0_67 = arith.constant 0 : index
    %c256_68 = arith.constant 256 : index
    %55 = vector.load %arg12[%c0_66, %c0_67, %c256_68] : memref<18x16x384xbf16, #tpu.memory_space<vmem>>, vector<18x16x128xbf16>
    tpu.vector_store %arg12[%c0_66, %c0_67, %c256_68], %54 {strides = array<i32>} : memref<18x16x384xbf16, #tpu.memory_space<vmem>>, vector<18x16x128xbf16>,
    %c0_69 = arith.constant 0 : index
    %c0_70 = arith.constant 0 : index
    %c0_71 = arith.constant 0 : index
    %56 = vector.load %arg12[%c0_69, %c0_70, %c0_71] : memref<18x16x384xbf16, #tpu.memory_space<vmem>>, vector<16x16x384xbf16>
    %c0_72 = arith.constant 0 : index
    %c0_73 = arith.constant 0 : index
    %c0_74 = arith.constant 0 : index
    %57 = vector.load %arg6[%c0_72, %c0_73, %c0_74] : memref<3x384x128xbf16, #tpu.memory_space<vmem>>, vector<1x384x128xbf16>
    %58 = vector.shape_cast %57 : vector<1x384x128xbf16> to vector<384x128xbf16>
    "tpu.trace_start"() <{level = 10 : i32, message = "hwk,kc->hwc"}> : () -> ()
    %cst_75 = arith.constant dense<0.000000e+00> : vector<16x16x128xf32>
    %59 = tpu.matmul %56, %58, %cst_75 {dimension_numbers = #tpu.dot_dimension_numbers<[2], [0], [0, 1], [1], [0, 0, 0, 1, 1, 1], [], []>} : vector<16x16x384xbf16>, vector<384x128xbf16>, vector<16x16x128xf32> -> vector<16x16x128xf32>
    "tpu.trace_stop"() : () -> ()
    %c1_76 = arith.constant 1 : index
    %c0_77 = arith.constant 0 : index
    %c0_78 = arith.constant 0 : index
    %60 = vector.load %arg12[%c1_76, %c0_77, %c0_78] : memref<18x16x384xbf16, #tpu.memory_space<vmem>>, vector<16x16x384xbf16>
    %c1_79 = arith.constant 1 : index
    %c0_80 = arith.constant 0 : index
    %c0_81 = arith.constant 0 : index
    %61 = vector.load %arg6[%c1_79, %c0_80, %c0_81] : memref<3x384x128xbf16, #tpu.memory_space<vmem>>, vector<1x384x128xbf16>
    %62 = vector.shape_cast %61 : vector<1x384x128xbf16> to vector<384x128xbf16>
    "tpu.trace_start"() <{level = 10 : i32, message = "hwk,kc->hwc"}> : () -> ()
    %cst_82 = arith.constant dense<0.000000e+00> : vector<16x16x128xf32>
    %63 = tpu.matmul %60, %62, %cst_82 {dimension_numbers = #tpu.dot_dimension_numbers<[2], [0], [0, 1], [1], [0, 0, 0, 1, 1, 1], [], []>} : vector<16x16x384xbf16>, vector<384x128xbf16>, vector<16x16x128xf32> -> vector<16x16x128xf32>
    "tpu.trace_stop"() : () -> ()
    %64 = arith.addf %59, %63 : vector<16x16x128xf32>
    %c2_83 = arith.constant 2 : index
    %c0_84 = arith.constant 0 : index
    %c0_85 = arith.constant 0 : index
    %65 = vector.load %arg12[%c2_83, %c0_84, %c0_85] : memref<18x16x384xbf16, #tpu.memory_space<vmem>>, vector<16x16x384xbf16>
    %c2_86 = arith.constant 2 : index
    %c0_87 = arith.constant 0 : index
    %c0_88 = arith.constant 0 : index
    %66 = vector.load %arg6[%c2_86, %c0_87, %c0_88] : memref<3x384x128xbf16, #tpu.memory_space<vmem>>, vector<1x384x128xbf16>
    %67 = vector.shape_cast %66 : vector<1x384x128xbf16> to vector<384x128xbf16>
    "tpu.trace_start"() <{level = 10 : i32, message = "hwk,kc->hwc"}> : () -> ()
    %cst_89 = arith.constant dense<0.000000e+00> : vector<16x16x128xf32>
    %68 = tpu.matmul %65, %67, %cst_89 {dimension_numbers = #tpu.dot_dimension_numbers<[2], [0], [0, 1], [1], [0, 0, 0, 1, 1, 1], [], []>} : vector<16x16x384xbf16>, vector<384x128xbf16>, vector<16x16x128xf32> -> vector<16x16x128xf32>
    "tpu.trace_stop"() : () -> ()
    %69 = arith.addf %64, %68 : vector<16x16x128xf32>
    %c0_90 = arith.constant 0 : index
    %c0_91 = arith.constant 0 : index
    %70 = vector.load %arg7[%c0_90, %c0_91] : memref<1x128xf32, #tpu.memory_space<vmem>>, vector<1x128xf32>
    %71 = vector.shape_cast %70 : vector<1x128xf32> to vector<1x1x128xf32>
    %72 = vector.broadcast %71 : vector<1x1x128xf32> to vector<16x16x128xf32>
    %73 = arith.mulf %69, %72 : vector<16x16x128xf32>
    %c0_92 = arith.constant 0 : index
    %c0_93 = arith.constant 0 : index
    %74 = vector.load %arg8[%c0_92, %c0_93] : memref<1x128xf32, #tpu.memory_space<vmem>>, vector<1x128xf32>
    %75 = vector.shape_cast %74 : vector<1x128xf32> to vector<1x1x128xf32>
    %76 = vector.broadcast %75 : vector<1x1x128xf32> to vector<16x16x128xf32>
    %77 = arith.addf %73, %76 : vector<16x16x128xf32>
    %c2_i32 = arith.constant 2 : i32
    %78 = arith.addi %1, %c2_i32 : i32
    %c0_94 = arith.constant 0 : index
    %79 = arith.index_cast %78 : i32 to index
    %c1_95 = arith.constant 1 : index
    %c0_96 = arith.constant 0 : index
    %80 = vector.load %arg2[%c0_94, %79, %c1_95, %c0_96] : memref<1x20x24x128xbf16, #tpu.memory_space<vmem>>, vector<1x16x16x128xbf16>
    %81 = vector.shape_cast %80 : vector<1x16x16x128xbf16> to vector<16x16x128xbf16>
    %82 = arith.extf %81 : vector<16x16x128xbf16> to vector<16x16x128xf32>
    %83 = arith.addf %77, %82 : vector<16x16x128xf32>
    %cst_97 = arith.constant 0.000000e+00 : f32
    %84 = vector.broadcast %cst_97 : f32 to vector<16x16x128xf32>
    %85 = arith.maximumf %83, %84 : vector<16x16x128xf32>
    %86 = vector.shape_cast %85 : vector<16x16x128xf32> to vector<1x16x16x128xf32>
    %87 = arith.truncf %86 : vector<1x16x16x128xf32> to vector<1x16x16x128xbf16>
    %c0_98 = arith.constant 0 : index
    %c0_99 = arith.constant 0 : index
    %c0_100 = arith.constant 0 : index
    %c0_101 = arith.constant 0 : index
    %88 = vector.load %arg9[%c0_98, %c0_99, %c0_100, %c0_101] : memref<1x16x16x128xbf16, #tpu.memory_space<vmem>>, vector<1x16x16x128xbf16>
    tpu.vector_store %arg9[%c0_98, %c0_99, %c0_100, %c0_101], %87 {strides = array<i32>} : memref<1x16x16x128xbf16, #tpu.memory_space<vmem>>, vector<1x16x16x128xbf16>,
    return
  }
  func.func @transform_0(%arg0: i32, %arg1: i32) -> (i32, i32, i32, i32) {
    %c0_i32 = arith.constant 0 : i32
    %c0_i32_0 = arith.constant 0 : i32
    %c0_i32_1 = arith.constant 0 : i32
    %c0_i32_2 = arith.constant 0 : i32
    return %arg0, %c0_i32, %c0_i32_0, %c0_i32_1 : i32, i32, i32, i32
  }
  func.func @transform_1(%arg0: i32, %arg1: i32) -> (i32, i32, i32) {
    %c0_i32 = arith.constant 0 : i32
    %c0_i32_0 = arith.constant 0 : i32
    %c0_i32_1 = arith.constant 0 : i32
    %c0_i32_2 = arith.constant 0 : i32
    return %c0_i32, %c0_i32_0, %c0_i32_1 : i32, i32, i32
  }
  func.func @transform_2(%arg0: i32, %arg1: i32) -> (i32, i32) {
    %c0_i32 = arith.constant 0 : i32
    %c0_i32_0 = arith.constant 0 : i32
    %c0_i32_1 = arith.constant 0 : i32
    return %c0_i32, %c0_i32_0 : i32, i32
  }
  func.func @transform_3(%arg0: i32, %arg1: i32) -> (i32, i32) {
    %c0_i32 = arith.constant 0 : i32
    %c0_i32_0 = arith.constant 0 : i32
    %c0_i32_1 = arith.constant 0 : i32
    return %c0_i32, %c0_i32_0 : i32, i32
  }
  func.func @transform_4(%arg0: i32, %arg1: i32) -> (i32, i32, i32) {
    %c0_i32 = arith.constant 0 : i32
    %c0_i32_0 = arith.constant 0 : i32
    %c0_i32_1 = arith.constant 0 : i32
    %c0_i32_2 = arith.constant 0 : i32
    return %c0_i32, %c0_i32_0, %c0_i32_1 : i32, i32, i32
  }
  func.func @transform_5(%arg0: i32, %arg1: i32) -> (i32, i32) {
    %c0_i32 = arith.constant 0 : i32
    %c0_i32_0 = arith.constant 0 : i32
    %c0_i32_1 = arith.constant 0 : i32
    return %c0_i32, %c0_i32_0 : i32, i32
  }
  func.func @transform_6(%arg0: i32, %arg1: i32) -> (i32, i32) {
    %c0_i32 = arith.constant 0 : i32
    %c0_i32_0 = arith.constant 0 : i32
    %c0_i32_1 = arith.constant 0 : i32
    return %c0_i32, %c0_i32_0 : i32, i32
  }
  func.func @transform_7(%arg0: i32, %arg1: i32) -> (i32, i32, i32, i32) {
    %c0_i32 = arith.constant 0 : i32
    %c0_i32_0 = arith.constant 0 : i32
    %c0_i32_1 = arith.constant 0 : i32
    return %arg0, %arg1, %c0_i32, %c0_i32_0 : i32, i32, i32, i32
  }
}

</mosaic_0001>

<bundles_post_ra>
// kernel: tpu_custom_call.1
= control target key start
LH: loop header
LB: loop body
LE: loop exit
PB: predicated region body
PF: predicated region fallthrough
CT: control target
= control target key end

     0   :  { %s13790_s0 = inlined_call_operand.hbm [shape: bf16[2,20,24,128], index: 0, kind: input, shape index: {}]   ;;  %s13791_s1 = inlined_call_operand.hbm [shape: bf16[3,384,128], index: 1, kind: input, shape index: {}]   ;;  %s13792_s2 = inlined_call_operand.vmem [shape: f32[1,128], index: 2, kind: input, shape index: {}]   ;;  %s13793_s3 = inlined_call_operand.vmem [shape: f32[1,128], index: 3, kind: input, shape index: {}]   ;;  %s13794_s4 = inlined_call_operand.hbm [shape: bf16[3,384,128], index: 4, kind: input, shape index: {}]   ;;  %s13795_s5 = inlined_call_operand.vmem [shape: f32[1,128], index: 5, kind: input, shape index: {}]   ;;  %s13796_s6 = inlined_call_operand.vmem [shape: f32[1,128], index: 6, kind: input, shape index: {}]   ;;  %s13797_s7 = inlined_call_operand.hbm [shape: bf16[2,16,16,128], index: 7, kind: output, shape index: {}]  }
   0x1   :  { %13811 = sst [smem:[#allocation56_spill]] %s13791_s1 }
   0x2   :  { %13812 = sst [smem:[#allocation57_spill]] %s13794_s4 }
   0x3   :  { %12 = vsyncpa [#allocation6], 0 }
   0x4   :  { %14 = vsyncpa [#allocation6 + $0x1], 0 }
   0x5   :  { %15 = vsyncpa [#allocation9], 0 }
   0x6   :  { %16 = vsyncpa [#allocation7], 0 }
   0x7   :  { %18 = vsyncpa [#allocation7 + $0x1], 0  ;;  %s11480_s24 = smov 0   ;;  %s11482_s25 = smov 0  }
   0x8   :  { %s11484_s26 = smov 0   ;;  %s11486_s27 = smov 0  }
   0x9   :  { %s11488_s28 = smov 0   ;;  %s11490_s29 = smov 0  }
   0xa LB: > { %13813 = sst [smem:[#allocation15_spill]] %s11431_s29  ;;  %s8648_s30 = sadd.s32 4294967295, %s11431_s29   ;;  %s11431_s29 = sphi %s11490_s29, %s24_s29   ;;  %s11427_s28 = sphi %s11488_s28, %s14040_s28   ;;  %s11423_s27 = sphi %s11486_s27, %s14039_s27   ;;  %s11419_s26 = sphi %s11484_s26, %s14038_s26   ;;  %s11415_s25 = sphi %s11482_s25, %s14037_s25   ;;  %s11411_s24 = sphi %s11480_s24, %s14036_s24  }
   0xb   : > { %s8649_s8 = sadd.s32 4294967294, %s11431_s29   ;;  %p56_p0 = scmp.ne.s32.totalorder %s11415_s25, %s11411_s24 }
   0xc   : > { %p11514_p1 = scmp.eq.s32.totalorder %s8648_s30, 0  ;;  %p11518_p2 = scmp.eq.s32.totalorder %s8648_s30, 1 }
   0xd   : > { %p214_p3 = scmp.eq.s32.totalorder %s8649_s8, 1  ;;  %p8650_p5 = scmp.ge.s32.totalorder %s11431_s29, 1 }
   0xe   : > { %p11524_p4 = por %p11514_p1, %p56_p0  ;;  %p221_p7 = scmp.lt.s32.totalorder %s11431_s29, 3 }
   0xf   : > { %p11529_p6 = por %p214_p3, %p56_p0  ;;  %s13819_s1 = sld [smem:[#allocation56_spill]] }
  0x10   : > { %p11537_p8 = pnand %p8650_p5, %p221_p7  ;;  %s11433_s17 = smov [#allocation8]  }
  0x11   : > { %s13817_s12 = scalar_select %p11529_p6, 1, 0 }
  0x12   : > { %p11167_p9 = pneg %p11537_p8  ;;  %s234_s18 = sshll.u32 %s11433_s17, 4  ;;  %s235_s18 = int_to_ptr.vmem [resolvable:$true] %s234_s18 }
  0x13   : > { %13818 = sst [smem:[#allocation16_spill]] %s13817_s12  ;;  %p8653_p11 = scmp.ge.s32.totalorder %s11431_s29, 2 }
  0x14   : > { %p11168_p10 = pnand %p11167_p9, %p11514_p1  ;;  %s13821_s4 = sld [smem:[#allocation57_spill]] }
  0x15   : > { %s232_s15 = sshll.u32 %s13819_s1, 4  ;;  %s13798_s22 = smov 64   ;;  %s233_s15 = int_to_ptr.hbm [resolvable:$true] %s232_s15 }
  0x16   : > { %s13799_s23 = smov 4   ;;  %s11436_s30 = smov [#allocation10]  }
  0x17   : > { %11170 = dma.hbm_to_vmem [thread:$0]  (!%p11168_p10), %s233_s15, 9216, %s235_s18, [#allocation9], %s13798_s22, %s13798_s22, %s13799_s23  }
  0x18   : > { %s254_s8 = sshll.u32 %s11436_s30, 4  ;;  %s36_s13 = sadd.s32 1, %s11427_s28  ;;  %s255_s8 = int_to_ptr.vmem [resolvable:$true] %s254_s8 }
  0x19   : > { %s43_s14 = sadd.s32 1, %s11419_s26  ;;  %p38_p12 = scmp.ge.s32.totalorder %s36_s13, 2 }
  0x1a   : > { %s252_s21 = sshll.u32 %s13821_s4, 4  ;;  %p50_p13 = scmp.ne.s32.totalorder %s11419_s26, %s11415_s25  ;;  %s253_s21 = int_to_ptr.hbm [resolvable:$true] %s252_s21 }
  0x1b   : > { %11173 = dma.hbm_to_vmem [thread:$0]  (!%p11168_p10), %s253_s21, 9216, %s255_s8, [#allocation9], %s13798_s22, %s13798_s22, %s13799_s23  }
  0x1c   : > { %p51_p0 = scmp.eq.s32.totalorder %s11431_s29, 0  ;;  %p11184_p3 = scmp.lt.s32.totalorder %s11431_s29, 2 }
  0x1d   : > { %s14042_s13 = smov (%p38_p12, %s36_s13), 0  ;;  %p11565_p7 = por %p11518_p2, %p50_p13 }
  0x1e   : > { %p52_p5 = por %p51_p0, %p50_p13  ;;  %s40_s17 = ssub.s32 %s11427_s28, %s14042_s13 }
  0x1f   : > { %s274_s18 = sand.u32 1, %s11419_s26   ;;  %p41_p9 = scmp.eq.s32.totalorder %s40_s17, 0 }
  0x20   : > { %s11152_s19 = smul.u32 240, %s274_s18  ;;  %p11175_p10 = pnand %p11184_p3, %p52_p5 }
  0x21   : > { %s11573_s20 = scalar_select %p41_p9, %s11419_s26, %s43_s14  }
  0x22   : > { %s11153_s21 = smul.u32 240, %s11427_s28  ;;  %s278_s30 = scalar_lea.vmem [#allocation5], %s11152_s19 }
  0x23   : > { %s286_s8 = sshll.u32 %s278_s30, 4  ;;  %s275_s4 = scalar_lea.sflag [#allocation6], %s274_s18  ;;  %s287_s8 = int_to_ptr.vmem [resolvable:$true] %s286_s8 }
  0x24   : > { %s283_s1 = scalar_lea.hbm %s13790_s0, %s11153_s21  ;;  %s13823_s29 = smov 4  }
  0x25   : > { %s284_s10 = sshll.u32 %s283_s1, 4  ;;  %s13824_s12 = smov 64   ;;  %s285_s10 = int_to_ptr.hbm [resolvable:$true] %s284_s10 }
  0x26   : > { %11177 = dma.hbm_to_vmem [thread:$0]  (!%p11175_p10), %s285_s10, 3840, %s287_s8, %s275_s4, %s13824_s12, %s13824_s12, %s13823_s29  }
  0x27   : > { %298 = sbr.rel (%p11537_p8) target bundleno = 1893 (0x765), region = 48 }
  0x2c   : > { %s11585_s14 = sand.u32 1, %s11415_s25  }
  0x2d   : > { %s11154_s17 = smul.u32 240, %s11585_s14  ;;  %s301_s22 = scalar_lea.sflag [#allocation6], %s11585_s14 }
  0x2f   : > { %s11589_s23 = scalar_lea.vmem [#allocation5], %s11154_s17 }
  0x30   : > { %11398 = dma.done.wait (%p11524_p4), %s301_s22, 3840  }
  0x31   : > { %11400 = vsyncadd (%p11524_p4), %s301_s22, 4294963456 }
  0x32   : > { %11402 = dma.done.wait (%p11514_p1), [#allocation9], 18432  }
  0x33   : > { %11404 = vsyncadd (%p11514_p1), [#allocation9], 4294948864  ;;  %v10689_v0 = vld [vmem:[#allocation8 + $0xf8] sm:$0xff]  ;;  %v10688_v2 = vld [vmem:[#allocation8 + $0xf0] sm:$0xff]  ;;  %vm492_vm0 = vsmask.f32 3328 }
  0x34   : > { %v10697_v1 = vld [vmem:[#allocation8 + $0x138] sm:$0xff]  ;;  %2072 = vmatpush.bf16.msra.mxu0 %v10689_v0  ;;  %v10696_v3 = vld [vmem:[#allocation8 + $0x130] sm:$0xff]  ;;  %v10687_v4 = vld [vmem:[#allocation8 + $0xe8] sm:$0xff]  ;;  %vm493_vm1 = vsmask.f32 7440  ;;  %v13825_v33 = vmov 0 }
  0x35   : > { %2171 = vmatpush.bf16.msra.mxu1 %v10697_v1  ;;  %11136 = vmatpush.bf16.msra.mxu3 %v10697_v1  ;;  %v10695_v5 = vld [vmem:[#allocation8 + $0x128] sm:$0xff]  ;;  %v355_v7 = vld [vmem:[%s11589_s23 + $0x10] sm:$0xf]  ;;  %v437_v10 = vld [vmem:[%s11589_s23 + $0x14] sm:$0x1]  ;;  %vm1175_vm3 = vcmask 1042432  }
  0x36   : > { %v354_v6 = vld [vmem:[%s11589_s23 + $0xc] sm:$0xf]  ;;  %v436_v9 = vld [vmem:[%s11589_s23 + $0x10] sm:$0xf]  ;;  %395 = vst [vmem:[#allocation3 + $0x24] sm:$0xf] %v355_v7  ;;  %vm11614_vm2 = vmor %vm492_vm0, %vm493_vm1 }
  0x37   : > { %394 = vst [vmem:[#allocation3 + $0x18] sm:$0xf] %v354_v6  ;;  %v435_v8 = vld [vmem:[%s11589_s23 + $0xc] sm:$0xf]  ;;  %v10686_v13 = vld [vmem:[#allocation8 + $0xe0] sm:$0xff]  ;;  %v529_v14 = vshll.u32 %v436_v9, 16 }
  0x38   : > { %2073 = vmatpush.bf16.msra.mxu0 %v10688_v2  ;;  %v520_v11 = vshrl.u32 %v435_v8, 16  ;;  %v523_v12 = vshll.u32 %v435_v8, 16  ;;  %v533_v15 = vshrl.u32 %v436_v9, 16  ;;  %v539_v16 = vshll.u32 %v437_v10, 16  ;;  %v468_v17 = vld [vmem:[%s11589_s23 + $0x90] sm:$0xf] }
  0x39   : > { %2172 = vmatpush.bf16.msra.mxu1 %v10696_v3  ;;  %11137 = vmatpush.bf16.msra.mxu3 %v10696_v3  ;;  %v11605_v18 = vld [vmem:[#allocation8 + $0x178] sm:$0xff]  ;;  %v469_v21 = vld [vmem:[%s11589_s23 + $0x94] sm:$0xf]  ;;  %v531_v24 = vrot.slane %v529_v14, 5  ;;  %v784_v26 = vshrl.u32 %v468_v17, 16  ;;  %v787_v29 = vshll.u32 %v468_v17, 16 }
  0x3a   : > { %v522_v19 = vrot.slane %v520_v11, 4  ;;  %v525_v20 = vrot.slane %v523_v12, 5  ;;  %v470_v22 = vld [vmem:[%s11589_s23 + $0x98] sm:$0x1]  ;;  %v10694_v23 = vld [vmem:[#allocation8 + $0x120] sm:$0xff]  ;;  %v535_v25 = vrot.slane %v533_v15, 4  ;;  %11144 = vmatpush.bf16.msra.mxu2 %v11605_v18 }
  0x3b   : > { %v356_v27 = vld [vmem:[%s11589_s23 + $0x18] sm:$0xf]  ;;  %v793_v30 = vshll.u32 %v469_v21, 16  ;;  %v797_v31 = vshrl.u32 %v469_v21, 16  ;;  %v357_v32 = vld [vmem:[%s11589_s23 + $0x1c] sm:$0xf] }
  0x3c   : > { %2074 = vmatpush.bf16.msra.mxu0 %v10687_v4  ;;  %v526_v28 = vor.u32 %v525_v20, %v522_v19  ;;  %v13826_v33 = vsel %vm11614_vm2, 4294967295, %v13825_v33  ;;  %v536_v34 = vor.u32 %v535_v25, %v531_v24  ;;  %v541_v35 = vrot.slane %v539_v16, 5  ;;  %396 = vst [vmem:[#allocation3 + $0x30] sm:$0xf] %v356_v27  ;;  %v438_v42 = vld [vmem:[%s11589_s23 + $0x18] sm:$0xf] }
  0x3d   : > { %2173 = vmatpush.bf16.msra.mxu1 %v10695_v5  ;;  %11138 = vmatpush.bf16.msra.mxu3 %v10695_v5  ;;  %13827 = vst [vmem:[#allocation17_spill] sm:$0xff] %v13826_v33  ;;  %v786_v36 = vrot.slane %v784_v26, 4  ;;  %v803_v37 = vshll.u32 %v470_v22, 16  ;;  %v789_v39 = vrot.slane %v787_v29, 5  ;;  %v795_v40 = vrot.slane %v793_v30, 5  ;;  %v10685_v43 = vld [vmem:[#allocation8 + $0xd8] sm:$0xff] }
  0x3e   : > { %v527_v38 = vrot.slane %v526_v28, 4  ;;  %v799_v41 = vrot.slane %v797_v31, 4  ;;  %v10693_v44 = vld [vmem:[#allocation8 + $0x118] sm:$0xff]  ;;  %v537_v45 = vrot.slane %v536_v34, 4  ;;  %397 = vst [vmem:[#allocation3 + $0x3c] sm:$0xf] %v357_v32 }
  0x3f   : > { %v805_v46 = vrot.slane %v803_v37, 5  ;;  %v790_v48 = vor.u32 %v789_v39, %v786_v36  ;;  %v439_v50 = vld [vmem:[%s11589_s23 + $0x1c] sm:$0xf]  ;;  %v440_v51 = vld [vmem:[%s11589_s23 + $0x20] sm:$0x1]  ;;  %v544_v56 = vshrl.u32 %v438_v42, 16 }
  0x40   : > { %2075 = vmatpush.bf16.msra.mxu0 %v10686_v13  ;;  %v532_v47 = vsel %vm11614_vm2, %v527_v38, %v531_v24  ;;  %v800_v49 = vor.u32 %v799_v41, %v795_v40  ;;  %v471_v52 = vld [vmem:[%s11589_s23 + $0x9c] sm:$0xf]  ;;  %v10684_v53 = vld [vmem:[#allocation8 + $0xd0] sm:$0xff]  ;;  %v542_v55 = vsel %vm11614_vm2, %v537_v45, %v541_v35  ;;  %v547_v57 = vshll.u32 %v438_v42, 16  ;;  %v11632_v19 = vld [vmem:[#allocation3 + $0x18] sm:$0xf] }
  0x41   : > { %2174 = vmatpush.bf16.msra.mxu1 %v10694_v23  ;;  %11139 = vmatpush.bf16.msra.mxu3 %v10694_v23  ;;  %v10692_v54 = vld [vmem:[#allocation8 + $0x110] sm:$0xff]  ;;  %1017 = vst [vmem:[#allocation3 + $0x1c] sm:$0xf] %v532_v47  ;;  %v553_v58 = vshll.u32 %v439_v50, 16  ;;  %v791_v59 = vrot.slane %v790_v48, 4  ;;  %v557_v61 = vshrl.u32 %v439_v50, 16 }
  0x42   : > { %1018 = vst [vmem:[#allocation3 + $0x28] sm:$0xf] %v542_v55  ;;  %v801_v60 = vrot.slane %v800_v49, 4  ;;  %v563_v62 = vshll.u32 %v440_v51, 16  ;;  %v546_v63 = vrot.slane %v544_v56, 4  ;;  %v549_v0 = vrot.slane %v547_v57, 5 }
  0x43   : > { %v555_v1 = vrot.slane %v553_v58, 5  ;;  %v472_v2 = vld [vmem:[%s11589_s23 + $0xa0] sm:$0xf]  ;;  %v808_v3 = vshrl.u32 %v471_v52, 16  ;;  %v796_v4 = vsel %vm11614_vm2, %v791_v59, %v795_v40  ;;  %v559_v6 = vrot.slane %v557_v61, 4  ;;  %v10683_v12 = vld [vmem:[#allocation8 + $0xc8] sm:$0xff] }
  0x44   : > { %2076 = vmatpush.bf16.msra.mxu0 %v10685_v43  ;;  %v806_v5 = vsel %vm11614_vm2, %v801_v60, %v805_v46  ;;  %v473_v7 = vld [vmem:[%s11589_s23 + $0xa4] sm:$0x1]  ;;  %1039 = vst [vmem:[#allocation3 + $0x124] sm:$0xf] %v796_v4  ;;  %v550_v8 = vor.u32 %v549_v0, %v546_v63  ;;  %v811_v10 = vshll.u32 %v471_v52, 16  ;;  %v817_v11 = vshll.u32 %v472_v2, 16 }
  0x45   : > { %2175 = vmatpush.bf16.msra.mxu1 %v10693_v44  ;;  %11140 = vmatpush.bf16.msra.mxu3 %v10693_v44  ;;  %v810_v9 = vrot.slane %v808_v3, 4  ;;  %1040 = vst [vmem:[#allocation3 + $0x130] sm:$0xf] %v806_v5  ;;  %v560_v13 = vor.u32 %v559_v6, %v555_v1  ;;  %v565_v14 = vrot.slane %v563_v62, 5  ;;  %v821_v15 = vshrl.u32 %v472_v2, 16  ;;  %v10691_v17 = vld [vmem:[#allocation8 + $0x108] sm:$0xff] }
  0x46   : > { %v827_v16 = vshll.u32 %v473_v7, 16  ;;  %v551_v20 = vrot.slane %v550_v8, 4  ;;  %v813_v21 = vrot.slane %v811_v10, 5  ;;  %v819_v22 = vrot.slane %v817_v11, 5  ;;  %v358_v23 = vld [vmem:[%s11589_s23 + $0x24] sm:$0xf] }
  0x47   : > { %v10629_v24 = vld [vmem:[#allocation3 + $0x20] sm:$0xf0]  ;;  %v561_v25 = vrot.slane %v560_v13, 4  ;;  %v823_v26 = vrot.slane %v821_v15, 4  ;;  %v10682_v28 = vld [vmem:[#allocation8 + $0xc0] sm:$0xff]  ;;  %vm1176_vm4 = vcmask 1046532  }
  0x48   : > { %2077 = vmatpush.bf16.msra.mxu0 %v10684_v53  ;;  %v829_v27 = vrot.slane %v827_v16, 5  ;;  %v10690_v29 = vld [vmem:[#allocation8 + $0x100] sm:$0xff]  ;;  %v10628_v30 = vld [vmem:[#allocation3 + $0x1c] sm:$0xf]  ;;  %v556_v32 = vsel %vm11614_vm2, %v551_v20, %v555_v1  ;;  %v814_v34 = vor.u32 %v813_v21, %v810_v9  ;;  %v359_v35 = vld [vmem:[%s11589_s23 + $0x28] sm:$0xf]  ;;  %v8682_v43 = vor.u32 %v10629_v24, %v11632_v19 }
  0x49   : > { %2176 = vmatpush.bf16.msra.mxu1 %v10692_v54  ;;  %11141 = vmatpush.bf16.msra.mxu3 %v10692_v54  ;;  %v8683_v31 = vld [vmem:[#allocation3 + $0x24] sm:$0xf0]  ;;  %398 = vst [vmem:[#allocation3 + $0x48] sm:$0xf] %v358_v23  ;;  %v566_v36 = vsel %vm11614_vm2, %v561_v25, %v565_v14  ;;  %v824_v37 = vor.u32 %v823_v26, %v819_v22  ;;  %v441_v38 = vld [vmem:[%s11589_s23 + $0x24] sm:$0xf]  ;;  %vm11729_vm5 = vmor %vm1175_vm3, %vm1176_vm4 }
  0x4a   : > { %1019 = vst [vmem:[#allocation3 + $0x34] sm:$0xf] %v556_v32  ;;  %v442_v39 = vld [vmem:[%s11589_s23 + $0x28] sm:$0xf]  ;;  %v815_v40 = vrot.slane %v814_v34, 4  ;;  %v568_v42 = vshrl.u32 %v441_v38, 16  ;;  %v8686_v52 = vor.u32 %v10628_v30, %v8683_v31 }
  0x4b   : > { %1020 = vst [vmem:[#allocation3 + $0x40] sm:$0xf] %v566_v36  ;;  %v443_v41 = vld [vmem:[%s11589_s23 + $0x2c] sm:$0x1]  ;;  %v10661_v44 = vld [vmem:[#allocation3 + $0x124] sm:$0xf] }
  0x4c   : > { %2078 = vmatpush.bf16.msra.mxu0 %v10683_v12  ;;  %v825_v45 = vrot.slane %v824_v37, 4  ;;  %399 = vst [vmem:[#allocation3 + $0x54] sm:$0xf] %v359_v35  ;;  %v571_v46 = vshll.u32 %v441_v38, 16  ;;  %v8815_v47 = vld [vmem:[#allocation3 + $0x12c] sm:$0xf0]  ;;  %v820_v48 = vsel %vm11614_vm2, %v815_v40, %v819_v22 }
  0x4d   : > { %2177 = vmatpush.bf16.msra.mxu1 %v10691_v17  ;;  %11142 = vmatpush.bf16.msra.mxu3 %v10691_v17  ;;  %v570_v49 = vrot.slane %v568_v42, 4  ;;  %v577_v50 = vshll.u32 %v442_v39, 16  ;;  %v581_v51 = vshrl.u32 %v442_v39, 16  ;;  %1041 = vst [vmem:[#allocation3 + $0x13c] sm:$0xf] %v820_v48  ;;  %v587_v55 = vshll.u32 %v443_v41, 16 }
  0x4e   : > { %v830_v53 = vsel %vm11614_vm2, %v825_v45, %v829_v27  ;;  %v573_v54 = vrot.slane %v571_v46, 5  ;;  %v474_v56 = vld [vmem:[%s11589_s23 + $0xa8] sm:$0xf]  ;;  %v8818_v57 = vor.u32 %v10661_v44, %v8815_v47  ;;  %v475_v60 = vld [vmem:[%s11589_s23 + $0xac] sm:$0xf]  ;;  %v10704_v10 = vld [vmem:[#allocation8 + $0x170] sm:$0xff] }
  0x4f   : > { %1042 = vst [vmem:[#allocation3 + $0x148] sm:$0xf] %v830_v53  ;;  %v579_v58 = vrot.slane %v577_v50, 5  ;;  %v583_v59 = vrot.slane %v581_v51, 4  ;;  %v589_v62 = vrot.slane %v587_v55, 5  ;;  %v832_v0 = vshrl.u32 %v474_v56, 16  ;;  %11145 = vmatpush.bf16.msra.mxu2 %v10704_v10 }
  0x50   : > { %2079 = vmatpush.bf16.msra.mxu0 %v10682_v28  ;;  %v574_v61 = vor.u32 %v573_v54, %v570_v49  ;;  %v476_v63 = vld [vmem:[%s11589_s23 + $0xb0] sm:$0x1]  ;;  %v835_v2 = vshll.u32 %v474_v56, 16  ;;  %v841_v3 = vshll.u32 %v475_v60, 16  ;;  %v845_v4 = vshrl.u32 %v475_v60, 16  ;;  %s8658_s12 = sshll.u32 %s11585_s14, 7 }
  0x51   : > { %2178 = vmatpush.bf16.msra.mxu1 %v10690_v29  ;;  %11143 = vmatpush.bf16.msra.mxu3 %v10690_v29  ;;  %v584_v1 = vor.u32 %v583_v59, %v579_v58  ;;  %v834_v6 = vrot.slane %v832_v0, 4  ;;  %v851_v7 = vshll.u32 %v476_v63, 16  ;;  %v360_v13 = vld [vmem:[%s11589_s23 + $0x30] sm:$0xf]  ;;  %v361_v16 = vld [vmem:[%s11589_s23 + $0x34] sm:$0xf] }
  0x52   : > { %v575_v5 = vrot.slane %v574_v61, 4  ;;  %v837_v9 = vrot.slane %v835_v2, 5  ;;  %v847_v12 = vrot.slane %v845_v4, 4  ;;  %v444_v17 = vld [vmem:[%s11589_s23 + $0x30] sm:$0xf]  ;;  %vm4101_vm6 = vcmask 1040384  }
  0x53   : > { %2080 = vmatmul.bf16.vlgmr.msra.gmra.mxu0 %v8682_v43  ;;  %v585_v8 = vrot.slane %v584_v1, 4  ;;  %v853_v20 = vrot.slane %v851_v7, 5  ;;  %v445_v21 = vld [vmem:[%s11589_s23 + $0x34] sm:$0xf]  ;;  %400 = vst [vmem:[#allocation3 + $0x60] sm:$0xf] %v360_v13 }
  0x54   : > { %2270 = vmatpush.bf16.msrb.mxu0 %v11605_v18  ;;  %2179 = vmatmul.bf16.vlgmr.msra.gmra.mxu1 %v8686_v52  ;;  %v843_v18 = vrot.slane %v841_v3, 5  ;;  %v580_v11 = vsel %vm11614_vm2, %v575_v5, %v579_v58  ;;  %v838_v15 = vor.u32 %v837_v9, %v834_v6  ;;  %v446_v23 = vld [vmem:[%s11589_s23 + $0x38] sm:$0x1]  ;;  %v592_v24 = vshrl.u32 %v444_v17, 16  ;;  %v8693_v25 = vld [vmem:[#allocation3 + $0x30] sm:$0xf] }
  0x55   : > { %2234 = vmatmul.bf16.vlgmr.msra.gmra.mxu3 %v8818_v57  ;;  %v590_v14 = vsel %vm11614_vm2, %v585_v8, %v589_v62  ;;  %1021 = vst [vmem:[#allocation3 + $0x4c] sm:$0xf] %v580_v11  ;;  %v10632_v26 = vld [vmem:[#allocation3 + $0x38] sm:$0xf0]  ;;  %v595_v28 = vshll.u32 %v444_v17, 16  ;;  %v601_v29 = vshll.u32 %v445_v21, 16 }
  0x56   : > { %1022 = vst [vmem:[#allocation3 + $0x58] sm:$0xf] %v590_v14  ;;  %v848_v19 = vor.u32 %v847_v12, %v843_v18  ;;  %v839_v22 = vrot.slane %v838_v15, 4  ;;  %v605_v30 = vshrl.u32 %v445_v21, 16  ;;  %v10631_v31 = vld [vmem:[#allocation3 + $0x34] sm:$0xf]  ;;  %v8694_v52 = vor.u32 %v10632_v26, %v8693_v25 }
  0x57   : > { %401 = vst [vmem:[#allocation3 + $0x6c] sm:$0xf] %v361_v16  ;;  %v8695_v32 = vld [vmem:[#allocation3 + $0x3c] sm:$0xf0]  ;;  %v594_v35 = vrot.slane %v592_v24, 4  ;;  %v611_v36 = vshll.u32 %v446_v23, 16 }
  0x58   : > { %2271 = vmatpush.bf16.msrb.mxu0 %v10704_v10  ;;  %v849_v27 = vrot.slane %v848_v19, 4  ;;  %v844_v34 = vsel %vm11614_vm2, %v839_v22, %v843_v18  ;;  %v477_v37 = vld [vmem:[%s11589_s23 + $0xb4] sm:$0xf]  ;;  %v478_v38 = vld [vmem:[%s11589_s23 + $0xb8] sm:$0xf]  ;;  %v597_v41 = vrot.slane %v595_v28, 5  ;;  %v8698_v56 = vor.u32 %v10631_v31, %v8695_v32 }
  0x59   : > { %v10664_v39 = vld [vmem:[#allocation3 + $0x13c] sm:$0xf]  ;;  %1043 = vst [vmem:[#allocation3 + $0x154] sm:$0xf] %v844_v34  ;;  %v603_v42 = vrot.slane %v601_v29, 5  ;;  %v607_v43 = vrot.slane %v605_v30, 4 }
  0x5a   : > { %v854_v40 = vsel %vm11614_vm2, %v849_v27, %v853_v20  ;;  %v613_v44 = vrot.slane %v611_v36, 5  ;;  %v479_v45 = vld [vmem:[%s11589_s23 + $0xbc] sm:$0x1]  ;;  %v856_v46 = vshrl.u32 %v477_v37, 16  ;;  %v8827_v47 = vld [vmem:[#allocation3 + $0x144] sm:$0xf0]  ;;  %v598_v48 = vor.u32 %v597_v41, %v594_v35 }
  0x5b   : > { %1044 = vst [vmem:[#allocation3 + $0x160] sm:$0xf] %v854_v40  ;;  %v608_v49 = vor.u32 %v607_v43, %v603_v42  ;;  %v859_v50 = vshll.u32 %v477_v37, 16  ;;  %v865_v51 = vshll.u32 %v478_v38, 16  ;;  %v869_v54 = vshrl.u32 %v478_v38, 16  ;;  %s13498_s16 = scalar_lea.vmem [#allocation11], %s8658_s12 }
  0x5c   : > { %v858_v53 = vrot.slane %v856_v46, 4  ;;  %v875_v55 = vshll.u32 %v479_v45, 16  ;;  %v599_v57 = vrot.slane %v598_v48, 4  ;;  %v8830_v60 = vor.u32 %v10664_v39, %v8827_v47  ;;  %v447_v2 = vld [vmem:[%s11589_s23 + $0x3c] sm:$0xf]  ;;  %s8536_s22 = sshll.u32 %s13498_s16, 4  ;;  %s8537_s22 = int_to_ptr.vmem [resolvable:$true] %s8536_s22 }
  0x5d   : > { %v609_v58 = vrot.slane %v608_v49, 4  ;;  %v861_v59 = vrot.slane %v859_v50, 5  ;;  %v867_v61 = vrot.slane %v865_v51, 5  ;;  %v871_v62 = vrot.slane %v869_v54, 4  ;;  %v448_v3 = vld [vmem:[%s11589_s23 + $0x40] sm:$0xf] }
  0x5e   : > { %v604_v63 = vsel %vm11614_vm2, %v599_v57, %v603_v42  ;;  %v877_v5 = vrot.slane %v875_v55, 5  ;;  %v616_v6 = vshrl.u32 %v447_v2, 16  ;;  %v619_v7 = vshll.u32 %v447_v2, 16  ;;  %v480_v18 = vld [vmem:[%s11589_s23 + $0xc0] sm:$0xf]  ;;  %s11365_s12 = scalar_lea.hbm %s13797_s7, 256 }
  0x5f   : > { %v614_v0 = vsel %vm11614_vm2, %v609_v58, %v613_v44  ;;  %v862_v1 = vor.u32 %v861_v59, %v858_v53  ;;  %1023 = vst [vmem:[#allocation3 + $0x64] sm:$0xf] %v604_v63  ;;  %v872_v4 = vor.u32 %v871_v62, %v867_v61  ;;  %v625_v9 = vshll.u32 %v448_v3, 16  ;;  %v362_v11 = vld [vmem:[%s11589_s23 + $0x3c] sm:$0xf] }
  0x60   : > { %1024 = vst [vmem:[#allocation3 + $0x70] sm:$0xf] %v614_v0  ;;  %v363_v12 = vld [vmem:[%s11589_s23 + $0x40] sm:$0xf]  ;;  %v618_v13 = vrot.slane %v616_v6, 4  ;;  %v621_v16 = vrot.slane %v619_v7, 5 }
  0x61   : > { %v863_v8 = vrot.slane %v862_v1, 4  ;;  %v873_v10 = vrot.slane %v872_v4, 4  ;;  %402 = vst [vmem:[#allocation3 + $0x78] sm:$0xf] %v362_v11  ;;  %v449_v15 = vld [vmem:[%s11589_s23 + $0x44] sm:$0x1] }
  0x62   : > { %v627_v17 = vrot.slane %v625_v9, 5  ;;  %v629_v20 = vshrl.u32 %v448_v3, 16  ;;  %v635_v21 = vshll.u32 %v449_v15, 16  ;;  %v481_v22 = vld [vmem:[%s11589_s23 + $0xc4] sm:$0xf]  ;;  %v622_v23 = vor.u32 %v621_v16, %v618_v13  ;;  %v10703_v6 = vld [vmem:[#allocation8 + $0x168] sm:$0xff] }
  0x63   : > { %2085 = vmatmul.bf16.gmra.mxu0 %v8694_v52  ;;  %v868_v14 = vsel %vm11614_vm2, %v863_v8, %v867_v61  ;;  %v878_v19 = vsel %vm11614_vm2, %v873_v10, %v877_v5  ;;  %v482_v24 = vld [vmem:[%s11589_s23 + $0xc8] sm:$0x1]  ;;  %v880_v25 = vshrl.u32 %v480_v18, 16  ;;  %v883_v26 = vshll.u32 %v480_v18, 16  ;;  %403 = vst [vmem:[#allocation3 + $0x84] sm:$0xf] %v363_v12  ;;  %11146 = vmatpush.bf16.msra.mxu2 %v10703_v6 }
  0x64   : > { %2184 = vmatmul.bf16.gmra.mxu1 %v8698_v56  ;;  %1045 = vst [vmem:[#allocation3 + $0x16c] sm:$0xf] %v868_v14  ;;  %v631_v27 = vrot.slane %v629_v20, 4  ;;  %v889_v28 = vshll.u32 %v481_v22, 16  ;;  %v893_v29 = vshrl.u32 %v481_v22, 16  ;;  %v623_v30 = vrot.slane %v622_v23, 4  ;;  %2272 = vmatpush.bf16.msrb.mxu0 %v10703_v6 }
  0x65   : > { %2239 = vmatmul.bf16.gmra.mxu3 %v8830_v60  ;;  %1046 = vst [vmem:[#allocation3 + $0x178] sm:$0xf] %v878_v19  ;;  %v882_v31 = vrot.slane %v880_v25, 4  ;;  %v885_v32 = vrot.slane %v883_v26, 5  ;;  %v899_v34 = vshll.u32 %v482_v24, 16  ;;  %v637_v38 = vrot.slane %v635_v21, 5 }
  0x66   : > { %v8705_v35 = vld [vmem:[#allocation3 + $0x48] sm:$0xf]  ;;  %v10635_v36 = vld [vmem:[#allocation3 + $0x50] sm:$0xf0]  ;;  %v632_v37 = vor.u32 %v631_v27, %v627_v17  ;;  %v891_v39 = vrot.slane %v889_v28, 5  ;;  %v895_v40 = vrot.slane %v893_v29, 4  ;;  %v628_v42 = vsel %vm11614_vm2, %v623_v30, %v627_v17 }
  0x67   : > { %v10634_v41 = vld [vmem:[#allocation3 + $0x4c] sm:$0xf]  ;;  %v886_v43 = vor.u32 %v885_v32, %v882_v31  ;;  %v8707_v44 = vld [vmem:[#allocation3 + $0x54] sm:$0xf0]  ;;  %1025 = vst [vmem:[#allocation3 + $0x7c] sm:$0xf] %v628_v42  ;;  %v8706_v53 = vor.u32 %v10635_v36, %v8705_v35 }
  0x68   : > { %v633_v45 = vrot.slane %v632_v37, 4  ;;  %v896_v46 = vor.u32 %v895_v40, %v891_v39  ;;  %v901_v47 = vrot.slane %v899_v34, 5  ;;  %v10667_v48 = vld [vmem:[#allocation3 + $0x154] sm:$0xf]  ;;  %v8839_v49 = vld [vmem:[#allocation3 + $0x15c] sm:$0xf0]  ;;  %v8710_v54 = vor.u32 %v10634_v41, %v8707_v44 }
  0x69   : > { %v887_v50 = vrot.slane %v886_v43, 4  ;;  %v8842_v56 = vor.u32 %v10667_v48, %v8839_v49  ;;  %v450_v58 = vld [vmem:[%s11589_s23 + $0x48] sm:$0xf]  ;;  %v451_v59 = vld [vmem:[%s11589_s23 + $0x4c] sm:$0xf]  ;;  %vm4158_vm9 = vcmask 1043456  }
  0x6a   : > { %v638_v51 = vsel %vm11614_vm2, %v633_v45, %v637_v38  ;;  %v897_v52 = vrot.slane %v896_v46, 4  ;;  %v640_v60 = vshrl.u32 %v450_v58, 16  ;;  %v643_v61 = vshll.u32 %v450_v58, 16  ;;  %v483_v0 = vld [vmem:[%s11589_s23 + $0xcc] sm:$0xf] }
  0x6b   : > { %1026 = vst [vmem:[#allocation3 + $0x88] sm:$0xf] %v638_v51  ;;  %v892_v55 = vsel %vm11614_vm2, %v887_v50, %v891_v39  ;;  %v649_v62 = vshll.u32 %v451_v59, 16  ;;  %v653_v63 = vshrl.u32 %v451_v59, 16  ;;  %v484_v5 = vld [vmem:[%s11589_s23 + $0xd0] sm:$0xf] }
  0x6c   : > { %v902_v57 = vsel %vm11614_vm2, %v897_v52, %v901_v47  ;;  %1047 = vst [vmem:[#allocation3 + $0x184] sm:$0xf] %v892_v55  ;;  %v642_v1 = vrot.slane %v640_v60, 4  ;;  %v645_v2 = vrot.slane %v643_v61, 5  ;;  %v364_v7 = vld [vmem:[%s11589_s23 + $0x48] sm:$0xf] }
  0x6d   : > { %1048 = vst [vmem:[#allocation3 + $0x190] sm:$0xf] %v902_v57  ;;  %v651_v3 = vrot.slane %v649_v62, 5  ;;  %v655_v4 = vrot.slane %v653_v63, 4  ;;  %v365_v8 = vld [vmem:[%s11589_s23 + $0x4c] sm:$0xf] }
  0x6e   : > { %v904_v9 = vshrl.u32 %v483_v0, 16  ;;  %404 = vst [vmem:[#allocation3 + $0x90] sm:$0xf] %v364_v7  ;;  %v452_v18 = vld [vmem:[%s11589_s23 + $0x50] sm:$0x1]  ;;  %v646_v10 = vor.u32 %v645_v2, %v642_v1  ;;  %v907_v17 = vshll.u32 %v483_v0, 16 }
  0x6f   : > { %v656_v11 = vor.u32 %v655_v4, %v651_v3  ;;  %v485_v12 = vld [vmem:[%s11589_s23 + $0xd4] sm:$0x1]  ;;  %405 = vst [vmem:[#allocation3 + $0x9c] sm:$0xf] %v365_v8  ;;  %v659_v13 = vshll.u32 %v452_v18, 16  ;;  %v913_v20 = vshll.u32 %v484_v5, 16 }
  0x70   : > { %v647_v14 = vrot.slane %v646_v10, 4  ;;  %v906_v16 = vrot.slane %v904_v9, 4  ;;  %v917_v21 = vshrl.u32 %v484_v5, 16  ;;  %v923_v22 = vshll.u32 %v485_v12, 16  ;;  %v8717_v28 = vld [vmem:[#allocation3 + $0x60] sm:$0xf] }
  0x71   : > { %v657_v15 = vrot.slane %v656_v11, 4  ;;  %v661_v19 = vrot.slane %v659_v13, 5  ;;  %v909_v24 = vrot.slane %v907_v17, 5  ;;  %v915_v26 = vrot.slane %v913_v20, 5  ;;  %v10638_v29 = vld [vmem:[#allocation3 + $0x68] sm:$0xf0] }
  0x72   : > { %v652_v23 = vsel %vm11614_vm2, %v647_v14, %v651_v3  ;;  %v919_v27 = vrot.slane %v917_v21, 4  ;;  %v10637_v31 = vld [vmem:[#allocation3 + $0x64] sm:$0xf]  ;;  %v8719_v32 = vld [vmem:[#allocation3 + $0x6c] sm:$0xf0]  ;;  %v925_v35 = vrot.slane %v923_v22, 5  ;;  %v8718_v40 = vor.u32 %v10638_v29, %v8717_v28 }
  0x73   : > { %2090 = vmatmul.bf16.gmra.mxu0 %v8706_v53  ;;  %v662_v25 = vsel %vm11614_vm2, %v657_v15, %v661_v19  ;;  %1027 = vst [vmem:[#allocation3 + $0x94] sm:$0xf] %v652_v23  ;;  %v910_v30 = vor.u32 %v909_v24, %v906_v16  ;;  %v10670_v36 = vld [vmem:[#allocation3 + $0x16c] sm:$0xf]  ;;  %v8851_v37 = vld [vmem:[#allocation3 + $0x174] sm:$0xf0]  ;;  %v8722_v41 = vor.u32 %v10637_v31, %v8719_v32 }
  0x74   : > { %2189 = vmatmul.bf16.gmra.mxu1 %v8710_v54  ;;  %1028 = vst [vmem:[#allocation3 + $0xa0] sm:$0xf] %v662_v25  ;;  %v920_v34 = vor.u32 %v919_v27, %v915_v26  ;;  %v8854_v43 = vor.u32 %v10670_v36, %v8851_v37  ;;  %v453_v45 = vld [vmem:[%s11589_s23 + $0x54] sm:$0xf]  ;;  %v454_v46 = vld [vmem:[%s11589_s23 + $0x58] sm:$0xf] }
  0x75   : > { %2244 = vmatmul.bf16.gmra.mxu3 %v8842_v56  ;;  %v911_v38 = vrot.slane %v910_v30, 4  ;;  %v664_v47 = vshrl.u32 %v453_v45, 16  ;;  %v667_v48 = vshll.u32 %v453_v45, 16  ;;  %v673_v49 = vshll.u32 %v454_v46, 16  ;;  %v486_v51 = vld [vmem:[%s11589_s23 + $0xd8] sm:$0xf] }
  0x76   : > { %v921_v39 = vrot.slane %v920_v34, 4  ;;  %v677_v50 = vshrl.u32 %v454_v46, 16  ;;  %v10611_v52 = vld [vmem:[#allocation8 + $0x38] sm:$0xff]  ;;  %v928_v56 = vshrl.u32 %v486_v51, 16  ;;  %v10702_v57 = vld [vmem:[#allocation8 + $0x160] sm:$0xff]  ;;  %v931_v60 = vshll.u32 %v486_v51, 16 }
  0x77   : > { %v916_v42 = vsel %vm11614_vm2, %v911_v38, %v915_v26  ;;  %v666_v53 = vrot.slane %v664_v47, 4  ;;  %v669_v54 = vrot.slane %v667_v48, 5  ;;  %v487_v55 = vld [vmem:[%s11589_s23 + $0xdc] sm:$0xf]  ;;  %v675_v58 = vrot.slane %v673_v49, 5  ;;  %2801 = vmatpush.bf16.msrb.mxu3 %v10611_v52  ;;  %v10610_v61 = vld [vmem:[#allocation8 + $0x30] sm:$0xff]  ;;  %11147 = vmatpush.bf16.msra.mxu2 %v10702_v57 }
  0x78   : > { %v926_v44 = vsel %vm11614_vm2, %v921_v39, %v925_v35  ;;  %1049 = vst [vmem:[#allocation3 + $0x19c] sm:$0xf] %v916_v42  ;;  %v679_v59 = vrot.slane %v677_v50, 4  ;;  %v10701_v62 = vld [vmem:[#allocation8 + $0x158] sm:$0xff]  ;;  %v366_v63 = vld [vmem:[%s11589_s23 + $0x54] sm:$0xf]  ;;  %2273 = vmatpush.bf16.msrb.mxu0 %v10702_v57 }
  0x79   : > { %1050 = vst [vmem:[#allocation3 + $0x1a8] sm:$0xf] %v926_v44  ;;  %v670_v0 = vor.u32 %v669_v54, %v666_v53  ;;  %v930_v1 = vrot.slane %v928_v56, 4  ;;  %v937_v2 = vshll.u32 %v487_v55, 16  ;;  %v367_v3 = vld [vmem:[%s11589_s23 + $0x58] sm:$0xf] }
  0x7a   : > { %406 = vst [vmem:[#allocation3 + $0xa8] sm:$0xf] %v366_v63  ;;  %v455_v4 = vld [vmem:[%s11589_s23 + $0x5c] sm:$0x1]  ;;  %v680_v5 = vor.u32 %v679_v59, %v675_v58  ;;  %v488_v9 = vld [vmem:[%s11589_s23 + $0xe0] sm:$0x1] }
  0x7b   : > { %407 = vst [vmem:[#allocation3 + $0xb4] sm:$0xf] %v367_v3  ;;  %v671_v6 = vrot.slane %v670_v0, 4  ;;  %v683_v7 = vshll.u32 %v455_v4, 16  ;;  %v933_v18 = vrot.slane %v931_v60, 5  ;;  %2802 = vmatpush.bf16.msrb.mxu3 %v10610_v61  ;;  %v10609_v10 = vld [vmem:[#allocation8 + $0x28] sm:$0xff]  ;;  %11148 = vmatpush.bf16.msra.mxu2 %v10701_v62 }
  0x7c   : > { %v681_v8 = vrot.slane %v680_v5, 4  ;;  %v939_v14 = vrot.slane %v937_v2, 5  ;;  %v941_v15 = vshrl.u32 %v487_v55, 16  ;;  %v947_v16 = vshll.u32 %v488_v9, 16  ;;  %2274 = vmatpush.bf16.msrb.mxu0 %v10701_v62  ;;  %v8729_v17 = vld [vmem:[#allocation3 + $0x78] sm:$0xf] }
  0x7d   : > { %v676_v11 = vsel %vm11614_vm2, %v671_v6, %v675_v58  ;;  %v685_v12 = vrot.slane %v683_v7, 5  ;;  %v934_v13 = vor.u32 %v933_v18, %v930_v1  ;;  %v10641_v19 = vld [vmem:[#allocation3 + $0x80] sm:$0xf0]  ;;  %v10640_v20 = vld [vmem:[#allocation3 + $0x7c] sm:$0xf]  ;;  %v10608_v27 = vld [vmem:[#allocation8 + $0x20] sm:$0xff] }
  0x7e   : > { %1029 = vst [vmem:[#allocation3 + $0xac] sm:$0xf] %v676_v11  ;;  %v8731_v22 = vld [vmem:[#allocation3 + $0x84] sm:$0xf0]  ;;  %v943_v24 = vrot.slane %v941_v15, 4  ;;  %v949_v30 = vrot.slane %v947_v16, 5  ;;  %v8730_v31 = vor.u32 %v10641_v19, %v8729_v17 }
  0x7f   : > { %v686_v21 = vsel %vm11614_vm2, %v681_v8, %v685_v12  ;;  %v935_v23 = vrot.slane %v934_v13, 4  ;;  %v10673_v25 = vld [vmem:[#allocation3 + $0x184] sm:$0xf]  ;;  %v8863_v26 = vld [vmem:[#allocation3 + $0x18c] sm:$0xf0]  ;;  %2803 = vmatpush.bf16.msrb.mxu3 %v10609_v10  ;;  %v8734_v32 = vor.u32 %v10640_v20, %v8731_v22  ;;  %v10607_v46 = vld [vmem:[#allocation8 + $0x18] sm:$0xff] }
  0x80   : > { %1030 = vst [vmem:[#allocation3 + $0xb8] sm:$0xf] %v686_v21  ;;  %v944_v29 = vor.u32 %v943_v24, %v939_v14  ;;  %v8866_v34 = vor.u32 %v10673_v25, %v8863_v26  ;;  %v1080_v36 = vld [vmem:[%s11589_s23 + $0x64] sm:$0xf]  ;;  %v456_v37 = vld [vmem:[%s11589_s23 + $0x60] sm:$0xf] }
  0x81   : > { %v940_v28 = vsel %vm11614_vm2, %v935_v23, %v939_v14  ;;  %v1236_v38 = vrot.slane %v1080_v36, 5  ;;  %v457_v39 = vld [vmem:[%s11589_s23 + $0x64] sm:$0xf]  ;;  %v1079_v42 = vld [vmem:[%s11589_s23 + $0x60] sm:$0xe]  ;;  %v691_v44 = vshll.u32 %v456_v37, 16 }
  0x82   : > { %1051 = vst [vmem:[#allocation3 + $0x1b4] sm:$0xf] %v940_v28  ;;  %v945_v35 = vrot.slane %v944_v29, 4  ;;  %v10700_v45 = vld [vmem:[#allocation8 + $0x150] sm:$0xff]  ;;  %v697_v47 = vshll.u32 %v457_v39, 16  ;;  %v8667_v48 = vrot.slane %v1079_v42, 9 }
  0x83   : > { %2095 = vmatmul.bf16.gmra.mxu0 %v8718_v40  ;;  %2804 = vmatpush.bf16.msrb.mxu3 %v10608_v27  ;;  %v688_v40 = vshrl.u32 %v456_v37, 16  ;;  %v10699_v49 = vld [vmem:[#allocation8 + $0x148] sm:$0xff]  ;;  %v10606_v50 = vld [vmem:[#allocation8 + $0x10] sm:$0xff]  ;;  %v13828_v51 = vmov 0  ;;  %v1238_v52 = vrot.slane %v1236_v38, 4  ;;  %v693_v55 = vrot.slane %v691_v44, 5 }
  0x84   : > { %2194 = vmatmul.bf16.gmra.mxu1 %v8722_v41  ;;  %v950_v41 = vsel %vm11614_vm2, %v945_v35, %v949_v30  ;;  %11149 = vmatpush.bf16.msra.mxu2 %v10700_v45  ;;  %v13829_v51 = vsel %vm11729_vm5, 4294967295, %v13828_v51  ;;  %v1237_v56 = vsel %vm11729_vm5, %v8667_v48, %v1236_v38  ;;  %v368_v57 = vld [vmem:[%s11589_s23 + $0x60] sm:$0xf]  ;;  %v369_v58 = vld [vmem:[%s11589_s23 + $0x64] sm:$0xf]  ;;  %v699_v62 = vrot.slane %v697_v47, 5 }
  0x85   : > { %2249 = vmatmul.bf16.gmra.mxu3 %v8854_v43  ;;  %v1081_v43 = vld [vmem:[%s11589_s23 + $0x68] sm:$0x1]  ;;  %1052 = vst [vmem:[#allocation3 + $0x1c0] sm:$0xf] %v950_v41  ;;  %v690_v54 = vrot.slane %v688_v40, 4  ;;  %2275 = vmatpush.bf16.msrb.mxu0 %v10700_v45  ;;  %v701_v63 = vshrl.u32 %v457_v39, 16 }
  0x86   : > { %13830 = vst [vmem:[#allocation18_spill] sm:$0xff] %v13829_v51  ;;  %v1239_v53 = vrot.slane %v1081_v43, 5  ;;  %v458_v60 = vld [vmem:[%s11589_s23 + $0x68] sm:$0x1]  ;;  %v10698_v0 = vld [vmem:[#allocation8 + $0x140] sm:$0xff]  ;;  %vm8279_vm14 = vcmask 1046528  }
  0x87   : > { %2805 = vmatpush.bf16.msrb.mxu3 %v10607_v46  ;;  %1374 = vst [vmem:[#allocation3 + $0xc8] sm:$0xf] %v1237_v56  ;;  %v694_v61 = vor.u32 %v693_v55, %v690_v54  ;;  %v10605_v1 = vld [vmem:[#allocation8 + $0x8] sm:$0xff]  ;;  %v707_v2 = vshll.u32 %v458_v60, 16  ;;  %v703_v4 = vrot.slane %v701_v63, 4  ;;  %v10604_v15 = vld [vmem:[#allocation8] sm:$0xff] }
  0x88   : > { %v1240_v59 = vsel %vm11729_vm5, %v1238_v52, %v1239_v53  ;;  %11150 = vmatpush.bf16.msra.mxu2 %v10699_v49  ;;  %408 = vst [vmem:[#allocation3 + $0xc0] sm:$0xf] %v368_v57  ;;  %v352_v5 = vld [vmem:[%s11589_s23] sm:$0xf]  ;;  %v10644_v7 = vld [vmem:[#allocation3 + $0x98] sm:$0xf0] }
  0x89   : > { %1375 = vst [vmem:[#allocation3 + $0xd4] sm:$0xf] %v1240_v59  ;;  %v695_v3 = vrot.slane %v694_v61, 4  ;;  %v8741_v6 = vld [vmem:[#allocation3 + $0x90] sm:$0xf]  ;;  %2276 = vmatpush.bf16.msrb.mxu0 %v10699_v49  ;;  %v704_v18 = vor.u32 %v703_v4, %v699_v62  ;;  %v709_v10 = vrot.slane %v707_v2, 5 }
  0x8a   : > { %v10643_v8 = vld [vmem:[#allocation3 + $0x94] sm:$0xf]  ;;  %409 = vst [vmem:[#allocation3 + $0xcc] sm:$0xf] %v369_v58  ;;  %v8743_v12 = vld [vmem:[#allocation3 + $0x9c] sm:$0xf0]  ;;  %v8742_v19 = vor.u32 %v10644_v7, %v8741_v6 }
  0x8b   : > { %2806 = vmatpush.bf16.msrb.mxu3 %v10606_v50  ;;  %v700_v9 = vsel %vm11614_vm2, %v695_v3, %v699_v62  ;;  %v353_v11 = vld [vmem:[%s11589_s23 + $0x4] sm:$0xf]  ;;  %392 = vst [vmem:[#allocation3] sm:$0xf] %v352_v5  ;;  %v10676_v13 = vld [vmem:[#allocation3 + $0x19c] sm:$0xf]  ;;  %v8746_v20 = vor.u32 %v10643_v8, %v8743_v12 }
  0x8c   : > { %1031 = vst [vmem:[#allocation3 + $0xc4] sm:$0xf] %v700_v9  ;;  %v8875_v14 = vld [vmem:[#allocation3 + $0x1a4] sm:$0xf0]  ;;  %11151 = vmatpush.bf16.msra.mxu2 %v10698_v0  ;;  %v705_v16 = vrot.slane %v704_v18, 4 }
  0x8d   : > { %393 = vst [vmem:[#allocation3 + $0xc] sm:$0xf] %v353_v11  ;;  %2277 = vmatpush.bf16.msrb.mxu0 %v10698_v0  ;;  %v8878_v23 = vor.u32 %v10676_v13, %v8875_v14  ;;  %v1083_v25 = vld [vmem:[%s11589_s23 + $0x70] sm:$0xf]  ;;  %v459_v27 = vld [vmem:[%s11589_s23 + $0x6c] sm:$0xf] }
  0x8e   : > { %v8773_v17 = vld [vmem:[#allocation3 + $0xc8] sm:$0xf]  ;;  %v710_v22 = vsel %vm11614_vm2, %v705_v16, %v709_v10  ;;  %v1243_v26 = vrot.slane %v1083_v25, 5  ;;  %v1082_v28 = vld [vmem:[%s11589_s23 + $0x6c] sm:$0xe]  ;;  %v715_v40 = vshll.u32 %v459_v27, 16 }
  0x8f   : > { %2807 = vmatpush.bf16.msrb.mxu3 %v10605_v1  ;;  %1032 = vst [vmem:[#allocation3 + $0xd0] sm:$0xf] %v710_v22  ;;  %v1084_v29 = vld [vmem:[%s11589_s23 + $0x74] sm:$0x1]  ;;  %v8668_v30 = vrot.slane %v1082_v28, 9 }
  0x90   : > { %v10651_v21 = vld [vmem:[#allocation3 + $0xd0] sm:$0xf0]  ;;  %v460_v35 = vld [vmem:[%s11589_s23 + $0x70] sm:$0xf]  ;;  %v717_v44 = vrot.slane %v715_v40, 5 }
  0x91   : > { %v8774_v24 = vor.u32 %v10651_v21, %v8773_v17  ;;  %v461_v36 = vld [vmem:[%s11589_s23 + $0x74] sm:$0x1]  ;;  %v1244_v37 = vsel %vm11729_vm5, %v8668_v30, %v1243_v26  ;;  %v721_v41 = vshll.u32 %v460_v35, 16  ;;  %v725_v42 = vshrl.u32 %v460_v35, 16  ;;  %v370_v47 = vld [vmem:[%s11589_s23 + $0x6c] sm:$0xf] }
  0x92   : > { %1376 = vst [vmem:[#allocation3 + $0xe0] sm:$0xf] %v1244_v37  ;;  %v731_v43 = vshll.u32 %v461_v36, 16  ;;  %v371_v48 = vld [vmem:[%s11589_s23 + $0x70] sm:$0xf] }
  0x93   : > { %2100 = vmatmul.bf16.gmra.mxu0 %v8730_v31  ;;  %2808 = vmatpush.bf16.msrb.mxu3 %v10604_v15  ;;  %v1245_v31 = vrot.slane %v1243_v26, 4  ;;  %v723_v45 = vrot.slane %v721_v41, 5  ;;  %v727_v46 = vrot.slane %v725_v42, 4  ;;  %410 = vst [vmem:[#allocation3 + $0xd8] sm:$0xf] %v370_v47 }
  0x94   : > { %2199 = vmatmul.bf16.gmra.mxu1 %v8734_v32  ;;  %2313 = vmatmul.bf16.vlgmr.msra.gmra.mxu2 %v8774_v24  ;;  %v1246_v32 = vrot.slane %v1084_v29, 5  ;;  %v733_v52 = vrot.slane %v731_v43, 5  ;;  %v8753_v53 = vld [vmem:[#allocation3 + $0xa8] sm:$0xf]  ;;  %v10647_v54 = vld [vmem:[#allocation3 + $0xb0] sm:$0xf0] }
  0x95   : > { %2254 = vmatmul.bf16.gmra.mxu3 %v8866_v34  ;;  %v712_v34 = vshrl.u32 %v459_v27, 16  ;;  %v728_v50 = vor.u32 %v727_v46, %v723_v45  ;;  %411 = vst [vmem:[#allocation3 + $0xe4] sm:$0xf] %v371_v48  ;;  %v10646_v55 = vld [vmem:[#allocation3 + $0xac] sm:$0xf]  ;;  %v8754_v1 = vor.u32 %v10647_v54, %v8753_v53 }
  0x96   : > { %v1247_v38 = vsel %vm11729_vm5, %v1245_v31, %v1246_v32  ;;  %v8755_v56 = vld [vmem:[#allocation3 + $0xb4] sm:$0xf0]  ;;  %v10679_v59 = vld [vmem:[#allocation3 + $0x1b4] sm:$0xf]  ;;  %v8887_v60 = vld [vmem:[#allocation3 + $0x1bc] sm:$0xf0] }
  0x97   : > { %v714_v39 = vrot.slane %v712_v34, 4  ;;  %1377 = vst [vmem:[#allocation3 + $0xec] sm:$0xf] %v1247_v38  ;;  %v729_v58 = vrot.slane %v728_v50, 4  ;;  %v8758_v2 = vor.u32 %v10646_v55, %v8755_v56  ;;  %v8890_v4 = vor.u32 %v10679_v59, %v8887_v60  ;;  %v1086_v5 = vld [vmem:[%s11589_s23 + $0x7c] sm:$0xf] }
  0x98   : > { %v462_v6 = vld [vmem:[%s11589_s23 + $0x78] sm:$0xf]  ;;  %v1087_v8 = vld [vmem:[%s11589_s23 + $0x80] sm:$0x1]  ;;  %v1250_v18 = vrot.slane %v1086_v5, 5 }
  0x99   : > { %v718_v49 = vor.u32 %v717_v44, %v714_v39  ;;  %v8785_v61 = vld [vmem:[#allocation3 + $0xe0] sm:$0xf]  ;;  %v734_v0 = vsel %vm11614_vm2, %v729_v58, %v733_v52  ;;  %v1085_v7 = vld [vmem:[%s11589_s23 + $0x78] sm:$0xe]  ;;  %v1253_v10 = vrot.slane %v1087_v8, 5  ;;  %v736_v13 = vshrl.u32 %v462_v6, 16 }
  0x9a   : > { %1034 = vst [vmem:[#allocation3 + $0xe8] sm:$0xf] %v734_v0  ;;  %v8669_v9 = vrot.slane %v1085_v7, 9  ;;  %v463_v11 = vld [vmem:[%s11589_s23 + $0x7c] sm:$0xf]  ;;  %v739_v14 = vshll.u32 %v462_v6, 16 }
  0x9b   : > { %v719_v57 = vrot.slane %v718_v49, 4  ;;  %v464_v12 = vld [vmem:[%s11589_s23 + $0x80] sm:$0x1]  ;;  %v745_v15 = vshll.u32 %v463_v11, 16  ;;  %v749_v16 = vshrl.u32 %v463_v11, 16  ;;  %v738_v21 = vrot.slane %v736_v13, 4 }
  0x9c   : > { %v1251_v17 = vsel %vm11729_vm5, %v8669_v9, %v1250_v18  ;;  %v741_v22 = vrot.slane %v739_v14, 5  ;;  %v372_v27 = vld [vmem:[%s11589_s23 + $0x78] sm:$0xf]  ;;  %v373_v28 = vld [vmem:[%s11589_s23 + $0x7c] sm:$0xf] }
  0x9d   : > { %v724_v63 = vsel %vm11614_vm2, %v719_v57, %v723_v45  ;;  %1378 = vst [vmem:[#allocation3 + $0xf8] sm:$0xf] %v1251_v17  ;;  %v747_v24 = vrot.slane %v745_v15, 5  ;;  %v751_v25 = vrot.slane %v749_v16, 4  ;;  %v8765_v31 = vld [vmem:[#allocation3 + $0xc0] sm:$0xf] }
  0x9e   : > { %v10654_v62 = vld [vmem:[#allocation3 + $0xe8] sm:$0xf0]  ;;  %1033 = vst [vmem:[#allocation3 + $0xdc] sm:$0xf] %v724_v63  ;;  %v742_v26 = vor.u32 %v741_v22, %v738_v21  ;;  %v10649_v36 = vld [vmem:[#allocation3 + $0xc4] sm:$0xf] }
  0x9f   : > { %v8786_v3 = vor.u32 %v10654_v62, %v8785_v61  ;;  %v752_v29 = vor.u32 %v751_v25, %v747_v24  ;;  %412 = vst [vmem:[#allocation3 + $0xf0] sm:$0xf] %v372_v27  ;;  %v10650_v34 = vld [vmem:[#allocation3 + $0xc8] sm:$0xf0]  ;;  %v8767_v37 = vld [vmem:[#allocation3 + $0xcc] sm:$0xf0] }
  0xa0   : > { %v743_v32 = vrot.slane %v742_v26, 4  ;;  %413 = vst [vmem:[#allocation3 + $0xfc] sm:$0xf] %v373_v28  ;;  %v8993_v38 = vld [vmem:[#allocation3] sm:$0xf]  ;;  %v8766_v43 = vor.u32 %v10650_v34, %v8765_v31  ;;  %v8770_v44 = vor.u32 %v10649_v36, %v8767_v37 }
  0xa1   : > { %v753_v35 = vrot.slane %v752_v29, 4  ;;  %v10551_v40 = vld [vmem:[#allocation3 + $0x8] sm:$0xf0]  ;;  %v1089_v48 = vld [vmem:[%s11589_s23 + $0x88] sm:$0xf] }
  0xa2   : > { %v748_v39 = vsel %vm11614_vm2, %v743_v32, %v747_v24  ;;  %v8994_v46 = vor.u32 %v10551_v40, %v8993_v38  ;;  %v465_v49 = vld [vmem:[%s11589_s23 + $0x84] sm:$0xf]  ;;  %v1090_v52 = vld [vmem:[%s11589_s23 + $0x8c] sm:$0x1]  ;;  %v466_v53 = vld [vmem:[%s11589_s23 + $0x88] sm:$0xf] }
  0xa3   : > { %2105 = vmatmul.bf16.gmra.mxu0 %v8742_v19  ;;  %v1252_v19 = vrot.slane %v1250_v18, 4  ;;  %1035 = vst [vmem:[#allocation3 + $0xf4] sm:$0xf] %v748_v39  ;;  %v1088_v50 = vld [vmem:[%s11589_s23 + $0x84] sm:$0xe]  ;;  %v1257_v55 = vrot.slane %v1089_v48, 5 }
  0xa4   : > { %2204 = vmatmul.bf16.gmra.mxu1 %v8746_v20  ;;  %2318 = vmatmul.bf16.gmra.mxu2 %v8786_v3  ;;  %v755_v20 = vshll.u32 %v464_v12, 16  ;;  %v8797_v41 = vld [vmem:[#allocation3 + $0xf8] sm:$0xf]  ;;  %v8670_v54 = vrot.slane %v1088_v50, 9  ;;  %v1260_v56 = vrot.slane %v1090_v52, 5  ;;  %v760_v58 = vshrl.u32 %v465_v49, 16 }
  0xa5   : > { %2259 = vmatmul.bf16.gmra.mxu3 %v8878_v23  ;;  %v1254_v23 = vsel %vm11729_vm5, %v1252_v19, %v1253_v10  ;;  %v467_v57 = vld [vmem:[%s11589_s23 + $0x8c] sm:$0x1]  ;;  %v763_v59 = vshll.u32 %v465_v49, 16  ;;  %v1259_v61 = vrot.slane %v1257_v55, 4  ;;  %v769_v62 = vshll.u32 %v466_v53, 16 }
  0xa6   : > { %1379 = vst [vmem:[#allocation3 + $0x104] sm:$0xf] %v1254_v23  ;;  %v757_v30 = vrot.slane %v755_v20, 5  ;;  %v1258_v60 = vsel %vm11729_vm5, %v8670_v54, %v1257_v55  ;;  %v773_v63 = vshrl.u32 %v466_v53, 16  ;;  %v762_v0 = vrot.slane %v760_v58, 4 }
  0xa7   : > { %1380 = vst [vmem:[#allocation3 + $0x110] sm:$0xf] %v1258_v60  ;;  %v1261_v3 = vsel %vm11729_vm5, %v1259_v61, %v1260_v56  ;;  %v374_v7 = vld [vmem:[%s11589_s23 + $0x84] sm:$0xf]  ;;  %v375_v8 = vld [vmem:[%s11589_s23 + $0x88] sm:$0xf] }
  0xa8   : > { %v758_v42 = vsel %vm11614_vm2, %v753_v35, %v757_v30  ;;  %v775_v5 = vrot.slane %v773_v63, 4  ;;  %1381 = vst [vmem:[#allocation3 + $0x11c] sm:$0xf] %v1261_v3  ;;  %v8777_v10 = vld [vmem:[#allocation3 + $0xd8] sm:$0xf] }
  0xa9   : > { %1036 = vst [vmem:[#allocation3 + $0x100] sm:$0xf] %v758_v42  ;;  %v9005_v12 = vld [vmem:[#allocation3 + $0x18] sm:$0xf]  ;;  %v10653_v14 = vld [vmem:[#allocation3 + $0xe0] sm:$0xf0] }
  0xaa   : > { %414 = vst [vmem:[#allocation3 + $0x108] sm:$0xf] %v374_v7  ;;  %v10652_v15 = vld [vmem:[#allocation3 + $0xdc] sm:$0xf]  ;;  %v8779_v16 = vld [vmem:[#allocation3 + $0xe4] sm:$0xf0]  ;;  %v8778_v22 = vor.u32 %v10653_v14, %v8777_v10 }
  0xab   : > { %415 = vst [vmem:[#allocation3 + $0x114] sm:$0xf] %v375_v8  ;;  %v10554_v19 = vld [vmem:[#allocation3 + $0x20] sm:$0xf0]  ;;  %v8782_v23 = vor.u32 %v10652_v15, %v8779_v16  ;;  %v1091_v31 = vld [vmem:[%s11589_s23 + $0x90] sm:$0xe] }
  0xac   : > { %v9006_v27 = vor.u32 %v10554_v19, %v9005_v12  ;;  %v1092_v29 = vld [vmem:[%s11589_s23 + $0x94] sm:$0xf]  ;;  %v1093_v32 = vld [vmem:[%s11589_s23 + $0x98] sm:$0x1]  ;;  %v8671_v34 = vrot.slane %v1091_v31, 9 }
  0xad   : > { %v10657_v45 = vld [vmem:[#allocation3 + $0x100] sm:$0xf0]  ;;  %v1264_v35 = vrot.slane %v1092_v29, 5  ;;  %v1267_v36 = vrot.slane %v1093_v32, 5  ;;  %v9017_v49 = vld [vmem:[#allocation3 + $0x30] sm:$0xf] }
  0xae   : > { %v8798_v47 = vor.u32 %v10657_v45, %v8797_v41  ;;  %v8809_v20 = vld [vmem:[#allocation3 + $0x110] sm:$0xf]  ;;  %v10557_v50 = vld [vmem:[#allocation3 + $0x38] sm:$0xf0]  ;;  %v9029_v15 = vld [vmem:[#allocation3 + $0x48] sm:$0xf] }
  0xaf   : > { %v10660_v24 = vld [vmem:[#allocation3 + $0x118] sm:$0xf0]  ;;  %v1265_v37 = vsel %vm11729_vm5, %v8671_v34, %v1264_v35  ;;  %v1266_v38 = vrot.slane %v1264_v35, 4  ;;  %v8789_v45 = vld [vmem:[#allocation3 + $0xf0] sm:$0xf] }
  0xb0   : > { %v8810_v28 = vor.u32 %v10660_v24, %v8809_v20  ;;  %1382 = vst [vmem:[#allocation3 + $0x128] sm:$0xf] %v1265_v37  ;;  %v8791_v48 = vld [vmem:[#allocation3 + $0xfc] sm:$0xf0]  ;;  %v1094_v63 = vld [vmem:[%s11589_s23 + $0x9c] sm:$0xe] }
  0xb1   : > { %v1268_v40 = vsel %vm11729_vm5, %v1266_v38, %v1267_v36  ;;  %v1095_v61 = vld [vmem:[%s11589_s23 + $0xa0] sm:$0xf]  ;;  %v10560_v16 = vld [vmem:[#allocation3 + $0x50] sm:$0xf0]  ;;  %v1097_v29 = vld [vmem:[%s11589_s23 + $0xa8] sm:$0xe] }
  0xb2   : > { %1383 = vst [vmem:[#allocation3 + $0x134] sm:$0xf] %v1268_v40  ;;  %v379_v10 = vld [vmem:[%s11589_s23 + $0xa0] sm:$0xf]  ;;  %v10659_v12 = vld [vmem:[#allocation3 + $0x110] sm:$0xf0] }
  0xb3   : > { %2110 = vmatmul.bf16.gmra.mxu0 %v8754_v1  ;;  %v765_v1 = vrot.slane %v763_v59, 5  ;;  %v9018_v59 = vor.u32 %v10557_v50, %v9017_v49  ;;  %419 = vst [vmem:[#allocation3 + $0x144] sm:$0xf] %v379_v10  ;;  %v1099_v31 = vld [vmem:[%s11589_s23 + $0xb0] sm:$0x1]  ;;  %v8673_v32 = vrot.slane %v1097_v29, 9 }
  0xb4   : > { %2209 = vmatmul.bf16.gmra.mxu1 %v8758_v2  ;;  %2323 = vmatmul.bf16.gmra.mxu2 %v8798_v47  ;;  %v779_v2 = vshll.u32 %v467_v57, 16  ;;  %v10655_v47 = vld [vmem:[#allocation3 + $0xf4] sm:$0xf]  ;;  %v1281_v35 = vrot.slane %v1099_v31, 5  ;;  %v9041_v49 = vld [vmem:[#allocation3 + $0x60] sm:$0xf] }
  0xb5   : > { %2264 = vmatmul.bf16.gmra.mxu3 %v8890_v4  ;;  %v771_v4 = vrot.slane %v769_v62, 5  ;;  %v766_v6 = vor.u32 %v765_v1, %v762_v0  ;;  %v8794_v55 = vor.u32 %v10655_v47, %v8791_v48  ;;  %v1096_v0 = vld [vmem:[%s11589_s23 + $0xa4] sm:$0x1]  ;;  %v8672_v1 = vrot.slane %v1094_v63, 9  ;;  %v10563_v50 = vld [vmem:[#allocation3 + $0x68] sm:$0xf0] }
  0xb6   : > { %v781_v18 = vrot.slane %v779_v2, 5  ;;  %v1271_v2 = vrot.slane %v1095_v61, 5  ;;  %v1274_v3 = vrot.slane %v1096_v0, 5  ;;  %v1101_v61 = vld [vmem:[%s11589_s23 + $0xb8] sm:$0xf] }
  0xb7   : > { %v776_v9 = vor.u32 %v775_v5, %v771_v4  ;;  %v767_v11 = vrot.slane %v766_v6, 4  ;;  %v8821_v52 = vld [vmem:[#allocation3 + $0x128] sm:$0xf]  ;;  %v1100_v0 = vld [vmem:[%s11589_s23 + $0xb4] sm:$0xe] }
  0xb8   : > { %v1273_v5 = vrot.slane %v1271_v2, 4  ;;  %v1104_v31 = vld [vmem:[%s11589_s23 + $0xc4] sm:$0xf]  ;;  %v10553_v51 = vld [vmem:[#allocation3 + $0x1c] sm:$0xf] }
  0xb9   : > { %v777_v13 = vrot.slane %v776_v9, 4  ;;  %v772_v17 = vsel %vm11614_vm2, %v767_v11, %v771_v4  ;;  %v10663_v56 = vld [vmem:[#allocation3 + $0x130] sm:$0xf0]  ;;  %v1272_v4 = vsel %vm11729_vm5, %v8672_v1, %v1271_v2  ;;  %v8801_v11 = vld [vmem:[#allocation3 + $0x108] sm:$0xf]  ;;  %v8674_v2 = vrot.slane %v1100_v0, 9 }
  0xba   : > { %1037 = vst [vmem:[#allocation3 + $0x10c] sm:$0xf] %v772_v17  ;;  %v8822_v60 = vor.u32 %v10663_v56, %v8821_v52  ;;  %v1275_v7 = vsel %vm11729_vm5, %v1273_v5, %v1274_v3  ;;  %v8802_v20 = vor.u32 %v10659_v12, %v8801_v11  ;;  %v1102_v1 = vld [vmem:[%s11589_s23 + $0xbc] sm:$0x1]  ;;  %v1285_v3 = vrot.slane %v1101_v61, 5 }
  0xbb   : > { %v782_v21 = vsel %vm11614_vm2, %v777_v13, %v781_v18  ;;  %1384 = vst [vmem:[#allocation3 + $0x140] sm:$0xf] %v1272_v4  ;;  %v378_v18 = vld [vmem:[%s11589_s23 + $0x9c] sm:$0xf]  ;;  %v1288_v4 = vrot.slane %v1102_v1, 5 }
  0xbc   : > { %1038 = vst [vmem:[#allocation3 + $0x118] sm:$0xf] %v782_v21  ;;  %v1286_v5 = vsel %vm11729_vm5, %v8674_v2, %v1285_v3  ;;  %vm4102_vm7 = vsmask.f32 256  ;;  %vm4159_vm10 = vsmask.f32 7938 }
  0xbd   : > { %1385 = vst [vmem:[#allocation3 + $0x14c] sm:$0xf] %v1275_v7  ;;  %v1287_v7 = vrot.slane %v1285_v3, 4  ;;  %vm12403_vm8 = vmand %vm4101_vm6, %vm4102_vm7  ;;  %vm4251_vm12 = vsmask.f32 4368 }
  0xbe   : > { %418 = vst [vmem:[#allocation3 + $0x138] sm:$0xf] %v378_v18  ;;  %vm12413_vm11 = vmand %vm4158_vm9, %vm4159_vm10 }
  0xbf   : > { %1388 = vst [vmem:[#allocation3 + $0x170] sm:$0xf] %v1286_v5  ;;  %v1289_v10 = vsel %vm11729_vm5, %v1287_v7, %v1288_v4  ;;  %v1107_v7 = vld [vmem:[%s11589_s23 + $0xd0] sm:$0xf]  ;;  %vm12489_vm13 = vmor %vm4102_vm7, %vm4251_vm12 }
  0xc0   : > { %1389 = vst [vmem:[#allocation3 + $0x17c] sm:$0xf] %v1289_v10 }
  0xc1   : > { %v10658_v13 = vld [vmem:[#allocation3 + $0x10c] sm:$0xf] }
  0xc2   : > { %v8833_v17 = vld [vmem:[#allocation3 + $0x140] sm:$0xf] }
  0xc3   : > { %2115 = vmatmul.bf16.gmra.mxu0 %v8766_v43  ;;  %v376_v43 = vld [vmem:[%s11589_s23 + $0x90] sm:$0xf]  ;;  %v8803_v14 = vld [vmem:[#allocation3 + $0x114] sm:$0xf0] }
  0xc4   : > { %2214 = vmatmul.bf16.gmra.mxu1 %v8770_v44  ;;  %2328 = vmatmul.bf16.gmra.mxu2 %v8810_v28  ;;  %v377_v44 = vld [vmem:[%s11589_s23 + $0x94] sm:$0xf]  ;;  %416 = vst [vmem:[#allocation3 + $0x120] sm:$0xf] %v376_v43  ;;  %v8806_v21 = vor.u32 %v10658_v13, %v8803_v14  ;;  %v383_v14 = vld [vmem:[%s11589_s23 + $0xb8] sm:$0xf] }
  0xc5   : > { %2809 = vmatmul.bf16.vlgmr.msrb.gmra.mxu3 %v8994_v46  ;;  %417 = vst [vmem:[#allocation3 + $0x12c] sm:$0xf] %v377_v44  ;;  %v10656_v46 = vld [vmem:[#allocation3 + $0xf8] sm:$0xf0]  ;;  %v382_v13 = vld [vmem:[%s11589_s23 + $0xb4] sm:$0xf] }
  0xc6   : > { %v8790_v54 = vor.u32 %v10656_v46, %v8789_v45  ;;  %v380_v45 = vld [vmem:[%s11589_s23 + $0xa8] sm:$0xf]  ;;  %v381_v46 = vld [vmem:[%s11589_s23 + $0xac] sm:$0xf]  ;;  %422 = vst [vmem:[#allocation3 + $0x168] sm:$0xf] %v382_v13 }
  0xc7   : > { %420 = vst [vmem:[#allocation3 + $0x150] sm:$0xf] %v380_v45  ;;  %v1106_v13 = vld [vmem:[%s11589_s23 + $0xcc] sm:$0xe] }
  0xc8   : > { %421 = vst [vmem:[#allocation3 + $0x15c] sm:$0xf] %v381_v46 }
  0xc9   : > { %423 = vst [vmem:[#allocation3 + $0x174] sm:$0xf] %v383_v14  ;;  %v1108_v14 = vld [vmem:[%s11589_s23 + $0xd4] sm:$0x1] }
  0xcb   : > { %v8813_v47 = vld [vmem:[#allocation3 + $0x120] sm:$0xf] }
  0xcc   : > { %v10662_v48 = vld [vmem:[#allocation3 + $0x128] sm:$0xf0] }
  0xd0   : > { %v2081_v25 = vpop.f32.mrf.mxu0 }
  0xd1   : > { %v2180_v26 = vpop.f32.mrf.mxu1 }
  0xd2   : > { %v11795_v30 = vadd.f32 %v2180_v26, %v2081_v25  ;;  %v9030_v25 = vor.u32 %v10560_v16, %v9029_v15  ;;  %v8825_v15 = vld [vmem:[#allocation3 + $0x138] sm:$0xf]  ;;  %v10665_v16 = vld [vmem:[#allocation3 + $0x140] sm:$0xf0] }
  0xd3   : > { %2120 = vmatmul.bf16.gmra.mxu0 %v8778_v22  ;;  %v10666_v22 = vld [vmem:[#allocation3 + $0x148] sm:$0xf0] }
  0xd4   : > { %2219 = vmatmul.bf16.gmra.mxu1 %v8782_v23  ;;  %2333 = vmatmul.bf16.gmra.mxu2 %v8822_v60  ;;  %v8834_v26 = vor.u32 %v10666_v22, %v8833_v17  ;;  %v9053_v17 = vld [vmem:[#allocation3 + $0x78] sm:$0xf] }
  0xd5   : > { %2814 = vmatmul.bf16.gmra.mxu3 %v9006_v27  ;;  %v1098_v27 = vld [vmem:[%s11589_s23 + $0xac] sm:$0xf] }
  0xd6   : > { %v1278_v34 = vrot.slane %v1098_v27, 5 }
  0xd8   : > { %v11801_v39 = vpop.f32.mrf.mxu3  ;;  %v11805_v41 = vpop.f32.mrf.mxu0  ;;  %v1279_v36 = vsel %vm11729_vm5, %v8673_v32, %v1278_v34  ;;  %v1280_v37 = vrot.slane %v1278_v34, 4  ;;  %v1103_v34 = vld [vmem:[%s11589_s23 + $0xc0] sm:$0xe] }
  0xd9   : > { %v11807_v42 = vpop.f32.mrf.mxu1  ;;  %1386 = vst [vmem:[#allocation3 + $0x158] sm:$0xf] %v1279_v36  ;;  %v8675_v36 = vrot.slane %v1103_v34, 9  ;;  %v8849_v34 = vld [vmem:[#allocation3 + $0x168] sm:$0xf] }
  0xda   : > { %v1282_v40 = vsel %vm11729_vm5, %v1280_v37, %v1281_v35  ;;  %v1105_v35 = vld [vmem:[%s11589_s23 + $0xc8] sm:$0x1]  ;;  %v1292_v37 = vrot.slane %v1104_v31, 5  ;;  %v387_v31 = vld [vmem:[%s11589_s23 + $0xd0] sm:$0xf] }
  0xdb   : > { %1387 = vst [vmem:[#allocation3 + $0x164] sm:$0xf] %v1282_v40  ;;  %v1295_v40 = vrot.slane %v1105_v35, 5  ;;  %v10671_v35 = vld [vmem:[#allocation3 + $0x170] sm:$0xf0] }
  0xdc   : > { %v1293_v45 = vsel %vm11729_vm5, %v8675_v36, %v1292_v37  ;;  %v1294_v46 = vrot.slane %v1292_v37, 4  ;;  %427 = vst [vmem:[#allocation3 + $0x1a4] sm:$0xf] %v387_v31  ;;  %v9077_v36 = vld [vmem:[#allocation3 + $0xa8] sm:$0xf] }
  0xdd   : > { %1390 = vst [vmem:[#allocation3 + $0x188] sm:$0xf] %v1293_v45  ;;  %v10572_v37 = vld [vmem:[#allocation3 + $0xb0] sm:$0xf0]  ;;  %v9089_v31 = vld [vmem:[#allocation3 + $0xc0] sm:$0xf] }
  0xe0   : > { %v11811_v53 = vpop.f32.mrf.mxu3  ;;  %v2086_v57 = vpop.f32.mrf.mxu0  ;;  %v8845_v52 = vld [vmem:[#allocation3 + $0x158] sm:$0xf] }
  0xe1   : > { %13831 = vst [vmem:[#allocation19_spill] sm:$0xff] %v11811_v53  ;;  %v2185_v58 = vpop.f32.mrf.mxu1 }
  0xe2   : > { %v11814_v62 = vadd.f32 %v2185_v58, %v2086_v57  ;;  %v10669_v56 = vld [vmem:[#allocation3 + $0x160] sm:$0xf0] }
  0xe3   : > { %2125 = vmatmul.bf16.gmra.mxu0 %v8790_v54  ;;  %v8846_v60 = vor.u32 %v10669_v56, %v8845_v52  ;;  %v384_v52 = vld [vmem:[%s11589_s23 + $0xc0] sm:$0xf] }
  0xe4   : > { %2224 = vmatmul.bf16.gmra.mxu1 %v8794_v55  ;;  %2338 = vmatmul.bf16.gmra.mxu2 %v8834_v26  ;;  %v8814_v55 = vor.u32 %v10662_v48, %v8813_v47  ;;  %v1296_v48 = vsel %vm11729_vm5, %v1294_v46, %v1295_v40  ;;  %424 = vst [vmem:[#allocation3 + $0x180] sm:$0xf] %v384_v52  ;;  %v8837_v56 = vld [vmem:[#allocation3 + $0x150] sm:$0xf] }
  0xe5   : > { %2819 = vmatmul.bf16.gmra.mxu3 %v9018_v59  ;;  %v9042_v59 = vor.u32 %v10563_v50, %v9041_v49  ;;  %1391 = vst [vmem:[#allocation3 + $0x194] sm:$0xf] %v1296_v48  ;;  %v8850_v48 = vor.u32 %v10671_v35, %v8849_v34  ;;  %v10575_v34 = vld [vmem:[#allocation3 + $0xc8] sm:$0xf0] }
  0xe8   : > { %v11820_v6 = vpop.f32.mrf.mxu3  ;;  %v11824_v8 = vpop.f32.mrf.mxu0 }
  0xe9   : > { %v11826_v9 = vpop.f32.mrf.mxu1 }
  0xec   : > { %v10675_v1 = vld [vmem:[#allocation3 + $0x190] sm:$0xf0] }
  0xf0   : > { %v11830_v19 = vpop.f32.mrf.mxu3  ;;  %v2091_v23 = vpop.f32.mrf.mxu0 }
  0xf1   : > { %13832 = vst [vmem:[#allocation20_spill] sm:$0xff] %v11830_v19  ;;  %v2190_v24 = vpop.f32.mrf.mxu1 }
  0xf2   : > { %v11833_v28 = vadd.f32 %v2190_v24, %v2091_v23  ;;  %v8826_v23 = vor.u32 %v10665_v16, %v8825_v15  ;;  %v10672_v24 = vld [vmem:[#allocation3 + $0x178] sm:$0xf0]  ;;  %v8676_v15 = vrot.slane %v1106_v13, 9  ;;  %v1299_v16 = vrot.slane %v1107_v7, 5 }
  0xf3   : > { %2130 = vmatmul.bf16.gmra.mxu0 %v8802_v20  ;;  %v10566_v20 = vld [vmem:[#allocation3 + $0x80] sm:$0xf0] }
  0xf4   : > { %2229 = vmatmul.bf16.gmra.mxu1 %v8806_v21  ;;  %2343 = vmatmul.bf16.gmra.mxu2 %v8846_v60  ;;  %v8857_v21 = vld [vmem:[#allocation3 + $0x170] sm:$0xf]  ;;  %v9054_v27 = vor.u32 %v10566_v20, %v9053_v17  ;;  %v8869_v60 = vld [vmem:[#allocation3 + $0x188] sm:$0xf]  ;;  %v1302_v17 = vrot.slane %v1108_v14, 5 }
  0xf5   : > { %2824 = vmatmul.bf16.gmra.mxu3 %v9030_v25  ;;  %v8858_v29 = vor.u32 %v10672_v24, %v8857_v21  ;;  %v8870_v5 = vor.u32 %v10675_v1, %v8869_v60  ;;  %v1300_v21 = vsel %vm11729_vm5, %v8676_v15, %v1299_v16  ;;  %v1111_v1 = vld [vmem:[%s11589_s23 + $0xe0] sm:$0x1] }
  0xf6   : > { %1392 = vst [vmem:[#allocation3 + $0x1a0] sm:$0xf] %v1300_v21  ;;  %v388_v21 = vld [vmem:[%s11589_s23 + $0xd8] sm:$0xf] }
  0xf7   : > { %428 = vst [vmem:[#allocation3 + $0x1b0] sm:$0xf] %v388_v21 }
  0xf8   : > { %v11839_v38 = vpop.f32.mrf.mxu3  ;;  %v11843_v43 = vpop.f32.mrf.mxu0 }
  0xf9   : > { %v11845_v44 = vpop.f32.mrf.mxu1 }
  0xfd   : > { %v8881_v45 = vld [vmem:[#allocation3 + $0x1a0] sm:$0xf] }
 0x100   : > { %v11849_v54 = vpop.f32.mrf.mxu3  ;;  %v2096_v57 = vpop.f32.mrf.mxu0 }
 0x101   : > { %13833 = vst [vmem:[#allocation21_spill] sm:$0xff] %v11849_v54  ;;  %v2195_v58 = vpop.f32.mrf.mxu1 }
 0x102   : > { %v11852_v63 = vadd.f32 %v2195_v58, %v2096_v57  ;;  %v10668_v57 = vld [vmem:[#allocation3 + $0x158] sm:$0xf0]  ;;  %v9065_v58 = vld [vmem:[#allocation3 + $0x90] sm:$0xf] }
 0x103   : > { %2135 = vmatmul.bf16.gmra.mxu0 %v8814_v55  ;;  %v385_v55 = vld [vmem:[%s11589_s23 + $0xc4] sm:$0xf]  ;;  %v8838_v0 = vor.u32 %v10668_v57, %v8837_v56  ;;  %v9078_v57 = vor.u32 %v10572_v37, %v9077_v36 }
 0x104   : > { %2348 = vmatmul.bf16.gmra.mxu2 %v8858_v29  ;;  %425 = vst [vmem:[#allocation3 + $0x18c] sm:$0xf] %v385_v55  ;;  %v386_v29 = vld [vmem:[%s11589_s23 + $0xcc] sm:$0xf] }
 0x105   : > { %2829 = vmatmul.bf16.gmra.mxu3 %v9042_v59  ;;  %v10569_v59 = vld [vmem:[#allocation3 + $0x98] sm:$0xf0]  ;;  %426 = vst [vmem:[#allocation3 + $0x198] sm:$0xf] %v386_v29 }
 0x106   : > { %v9066_v4 = vor.u32 %v10569_v59, %v9065_v58  ;;  %v1110_v59 = vld [vmem:[%s11589_s23 + $0xdc] sm:$0xf] }
 0x108   : > { %v11858_v18 = vpop.f32.mrf.mxu3  ;;  %v11862_v11 = vpop.f32.mrf.mxu0 }
 0x109   : > { %v11864_v12 = vpop.f32.mrf.mxu1 }
 0x10b   : > { %v10674_v29 = vld [vmem:[#allocation3 + $0x188] sm:$0xf0] }
 0x110   : > { %v11868_v22 = vpop.f32.mrf.mxu3  ;;  %v2101_v25 = vpop.f32.mrf.mxu0 }
 0x111   : > { %13834 = vst [vmem:[#allocation22_spill] sm:$0xff] %v11868_v22  ;;  %v2200_v26 = vpop.f32.mrf.mxu1  ;;  %v1066_v22 = vld [vmem:[%s11589_s23 + $0x2c] sm:$0x1] }
 0x112   : > { %v11871_v32 = vadd.f32 %v2200_v26, %v2101_v25 }
 0x113   : > { %2140 = vmatmul.bf16.gmra.mxu0 %v8826_v23  ;;  %v1301_v23 = vrot.slane %v1299_v16, 4 }
 0x114   : > { %2353 = vmatmul.bf16.gmra.mxu2 %v8870_v5 }
 0x115   : > { %2834 = vmatmul.bf16.gmra.mxu3 %v9054_v27  ;;  %v1303_v25 = vsel %vm11729_vm5, %v1301_v23, %v1302_v17  ;;  %v389_v23 = vld [vmem:[%s11589_s23 + $0xdc] sm:$0xf] }
 0x116   : > { %1393 = vst [vmem:[#allocation3 + $0x1ac] sm:$0xf] %v1303_v25  ;;  %v8861_v25 = vld [vmem:[#allocation3 + $0x180] sm:$0xf] }
 0x117   : > { %v11894_v20 = vpop.f32.mrf.mxu2  ;;  %429 = vst [vmem:[#allocation3 + $0x1bc] sm:$0xf] %v389_v23 }
 0x118   : > { %v11877_v47 = vpop.f32.mrf.mxu3  ;;  %v11881_v49 = vpop.f32.mrf.mxu0 }
 0x119   : > { %v11883_v50 = vpop.f32.mrf.mxu1 }
 0x11d   : > { %v10678_v52 = vld [vmem:[#allocation3 + $0x1a8] sm:$0xf0] }
 0x11e   : > { %v8882_v58 = vor.u32 %v10678_v52, %v8881_v45  ;;  %v8862_v45 = vor.u32 %v10674_v29, %v8861_v25 }
 0x11f   : > { %v11908_v40 = vpop.f32.mrf.mxu2 }
 0x120   : > { %v11887_v61 = vpop.f32.mrf.mxu3  ;;  %v2106_v2 = vpop.f32.mrf.mxu0  ;;  %13836 = vst [vmem:[#allocation24_spill] sm:$0xff] %v11908_v40 }
 0x121   : > { %13835 = vst [vmem:[#allocation23_spill] sm:$0xff] %v11887_v61  ;;  %v2205_v3 = vpop.f32.mrf.mxu1  ;;  %v10618_v61 = vld [vmem:[#allocation8 + $0x70] sm:$0xff] }
 0x122   : > { %v11890_v10 = vadd.f32 %v2205_v3, %v2106_v2  ;;  %v1306_v3 = vrot.slane %v1110_v59, 5 }
 0x123   : > { %2145 = vmatmul.bf16.gmra.mxu0 %v8838_v0  ;;  %v1109_v0 = vld [vmem:[%s11589_s23 + $0xd8] sm:$0xe] }
 0x124   : > { %2358 = vmatmul.bf16.gmra.mxu2 %v8882_v58  ;;  %v8677_v2 = vrot.slane %v1109_v0, 9  ;;  %v1308_v13 = vrot.slane %v1306_v3, 4  ;;  %v1059_v0 = vld [vmem:[%s11589_s23 + $0x10] sm:$0xf] }
 0x125   : > { %2839 = vmatmul.bf16.gmra.mxu3 %v9066_v4  ;;  %v1309_v4 = vrot.slane %v1111_v1, 5 }
 0x126   : > { %v1307_v7 = vsel %vm11729_vm5, %v8677_v2, %v1306_v3  ;;  %v1187_v2 = vrot.slane %v1059_v0, 5  ;;  %v1058_v3 = vld [vmem:[%s11589_s23 + $0xc] sm:$0xe] }
 0x127   : > { %v2319_v5 = vpop.f32.mrf.mxu2  ;;  %1394 = vst [vmem:[#allocation3 + $0x1b8] sm:$0xf] %v1307_v7  ;;  %v1310_v15 = vsel %vm11729_vm5, %v1308_v13, %v1309_v4  ;;  %v1060_v4 = vld [vmem:[%s11589_s23 + $0x14] sm:$0x1]  ;;  %v8660_v13 = vrot.slane %v1058_v3, 9  ;;  %v10619_v3 = vld [vmem:[#allocation8 + $0x78] sm:$0xff] }
 0x128   : > { %v11898_v24 = vpop.f32.mrf.mxu3  ;;  %v11902_v26 = vpop.f32.mrf.mxu0  ;;  %1395 = vst [vmem:[#allocation3 + $0x1c4] sm:$0xf] %v1310_v15  ;;  %v1189_v15 = vrot.slane %v1187_v2, 4  ;;  %v1190_v21 = vrot.slane %v1060_v4, 5  ;;  %v1062_v4 = vld [vmem:[%s11589_s23 + $0x1c] sm:$0xf]  ;;  %2900 = vmatpush.bf16.msra.mxu0 %v10619_v3 }
 0x129   : > { %v11904_v27 = vpop.f32.mrf.mxu1 }
 0x12a   : > { %v1191_v29 = vsel %vm11729_vm5, %v1189_v15, %v1190_v21  ;;  %v1194_v15 = vrot.slane %v1062_v4, 5  ;;  %v1061_v21 = vld [vmem:[%s11589_s23 + $0x18] sm:$0xe] }
 0x12b   : > { %1361 = vst [vmem:[#allocation3 + $0x2c] sm:$0xf] %v1191_v29 }
 0x12c   : > { %2901 = vmatpush.bf16.msra.mxu0 %v10618_v61 }
 0x12e   : > { %v8893_v36 = vld [vmem:[#allocation3 + $0x1b8] sm:$0xf] }
 0x12f   : > { %v11929_v35 = vpop.f32.mrf.mxu2 }
 0x130   : > { %v11910_v46 = vpop.f32.mrf.mxu3  ;;  %v2111_v55 = vpop.f32.mrf.mxu0  ;;  %13838 = vst [vmem:[#allocation26_spill] sm:$0xff] %v11929_v35 }
 0x131   : > { %13837 = vst [vmem:[#allocation25_spill] sm:$0xff] %v11910_v46  ;;  %v2210_v56 = vpop.f32.mrf.mxu1  ;;  %v1196_v46 = vrot.slane %v1194_v15, 4 }
 0x132   : > { %v11913_v60 = vadd.f32 %v2210_v56, %v2111_v55  ;;  %v9090_v56 = vor.u32 %v10575_v34, %v9089_v31  ;;  %v8873_v31 = vld [vmem:[#allocation3 + $0x198] sm:$0xf]  ;;  %v10677_v34 = vld [vmem:[#allocation3 + $0x1a0] sm:$0xf0] }
 0x133   : > { %2150 = vmatmul.bf16.gmra.mxu0 %v8850_v48  ;;  %v10681_v48 = vld [vmem:[#allocation3 + $0x1c0] sm:$0xf0] }
 0x135   : > { %2844 = vmatmul.bf16.gmra.mxu3 %v9078_v57  ;;  %v8894_v57 = vor.u32 %v10681_v48, %v8893_v36  ;;  %v9101_v36 = vld [vmem:[#allocation3 + $0xd8] sm:$0xf] }
 0x137   : > { %2363 = vmatmul.bf16.gmra.mxu2 %v8894_v57  ;;  %v2324_v1 = vpop.f32.mrf.mxu2 }
 0x138   : > { %v11919_v14 = vpop.f32.mrf.mxu3  ;;  %v11923_v16 = vpop.f32.mrf.mxu0 }
 0x139   : > { %v11925_v17 = vpop.f32.mrf.mxu1 }
 0x13f   : > { %v11949_v48 = vpop.f32.mrf.mxu2 }
 0x140   : > { %v11931_v37 = vpop.f32.mrf.mxu3  ;;  %v2116_v52 = vpop.f32.mrf.mxu0  ;;  %13842 = vst [vmem:[#allocation30_spill] sm:$0xff] %v11949_v48 }
 0x141   : > { %13839 = vst [vmem:[#allocation27_spill] sm:$0xff] %v11931_v37  ;;  %v2215_v55 = vpop.f32.mrf.mxu1  ;;  %v8661_v37 = vrot.slane %v1061_v21, 9 }
 0x142   : > { %v2216_v58 = vadd.f32 %v2215_v55, %v2116_v52  ;;  %v8874_v55 = vor.u32 %v10677_v34, %v8873_v31 }
 0x143   : > { %2155 = vmatmul.bf16.gmra.mxu0 %v8862_v45  ;;  %v10578_v45 = vld [vmem:[#allocation3 + $0xe0] sm:$0xf0] }
 0x144   : > { %v11934_v59 = vadd.f32 %v11894_v20, %v2216_v58  ;;  %v1188_v20 = vsel %vm11729_vm5, %v8660_v13, %v1187_v2  ;;  %v9102_v58 = vor.u32 %v10578_v45, %v9101_v36 }
 0x145   : > { %2849 = vmatmul.bf16.gmra.mxu3 %v9090_v56  ;;  %1360 = vst [vmem:[#allocation3 + $0x20] sm:$0xf] %v1188_v20  ;;  %v1063_v20 = vld [vmem:[%s11589_s23 + $0x20] sm:$0x1] }
 0x146   : > { %v1197_v31 = vrot.slane %v1063_v20, 5 }
 0x147   : > { %v2329_v13 = vpop.f32.mrf.mxu2 }
 0x148   : > { %v11939_v7 = vpop.f32.mrf.mxu3  ;;  %v11941_v23 = vpop.f32.mrf.mxu0  ;;  %v1198_v45 = vsel %vm11729_vm5, %v1196_v46, %v1197_v31  ;;  %v1065_v31 = vld [vmem:[%s11589_s23 + $0x28] sm:$0xf] }
 0x149   : > { %13840 = vst [vmem:[#allocation28_spill] sm:$0xff] %v11941_v23  ;;  %v11943_v25 = vpop.f32.mrf.mxu1 }
 0x14a   : > { %13841 = vst [vmem:[#allocation29_spill] sm:$0xff] %v11943_v25 }
 0x14b   : > { %1363 = vst [vmem:[#allocation3 + $0x44] sm:$0xf] %v1198_v45  ;;  %v1064_v45 = vld [vmem:[%s11589_s23 + $0x24] sm:$0xe] }
 0x14c   : > { %v8662_v53 = vrot.slane %v1064_v45, 9 }
 0x150   : > { %v11951_v52 = vpop.f32.mrf.mxu3  ;;  %v2121_v56 = vpop.f32.mrf.mxu0 }
 0x151   : > { %v2220_v57 = vpop.f32.mrf.mxu1 }
 0x152   : > { %v2221_v0 = vadd.f32 %v2220_v57, %v2121_v56  ;;  %v10680_v56 = vld [vmem:[#allocation3 + $0x1b8] sm:$0xf0]  ;;  %v9113_v57 = vld [vmem:[#allocation3 + $0xf0] sm:$0xf] }
 0x153   : > { %2160 = vmatmul.bf16.gmra.mxu0 %v8874_v55  ;;  %v8885_v55 = vld [vmem:[#allocation3 + $0x1b0] sm:$0xf] }
 0x154   : > { %v11953_v2 = vadd.f32 %v2319_v5, %v2221_v0  ;;  %v1195_v5 = vsel %vm11729_vm5, %v8661_v37, %v1194_v15  ;;  %v11968_v0 = vpop.f32.mrf.mxu2  ;;  %v8886_v4 = vor.u32 %v10680_v56, %v8885_v55  ;;  %v1204_v55 = vrot.slane %v1066_v22, 5 }
 0x155   : > { %2854 = vmatmul.bf16.gmra.mxu3 %v9102_v58  ;;  %1362 = vst [vmem:[#allocation3 + $0x38] sm:$0xf] %v1195_v5  ;;  %v10581_v58 = vld [vmem:[#allocation3 + $0xf8] sm:$0xf0]  ;;  %v1201_v5 = vrot.slane %v1065_v31, 5 }
 0x156   : > { %13845 = vst [vmem:[#allocation33_spill] sm:$0xff] %v11968_v0  ;;  %v9114_v37 = vor.u32 %v10581_v58, %v9113_v57  ;;  %v8689_v58 = vld [vmem:[#allocation3 + $0x20] sm:$0xf] }
 0x157   : > { %v1203_v0 = vrot.slane %v1201_v5, 4 }
 0x158   : > { %v11958_v29 = vpop.f32.mrf.mxu3  ;;  %v11960_v34 = vpop.f32.mrf.mxu0 }
 0x159   : > { %13843 = vst [vmem:[#allocation31_spill] sm:$0xff] %v11960_v34  ;;  %v11962_v36 = vpop.f32.mrf.mxu1  ;;  %v1205_v61 = vsel %vm11729_vm5, %v1203_v0, %v1204_v55  ;;  %v1068_v55 = vld [vmem:[%s11589_s23 + $0x34] sm:$0xf] }
 0x15a   : > { %13844 = vst [vmem:[#allocation32_spill] sm:$0xff] %v11962_v36 }
 0x15b   : > { %1365 = vst [vmem:[#allocation3 + $0x5c] sm:$0xf] %v1205_v61  ;;  %v1067_v61 = vld [vmem:[%s11589_s23 + $0x30] sm:$0xe] }
 0x15c   : > { %v2334_v19 = vpop.f32.mrf.mxu2  ;;  %v8663_v35 = vrot.slane %v1067_v61, 9 }
 0x160   : > { %v11970_v3 = vpop.f32.mrf.mxu3  ;;  %v2126_v21 = vpop.f32.mrf.mxu0 }
 0x161   : > { %v2225_v20 = vpop.f32.mrf.mxu1 }
 0x162   : > { %v2226_v15 = vadd.f32 %v2225_v20, %v2126_v21  ;;  %v9125_v21 = vld [vmem:[#allocation3 + $0x108] sm:$0xf]  ;;  %v10584_v20 = vld [vmem:[#allocation3 + $0x110] sm:$0xf0] }
 0x163   : > { %2165 = vmatmul.bf16.gmra.mxu0 %v8886_v4  ;;  %v10630_v4 = vld [vmem:[#allocation3 + $0x28] sm:$0xf0]  ;;  %v9126_v48 = vor.u32 %v10584_v20, %v9125_v21  ;;  %v10616_v20 = vld [vmem:[#allocation8 + $0x60] sm:$0xff] }
 0x164   : > { %v11972_v46 = vadd.f32 %v2324_v1, %v2226_v15  ;;  %v1202_v1 = vsel %vm11729_vm5, %v8662_v53, %v1201_v5  ;;  %v10617_v15 = vld [vmem:[#allocation8 + $0x68] sm:$0xff]  ;;  %v11989_v5 = vpop.f32.mrf.mxu2 }
 0x165   : > { %2859 = vmatmul.bf16.gmra.mxu3 %v9114_v37  ;;  %1364 = vst [vmem:[#allocation3 + $0x50] sm:$0xf] %v1202_v1  ;;  %v8690_v37 = vor.u32 %v10630_v4, %v8689_v58  ;;  %2902 = vmatpush.bf16.msra.mxu0 %v10617_v15  ;;  %v1208_v1 = vrot.slane %v1068_v55, 5 }
 0x166   : > { %13848 = vst [vmem:[#allocation36_spill] sm:$0xff] %v11989_v5  ;;  %v1072_v5 = vld [vmem:[%s11589_s23 + $0x44] sm:$0x1] }
 0x167   : > { %v1210_v58 = vrot.slane %v1208_v1, 4  ;;  %v1209_v21 = vsel %vm11729_vm5, %v8663_v35, %v1208_v1  ;;  %v1218_v40 = vrot.slane %v1072_v5, 5 }
 0x168   : > { %v11977_v54 = vpop.f32.mrf.mxu3  ;;  %v11979_v56 = vpop.f32.mrf.mxu0  ;;  %1366 = vst [vmem:[#allocation3 + $0x68] sm:$0xf] %v1209_v21 }
 0x169   : > { %13846 = vst [vmem:[#allocation34_spill] sm:$0xff] %v11979_v56  ;;  %v11981_v57 = vpop.f32.mrf.mxu1  ;;  %2903 = vmatpush.bf16.msra.mxu0 %v10616_v20 }
 0x16a   : > { %13847 = vst [vmem:[#allocation35_spill] sm:$0xff] %v11981_v57  ;;  %v1069_v57 = vld [vmem:[%s11589_s23 + $0x38] sm:$0x1] }
 0x16b   : > { %v1211_v4 = vrot.slane %v1069_v57, 5 }
 0x16c   : > { %v2339_v15 = vpop.f32.mrf.mxu2 }
 0x170   : > { %v11987_v22 = vpop.f32.mrf.mxu3  ;;  %v2131_v31 = vpop.f32.mrf.mxu0 }
 0x171   : > { %v2230_v45 = vpop.f32.mrf.mxu1 }
 0x172   : > { %v2231_v53 = vadd.f32 %v2230_v45, %v2131_v31  ;;  %v9137_v31 = vld [vmem:[#allocation3 + $0x120] sm:$0xf]  ;;  %v10587_v45 = vld [vmem:[#allocation3 + $0x128] sm:$0xf0] }
 0x173   : > { %2278 = vmatmul.bf16.vlgmr.msrb.gmra.mxu0 %v8690_v37  ;;  %v10633_v37 = vld [vmem:[#allocation3 + $0x40] sm:$0xf0]  ;;  %v9138_v35 = vor.u32 %v10587_v45, %v9137_v31  ;;  %v8713_v31 = vld [vmem:[#allocation3 + $0x50] sm:$0xf]  ;;  %v10636_v45 = vld [vmem:[#allocation3 + $0x58] sm:$0xf0] }
 0x174   : > { %v11991_v0 = vadd.f32 %v2329_v13, %v2231_v53  ;;  %v1212_v13 = vsel %vm11729_vm5, %v1210_v58, %v1211_v4  ;;  %v1071_v58 = vld [vmem:[%s11589_s23 + $0x40] sm:$0xf]  ;;  %v12010_v21 = vpop.f32.mrf.mxu2 }
 0x175   : > { %2864 = vmatmul.bf16.gmra.mxu3 %v9126_v48  ;;  %1367 = vst [vmem:[#allocation3 + $0x74] sm:$0xf] %v1212_v13  ;;  %v8701_v48 = vld [vmem:[#allocation3 + $0x38] sm:$0xf]  ;;  %v1215_v4 = vrot.slane %v1071_v58, 5 }
 0x176   : > { %v8702_v53 = vor.u32 %v10633_v37, %v8701_v48  ;;  %13850 = vst [vmem:[#allocation38_spill] sm:$0xff] %v12010_v21  ;;  %v1070_v13 = vld [vmem:[%s11589_s23 + $0x3c] sm:$0xe] }
 0x177   : > { %v8664_v20 = vrot.slane %v1070_v13, 9  ;;  %v1217_v34 = vrot.slane %v1215_v4, 4  ;;  %v10615_v37 = vld [vmem:[#allocation8 + $0x58] sm:$0xff] }
 0x178   : > { %v11996_v56 = vpop.f32.mrf.mxu3  ;;  %v11998_v36 = vpop.f32.mrf.mxu0  ;;  %2904 = vmatpush.bf16.msra.mxu0 %v10615_v37 }
 0x179   : > { %13849 = vst [vmem:[#allocation37_spill] sm:$0xff] %v11998_v36 }
 0x180   : > { %v12004_v57 = vpop.f32.mrf.mxu3  ;;  %v2136_v55 = vpop.f32.mrf.mxu0 }
 0x181   : > { %v2236_v1 = vadd.f32 %v11801_v39, %v2136_v55  ;;  %v1216_v39 = vsel %vm11729_vm5, %v8664_v20, %v1215_v4  ;;  %v10590_v55 = vld [vmem:[#allocation3 + $0x140] sm:$0xf0]  ;;  %v2344_v4 = vpop.f32.mrf.mxu2 }
 0x182   : > { %1368 = vst [vmem:[#allocation3 + $0x80] sm:$0xf] %v1216_v39  ;;  %v1073_v39 = vld [vmem:[%s11589_s23 + $0x48] sm:$0xe] }
 0x183   : > { %v12007_v61 = vadd.f32 %v2334_v19, %v2236_v1  ;;  %2283 = vmatmul.bf16.gmra.mxu0 %v8702_v53  ;;  %v1219_v19 = vsel %vm11729_vm5, %v1217_v34, %v1218_v40  ;;  %v9149_v53 = vld [vmem:[#allocation3 + $0x138] sm:$0xf]  ;;  %v1074_v34 = vld [vmem:[%s11589_s23 + $0x4c] sm:$0xf] }
 0x184   : > { %1369 = vst [vmem:[#allocation3 + $0x8c] sm:$0xf] %v1219_v19  ;;  %v9150_v58 = vor.u32 %v10590_v55, %v9149_v53  ;;  %v1222_v20 = vrot.slane %v1074_v34, 5  ;;  %v1075_v19 = vld [vmem:[%s11589_s23 + $0x50] sm:$0x1] }
 0x185   : > { %2869 = vmatmul.bf16.gmra.mxu3 %v9138_v35  ;;  %v8714_v35 = vor.u32 %v10636_v45, %v8713_v31  ;;  %v1225_v25 = vrot.slane %v1075_v19, 5  ;;  %v10614_v31 = vld [vmem:[#allocation8 + $0x50] sm:$0xff]  ;;  %v8725_v53 = vld [vmem:[#allocation3 + $0x68] sm:$0xf]  ;;  %v10639_v55 = vld [vmem:[#allocation3 + $0x70] sm:$0xf0] }
 0x186   : > { %v1224_v37 = vrot.slane %v1222_v20, 4  ;;  %2905 = vmatpush.bf16.msra.mxu0 %v10614_v31  ;;  %v1077_v19 = vld [vmem:[%s11589_s23 + $0x58] sm:$0xf] }
 0x187   : > { %v1229_v31 = vrot.slane %v1077_v19, 5  ;;  %v10625_v19 = vld [vmem:[#allocation8 + $0xa8] sm:$0xff] }
 0x188   : > { %v12014_v36 = vpop.f32.mrf.mxu3  ;;  %v12016_v48 = vpop.f32.mrf.mxu0 }
 0x189   : > { %13851 = vst [vmem:[#allocation39_spill] sm:$0xff] %v12014_v36  ;;  %v10622_v36 = vld [vmem:[#allocation8 + $0x90] sm:$0xff] }
 0x18a   : > { %13852 = vst [vmem:[#allocation40_spill] sm:$0xff] %v12016_v48  ;;  %v8665_v48 = vrot.slane %v1073_v39, 9 }
 0x18c   : > { %v1223_v45 = vsel %vm11729_vm5, %v8665_v48, %v1222_v20 }
 0x18d   : > { %1370 = vst [vmem:[#allocation3 + $0x98] sm:$0xf] %v1223_v45  ;;  %v1076_v45 = vld [vmem:[%s11589_s23 + $0x54] sm:$0xe] }
 0x190   : > { %v12022_v5 = vpop.f32.mrf.mxu3  ;;  %v2141_v1 = vpop.f32.mrf.mxu0 }
 0x191   : > { %13853 = vst [vmem:[#allocation41_spill] sm:$0xff] %v12022_v5  ;;  %v2241_v13 = vadd.f32 %v11820_v6, %v2141_v1  ;;  %v1226_v6 = vsel %vm11729_vm5, %v1224_v37, %v1225_v25  ;;  %v10593_v1 = vld [vmem:[#allocation3 + $0x158] sm:$0xf0]  ;;  %v10627_v37 = vld [vmem:[#allocation8 + $0xb8] sm:$0xff] }
 0x192   : > { %1371 = vst [vmem:[#allocation3 + $0xa4] sm:$0xf] %v1226_v6  ;;  %v1078_v6 = vld [vmem:[%s11589_s23 + $0x5c] sm:$0x1]  ;;  %2999 = vmatpush.bf16.msrb.mxu1 %v10627_v37 }
 0x193   : > { %v12025_v40 = vadd.f32 %v2339_v15, %v2241_v13  ;;  %2288 = vmatmul.bf16.gmra.mxu0 %v8714_v35  ;;  %v12038_v15 = vpop.f32.mrf.mxu2  ;;  %v9161_v35 = vld [vmem:[#allocation3 + $0x150] sm:$0xf]  ;;  %v8726_v13 = vor.u32 %v10639_v55, %v8725_v53  ;;  %v1232_v53 = vrot.slane %v1078_v6, 5 }
 0x194   : > { %13856 = vst [vmem:[#allocation44_spill] sm:$0xff] %v12038_v15  ;;  %v9162_v48 = vor.u32 %v10593_v1, %v9161_v35  ;;  %v10613_v35 = vld [vmem:[#allocation8 + $0x48] sm:$0xff] }
 0x195   : > { %2874 = vmatmul.bf16.gmra.mxu3 %v9150_v58  ;;  %2906 = vmatpush.bf16.msra.mxu0 %v10613_v35 }
 0x198   : > { %v12030_v21 = vpop.f32.mrf.mxu3  ;;  %v12032_v23 = vpop.f32.mrf.mxu0 }
 0x199   : > { %13854 = vst [vmem:[#allocation42_spill] sm:$0xff] %v12030_v21  ;;  %v1056_v21 = vld [vmem:[%s11589_s23 + $0x4] sm:$0xf] }
 0x19a   : > { %13855 = vst [vmem:[#allocation43_spill] sm:$0xff] %v12032_v23  ;;  %v8666_v23 = vrot.slane %v1076_v45, 9 }
 0x19b   : > { %v2349_v39 = vpop.f32.mrf.mxu2 }
 0x1a0   : > { %v12040_v58 = vpop.f32.mrf.mxu3  ;;  %v2146_v34 = vpop.f32.mrf.mxu0 }
 0x1a1   : > { %13857 = vst [vmem:[#allocation45_spill] sm:$0xff] %v12040_v58  ;;  %v2246_v20 = vadd.f32 %v11839_v38, %v2146_v34  ;;  %v1231_v58 = vrot.slane %v1229_v31, 4  ;;  %v10626_v38 = vld [vmem:[#allocation8 + $0xb0] sm:$0xff]  ;;  %v10642_v34 = vld [vmem:[#allocation3 + $0x88] sm:$0xf0] }
 0x1a2   : > { %3000 = vmatpush.bf16.msrb.mxu1 %v10626_v38  ;;  %v10624_v38 = vld [vmem:[#allocation8 + $0xa0] sm:$0xff] }
 0x1a3   : > { %v12043_v25 = vadd.f32 %v2344_v4, %v2246_v20  ;;  %2293 = vmatmul.bf16.gmra.mxu0 %v8726_v13  ;;  %v1230_v4 = vsel %vm11729_vm5, %v8666_v23, %v1229_v31  ;;  %v1233_v1 = vsel %vm11729_vm5, %v1231_v58, %v1232_v53  ;;  %v8737_v13 = vld [vmem:[#allocation3 + $0x80] sm:$0xf]  ;;  %v10596_v20 = vld [vmem:[#allocation3 + $0x170] sm:$0xf0]  ;;  %v12056_v37 = vpop.f32.mrf.mxu2 }
 0x1a4   : > { %1372 = vst [vmem:[#allocation3 + $0xb0] sm:$0xf] %v1230_v4  ;;  %v8738_v6 = vor.u32 %v10642_v34, %v8737_v13  ;;  %v432_v31 = vld [vmem:[%s11589_s23] sm:$0xf]  ;;  %v433_v53 = vld [vmem:[%s11589_s23 + $0x4] sm:$0xf] }
 0x1a5   : > { %2879 = vmatmul.bf16.gmra.mxu3 %v9162_v48  ;;  %1373 = vst [vmem:[#allocation3 + $0xbc] sm:$0xf] %v1233_v1  ;;  %v9173_v48 = vld [vmem:[#allocation3 + $0x168] sm:$0xf]  ;;  %v496_v4 = vshrl.u32 %v432_v31, 16  ;;  %v499_v1 = vshll.u32 %v432_v31, 16 }
 0x1a6   : > { %13860 = vst [vmem:[#allocation48_spill] sm:$0xff] %v12056_v37  ;;  %3001 = vmatpush.bf16.msrb.mxu1 %v10625_v19  ;;  %v9174_v58 = vor.u32 %v10596_v20, %v9173_v48  ;;  %v10612_v13 = vld [vmem:[#allocation8 + $0x40] sm:$0xff]  ;;  %v434_v34 = vld [vmem:[%s11589_s23 + $0x8] sm:$0x1]  ;;  %v509_v48 = vshrl.u32 %v433_v53, 16 }
 0x1a7   : > { %v498_v37 = vrot.slane %v496_v4, 4  ;;  %v501_v19 = vrot.slane %v499_v1, 5  ;;  %v10623_v20 = vld [vmem:[#allocation8 + $0x98] sm:$0xff]  ;;  %2907 = vmatpush.bf16.msra.mxu0 %v10612_v13  ;;  %v1055_v4 = vld [vmem:[%s11589_s23] sm:$0xe] }
 0x1a8   : > { %v12048_v15 = vpop.f32.mrf.mxu3  ;;  %v12050_v55 = vpop.f32.mrf.mxu0  ;;  %v511_v31 = vrot.slane %v509_v48, 4  ;;  %v1057_v1 = vld [vmem:[%s11589_s23 + $0x8] sm:$0x1] }
 0x1a9   : > { %13858 = vst [vmem:[#allocation46_spill] sm:$0xff] %v12048_v15 }
 0x1aa   : > { %13859 = vst [vmem:[#allocation47_spill] sm:$0xff] %v12050_v55  ;;  %v505_v55 = vshll.u32 %v433_v53, 16  ;;  %3002 = vmatpush.bf16.msrb.mxu1 %v10624_v38 }
 0x1ae   : > { %3003 = vmatpush.bf16.msrb.mxu1 %v10623_v20 }
 0x1b0   : > { %v12058_v45 = vpop.f32.mrf.mxu3  ;;  %v2151_v23 = vpop.f32.mrf.mxu0 }
 0x1b1   : > { %13861 = vst [vmem:[#allocation49_spill] sm:$0xff] %v12058_v45  ;;  %v2251_v35 = vadd.f32 %v11858_v18, %v2151_v23  ;;  %v507_v45 = vrot.slane %v505_v55, 5  ;;  %v515_v18 = vshll.u32 %v434_v34, 16  ;;  %v502_v23 = vor.u32 %v501_v19, %v498_v37 }
 0x1b2   : > { %v8659_v34 = vrot.slane %v1055_v4, 9  ;;  %v1183_v37 = vrot.slane %v1057_v1, 5  ;;  %3004 = vmatpush.bf16.msrb.mxu1 %v10622_v36  ;;  %v10599_v4 = vld [vmem:[#allocation3 + $0x188] sm:$0xf0] }
 0x1b3   : > { %v12063_v15 = vadd.f32 %v2349_v39, %v2251_v35  ;;  %2298 = vmatmul.bf16.gmra.mxu0 %v8738_v6  ;;  %v1180_v39 = vrot.slane %v1056_v21, 5  ;;  %v2354_v35 = vpop.f32.mrf.mxu2  ;;  %v503_v38 = vrot.slane %v502_v23, 4  ;;  %v512_v55 = vor.u32 %v511_v31, %v507_v45  ;;  %v8749_v21 = vld [vmem:[#allocation3 + $0x98] sm:$0xf]  ;;  %v9185_v23 = vld [vmem:[#allocation3 + $0x180] sm:$0xf] }
 0x1b4   : > { %v517_v53 = vrot.slane %v515_v18, 5  ;;  %v10645_v18 = vld [vmem:[#allocation3 + $0xa0] sm:$0xf0] }
 0x1b5   : > { %2884 = vmatmul.bf16.gmra.mxu3 %v9174_v58  ;;  %v1182_v13 = vrot.slane %v1180_v39, 4  ;;  %v508_v19 = vsel %vm11614_vm2, %v503_v38, %v507_v45  ;;  %v513_v48 = vrot.slane %v512_v55, 4  ;;  %v10621_v45 = vld [vmem:[#allocation8 + $0x88] sm:$0xff]  ;;  %v8750_v38 = vor.u32 %v10645_v18, %v8749_v21  ;;  %v8761_v18 = vld [vmem:[#allocation3 + $0xb0] sm:$0xf] }
 0x1b6   : > { %1015 = vst [vmem:[#allocation3 + $0x4] sm:$0xf] %v508_v19  ;;  %3005 = vmatpush.bf16.msrb.mxu1 %v10621_v45 }
 0x1b7   : > { %v1184_v20 = vsel %vm11729_vm5, %v1182_v13, %v1183_v37  ;;  %v518_v31 = vsel %vm11614_vm2, %v513_v48, %v517_v53  ;;  %v10783_v53 = vld [vmem:[#allocation8 + $0x238] sm:$0xff] }
 0x1b8   : > { %v2845_v5 = vpop.f32.mrf.mxu3  ;;  %v12070_v58 = vpop.f32.mrf.mxu0  ;;  %1016 = vst [vmem:[#allocation3 + $0x10] sm:$0xf] %v518_v31  ;;  %3850 = vmatpush.bf16.msrb.mxu0 %v10783_v53  ;;  %v10602_v31 = vld [vmem:[#allocation3 + $0x1a0] sm:$0xf0] }
 0x1b9   : > { %v12068_v6 = vadd.f32 %v2845_v5, %v11934_v59  ;;  %v10775_v59 = vld [vmem:[#allocation8 + $0x1f8] sm:$0xff]  ;;  %v1181_v5 = vsel %vm11729_vm5, %v8659_v34, %v1180_v39  ;;  %1359 = vst [vmem:[#allocation3 + $0x14] sm:$0xf] %v1184_v20  ;;  %v9186_v39 = vor.u32 %v10599_v4, %v9185_v23  ;;  %v10620_v34 = vld [vmem:[#allocation8 + $0x80] sm:$0xff]  ;;  %v10648_v23 = vld [vmem:[#allocation3 + $0xb8] sm:$0xf0] }
 0x1ba   : > { %1358 = vst [vmem:[#allocation3 + $0x8] sm:$0xf] %v1181_v5  ;;  %3751 = vmatpush.bf16.msra.mxu3 %v10775_v59  ;;  %3006 = vmatpush.bf16.msrb.mxu1 %v10620_v34  ;;  %v8762_v45 = vor.u32 %v10648_v23, %v8761_v18  ;;  %v10555_v34 = vld [vmem:[#allocation3 + $0x28] sm:$0xf0] }
 0x1bb   : > { %v12085_v13 = vpop.f32.mrf.mxu2  ;;  %v10767_v18 = vld [vmem:[#allocation8 + $0x1b8] sm:$0xff] }
 0x1bc   : > { %3652 = vmatpush.bf16.msrb.mxu2 %v10767_v18 }
 0x1bd   : > { %v10550_v23 = vld [vmem:[#allocation3 + $0x4] sm:$0xf] }
 0x1c0   : > { %v12082_v36 = vpop.f32.mrf.mxu3  ;;  %v2156_v55 = vpop.f32.mrf.mxu0  ;;  %v10552_v48 = vld [vmem:[#allocation3 + $0x10] sm:$0xf0] }
 0x1c1   : > { %v2256_v1 = vadd.f32 %v11877_v47, %v2156_v55  ;;  %v9001_v19 = vld [vmem:[#allocation3 + $0x8] sm:$0xf] }
 0x1c2   : > { %v9002_v59 = vor.u32 %v10552_v48, %v9001_v19 }
 0x1c3   : > { %v12087_v37 = vadd.f32 %v2354_v35, %v2256_v1  ;;  %2303 = vmatmul.bf16.gmra.mxu0 %v8750_v38  ;;  %v2359_v47 = vpop.f32.mrf.mxu2  ;;  %v9197_v35 = vld [vmem:[#allocation3 + $0x198] sm:$0xf] }
 0x1c4   : > { %3007 = vmatmul.bf16.vlgmr.msrb.gmra.mxu1 %v9002_v59  ;;  %v9198_v55 = vor.u32 %v10602_v31, %v9197_v35 }
 0x1c5   : > { %2889 = vmatmul.bf16.gmra.mxu3 %v9186_v39 }
 0x1c8   : > { %v2850_v5 = vpop.f32.mrf.mxu3  ;;  %v12092_v20 = vpop.f32.mrf.mxu0 }
 0x1c9   : > { %v12090_v21 = vadd.f32 %v2850_v5, %v11953_v2  ;;  %v9013_v2 = vld [vmem:[#allocation3 + $0x20] sm:$0xf] }
 0x1ca   : > { %v9014_v53 = vor.u32 %v10555_v34, %v9013_v2  ;;  %v10558_v2 = vld [vmem:[#allocation3 + $0x40] sm:$0xf0] }
 0x1cb   : > { %v12099_v19 = vpop.f32.mrf.mxu2 }
 0x1cc   : > { %13862 = vst [vmem:[#allocation50_spill] sm:$0xff] %v12099_v19 }
 0x1d0   : > { %v12094_v4 = vpop.f32.mrf.mxu3  ;;  %v2161_v38 = vpop.f32.mrf.mxu0 }
 0x1d1   : > { %v2261_v39 = vadd.f32 %v11898_v24, %v2161_v38  ;;  %v8995_v24 = vld [vmem:[#allocation3 + $0xc] sm:$0xf0]  ;;  %v10774_v38 = vld [vmem:[#allocation8 + $0x1f0] sm:$0xff] }
 0x1d2   : > { %v8998_v35 = vor.u32 %v10550_v23, %v8995_v24  ;;  %3752 = vmatpush.bf16.msra.mxu3 %v10774_v38  ;;  %v10782_v23 = vld [vmem:[#allocation8 + $0x230] sm:$0xff] }
 0x1d3   : > { %v12097_v1 = vadd.f32 %v2359_v47, %v2261_v39  ;;  %2308 = vmatmul.bf16.gmra.mxu0 %v8762_v45  ;;  %v2364_v45 = vpop.f32.mrf.mxu2  ;;  %v10766_v24 = vld [vmem:[#allocation8 + $0x1b0] sm:$0xff] }
 0x1d4   : > { %3012 = vmatmul.bf16.gmra.mxu1 %v9014_v53  ;;  %3851 = vmatpush.bf16.msrb.mxu0 %v10782_v23 }
 0x1d5   : > { %2894 = vmatmul.bf16.gmra.mxu3 %v9198_v55  ;;  %3653 = vmatpush.bf16.msrb.mxu2 %v10766_v24 }
 0x1d8   : > { %v2855_v48 = vpop.f32.mrf.mxu3  ;;  %v12104_v5 = vpop.f32.mrf.mxu0 }
 0x1d9   : > { %v12102_v59 = vadd.f32 %v2855_v48, %v11972_v46  ;;  %13863 = vst [vmem:[#allocation51_spill] sm:$0xff] %v12104_v5  ;;  %v9025_v46 = vld [vmem:[#allocation3 + $0x38] sm:$0xf]  ;;  %v10770_v5 = vld [vmem:[#allocation8 + $0x1d0] sm:$0xff] }
 0x1da   : > { %v9026_v34 = vor.u32 %v10558_v2, %v9025_v46  ;;  %v2183_v2 = vadd.f32 %v11807_v42, %v11805_v41  ;;  %v10773_v41 = vld [vmem:[#allocation8 + $0x1e8] sm:$0xff]  ;;  %v9049_v42 = vld [vmem:[#allocation3 + $0x68] sm:$0xf] }
 0x1db   : > { %3753 = vmatpush.bf16.msra.mxu3 %v10773_v41 }
 0x1e0   : > { %v12106_v47 = vpop.f32.mrf.mxu3  ;;  %v2166_v31 = vpop.f32.mrf.mxu0 }
 0x1e1   : > { %v2266_v55 = vadd.f32 %v11919_v14, %v2166_v31  ;;  %v9007_v14 = vld [vmem:[#allocation3 + $0x24] sm:$0xf0] }
 0x1e3   : > { %v12109_v39 = vadd.f32 %v2364_v45, %v2266_v55  ;;  %2908 = vmatmul.bf16.vlgmr.msra.gmra.mxu0 %v8998_v35  ;;  %v9010_v45 = vor.u32 %v10553_v51, %v9007_v14  ;;  %v9037_v55 = vld [vmem:[#allocation3 + $0x50] sm:$0xf]  ;;  %v10556_v51 = vld [vmem:[#allocation3 + $0x34] sm:$0xf]  ;;  %v9019_v14 = vld [vmem:[#allocation3 + $0x3c] sm:$0xf0] }
 0x1e4   : > { %3017 = vmatmul.bf16.gmra.mxu1 %v9026_v34 }
 0x1e8   : > { %v2860_v53 = vpop.f32.mrf.mxu3  ;;  %v12114_v18 = vpop.f32.mrf.mxu0 }
 0x1e9   : > { %v12112_v48 = vadd.f32 %v2860_v53, %v11991_v0  ;;  %13864 = vst [vmem:[#allocation52_spill] sm:$0xff] %v12114_v18  ;;  %v10561_v0 = vld [vmem:[#allocation3 + $0x58] sm:$0xf0] }
 0x1ea   : > { %v9038_v46 = vor.u32 %v10561_v0, %v9037_v55  ;;  %v10765_v55 = vld [vmem:[#allocation8 + $0x1a8] sm:$0xff]  ;;  %v10564_v0 = vld [vmem:[#allocation3 + $0x70] sm:$0xf0] }
 0x1eb   : > { %3654 = vmatpush.bf16.msrb.mxu2 %v10765_v55 }
 0x1f0   : > { %v12116_v31 = vpop.f32.mrf.mxu3  ;;  %v2279_v35 = vpop.f32.mrf.mxu0 }
 0x1f1   : > { %v12119_v38 = vadd.f32 %v2279_v35, %v11795_v30  ;;  %v9022_v30 = vor.u32 %v10556_v51, %v9019_v14  ;;  %v10559_v14 = vld [vmem:[#allocation3 + $0x4c] sm:$0xf] }
 0x1f3   : > { %2913 = vmatmul.bf16.gmra.mxu0 %v9010_v45 }
 0x1f4   : > { %3022 = vmatmul.bf16.gmra.mxu1 %v9038_v46  ;;  %v2188_v46 = vadd.f32 %v11826_v9, %v11824_v8  ;;  %v9061_v8 = vld [vmem:[#allocation3 + $0x80] sm:$0xf]  ;;  %v10567_v9 = vld [vmem:[#allocation3 + $0x88] sm:$0xf0] }
 0x1f8   : > { %v2865_v34 = vpop.f32.mrf.mxu3  ;;  %v2281_v23 = vpop.f32.mrf.mxu0 }
 0x1f9   : > { %v12124_v53 = vadd.f32 %v2865_v34, %v12007_v61  ;;  %v12126_v24 = vadd.f32 %v2281_v23, %v2183_v2  ;;  %v9050_v61 = vor.u32 %v10564_v0, %v9049_v42  ;;  %v2193_v0 = vadd.f32 %v11845_v44, %v11843_v43  ;;  %v9073_v43 = vld [vmem:[#allocation3 + $0x98] sm:$0xf]  ;;  %v10570_v44 = vld [vmem:[#allocation3 + $0xa0] sm:$0xf0] }
 0x200   : > { %v12128_v33 = vpop.f32.mrf.mxu3  ;;  %v2284_v45 = vpop.f32.mrf.mxu0 }
 0x201   : > { %v12131_v35 = vadd.f32 %v2284_v45, %v11814_v62  ;;  %v10781_v62 = vld [vmem:[#allocation8 + $0x228] sm:$0xff] }
 0x202   : > { %3852 = vmatpush.bf16.msrb.mxu0 %v10781_v62  ;;  %v10764_v62 = vld [vmem:[#allocation8 + $0x1a0] sm:$0xff] }
 0x203   : > { %2918 = vmatmul.bf16.gmra.mxu0 %v9022_v30  ;;  %v9031_v30 = vld [vmem:[#allocation3 + $0x54] sm:$0xf0]  ;;  %3655 = vmatpush.bf16.msrb.mxu2 %v10764_v62 }
 0x204   : > { %3027 = vmatmul.bf16.gmra.mxu1 %v9050_v61  ;;  %v9034_v55 = vor.u32 %v10559_v14, %v9031_v30  ;;  %v10562_v14 = vld [vmem:[#allocation3 + $0x64] sm:$0xf] }
 0x208   : > { %v2870_v2 = vpop.f32.mrf.mxu3  ;;  %v2286_v23 = vpop.f32.mrf.mxu0 }
 0x209   : > { %v12136_v34 = vadd.f32 %v2870_v2, %v12025_v40  ;;  %v12138_v51 = vadd.f32 %v2286_v23, %v2188_v46  ;;  %v9062_v40 = vor.u32 %v10567_v9, %v9061_v8  ;;  %v2198_v9 = vadd.f32 %v11864_v12, %v11862_v11  ;;  %v9085_v12 = vld [vmem:[#allocation3 + $0xb0] sm:$0xf] }
 0x210   : > { %v12140_v45 = vpop.f32.mrf.mxu3  ;;  %v2289_v41 = vpop.f32.mrf.mxu0 }
 0x211   : > { %v12143_v42 = vadd.f32 %v2289_v41, %v11833_v28  ;;  %v9043_v28 = vld [vmem:[#allocation3 + $0x6c] sm:$0xf0] }
 0x213   : > { %2923 = vmatmul.bf16.gmra.mxu0 %v9034_v55  ;;  %v9046_v55 = vor.u32 %v10562_v14, %v9043_v28  ;;  %v10565_v14 = vld [vmem:[#allocation3 + $0x7c] sm:$0xf] }
 0x214   : > { %3032 = vmatmul.bf16.gmra.mxu1 %v9062_v40 }
 0x218   : > { %v2875_v61 = vpop.f32.mrf.mxu3  ;;  %v2291_v2 = vpop.f32.mrf.mxu0 }
 0x219   : > { %v12148_v46 = vadd.f32 %v2875_v61, %v12043_v25  ;;  %v12150_v23 = vadd.f32 %v2291_v2, %v2193_v0  ;;  %v9074_v25 = vor.u32 %v10570_v44, %v9073_v43  ;;  %v10772_v2 = vld [vmem:[#allocation8 + $0x1e0] sm:$0xff]  ;;  %v10763_v43 = vld [vmem:[#allocation8 + $0x198] sm:$0xff] }
 0x21a   : > { %3754 = vmatpush.bf16.msra.mxu3 %v10772_v2  ;;  %v10780_v44 = vld [vmem:[#allocation8 + $0x220] sm:$0xff]  ;;  %3656 = vmatpush.bf16.msrb.mxu2 %v10763_v43 }
 0x21b   : > { %3853 = vmatpush.bf16.msrb.mxu0 %v10780_v44 }
 0x220   : > { %v12152_v30 = vpop.f32.mrf.mxu3  ;;  %v2294_v41 = vpop.f32.mrf.mxu0 }
 0x221   : > { %v12155_v8 = vadd.f32 %v2294_v41, %v11852_v63  ;;  %v9055_v63 = vld [vmem:[#allocation3 + $0x84] sm:$0xf0] }
 0x223   : > { %2928 = vmatmul.bf16.gmra.mxu0 %v9046_v55  ;;  %v9058_v55 = vor.u32 %v10565_v14, %v9055_v63  ;;  %v10568_v63 = vld [vmem:[#allocation3 + $0x94] sm:$0xf] }
 0x224   : > { %3037 = vmatmul.bf16.gmra.mxu1 %v9074_v25 }
 0x228   : > { %v2880_v40 = vpop.f32.mrf.mxu3  ;;  %v2296_v61 = vpop.f32.mrf.mxu0 }
 0x229   : > { %v12160_v0 = vadd.f32 %v2880_v40, %v12063_v15  ;;  %v12162_v62 = vadd.f32 %v2296_v61, %v2198_v9  ;;  %v10573_v15 = vld [vmem:[#allocation3 + $0xb8] sm:$0xf0]  ;;  %v2203_v9 = vadd.f32 %v11883_v50, %v11881_v49  ;;  %v9097_v49 = vld [vmem:[#allocation3 + $0xc8] sm:$0xf]  ;;  %v10576_v50 = vld [vmem:[#allocation3 + $0xd0] sm:$0xf0] }
 0x22a   : > { %v9086_v25 = vor.u32 %v10573_v15, %v9085_v12  ;;  %v9098_v15 = vor.u32 %v10576_v50, %v9097_v49 }
 0x230   : > { %v12164_v28 = vpop.f32.mrf.mxu3  ;;  %v2299_v41 = vpop.f32.mrf.mxu0 }
 0x231   : > { %v12167_v11 = vadd.f32 %v2299_v41, %v11871_v32  ;;  %v9067_v32 = vld [vmem:[#allocation3 + $0x9c] sm:$0xf0]  ;;  %v12176_v41 = vpop.f32.mrf.mxu1 }
 0x233   : > { %2933 = vmatmul.bf16.gmra.mxu0 %v9058_v55  ;;  %v9070_v55 = vor.u32 %v10568_v63, %v9067_v32  ;;  %v10571_v32 = vld [vmem:[#allocation3 + $0xac] sm:$0xf] }
 0x234   : > { %3042 = vmatmul.bf16.gmra.mxu1 %v9086_v25  ;;  %v2208_v25 = vadd.f32 %v11904_v27, %v11902_v26  ;;  %v10779_v26 = vld [vmem:[#allocation8 + $0x218] sm:$0xff]  ;;  %v9109_v27 = vld [vmem:[#allocation3 + $0xe0] sm:$0xf] }
 0x235   : > { %3854 = vmatpush.bf16.msrb.mxu0 %v10779_v26 }
 0x238   : > { %v2885_v40 = vpop.f32.mrf.mxu3  ;;  %v2301_v2 = vpop.f32.mrf.mxu0 }
 0x239   : > { %v12172_v61 = vadd.f32 %v2885_v40, %v12087_v37  ;;  %v12174_v14 = vadd.f32 %v2301_v2, %v2203_v9  ;;  %v10762_v37 = vld [vmem:[#allocation8 + $0x190] sm:$0xff] }
 0x23a   : > { %3657 = vmatpush.bf16.msrb.mxu2 %v10762_v37 }
 0x240   : > { %v12178_v43 = vpop.f32.mrf.mxu3  ;;  %v2304_v44 = vpop.f32.mrf.mxu0 }
 0x241   : > { %v12181_v12 = vadd.f32 %v2304_v44, %v11890_v10  ;;  %v3008_v40 = vpop.f32.mrf.mxu1  ;;  %v10771_v10 = vld [vmem:[#allocation8 + $0x1d8] sm:$0xff] }
 0x242   : > { %3755 = vmatpush.bf16.msra.mxu3 %v10771_v10 }
 0x243   : > { %2938 = vmatmul.bf16.gmra.mxu0 %v9070_v55  ;;  %v9079_v55 = vld [vmem:[#allocation3 + $0xb4] sm:$0xf0] }
 0x244   : > { %3047 = vmatmul.bf16.gmra.mxu1 %v9098_v15  ;;  %v9082_v49 = vor.u32 %v10571_v32, %v9079_v55  ;;  %v10574_v55 = vld [vmem:[#allocation3 + $0xc4] sm:$0xf] }
 0x246   : > { %3756 = vmatpush.bf16.msra.mxu3 %v10770_v5  ;;  %v2818_v5 = vadd.f32 %v11970_v3, %v12138_v51  ;;  %v2821_v3 = vadd.f32 %v11977_v54, %v12143_v42  ;;  %v10583_v54 = vld [vmem:[#allocation3 + $0x10c] sm:$0xf] }
 0x248   : > { %v2890_v9 = vpop.f32.mrf.mxu3  ;;  %v2306_v18 = vpop.f32.mrf.mxu0 }
 0x249   : > { %v12186_v2 = vadd.f32 %v2890_v9, %v12097_v1  ;;  %v12188_v63 = vadd.f32 %v2306_v18, %v2208_v25  ;;  %v3010_v44 = vpop.f32.mrf.mxu1  ;;  %v10579_v1 = vld [vmem:[#allocation3 + $0xe8] sm:$0xf0]  ;;  %v2213_v18 = vadd.f32 %v11925_v17, %v11923_v16  ;;  %v9121_v17 = vld [vmem:[#allocation3 + $0xf8] sm:$0xf] }
 0x24a   : > { %v9110_v9 = vor.u32 %v10579_v1, %v9109_v27  ;;  %v2811_v27 = vadd.f32 %v11939_v7, %v12119_v38  ;;  %v10577_v7 = vld [vmem:[#allocation3 + $0xdc] sm:$0xf]  ;;  %v9103_v38 = vld [vmem:[#allocation3 + $0xe4] sm:$0xf0] }
 0x24b   : > { %13865 = vst [vmem:[#allocation53_spill] sm:$0xff] %v12186_v2 }
 0x250   : > { %v12190_v19 = vpop.f32.mrf.mxu3  ;;  %v2309_v50 = vpop.f32.mrf.mxu0 }
 0x251   : > { %13866 = vst [vmem:[#allocation54_spill] sm:$0xff] %v12190_v19  ;;  %v12193_v37 = vadd.f32 %v2309_v50, %v11913_v60  ;;  %v3013_v15 = vpop.f32.mrf.mxu1  ;;  %v10761_v60 = vld [vmem:[#allocation8 + $0x188] sm:$0xff] }
 0x252   : > { %3658 = vmatpush.bf16.msrb.mxu2 %v10761_v60 }
 0x253   : > { %2943 = vmatmul.bf16.gmra.mxu0 %v9082_v49  ;;  %v9091_v49 = vld [vmem:[#allocation3 + $0xcc] sm:$0xf0] }
 0x254   : > { %3052 = vmatmul.bf16.gmra.mxu1 %v9110_v9  ;;  %v9094_v26 = vor.u32 %v10574_v55, %v9091_v49 }
 0x258   : > { %v2895_v25 = vpop.f32.mrf.mxu3  ;;  %v2311_v19 = vpop.f32.mrf.mxu0 }
 0x259   : > { %v12198_v10 = vadd.f32 %v2895_v25, %v12109_v39  ;;  %v12200_v32 = vadd.f32 %v2311_v19, %v2213_v18  ;;  %v3015_v50 = vpop.f32.mrf.mxu1  ;;  %v10582_v39 = vld [vmem:[#allocation3 + $0x100] sm:$0xf0]  ;;  %v2813_v19 = vadd.f32 %v11951_v52, %v12126_v24  ;;  %v9133_v52 = vld [vmem:[#allocation3 + $0x110] sm:$0xf]  ;;  %v10585_v24 = vld [vmem:[#allocation3 + $0x118] sm:$0xf0] }
 0x25a   : > { %v9122_v25 = vor.u32 %v10582_v39, %v9121_v17  ;;  %v10769_v39 = vld [vmem:[#allocation8 + $0x1c8] sm:$0xff] }
 0x25b   : > { %13867 = vst [vmem:[#allocation55_spill] sm:$0xff] %v12198_v10  ;;  %3757 = vmatpush.bf16.msra.mxu3 %v10769_v39 }
 0x260   : > { %v2909_v1 = vpop.f32.mrf.mxu0 }
 0x261   : > { %v2910_v2 = vadd.f32 %v2909_v1, %v2811_v27  ;;  %v3018_v9 = vpop.f32.mrf.mxu1 }
 0x263   : > { %v12204_v16 = vadd.f32 %v3008_v40, %v2910_v2  ;;  %2948 = vmatmul.bf16.gmra.mxu0 %v9094_v26  ;;  %v2816_v40 = vadd.f32 %v11958_v29, %v12131_v35  ;;  %v9106_v2 = vor.u32 %v10577_v7, %v9103_v38  ;;  %v10760_v26 = vld [vmem:[#allocation8 + $0x180] sm:$0xff]  ;;  %v10707_v7 = vld [vmem:[#allocation3 + $0x38] sm:$0xf0]  ;;  %v9115_v38 = vld [vmem:[#allocation3 + $0xfc] sm:$0xf0] }
 0x264   : > { %3057 = vmatmul.bf16.gmra.mxu1 %v9122_v25  ;;  %3659 = vmatpush.bf16.msrb.mxu2 %v10760_v26  ;;  %v10580_v35 = vld [vmem:[#allocation3 + $0xf4] sm:$0xf] }
 0x265   : > { %v9118_v51 = vor.u32 %v10580_v35, %v9115_v38  ;;  %v10911_v35 = vld [vmem:[#allocation10 + $0xf8] sm:$0xff]  ;;  %v9127_v38 = vld [vmem:[#allocation3 + $0x114] sm:$0xf0] }
 0x266   : > { %6312 = vmatpush.bf16.msra.mxu1 %v10911_v35 }
 0x268   : > { %v2911_v18 = vpop.f32.mrf.mxu0 }
 0x269   : > { %v2912_v10 = vadd.f32 %v2911_v18, %v2813_v19  ;;  %v3020_v55 = vpop.f32.mrf.mxu1  ;;  %v9305_v18 = vld [vmem:[#allocation3 + $0x30] sm:$0xf] }
 0x26b   : > { %v12208_v60 = vadd.f32 %v3010_v44, %v2912_v10  ;;  %v10778_v44 = vld [vmem:[#allocation8 + $0x210] sm:$0xff]  ;;  %v9134_v10 = vor.u32 %v10585_v24, %v9133_v52 }
 0x26c   : > { %3855 = vmatpush.bf16.msrb.mxu0 %v10778_v44  ;;  %v9145_v44 = vld [vmem:[#allocation3 + $0x128] sm:$0xf] }
 0x270   : > { %v2914_v49 = vpop.f32.mrf.mxu0 }
 0x271   : > { %v2915_v27 = vadd.f32 %v2914_v49, %v2816_v40  ;;  %v3023_v17 = vpop.f32.mrf.mxu1  ;;  %v9306_v40 = vor.u32 %v10707_v7, %v9305_v18  ;;  %v9307_v49 = vld [vmem:[#allocation3 + $0x3c] sm:$0xf0]  ;;  %v9317_v7 = vld [vmem:[#allocation3 + $0x48] sm:$0xf] }
 0x273   : > { %v12212_v1 = vadd.f32 %v3013_v15, %v2915_v27  ;;  %2953 = vmatmul.bf16.gmra.mxu0 %v9106_v2  ;;  %v10768_v15 = vld [vmem:[#allocation8 + $0x1c0] sm:$0xff]  ;;  %3660 = vmatmul.bf16.vlgmr.msrb.gmra.mxu2 %v9306_v40 }
 0x274   : > { %3062 = vmatmul.bf16.gmra.mxu1 %v9134_v10  ;;  %v10706_v2 = vld [vmem:[#allocation3 + $0x34] sm:$0xf]  ;;  %3758 = vmatpush.bf16.msra.mxu3 %v10768_v15 }
 0x275   : > { %v9310_v26 = vor.u32 %v10706_v2, %v9307_v49  ;;  %v10588_v10 = vld [vmem:[#allocation3 + $0x130] sm:$0xf0]  ;;  %v10709_v2 = vld [vmem:[#allocation3 + $0x4c] sm:$0xf]  ;;  %v9319_v49 = vld [vmem:[#allocation3 + $0x54] sm:$0xf0] }
 0x276   : > { %v9146_v39 = vor.u32 %v10588_v10, %v9145_v44  ;;  %v10591_v44 = vld [vmem:[#allocation3 + $0x148] sm:$0xf0] }
 0x277   : > { %3759 = vmatmul.bf16.vlgmr.msra.gmra.mxu3 %v9310_v26 }
 0x278   : > { %v2916_v25 = vpop.f32.mrf.mxu0 }
 0x279   : > { %v2917_v29 = vadd.f32 %v2916_v25, %v2818_v5  ;;  %v3025_v27 = vpop.f32.mrf.mxu1  ;;  %v10919_v5 = vld [vmem:[#allocation10 + $0x138] sm:$0xff] }
 0x27a   : > { %6401 = vmatpush.bf16.msra.mxu2 %v10919_v5 }
 0x27b   : > { %v12216_v19 = vadd.f32 %v3015_v50, %v2917_v29  ;;  %v2823_v29 = vadd.f32 %v11987_v22, %v12150_v23  ;;  %v2826_v22 = vadd.f32 %v11996_v56, %v12155_v8  ;;  %v9130_v23 = vor.u32 %v10583_v54, %v9127_v38  ;;  %v10777_v56 = vld [vmem:[#allocation8 + $0x208] sm:$0xff]  ;;  %v9329_v8 = vld [vmem:[#allocation3 + $0x60] sm:$0xf]  ;;  %v10713_v54 = vld [vmem:[#allocation3 + $0x68] sm:$0xf0] }
 0x27c   : > { %v9331_v38 = vld [vmem:[#allocation3 + $0x6c] sm:$0xf0]  ;;  %3856 = vmatpush.bf16.msrb.mxu0 %v10777_v56  ;;  %v9151_v56 = vld [vmem:[#allocation3 + $0x144] sm:$0xf0] }
 0x280   : > { %v2919_v52 = vpop.f32.mrf.mxu0 }
 0x281   : > { %v2920_v24 = vadd.f32 %v2919_v52, %v2821_v3  ;;  %v3028_v25 = vpop.f32.mrf.mxu1  ;;  %v9322_v3 = vor.u32 %v10709_v2, %v9319_v49  ;;  %v13868_v49 = vld [vmem:[#allocation39_spill] sm:$0xff] }
 0x283   : > { %v12220_v50 = vadd.f32 %v3018_v9, %v2920_v24  ;;  %2958 = vmatmul.bf16.gmra.mxu0 %v9118_v51  ;;  %v10710_v9 = vld [vmem:[#allocation3 + $0x50] sm:$0xf0]  ;;  %v9157_v24 = vld [vmem:[#allocation3 + $0x140] sm:$0xf] }
 0x284   : > { %3067 = vmatmul.bf16.gmra.mxu1 %v9146_v39  ;;  %v9318_v40 = vor.u32 %v10710_v9, %v9317_v7  ;;  %v9158_v10 = vor.u32 %v10591_v44, %v9157_v24  ;;  %v2828_v39 = vadd.f32 %v12004_v57, %v12162_v62  ;;  %v9139_v7 = vld [vmem:[#allocation3 + $0x12c] sm:$0xf0]  ;;  %v10712_v9 = vld [vmem:[#allocation3 + $0x64] sm:$0xf]  ;;  %v2831_v57 = vadd.f32 %v13868_v49, %v12167_v11 }
 0x285   : > { %v9334_v2 = vor.u32 %v10712_v9, %v9331_v38  ;;  %v13869_v44 = vld [vmem:[#allocation41_spill] sm:$0xff]  ;;  %v10910_v9 = vld [vmem:[#allocation10 + $0xf0] sm:$0xff] }
 0x286   : > { %3665 = vmatmul.bf16.gmra.mxu2 %v9318_v40  ;;  %6313 = vmatpush.bf16.msra.mxu1 %v10910_v9 }
 0x287   : > { %3764 = vmatmul.bf16.gmra.mxu3 %v9322_v3 }
 0x288   : > { %v2921_v15 = vpop.f32.mrf.mxu0 }
 0x289   : > { %v2922_v18 = vadd.f32 %v2921_v15, %v2823_v29  ;;  %v3030_v26 = vpop.f32.mrf.mxu1 }
 0x28b   : > { %v12224_v42 = vadd.f32 %v3020_v55, %v2922_v18  ;;  %v10586_v18 = vld [vmem:[#allocation3 + $0x124] sm:$0xf] }
 0x28c   : > { %v9142_v62 = vor.u32 %v10586_v18, %v9139_v7  ;;  %v10918_v18 = vld [vmem:[#allocation10 + $0x130] sm:$0xff]  ;;  %v10715_v7 = vld [vmem:[#allocation3 + $0x7c] sm:$0xf] }
 0x28d   : > { %6402 = vmatpush.bf16.msra.mxu2 %v10918_v18  ;;  %v10592_v18 = vld [vmem:[#allocation3 + $0x154] sm:$0xf] }
 0x290   : > { %v2924_v51 = vpop.f32.mrf.mxu0 }
 0x291   : > { %v2925_v52 = vadd.f32 %v2924_v51, %v2826_v22  ;;  %v3033_v5 = vpop.f32.mrf.mxu1  ;;  %v10594_v51 = vld [vmem:[#allocation3 + $0x160] sm:$0xf0] }
 0x293   : > { %v12228_v55 = vadd.f32 %v3023_v17, %v2925_v52  ;;  %2963 = vmatmul.bf16.gmra.mxu0 %v9130_v23  ;;  %v9330_v17 = vor.u32 %v10713_v54, %v9329_v8  ;;  %v9169_v23 = vld [vmem:[#allocation3 + $0x158] sm:$0xf]  ;;  %v10716_v54 = vld [vmem:[#allocation3 + $0x80] sm:$0xf0] }
 0x294   : > { %3072 = vmatmul.bf16.gmra.mxu1 %v9158_v10  ;;  %v9170_v52 = vor.u32 %v10594_v51, %v9169_v23  ;;  %v2833_v10 = vadd.f32 %v13869_v44, %v12174_v14  ;;  %v9341_v8 = vld [vmem:[#allocation3 + $0x78] sm:$0xf]  ;;  %v10597_v23 = vld [vmem:[#allocation3 + $0x178] sm:$0xf0]  ;;  %v13871_v44 = vld [vmem:[#allocation45_spill] sm:$0xff] }
 0x295   : > { %v13870_v14 = vld [vmem:[#allocation42_spill] sm:$0xff] }
 0x296   : > { %3670 = vmatmul.bf16.gmra.mxu2 %v9330_v17  ;;  %v9343_v17 = vld [vmem:[#allocation3 + $0x84] sm:$0xf0]  ;;  %v2836_v49 = vadd.f32 %v13870_v14, %v12181_v12  ;;  %v9353_v12 = vld [vmem:[#allocation3 + $0x90] sm:$0xf] }
 0x297   : > { %3769 = vmatmul.bf16.gmra.mxu3 %v9334_v2  ;;  %v9346_v2 = vor.u32 %v10715_v7, %v9343_v17  ;;  %v10776_v7 = vld [vmem:[#allocation8 + $0x200] sm:$0xff] }
 0x298   : > { %v2926_v29 = vpop.f32.mrf.mxu0  ;;  %3857 = vmatpush.bf16.msrb.mxu0 %v10776_v7 }
 0x299   : > { %v2927_v15 = vadd.f32 %v2926_v29, %v2828_v39  ;;  %v3035_v40 = vpop.f32.mrf.mxu1 }
 0x29b   : > { %v12232_v35 = vadd.f32 %v3025_v27, %v2927_v15  ;;  %v10589_v15 = vld [vmem:[#allocation3 + $0x13c] sm:$0xf] }
 0x2a0   : > { %v2929_v3 = vpop.f32.mrf.mxu0 }
 0x2a1   : > { %v2930_v22 = vadd.f32 %v2929_v3, %v2831_v57  ;;  %v3038_v24 = vpop.f32.mrf.mxu1  ;;  %v9154_v57 = vor.u32 %v10589_v15, %v9151_v56  ;;  %v10719_v15 = vld [vmem:[#allocation3 + $0x98] sm:$0xf0]  ;;  %v10718_v56 = vld [vmem:[#allocation3 + $0x94] sm:$0xf] }
 0x2a3   : > { %v12236_v27 = vadd.f32 %v3028_v25, %v2930_v22  ;;  %2968 = vmatmul.bf16.gmra.mxu0 %v9142_v62  ;;  %v9342_v25 = vor.u32 %v10716_v54, %v9341_v8  ;;  %v9181_v22 = vld [vmem:[#allocation3 + $0x170] sm:$0xf]  ;;  %v9163_v54 = vld [vmem:[#allocation3 + $0x15c] sm:$0xf0] }
 0x2a4   : > { %3077 = vmatmul.bf16.gmra.mxu1 %v9170_v52  ;;  %v9182_v51 = vor.u32 %v10597_v23, %v9181_v22  ;;  %v9166_v14 = vor.u32 %v10592_v18, %v9163_v54  ;;  %v10722_v18 = vld [vmem:[#allocation3 + $0xb0] sm:$0xf0]  ;;  %v10917_v54 = vld [vmem:[#allocation10 + $0x128] sm:$0xff] }
 0x2a5   : > { %6403 = vmatpush.bf16.msra.mxu2 %v10917_v54  ;;  %v9379_v54 = vld [vmem:[#allocation3 + $0xcc] sm:$0xf0] }
 0x2a6   : > { %3675 = vmatmul.bf16.gmra.mxu2 %v9342_v25  ;;  %v9355_v25 = vld [vmem:[#allocation3 + $0x9c] sm:$0xf0] }
 0x2a7   : > { %3774 = vmatmul.bf16.gmra.mxu3 %v9346_v2  ;;  %v9358_v9 = vor.u32 %v10718_v56, %v9355_v25 }
 0x2a8   : > { %v2931_v39 = vpop.f32.mrf.mxu0 }
 0x2a9   : > { %v2932_v29 = vadd.f32 %v2931_v39, %v2833_v10  ;;  %v12242_v38 = vpop.f32.mrf.mxu1  ;;  %v2838_v10 = vadd.f32 %v13871_v44, %v12188_v63  ;;  %v13872_v63 = vld [vmem:[#allocation46_spill] sm:$0xff] }
 0x2aa   : > { %v2841_v2 = vadd.f32 %v13872_v63, %v12193_v37  ;;  %v9365_v37 = vld [vmem:[#allocation3 + $0xa8] sm:$0xf]  ;;  %v13876_v63 = vld [vmem:[#allocation29_spill] sm:$0xff] }
 0x2ab   : > { %v12240_v11 = vadd.f32 %v3030_v26, %v2932_v29  ;;  %v9366_v56 = vor.u32 %v10722_v18, %v9365_v37 }
 0x2b0   : > { %v2934_v62 = vpop.f32.mrf.mxu0 }
 0x2b1   : > { %v2935_v26 = vadd.f32 %v2934_v62, %v2836_v49  ;;  %v3043_v52 = vpop.f32.mrf.mxu1  ;;  %v9193_v62 = vld [vmem:[#allocation3 + $0x188] sm:$0xf] }
 0x2b3   : > { %v12246_v3 = vadd.f32 %v3033_v5, %v2935_v26  ;;  %2973 = vmatmul.bf16.gmra.mxu0 %v9154_v57  ;;  %v9354_v5 = vor.u32 %v10719_v15, %v9353_v12  ;;  %v10600_v26 = vld [vmem:[#allocation3 + $0x190] sm:$0xf0]  ;;  %v10721_v12 = vld [vmem:[#allocation3 + $0xac] sm:$0xf]  ;;  %v9175_v15 = vld [vmem:[#allocation3 + $0x174] sm:$0xf0] }
 0x2b4   : > { %3082 = vmatmul.bf16.gmra.mxu1 %v9182_v51  ;;  %v9194_v22 = vor.u32 %v10600_v26, %v9193_v62  ;;  %v13873_v51 = vld [vmem:[#allocation49_spill] sm:$0xff]  ;;  %v9205_v62 = vld [vmem:[#allocation3 + $0x1a0] sm:$0xf]  ;;  %v10603_v26 = vld [vmem:[#allocation3 + $0x1a8] sm:$0xf0] }
 0x2b5   : > { %v2843_v44 = vadd.f32 %v13873_v51, %v12200_v32  ;;  %v13875_v32 = vld [vmem:[#allocation28_spill] sm:$0xff] }
 0x2b6   : > { %3680 = vmatmul.bf16.gmra.mxu2 %v9354_v5  ;;  %v13877_v51 = vld [vmem:[#allocation24_spill] sm:$0xff] }
 0x2b7   : > { %3779 = vmatmul.bf16.gmra.mxu3 %v9358_v9 }
 0x2b8   : > { %v2936_v39 = vpop.f32.mrf.mxu0 }
 0x2b9   : > { %v2937_v29 = vadd.f32 %v2936_v39, %v2838_v10  ;;  %v12252_v17 = vpop.f32.mrf.mxu1 }
 0x2bb   : > { %v12250_v8 = vadd.f32 %v3035_v40, %v2937_v29  ;;  %v10595_v29 = vld [vmem:[#allocation3 + $0x16c] sm:$0xf] }
 0x2bc   : > { %v9178_v7 = vor.u32 %v10595_v29, %v9175_v15  ;;  %v10725_v15 = vld [vmem:[#allocation3 + $0xc8] sm:$0xf0] }
 0x2c0   : > { %v2939_v49 = vpop.f32.mrf.mxu0 }
 0x2c1   : > { %v2940_v40 = vadd.f32 %v2939_v49, %v2841_v2  ;;  %v3048_v23 = vpop.f32.mrf.mxu1  ;;  %v2218_v2 = vadd.f32 %v13876_v63, %v13875_v32  ;;  %v13879_v63 = vld [vmem:[#allocation31_spill] sm:$0xff] }
 0x2c3   : > { %v12256_v57 = vadd.f32 %v3038_v24, %v2940_v40  ;;  %2978 = vmatmul.bf16.gmra.mxu0 %v9166_v14  ;;  %v9367_v24 = vld [vmem:[#allocation3 + $0xb4] sm:$0xf0] }
 0x2c4   : > { %3087 = vmatmul.bf16.gmra.mxu1 %v9194_v22  ;;  %v9370_v25 = vor.u32 %v10721_v12, %v9367_v24  ;;  %v10909_v40 = vld [vmem:[#allocation10 + $0xe8] sm:$0xff]  ;;  %v9206_v22 = vor.u32 %v10603_v26, %v9205_v62  ;;  %v9377_v12 = vld [vmem:[#allocation3 + $0xc0] sm:$0xf] }
 0x2c5   : > { %6314 = vmatpush.bf16.msra.mxu1 %v10909_v40  ;;  %v9378_v24 = vor.u32 %v10725_v15, %v9377_v12  ;;  %v13881_v62 = vld [vmem:[#allocation26_spill] sm:$0xff]  ;;  %v10728_v12 = vld [vmem:[#allocation3 + $0xe0] sm:$0xf0] }
 0x2c6   : > { %3685 = vmatmul.bf16.gmra.mxu2 %v9366_v56  ;;  %v9187_v56 = vld [vmem:[#allocation3 + $0x18c] sm:$0xf0]  ;;  %v10727_v15 = vld [vmem:[#allocation3 + $0xdc] sm:$0xf] }
 0x2c7   : > { %3784 = vmatmul.bf16.gmra.mxu3 %v9370_v25 }
 0x2c8   : > { %v2941_v10 = vpop.f32.mrf.mxu0 }
 0x2c9   : > { %v12260_v39 = vadd.f32 %v2941_v10, %v2843_v44  ;;  %v12262_v5 = vpop.f32.mrf.mxu1  ;;  %v2317_v44 = vadd.f32 %v13877_v51, %v2218_v2 }
 0x2ca   : > { %13874 = vst [vmem:[#allocation39_spill] sm:$0xff] %v12262_v5  ;;  %v12445_v5 = vld [vmem:[%s13792_s2] ss:$0 sm:$0xff] }
 0x2cb   : > { %v2848_v29 = vadd.f32 %v12082_v36, %v2317_v44  ;;  %v13880_v36 = vld [vmem:[#allocation32_spill] sm:$0xff] }
 0x2cc   : > { %v2223_v2 = vadd.f32 %v13880_v36, %v13879_v63 }
 0x2ce   : > { %v2322_v26 = vadd.f32 %v13881_v62, %v2223_v2  ;;  %v10916_v2 = vld [vmem:[#allocation10 + $0x120] sm:$0xff]  ;;  %v13887_v62 = vld [vmem:[#allocation30_spill] sm:$0xff] }
 0x2cf   : > { %6404 = vmatpush.bf16.msra.mxu2 %v10916_v2 }
 0x2d0   : > { %v2944_v9 = vpop.f32.mrf.mxu0  ;;  %v2853_v51 = vadd.f32 %v12094_v4, %v2322_v26 }
 0x2d1   : > { %v2945_v14 = vadd.f32 %v2944_v9, %v12068_v6  ;;  %v3053_v10 = vpop.f32.mrf.mxu1  ;;  %v10724_v6 = vld [vmem:[#allocation3 + $0xc4] sm:$0xf] }
 0x2d3   : > { %v12267_v49 = vadd.f32 %v3043_v52, %v2945_v14  ;;  %2983 = vmatmul.bf16.gmra.mxu0 %v9178_v7  ;;  %v10598_v52 = vld [vmem:[#allocation3 + $0x184] sm:$0xf]  ;;  %v9382_v7 = vor.u32 %v10724_v6, %v9379_v54  ;;  %v10601_v6 = vld [vmem:[#allocation3 + $0x19c] sm:$0xf] }
 0x2d4   : > { %3092 = vmatmul.bf16.gmra.mxu1 %v9206_v22  ;;  %v9190_v9 = vor.u32 %v10598_v52, %v9187_v56  ;;  %v9199_v52 = vld [vmem:[#allocation3 + $0x1a4] sm:$0xf0] }
 0x2d6   : > { %3690 = vmatmul.bf16.gmra.mxu2 %v9378_v24  ;;  %v9391_v24 = vld [vmem:[#allocation3 + $0xe4] sm:$0xf0] }
 0x2d7   : > { %3789 = vmatmul.bf16.gmra.mxu3 %v9382_v7  ;;  %v9394_v54 = vor.u32 %v10727_v15, %v9391_v24  ;;  %v12295_v15 = vpop.f32.mrf.mxu2  ;;  %v10708_v24 = vld [vmem:[#allocation3 + $0x40] sm:$0xf0] }
 0x2d8   : > { %v2946_v37 = vpop.f32.mrf.mxu0 }
 0x2d9   : > { %v12271_v18 = vadd.f32 %v2946_v37, %v2848_v29  ;;  %v12273_v25 = vpop.f32.mrf.mxu1  ;;  %v9389_v37 = vld [vmem:[#allocation3 + $0xd8] sm:$0xf] }
 0x2da   : > { %13878 = vst [vmem:[#allocation41_spill] sm:$0xff] %v12273_v25  ;;  %v9390_v56 = vor.u32 %v10728_v12, %v9389_v37 }
 0x2e0   : > { %v2949_v32 = vpop.f32.mrf.mxu0 }
 0x2e1   : > { %v2950_v14 = vadd.f32 %v2949_v32, %v12090_v21  ;;  %v3058_v22 = vpop.f32.mrf.mxu1  ;;  %v13885_v32 = vld [vmem:[#allocation35_spill] sm:$0xff] }
 0x2e3   : > { %v12278_v40 = vadd.f32 %v3048_v23, %v2950_v14  ;;  %2988 = vmatmul.bf16.gmra.mxu0 %v9190_v9  ;;  %v9202_v23 = vor.u32 %v10601_v6, %v9199_v52  ;;  %v13884_v9 = vld [vmem:[#allocation34_spill] sm:$0xff]  ;;  %v10908_v14 = vld [vmem:[#allocation10 + $0xe0] sm:$0xff]  ;;  %v12297_v6 = vpop.f32.mrf.mxu3 }
 0x2e4   : > { %v2228_v4 = vadd.f32 %v13885_v32, %v13884_v9  ;;  %6315 = vmatpush.bf16.msra.mxu1 %v10908_v14  ;;  %v10730_v52 = vld [vmem:[#allocation3 + $0xf4] sm:$0xf] }
 0x2e6   : > { %3695 = vmatmul.bf16.gmra.mxu2 %v9390_v56  ;;  %v2327_v26 = vadd.f32 %v13887_v62, %v2228_v4  ;;  %v9313_v56 = vld [vmem:[#allocation3 + $0x38] sm:$0xf] }
 0x2e7   : > { %3794 = vmatmul.bf16.gmra.mxu3 %v9394_v54  ;;  %v9314_v9 = vor.u32 %v10708_v24, %v9313_v56 }
 0x2e8   : > { %v2951_v44 = vpop.f32.mrf.mxu0 }
 0x2e9   : > { %v12282_v29 = vadd.f32 %v2951_v44, %v2853_v51  ;;  %v12284_v21 = vpop.f32.mrf.mxu1  ;;  %v2858_v51 = vadd.f32 %v12106_v47, %v2327_v26  ;;  %v13889_v47 = vld [vmem:[#allocation37_spill] sm:$0xff] }
 0x2ea   : > { %13883 = vst [vmem:[#allocation45_spill] sm:$0xff] %v12284_v21  ;;  %v2233_v4 = vadd.f32 %v12176_v41, %v13889_v47 }
 0x2eb   : > { %13882 = vst [vmem:[#allocation42_spill] sm:$0xff] %v12282_v29 }
 0x2f0   : > { %v2954_v7 = vpop.f32.mrf.mxu0 }
 0x2f1   : > { %v2955_v63 = vadd.f32 %v2954_v7, %v12102_v59  ;;  %v3063_v37 = vpop.f32.mrf.mxu1  ;;  %v9401_v59 = vld [vmem:[#allocation3 + $0xf0] sm:$0xf] }
 0x2f3   : > { %v12289_v36 = vadd.f32 %v3053_v10, %v2955_v63  ;;  %2993 = vmatmul.bf16.gmra.mxu0 %v9202_v23  ;;  %v10731_v10 = vld [vmem:[#allocation3 + $0xf8] sm:$0xf0]  ;;  %v9403_v23 = vld [vmem:[#allocation3 + $0xfc] sm:$0xf0] }
 0x2f4   : > { %v9402_v54 = vor.u32 %v10731_v10, %v9401_v59  ;;  %v9406_v7 = vor.u32 %v10730_v52, %v9403_v23  ;;  %v10733_v23 = vld [vmem:[#allocation3 + $0x10c] sm:$0xf] }
 0x2f5   : > { %13886 = vst [vmem:[#allocation46_spill] sm:$0xff] %v12289_v36 }
 0x2f6   : > { %3700 = vmatmul.bf16.gmra.mxu2 %v9402_v54  ;;  %v3661_v62 = vpop.f32.mrf.mxu2  ;;  %v9413_v54 = vld [vmem:[#allocation3 + $0x108] sm:$0xf] }
 0x2f7   : > { %3799 = vmatmul.bf16.gmra.mxu3 %v9406_v7  ;;  %v9325_v7 = vld [vmem:[#allocation3 + $0x50] sm:$0xf] }
 0x2f8   : > { %v2956_v44 = vpop.f32.mrf.mxu0 }
 0x2f9   : > { %v12293_v12 = vadd.f32 %v2956_v44, %v2858_v51  ;;  %v12302_v2 = vpop.f32.mrf.mxu1  ;;  %v13892_v44 = vld [vmem:[#allocation33_spill] sm:$0xff] }
 0x2fa   : > { %13890 = vst [vmem:[#allocation28_spill] sm:$0xff] %v12302_v2  ;;  %v3760_v26 = vpop.f32.mrf.mxu3  ;;  %v2332_v59 = vadd.f32 %v13892_v44, %v2233_v4  ;;  %v13895_v44 = vld [vmem:[#allocation19_spill] sm:$0xff] }
 0x2fb   : > { %13888 = vst [vmem:[#allocation49_spill] sm:$0xff] %v12293_v12  ;;  %v12306_v51 = vadd.f32 %v3760_v26, %v3661_v62 }
 0x2fc   : > { %v2863_v10 = vadd.f32 %v12116_v31, %v2332_v59  ;;  %v13894_v31 = vld [vmem:[#allocation40_spill] sm:$0xff] }
 0x2fd   : > { %v2238_v59 = vadd.f32 %v13895_v44, %v13894_v31  ;;  %v9427_v44 = vld [vmem:[#allocation3 + $0x12c] sm:$0xf0] }
 0x2fe   : > { %v3663_v24 = vpop.f32.mrf.mxu2 }
 0x300   : > { %v2959_v32 = vpop.f32.mrf.mxu0 }
 0x301   : > { %v2960_v63 = vadd.f32 %v2959_v32, %v12112_v48  ;;  %v10734_v48 = vld [vmem:[#allocation3 + $0x110] sm:$0xf0]  ;;  %v3068_v32 = vpop.f32.mrf.mxu1 }
 0x302   : > { %v3762_v41 = vpop.f32.mrf.mxu3  ;;  %v9414_v47 = vor.u32 %v10734_v48, %v9413_v54 }
 0x303   : > { %v12304_v14 = vadd.f32 %v3058_v22, %v2960_v63  ;;  %3858 = vmatmul.bf16.vlgmr.msrb.gmra.mxu0 %v9314_v9  ;;  %v10711_v22 = vld [vmem:[#allocation3 + $0x58] sm:$0xf0]  ;;  %v12312_v9 = vadd.f32 %v3762_v41, %v3663_v24  ;;  %v9415_v63 = vld [vmem:[#allocation3 + $0x114] sm:$0xf0]  ;;  %v13897_v41 = vld [vmem:[#allocation36_spill] sm:$0xff] }
 0x304   : > { %v9418_v62 = vor.u32 %v10733_v23, %v9415_v63  ;;  %v9326_v4 = vor.u32 %v10711_v22, %v9325_v7  ;;  %v2337_v54 = vadd.f32 %v13897_v41, %v2238_v59  ;;  %v10907_v63 = vld [vmem:[#allocation10 + $0xd8] sm:$0xff]  ;;  %v13900_v41 = vld [vmem:[#allocation43_spill] sm:$0xff] }
 0x305   : > { %13891 = vst [vmem:[#allocation29_spill] sm:$0xff] %v12304_v14  ;;  %6316 = vmatpush.bf16.msra.mxu1 %v10907_v63  ;;  %v491_v14 = vld [vmem:[%s11589_s23 + $0xec] sm:$0x1] }
 0x306   : > { %3705 = vmatmul.bf16.gmra.mxu2 %v9414_v47  ;;  %v2868_v23 = vadd.f32 %v12128_v33, %v2337_v54  ;;  %v9337_v47 = vld [vmem:[#allocation3 + $0x68] sm:$0xf] }
 0x307   : > { %3804 = vmatmul.bf16.gmra.mxu3 %v9418_v62  ;;  %v9425_v62 = vld [vmem:[#allocation3 + $0x120] sm:$0xf]  ;;  %v13901_v54 = vld [vmem:[#allocation20_spill] sm:$0xff] }
 0x308   : > { %v2961_v52 = vpop.f32.mrf.mxu0 }
 0x309   : > { %v12310_v56 = vadd.f32 %v2961_v52, %v2863_v10  ;;  %v3666_v2 = vpop.f32.mrf.mxu2  ;;  %v12322_v48 = vpop.f32.mrf.mxu1 }
 0x30a   : > { %v3765_v21 = vpop.f32.mrf.mxu3  ;;  %13898 = vst [vmem:[#allocation32_spill] sm:$0xff] %v12322_v48 }
 0x30b   : > { %13893 = vst [vmem:[#allocation24_spill] sm:$0xff] %v12310_v56  ;;  %v10915_v56 = vld [vmem:[#allocation10 + $0x118] sm:$0xff]  ;;  %v12319_v24 = vadd.f32 %v3765_v21, %v3666_v2  ;;  %v10736_v2 = vld [vmem:[#allocation3 + $0x124] sm:$0xf] }
 0x30c   : > { %6405 = vmatpush.bf16.msra.mxu2 %v10915_v56  ;;  %v9430_v56 = vor.u32 %v10736_v2, %v9427_v44 }
 0x310   : > { %v2964_v26 = vpop.f32.mrf.mxu0 }
 0x311   : > { %v2965_v10 = vadd.f32 %v2964_v26, %v12124_v53  ;;  %v3668_v53 = vpop.f32.mrf.mxu2  ;;  %v10714_v26 = vld [vmem:[#allocation3 + $0x70] sm:$0xf0] }
 0x312   : > { %v9338_v59 = vor.u32 %v10714_v26, %v9337_v47 }
 0x313   : > { %v12317_v52 = vadd.f32 %v3063_v37, %v2965_v10  ;;  %3863 = vmatmul.bf16.gmra.mxu0 %v9326_v4  ;;  %v3767_v37 = vpop.f32.mrf.mxu3  ;;  %v10737_v4 = vld [vmem:[#allocation3 + $0x128] sm:$0xf0]  ;;  %v3073_v10 = vpop.f32.mrf.mxu1 }
 0x314   : > { %v12327_v31 = vadd.f32 %v3767_v37, %v3668_v53  ;;  %v9426_v21 = vor.u32 %v10737_v4, %v9425_v62  ;;  %v13903_v4 = vld [vmem:[#allocation38_spill] sm:$0xff] }
 0x315   : > { %13896 = vst [vmem:[#allocation31_spill] sm:$0xff] %v12317_v52 }
 0x316   : > { %3710 = vmatmul.bf16.gmra.mxu2 %v9426_v21 }
 0x317   : > { %3809 = vmatmul.bf16.gmra.mxu3 %v9430_v56 }
 0x318   : > { %v2966_v7 = vpop.f32.mrf.mxu0 }
 0x319   : > { %v12325_v22 = vadd.f32 %v2966_v7, %v2868_v23  ;;  %v2243_v23 = vadd.f32 %v13901_v54, %v13900_v41  ;;  %v3671_v53 = vpop.f32.mrf.mxu2  ;;  %v9437_v41 = vld [vmem:[#allocation3 + $0x138] sm:$0xf] }
 0x31b   : > { %13899 = vst [vmem:[#allocation26_spill] sm:$0xff] %v12325_v22  ;;  %v3770_v37 = vpop.f32.mrf.mxu3  ;;  %v2342_v63 = vadd.f32 %v13903_v4, %v2243_v23  ;;  %v12340_v2 = vpop.f32.mrf.mxu1  ;;  %v13906_v4 = vld [vmem:[#allocation47_spill] sm:$0xff] }
 0x31c   : > { %v12334_v62 = vadd.f32 %v3770_v37, %v3671_v53  ;;  %13905 = vst [vmem:[#allocation30_spill] sm:$0xff] %v12340_v2  ;;  %v9439_v53 = vld [vmem:[#allocation3 + $0x144] sm:$0xf0] }
 0x31d   : > { %v2873_v21 = vadd.f32 %v12140_v45, %v2342_v63  ;;  %v13907_v63 = vld [vmem:[#allocation21_spill] sm:$0xff] }
 0x320   : > { %v2969_v33 = vpop.f32.mrf.mxu0 }
 0x321   : > { %v2970_v7 = vadd.f32 %v2969_v33, %v12136_v34  ;;  %v3673_v44 = vpop.f32.mrf.mxu2  ;;  %v10740_v34 = vld [vmem:[#allocation3 + $0x140] sm:$0xf0]  ;;  %v9349_v33 = vld [vmem:[#allocation3 + $0x80] sm:$0xf] }
 0x323   : > { %v12332_v48 = vadd.f32 %v3068_v32, %v2970_v7  ;;  %3868 = vmatmul.bf16.gmra.mxu0 %v9338_v59  ;;  %v3772_v56 = vpop.f32.mrf.mxu3  ;;  %v10739_v32 = vld [vmem:[#allocation3 + $0x13c] sm:$0xf]  ;;  %v10717_v59 = vld [vmem:[#allocation3 + $0x88] sm:$0xf0]  ;;  %v9438_v7 = vor.u32 %v10740_v34, %v9437_v41  ;;  %v3078_v22 = vpop.f32.mrf.mxu1 }
 0x324   : > { %v12342_v54 = vadd.f32 %v3772_v56, %v3673_v44  ;;  %v9442_v37 = vor.u32 %v10739_v32, %v9439_v53  ;;  %v9350_v23 = vor.u32 %v10717_v59, %v9349_v33  ;;  %v13909_v56 = vld [vmem:[#allocation44_spill] sm:$0xff]  ;;  %v9361_v59 = vld [vmem:[#allocation3 + $0x98] sm:$0xf] }
 0x325   : > { %13902 = vst [vmem:[#allocation34_spill] sm:$0xff] %v12332_v48 }
 0x326   : > { %3715 = vmatmul.bf16.gmra.mxu2 %v9438_v7  ;;  %v10720_v7 = vld [vmem:[#allocation3 + $0xa0] sm:$0xf0] }
 0x327   : > { %3814 = vmatmul.bf16.gmra.mxu3 %v9442_v37 }
 0x328   : > { %v2971_v47 = vpop.f32.mrf.mxu0 }
 0x329   : > { %v12338_v26 = vadd.f32 %v2971_v47, %v2873_v21  ;;  %v2248_v21 = vadd.f32 %v13907_v63, %v13906_v4  ;;  %v10742_v63 = vld [vmem:[#allocation3 + $0x154] sm:$0xf] }
 0x32b   : > { %13904 = vst [vmem:[#allocation35_spill] sm:$0xff] %v12338_v26  ;;  %v3676_v26 = vpop.f32.mrf.mxu2  ;;  %v3775_v48 = vpop.f32.mrf.mxu3  ;;  %v2347_v41 = vadd.f32 %v13909_v56, %v2248_v21 }
 0x32c   : > { %v12349_v44 = vadd.f32 %v3775_v48, %v3676_v26  ;;  %v9451_v48 = vld [vmem:[#allocation3 + $0x15c] sm:$0xf0] }
 0x32d   : > { %v2878_v34 = vadd.f32 %v12152_v30, %v2347_v41  ;;  %v10906_v26 = vld [vmem:[#allocation10 + $0xd0] sm:$0xff]  ;;  %v9454_v21 = vor.u32 %v10742_v63, %v9451_v48  ;;  %v9362_v30 = vor.u32 %v10720_v7, %v9361_v59  ;;  %v13912_v41 = vld [vmem:[#allocation22_spill] sm:$0xff] }
 0x32e   : > { %6317 = vmatpush.bf16.msra.mxu1 %v10906_v26 }
 0x330   : > { %v2974_v45 = vpop.f32.mrf.mxu0 }
 0x331   : > { %v2975_v47 = vadd.f32 %v2974_v45, %v12148_v46  ;;  %v10914_v46 = vld [vmem:[#allocation10 + $0x110] sm:$0xff]  ;;  %v10743_v45 = vld [vmem:[#allocation3 + $0x158] sm:$0xf0] }
 0x332   : > { %6406 = vmatpush.bf16.msra.mxu2 %v10914_v46  ;;  %v13914_v46 = vld [vmem:[#allocation48_spill] sm:$0xff] }
 0x333   : > { %v12347_v2 = vadd.f32 %v3073_v10, %v2975_v47  ;;  %3873 = vmatmul.bf16.gmra.mxu0 %v9350_v23  ;;  %v3678_v53 = vpop.f32.mrf.mxu2  ;;  %v3777_v37 = vpop.f32.mrf.mxu3  ;;  %v9449_v10 = vld [vmem:[#allocation3 + $0x150] sm:$0xf] }
 0x334   : > { %v12355_v23 = vadd.f32 %v3777_v37, %v3678_v53  ;;  %v9450_v4 = vor.u32 %v10743_v45, %v9449_v10  ;;  %v12357_v47 = vpop.f32.mrf.mxu1 }
 0x335   : > { %13908 = vst [vmem:[#allocation37_spill] sm:$0xff] %v12347_v2 }
 0x336   : > { %13911 = vst [vmem:[#allocation40_spill] sm:$0xff] %v12357_v47  ;;  %3720 = vmatmul.bf16.gmra.mxu2 %v9450_v4 }
 0x337   : > { %3819 = vmatmul.bf16.gmra.mxu3 %v9454_v21 }
 0x338   : > { %v2976_v32 = vpop.f32.mrf.mxu0 }
 0x339   : > { %v12353_v33 = vadd.f32 %v2976_v32, %v2878_v34  ;;  %v2253_v34 = vadd.f32 %v13912_v41, %v12070_v58  ;;  %v9461_v58 = vld [vmem:[#allocation3 + $0x168] sm:$0xf]  ;;  %v10746_v41 = vld [vmem:[#allocation3 + $0x170] sm:$0xf0] }
 0x33b   : > { %13910 = vst [vmem:[#allocation33_spill] sm:$0xff] %v12353_v33  ;;  %v3681_v37 = vpop.f32.mrf.mxu2  ;;  %v3780_v10 = vpop.f32.mrf.mxu3  ;;  %v2352_v63 = vadd.f32 %v13914_v46, %v2253_v34  ;;  %v4161_v33 = vld [vmem:[#allocation2 + $0x8] sm:$0xf] }
 0x33c   : > { %v12364_v45 = vadd.f32 %v3780_v10, %v3681_v37  ;;  %v3083_v59 = vpop.f32.mrf.mxu1  ;;  %v9463_v37 = vld [vmem:[#allocation3 + $0x174] sm:$0xf0] }
 0x33d   : > { %v2883_v4 = vadd.f32 %v12164_v28, %v2352_v63  ;;  %v13916_v28 = vld [vmem:[#allocation23_spill] sm:$0xff] }
 0x33e   : > { %v2258_v63 = vadd.f32 %v13916_v28, %v12092_v20 }
 0x340   : > { %v2979_v56 = vpop.f32.mrf.mxu0 }
 0x341   : > { %v2980_v32 = vadd.f32 %v2979_v56, %v12160_v0  ;;  %v10745_v0 = vld [vmem:[#allocation3 + $0x16c] sm:$0xf]  ;;  %v10723_v56 = vld [vmem:[#allocation3 + $0xb8] sm:$0xf0] }
 0x342   : > { %v9466_v10 = vor.u32 %v10745_v0, %v9463_v37  ;;  %v10749_v37 = vld [vmem:[#allocation3 + $0x188] sm:$0xf0] }
 0x343   : > { %v12362_v53 = vadd.f32 %v3078_v22, %v2980_v32  ;;  %3878 = vmatmul.bf16.gmra.mxu0 %v9362_v30  ;;  %v3683_v26 = vpop.f32.mrf.mxu2  ;;  %v3782_v21 = vpop.f32.mrf.mxu3  ;;  %v9373_v22 = vld [vmem:[#allocation3 + $0xb0] sm:$0xf]  ;;  %v9462_v32 = vor.u32 %v10746_v41, %v9461_v58  ;;  %v2357_v58 = vadd.f32 %v12085_v13, %v2258_v63  ;;  %v13920_v63 = vld [vmem:[#allocation51_spill] sm:$0xff] }
 0x344   : > { %v12370_v30 = vadd.f32 %v3782_v21, %v3683_v26  ;;  %v9374_v34 = vor.u32 %v10723_v56, %v9373_v22  ;;  %v9385_v56 = vld [vmem:[#allocation3 + $0xc8] sm:$0xf] }
 0x345   : > { %13913 = vst [vmem:[#allocation19_spill] sm:$0xff] %v12362_v53  ;;  %v2888_v41 = vadd.f32 %v12178_v43, %v2357_v58  ;;  %v13921_v58 = vld [vmem:[#allocation25_spill] sm:$0xff] }
 0x346   : > { %3725 = vmatmul.bf16.gmra.mxu2 %v9462_v32 }
 0x347   : > { %3824 = vmatmul.bf16.gmra.mxu3 %v9466_v10  ;;  %v10748_v10 = vld [vmem:[#allocation3 + $0x184] sm:$0xf] }
 0x348   : > { %v2981_v48 = vpop.f32.mrf.mxu0 }
 0x349   : > { %v12368_v7 = vadd.f32 %v2981_v48, %v2883_v4  ;;  %v12375_v48 = vpop.f32.mrf.mxu1 }
 0x34a   : > { %13917 = vst [vmem:[#allocation43_spill] sm:$0xff] %v12375_v48 }
 0x34b   : > { %13915 = vst [vmem:[#allocation36_spill] sm:$0xff] %v12368_v7  ;;  %v3686_v7 = vpop.f32.mrf.mxu2  ;;  %v3785_v26 = vpop.f32.mrf.mxu3 }
 0x34c   : > { %v12379_v21 = vadd.f32 %v3785_v26, %v3686_v7  ;;  %v9475_v7 = vld [vmem:[#allocation3 + $0x18c] sm:$0xf0] }
 0x34d   : > { %v9478_v26 = vor.u32 %v10748_v10, %v9475_v7  ;;  %v4104_v7 = vld [vmem:[#allocation2] sm:$0x1] }
 0x350   : > { %v2984_v46 = vpop.f32.mrf.mxu0 }
 0x351   : > { %v2985_v4 = vadd.f32 %v2984_v46, %v12172_v61  ;;  %v9473_v61 = vld [vmem:[#allocation3 + $0x180] sm:$0xf]  ;;  %v10726_v46 = vld [vmem:[#allocation3 + $0xd0] sm:$0xf0] }
 0x352   : > { %v9474_v28 = vor.u32 %v10749_v37, %v9473_v61  ;;  %v9386_v13 = vor.u32 %v10726_v46, %v9385_v56  ;;  %v13926_v56 = vld [vmem:[#allocation54_spill] sm:$0xff] }
 0x353   : > { %v12377_v47 = vadd.f32 %v3083_v59, %v2985_v4  ;;  %3883 = vmatmul.bf16.gmra.mxu0 %v9374_v34  ;;  %v3688_v20 = vpop.f32.mrf.mxu2  ;;  %v3787_v32 = vpop.f32.mrf.mxu3  ;;  %v10913_v4 = vld [vmem:[#allocation10 + $0x108] sm:$0xff] }
 0x354   : > { %v3088_v59 = vpop.f32.mrf.mxu1  ;;  %v12385_v34 = vadd.f32 %v3787_v32, %v3688_v20  ;;  %6407 = vmatpush.bf16.msra.mxu2 %v10913_v4  ;;  %v13924_v32 = vld [vmem:[#allocation50_spill] sm:$0xff]  ;;  %v10729_v4 = vld [vmem:[#allocation3 + $0xe8] sm:$0xf0] }
 0x355   : > { %13918 = vst [vmem:[#allocation20_spill] sm:$0xff] %v12377_v47 }
 0x356   : > { %3730 = vmatmul.bf16.gmra.mxu2 %v9474_v28 }
 0x357   : > { %3829 = vmatmul.bf16.gmra.mxu3 %v9478_v26  ;;  %v4105_v26 = vsel %vm12403_vm8, 0, %v4104_v7  ;;  %v13932_v7 = vld [vmem:[#allocation52_spill] sm:$0xff] }
 0x358   : > { %v2986_v0 = vpop.f32.mrf.mxu0  ;;  %4106 = vst [vmem:[#allocation2] sm:$0x1] %v4105_v26  ;;  %v13934_v26 = vld [vmem:[#allocation55_spill] sm:$0xff] }
 0x359   : > { %v12383_v22 = vadd.f32 %v2986_v0, %v2888_v41  ;;  %v2263_v41 = vadd.f32 %v13921_v58, %v13920_v63  ;;  %v13922_v0 = vld [vmem:[#allocation53_spill] sm:$0xff]  ;;  %v9485_v63 = vld [vmem:[#allocation3 + $0x198] sm:$0xf]  ;;  %v10752_v58 = vld [vmem:[#allocation3 + $0x1a0] sm:$0xf0] }
 0x35b   : > { %13919 = vst [vmem:[#allocation38_spill] sm:$0xff] %v12383_v22  ;;  %v12392_v47 = vpop.f32.mrf.mxu2  ;;  %v12394_v20 = vpop.f32.mrf.mxu3  ;;  %v2362_v61 = vadd.f32 %v13924_v32, %v2263_v41  ;;  %v10751_v41 = vld [vmem:[#allocation3 + $0x19c] sm:$0xf]  ;;  %v9487_v32 = vld [vmem:[#allocation3 + $0x1a4] sm:$0xf0] }
 0x35c   : > { %v12397_v37 = vpop.f32.mrf.mxu1 }
 0x35d   : > { %13925 = vst [vmem:[#allocation21_spill] sm:$0xff] %v12397_v37  ;;  %v2893_v10 = vadd.f32 %v13926_v56, %v2362_v61  ;;  %v9490_v56 = vor.u32 %v10751_v41, %v9487_v32  ;;  %v4107_v32 = vld [vmem:[#allocation2 + $0xc] sm:$0x1] }
 0x360   : > { %v2989_v43 = vpop.f32.mrf.mxu0 }
 0x361   : > { %v2990_v48 = vadd.f32 %v2989_v43, %v13922_v0  ;;  %v9486_v0 = vor.u32 %v10752_v58, %v9485_v63 }
 0x363   : > { %v12390_v22 = vadd.f32 %v3088_v59, %v2990_v48  ;;  %3888 = vmatmul.bf16.gmra.mxu0 %v9386_v13  ;;  %v9397_v59 = vld [vmem:[#allocation3 + $0xe0] sm:$0xf]  ;;  %v12409_v13 = vpop.f32.mrf.mxu2  ;;  %v12411_v43 = vpop.f32.mrf.mxu3 }
 0x364   : > { %v9398_v61 = vor.u32 %v10729_v4, %v9397_v59  ;;  %v4162_v59 = vsel %vm12413_vm11, 0, %v4161_v33  ;;  %v4108_v33 = vsel %vm12403_vm8, 0, %v4107_v32 }
 0x365   : > { %13923 = vst [vmem:[#allocation47_spill] sm:$0xff] %v12390_v22 }
 0x366   : > { %3735 = vmatmul.bf16.gmra.mxu2 %v9486_v0  ;;  %4163 = vst [vmem:[#allocation2 + $0x8] sm:$0xf] %v4162_v59 }
 0x367   : > { %3834 = vmatmul.bf16.gmra.mxu3 %v9490_v56  ;;  %v10732_v56 = vld [vmem:[#allocation3 + $0x100] sm:$0xf0]  ;;  %4109 = vst [vmem:[#allocation2 + $0xc] sm:$0x1] %v4108_v33 }
 0x368   : > { %v2991_v46 = vpop.f32.mrf.mxu0 }
 0x369   : > { %v12400_v28 = vadd.f32 %v2991_v46, %v2893_v10  ;;  %v3093_v46 = vpop.f32.mrf.mxu1 }
 0x36b   : > { %13927 = vst [vmem:[#allocation44_spill] sm:$0xff] %v12400_v28  ;;  %v13933_v28 = vld [vmem:[#allocation27_spill] sm:$0xff]  ;;  %v12424_v4 = vpop.f32.mrf.mxu3  ;;  %v12426_v63 = vpop.f32.mrf.mxu2 }
 0x36c   : > { %v2268_v22 = vadd.f32 %v13933_v28, %v13932_v7  ;;  %v10905_v28 = vld [vmem:[#allocation10 + $0xc8] sm:$0xff] }
 0x36d   : > { %6318 = vmatpush.bf16.msra.mxu1 %v10905_v28  ;;  %v490_v7 = vld [vmem:[%s11589_s23 + $0xe8] sm:$0xf] }
 0x36e   : > { %v2367_v58 = vadd.f32 %v12295_v15, %v2268_v22  ;;  %v9497_v15 = vld [vmem:[#allocation3 + $0x1b0] sm:$0xf]  ;;  %v10755_v22 = vld [vmem:[#allocation3 + $0x1b8] sm:$0xf0]  ;;  %v965_v52 = vshrl.u32 %v490_v7, 16 }
 0x36f   : > { %v9498_v59 = vor.u32 %v10755_v22, %v9497_v15  ;;  %v12451_v22 = vld [vmem:[%s13793_s3] ss:$0 sm:$0xff] }
 0x370   : > { %v2994_v10 = vpop.f32.mrf.mxu0  ;;  %v2898_v41 = vadd.f32 %v12297_v6, %v2367_v58  ;;  %v9499_v58 = vld [vmem:[#allocation3 + $0x1bc] sm:$0xf0]  ;;  %v967_v15 = vrot.slane %v965_v52, 4 }
 0x371   : > { %v2995_v53 = vadd.f32 %v2994_v10, %v13934_v26  ;;  %v10754_v26 = vld [vmem:[#allocation3 + $0x1b4] sm:$0xf] }
 0x373   : > { %v12420_v2 = vadd.f32 %v3093_v46, %v2995_v53  ;;  %3893 = vmatmul.bf16.gmra.mxu0 %v9398_v61  ;;  %v9409_v61 = vld [vmem:[#allocation3 + $0xf8] sm:$0xf]  ;;  %v12434_v10 = vpop.f32.mrf.mxu3  ;;  %v489_v46 = vld [vmem:[%s11589_s23 + $0xe4] sm:$0xf]  ;;  %v12438_v6 = vpop.f32.mrf.mxu2 }
 0x374   : > { %v952_v28 = vshrl.u32 %v489_v46, 16 }
 0x375   : > { %13935 = vst [vmem:[#allocation22_spill] sm:$0xff] %v12420_v2  ;;  %v9410_v2 = vor.u32 %v10732_v56, %v9409_v61  ;;  %v4164_v61 = vld [vmem:[#allocation2 + $0x14] sm:$0xf] }
 0x376   : > { %3740 = vmatmul.bf16.gmra.mxu2 %v9498_v59  ;;  %v954_v33 = vrot.slane %v952_v28, 4 }
 0x378   : > { %v2996_v0 = vpop.f32.mrf.mxu0 }
 0x379   : > { %v12430_v53 = vadd.f32 %v2996_v0, %v2898_v41  ;;  %v955_v41 = vshll.u32 %v489_v46, 16  ;;  %v961_v0 = vshll.u32 %v490_v7, 16  ;;  %v971_v46 = vshll.u32 %v491_v14, 16 }
 0x37b   : > { %13936 = vst [vmem:[#allocation48_spill] sm:$0xff] %v12430_v53  ;;  %v9502_v53 = vor.u32 %v10754_v26, %v9499_v58  ;;  %v957_v25 = vrot.slane %v955_v41, 5  ;;  %v963_v12 = vrot.slane %v961_v0, 5  ;;  %v12455_v26 = vpop.f32.mrf.mxu3  ;;  %v973_v59 = vrot.slane %v971_v46, 5  ;;  %v10926_v0 = vld [vmem:[#allocation10 + $0x170] sm:$0xff] }
 0x37d   : > { %3839 = vmatmul.bf16.gmra.mxu3 %v9502_v53  ;;  %v958_v56 = vor.u32 %v957_v25, %v954_v33  ;;  %v10927_v53 = vld [vmem:[#allocation10 + $0x178] sm:$0xff]  ;;  %v968_v52 = vor.u32 %v967_v15, %v963_v12  ;;  %v12465_v15 = vpop.f32.mrf.mxu2 }
 0x37e   : > { %6490 = vmatpush.bf16.msrb.mxu3 %v10927_v53  ;;  %v10735_v53 = vld [vmem:[#allocation3 + $0x118] sm:$0xf0] }
 0x37f   : > { %v959_v14 = vrot.slane %v958_v56, 4  ;;  %v969_v58 = vrot.slane %v968_v52, 4  ;;  %v4110_v56 = vld [vmem:[#allocation2 + $0x18] sm:$0x1] }
 0x380   : > { %v3859_v32 = vpop.f32.mrf.mxu0  ;;  %v4111_v52 = vsel %vm12403_vm8, 0, %v4110_v56 }
 0x381   : > { %v3860_v36 = vadd.f32 %v3859_v32, %v12306_v51  ;;  %v4165_v51 = vsel %vm12413_vm11, 0, %v4164_v61  ;;  %v974_v32 = vsel %vm11614_vm2, %v969_v58, %v973_v59  ;;  %v10925_v59 = vld [vmem:[#allocation10 + $0x168] sm:$0xff]  ;;  %4112 = vst [vmem:[#allocation2 + $0x18] sm:$0x1] %v4111_v52 }
 0x382   : > { %4166 = vst [vmem:[#allocation2 + $0x14] sm:$0xf] %v4165_v51  ;;  %6491 = vmatpush.bf16.msrb.mxu3 %v10926_v0  ;;  %v9421_v51 = vld [vmem:[#allocation3 + $0x110] sm:$0xf] }
 0x383   : > { %v3949_v7 = vadd.f32 %v3860_v36, %v12204_v16  ;;  %3898 = vmatmul.bf16.gmra.mxu0 %v9410_v2  ;;  %v390_v16 = vld [vmem:[%s11589_s23 + $0xe4] sm:$0xf]  ;;  %v391_v36 = vld [vmem:[%s11589_s23 + $0xe8] sm:$0xf]  ;;  %v964_v2 = vsel %vm11614_vm2, %v959_v14, %v963_v12  ;;  %1054 = vst [vmem:[#allocation3 + $0x1d8] sm:$0xf] %v974_v32  ;;  %v12471_v14 = vpop.f32.mrf.mxu3 }
 0x384   : > { %430 = vst [vmem:[#allocation3 + $0x1c8] sm:$0xf] %v390_v16 }
 0x385   : > { %v3989_v25 = vmul.f32 %v12445_v5, %v3949_v7  ;;  %431 = vst [vmem:[#allocation3 + $0x1d4] sm:$0xf] %v391_v36  ;;  %v9422_v36 = vor.u32 %v10735_v53, %v9421_v51 }
 0x386   : > { %1053 = vst [vmem:[#allocation3 + $0x1cc] sm:$0xf] %v964_v2  ;;  %6492 = vmatpush.bf16.msrb.mxu3 %v10925_v59  ;;  %v12476_v59 = vpop.f32.mrf.mxu2 }
 0x387   : > { %v4029_v41 = vadd.f32 %v12451_v22, %v3989_v25  ;;  %13938 = vst [vmem:[#allocation23_spill] sm:$0xff] %v12471_v14 }
 0x388   : > { %v3861_v33 = vpop.f32.mrf.mxu0 }
 0x389   : > { %v4065_v46 = vmax.f32 %v4029_v41, 0.0  ;;  %v3862_v61 = vadd.f32 %v3861_v33, %v12312_v9  ;;  %v10924_v33 = vld [vmem:[#allocation10 + $0x160] sm:$0xff] }
 0x38a   : > { %v9511_v56 = vld [vmem:[#allocation3 + $0x1d4] sm:$0xf0]  ;;  %6493 = vmatpush.bf16.msrb.mxu3 %v10924_v33 }
 0x38b   : > { %v4215_v7 = vpack.c.bf16 %v4065_v46, %v4065_v46  ;;  %v3950_v12 = vadd.f32 %v3862_v61, %v12208_v60  ;;  %v9509_v9 = vld [vmem:[#allocation3 + $0x1c8] sm:$0xf] }
 0x38c   : > { %v10758_v58 = vld [vmem:[#allocation3 + $0x1d0] sm:$0xf0]  ;;  %v4613_v46 = vld [vmem:[#allocation2] sm:$0xf] }
 0x38d   : > { %v4254_v25 = vshrl.u32 %v4215_v7, 16  ;;  %v3990_v16 = vmul.f32 %v12445_v5, %v3950_v12  ;;  %v4257_v41 = vshll.u32 %v4215_v7, 16  ;;  %v9510_v0 = vor.u32 %v10758_v58, %v9509_v9  ;;  %v10757_v32 = vld [vmem:[#allocation3 + $0x1cc] sm:$0xf]  ;;  %v4167_v12 = vld [vmem:[#allocation2 + $0x20] sm:$0xf] }
 0x38e   : > { %v9514_v51 = vor.u32 %v10757_v32, %v9511_v56  ;;  %v10923_v9 = vld [vmem:[#allocation10 + $0x158] sm:$0xff]  ;;  %v10922_v32 = vld [vmem:[#allocation10 + $0x150] sm:$0xff] }
 0x38f   : > { %v4256_v2 = vrot.slane %v4254_v25, 7  ;;  %v4030_v60 = vadd.f32 %v12451_v22, %v3990_v16  ;;  %3745 = vmatmul.bf16.gmra.mxu2 %v9510_v0  ;;  %v4168_v16 = vsel %vm12413_vm11, 0, %v4167_v12  ;;  %6494 = vmatpush.bf16.msrb.mxu3 %v10923_v9 }
 0x390   : > { %v3864_v61 = vpop.f32.mrf.mxu0  ;;  %3844 = vmatmul.bf16.gmra.mxu3 %v9514_v51  ;;  %4169 = vst [vmem:[#allocation2 + $0x20] sm:$0xf] %v4168_v16 }
 0x391   : > { %v4259_v14 = vor.u32 %v4257_v41, %v4256_v2  ;;  %v4066_v29 = vmax.f32 %v4030_v60, 0.0  ;;  %v3865_v52 = vadd.f32 %v3864_v61, %v12319_v24  ;;  %v13807_v24 = vmov 0   ;;  %v12485_v60 = vpop.f32.mrf.mxu3  ;;  %v4617_v61 = vld [vmem:[#allocation2 + $0x8] sm:$0x1] }
 0x392   : > { %v4260_v33 = vrot.slane %v4256_v2, 4 }
 0x393   : > { %v4614_v7 = vsel %vm12413_vm11, %v4259_v14, %v4613_v46  ;;  %v4216_v53 = vpack.c.bf16 %v4066_v29, %v4066_v29  ;;  %v3951_v25 = vadd.f32 %v3865_v52, %v12212_v1  ;;  %3903 = vmatmul.bf16.gmra.mxu0 %v9422_v36  ;;  %v10912_v29 = vld [vmem:[#allocation10 + $0x100] sm:$0xff]  ;;  %6495 = vmatpush.bf16.msrb.mxu3 %v10922_v32 }
 0x394   : > { %4615 = vst [vmem:[#allocation2] sm:$0xf] %v4614_v7  ;;  %v10904_v14 = vld [vmem:[#allocation10 + $0xc0] sm:$0xff]  ;;  %6408 = vmatpush.bf16.msra.mxu2 %v10912_v29 }
 0x395   : > { %4743 = vst [vmem:[#allocation2] sm:$0xf] %v13807_v24  ;;  %v4262_v58 = vshrl.u32 %v4216_v53, 16  ;;  %v3991_v41 = vmul.f32 %v12445_v5, %v3951_v25  ;;  %v4265_v36 = vshll.u32 %v4216_v53, 16  ;;  %6319 = vmatpush.bf16.msra.mxu1 %v10904_v14  ;;  %v4113_v53 = vld [vmem:[#allocation2 + $0x24] sm:$0x1]  ;;  %v12499_v14 = vpop.f32.mrf.mxu2 }
 0x396   : > { %v10738_v29 = vld [vmem:[#allocation3 + $0x130] sm:$0xf0] }
 0x397   : > { %v4264_v1 = vrot.slane %v4262_v58, 7  ;;  %v4031_v0 = vadd.f32 %v12451_v22, %v3991_v41  ;;  %v10921_v58 = vld [vmem:[#allocation10 + $0x148] sm:$0xff]  ;;  %v9433_v41 = vld [vmem:[#allocation3 + $0x128] sm:$0xf] }
 0x398   : > { %v3866_v56 = vpop.f32.mrf.mxu0  ;;  %6496 = vmatpush.bf16.msrb.mxu3 %v10921_v58 }
 0x399   : > { %v4267_v52 = vor.u32 %v4265_v36, %v4264_v1  ;;  %v4269_v12 = vrot.slane %v4264_v1, 4  ;;  %v4067_v51 = vmax.f32 %v4031_v0, 0.0  ;;  %v3867_v7 = vadd.f32 %v3866_v56, %v12327_v31  ;;  %v4620_v56 = vld [vmem:[#allocation2 + $0xc] sm:$0xf] }
 0x39a   : > { %v4114_v36 = vsel %vm12403_vm8, 0, %v4113_v53 }
 0x39b   : > { %v4268_v25 = vsel %vm12489_vm13, %v4260_v33, %v4267_v52  ;;  %v4618_v2 = vsel %vm12403_vm8, %v4269_v12, %v4617_v61  ;;  %v4217_v16 = vpack.c.bf16 %v4067_v51, %v4067_v51  ;;  %v3952_v9 = vadd.f32 %v3867_v7, %v12216_v19  ;;  %v12507_v61 = vpop.f32.mrf.mxu3  ;;  %4115 = vst [vmem:[#allocation2 + $0x24] sm:$0x1] %v4114_v36  ;;  %v10920_v12 = vld [vmem:[#allocation10 + $0x140] sm:$0xff] }
 0x39c   : > { %4616 = vst [vmem:[#allocation2 + $0x4] sm:$0xf] %v4268_v25  ;;  %v9434_v33 = vor.u32 %v10738_v29, %v9433_v41  ;;  %v4170_v25 = vld [vmem:[#allocation2 + $0x2c] sm:$0xf]  ;;  %6497 = vmatpush.bf16.msrb.mxu3 %v10920_v12  ;;  %v4750_v48 = vld [vmem:[#allocation2] sm:$0xf] }
 0x39d   : > { %4619 = vst [vmem:[#allocation2 + $0x8] sm:$0x1] %v4618_v2  ;;  %v4271_v1 = vshrl.u32 %v4217_v16, 16  ;;  %v3992_v31 = vmul.f32 %v12445_v5, %v3952_v9  ;;  %v4274_v19 = vshll.u32 %v4217_v16, 16  ;;  %v4171_v58 = vsel %vm12413_vm11, 0, %v4170_v25 }
 0x39e   : > { %4744 = vst [vmem:[#allocation2 + $0x4] sm:$0xf] %v13807_v24 }
 0x39f   : > { %4745 = vst [vmem:[#allocation2 + $0x8] sm:$0xf] %v13807_v24  ;;  %v4273_v0 = vrot.slane %v4271_v1, 7  ;;  %v4032_v32 = vadd.f32 %v12451_v22, %v3992_v31  ;;  %v12516_v1 = vpop.f32.mrf.mxu2 }
 0x3a0   : > { %13941 = vst [vmem:[#allocation51_spill] sm:$0xff] %v12507_v61  ;;  %v3869_v52 = vpop.f32.mrf.mxu0 }
 0x3a1   : > { %v4276_v51 = vor.u32 %v4274_v19, %v4273_v0  ;;  %v4068_v7 = vmax.f32 %v4032_v32, 0.0  ;;  %v3870_v53 = vadd.f32 %v3869_v52, %v12334_v62  ;;  %4172 = vst [vmem:[#allocation2 + $0x2c] sm:$0xf] %v4171_v58  ;;  %v4277_v19 = vrot.slane %v4273_v0, 4  ;;  %v4624_v32 = vld [vmem:[#allocation2 + $0x14] sm:$0x1] }
 0x3a2   : > { %13942 = vst [vmem:[#allocation25_spill] sm:$0xff] %v12516_v1  ;;  %v4116_v58 = vld [vmem:[#allocation2 + $0x30] sm:$0x1]  ;;  %v4173_v1 = vld [vmem:[#allocation2 + $0x38] sm:$0xf] }
 0x3a3   : > { %v4621_v2 = vsel %vm12413_vm11, %v4276_v51, %v4620_v56  ;;  %v4218_v9 = vpack.c.bf16 %v4068_v7, %v4068_v7  ;;  %v3953_v16 = vadd.f32 %v3870_v53, %v12220_v50  ;;  %3908 = vmatmul.bf16.gmra.mxu0 %v9434_v33  ;;  %v12520_v51 = vpop.f32.mrf.mxu3  ;;  %v9445_v7 = vld [vmem:[#allocation3 + $0x140] sm:$0xf]  ;;  %4786 = vst [vmem:[#allocation4] sm:$0xf] %v4750_v48 }
 0x3a4   : > { %4622 = vst [vmem:[#allocation2 + $0xc] sm:$0xf] %v4621_v2 }
 0x3a5   : > { %v4279_v41 = vshrl.u32 %v4218_v9, 16  ;;  %v3993_v29 = vmul.f32 %v12445_v5, %v3953_v16  ;;  %v4282_v31 = vshll.u32 %v4218_v9, 16  ;;  %13943 = vst [vmem:[#allocation53_spill] sm:$0xff] %v12520_v51 }
 0x3a7   : > { %v4281_v62 = vrot.slane %v4279_v41, 7  ;;  %v4033_v36 = vadd.f32 %v12451_v22, %v3993_v29  ;;  %v10741_v41 = vld [vmem:[#allocation3 + $0x148] sm:$0xf0] }
 0x3a8   : > { %v3871_v56 = vpop.f32.mrf.mxu0 }
 0x3a9   : > { %v4284_v52 = vor.u32 %v4282_v31, %v4281_v62  ;;  %v4286_v50 = vrot.slane %v4281_v62, 4  ;;  %v4069_v33 = vmax.f32 %v4033_v36, 0.0  ;;  %v3872_v12 = vadd.f32 %v3871_v56, %v12342_v54 }
 0x3aa   : > { %v4117_v54 = vsel %vm12403_vm8, 0, %v4116_v58 }
 0x3ab   : > { %v4825_v53 = vld [vmem:[#allocation2 + $0xc] sm:$0xf]  ;;  %v4285_v25 = vsel %vm12489_vm13, %v4277_v19, %v4284_v52  ;;  %v4625_v2 = vsel %vm12403_vm8, %v4286_v50, %v4624_v32  ;;  %v4219_v9 = vpack.c.bf16 %v4069_v33, %v4069_v33  ;;  %v3954_v0 = vadd.f32 %v3872_v12, %v12224_v42  ;;  %4118 = vst [vmem:[#allocation2 + $0x30] sm:$0x1] %v4117_v54  ;;  %v4627_v50 = vld [vmem:[#allocation2 + $0x18] sm:$0xf]  ;;  %v12531_v12 = vpop.f32.mrf.mxu2  ;;  %v12537_v54 = vpop.f32.mrf.mxu3 }
 0x3ac   : > { %v4752_v16 = vld [vmem:[#allocation2 + $0xc] sm:$0xf]  ;;  %4623 = vst [vmem:[#allocation2 + $0x10] sm:$0xf] %v4285_v25  ;;  %v4901_v31 = vshrl.u32 %v4825_v53, 16  ;;  %v4904_v36 = vshll.u32 %v4825_v53, 16  ;;  %v9446_v52 = vor.u32 %v10741_v41, %v9445_v7 }
 0x3ad   : > { %4626 = vst [vmem:[#allocation2 + $0x14] sm:$0x1] %v4625_v2  ;;  %v4288_v29 = vshrl.u32 %v4219_v9, 16  ;;  %v3994_v62 = vmul.f32 %v12445_v5, %v3954_v0  ;;  %v4291_v56 = vshll.u32 %v4219_v9, 16  ;;  %v5383_v42 = vld [vmem:[#allocation2 + $0xc] sm:$0xe] }
 0x3ae   : > { %4788 = vst [vmem:[#allocation4 + $0x18] sm:$0xf] %v4752_v16  ;;  %v9616_v24 = vrot.slane %v5383_v42, 9  ;;  %v4903_v0 = vrot.slane %v4901_v31, 4  ;;  %v4906_v16 = vrot.slane %v4904_v36, 5 }
 0x3af   : > { %v4290_v19 = vrot.slane %v4288_v29, 7  ;;  %v4034_v32 = vadd.f32 %v12451_v22, %v3994_v62  ;;  %13944 = vst [vmem:[#allocation50_spill] sm:$0xff] %v12531_v12  ;;  %v4631_v36 = vld [vmem:[#allocation2 + $0x20] sm:$0x1] }
 0x3b0   : > { %v3874_v33 = vpop.f32.mrf.mxu0  ;;  %13945 = vst [vmem:[#allocation54_spill] sm:$0xff] %v12537_v54 }
 0x3b1   : > { %v4293_v25 = vor.u32 %v4291_v56, %v4290_v19  ;;  %v4070_v58 = vmax.f32 %v4034_v32, 0.0  ;;  %v3875_v2 = vadd.f32 %v3874_v33, %v12349_v44 }
 0x3b3   : > { %v4826_v51 = vld [vmem:[#allocation2 + $0x10] sm:$0xf]  ;;  %v4628_v9 = vsel %vm12413_vm11, %v4293_v25, %v4627_v50  ;;  %v4220_v29 = vpack.c.bf16 %v4070_v58, %v4070_v58  ;;  %v3955_v7 = vadd.f32 %v3875_v2, %v12228_v55  ;;  %3913 = vmatmul.bf16.gmra.mxu0 %v9446_v52  ;;  %v4907_v58 = vor.u32 %v4906_v16, %v4903_v0  ;;  %v10847_v55 = vld [vmem:[#allocation10 + $0x78] sm:$0xff] }
 0x3b4   : > { %v5384_v53 = vld [vmem:[#allocation2 + $0x10] sm:$0xf]  ;;  %v4914_v62 = vshrl.u32 %v4826_v51, 16  ;;  %4629 = vst [vmem:[#allocation2 + $0x18] sm:$0xf] %v4628_v9  ;;  %7068 = vmatpush.bf16.msrb.mxu2 %v10847_v55 }
 0x3b5   : > { %v4753_v41 = vld [vmem:[#allocation2 + $0x10] sm:$0xf]  ;;  %v5385_v56 = vld [vmem:[#allocation2 + $0x14] sm:$0x1]  ;;  %v5497_v32 = vrot.slane %v5384_v53, 5  ;;  %v4296_v44 = vshrl.u32 %v4220_v29, 16  ;;  %v3995_v31 = vmul.f32 %v12445_v5, %v3955_v7 }
 0x3b6   : > { %4789 = vst [vmem:[#allocation4 + $0x24] sm:$0xf] %v4753_v41  ;;  %v5500_v25 = vrot.slane %v5385_v56, 5  ;;  %v4299_v2 = vshll.u32 %v4220_v29, 16  ;;  %v4827_v9 = vld [vmem:[#allocation2 + $0x14] sm:$0x1] }
 0x3b7   : > { %v5498_v33 = vsel %vm11729_vm5, %v9616_v24, %v5497_v32  ;;  %v5499_v50 = vrot.slane %v5497_v32, 4  ;;  %v4298_v52 = vrot.slane %v4296_v44, 7  ;;  %v4035_v54 = vadd.f32 %v12451_v22, %v3995_v31  ;;  %v9457_v16 = vld [vmem:[#allocation3 + $0x158] sm:$0xf] }
 0x3b8   : > { %5652 = vst [vmem:[#allocation4 + $0x20] sm:$0xf] %v5498_v33  ;;  %v4916_v12 = vrot.slane %v4914_v62, 4  ;;  %v4294_v53 = vrot.slane %v4290_v19, 4  ;;  %v3876_v61 = vpop.f32.mrf.mxu0  ;;  %v4910_v41 = vshll.u32 %v4826_v51, 16  ;;  %v4908_v29 = vrot.slane %v4907_v58, 4  ;;  %v12548_v62 = vpop.f32.mrf.mxu2 }
 0x3b9   : > { %v5501_v7 = vsel %vm11729_vm5, %v5499_v50, %v5500_v25  ;;  %v4301_v24 = vor.u32 %v4299_v2, %v4298_v52  ;;  %v4303_v32 = vrot.slane %v4298_v52, 4  ;;  %v4071_v56 = vmax.f32 %v4035_v54, 0.0 }
 0x3ba   : > { %v3877_v0 = vadd.f32 %v3876_v61, %v12355_v23  ;;  %5653 = vst [vmem:[#allocation4 + $0x2c] sm:$0xf] %v5501_v7  ;;  %v4912_v44 = vrot.slane %v4910_v41, 5  ;;  %v4920_v31 = vshll.u32 %v4827_v9, 16  ;;  %v4174_v19 = vsel %vm12413_vm11, 0, %v4173_v1 }
 0x3bb   : > { %v4302_v51 = vsel %vm12489_vm13, %v4294_v53, %v4301_v24  ;;  %v4632_v33 = vsel %vm12403_vm8, %v4303_v32, %v4631_v36  ;;  %v4221_v50 = vpack.c.bf16 %v4071_v56, %v4071_v56  ;;  %v9635_v23 = vld [vmem:[#allocation4 + $0x18] sm:$0xf]  ;;  %v10744_v61 = vld [vmem:[#allocation3 + $0x160] sm:$0xf0]  ;;  %4175 = vst [vmem:[#allocation2 + $0x38] sm:$0xf] %v4174_v19  ;;  %v12558_v53 = vpop.f32.mrf.mxu3 }
 0x3bc   : > { %v3956_v54 = vadd.f32 %v3877_v0, %v12232_v35  ;;  %4630 = vst [vmem:[#allocation2 + $0x1c] sm:$0xf] %v4302_v51  ;;  %v4913_v58 = vsel %vm11614_vm2, %v4908_v29, %v4912_v44  ;;  %v4917_v1 = vor.u32 %v4916_v12, %v4912_v44  ;;  %v4754_v55 = vld [vmem:[#allocation2 + $0x18] sm:$0xf]  ;;  %v4922_v24 = vrot.slane %v4920_v31, 5  ;;  %v10839_v32 = vld [vmem:[#allocation10 + $0x38] sm:$0xff] }
 0x3bd   : > { %v10857_v25 = vld [vmem:[#allocation4 + $0x20] sm:$0xf0]  ;;  %4633 = vst [vmem:[#allocation2 + $0x20] sm:$0x1] %v4632_v33  ;;  %v4305_v52 = vshrl.u32 %v4221_v50, 16  ;;  %v4308_v35 = vshll.u32 %v4221_v50, 16  ;;  %v9458_v12 = vor.u32 %v10744_v61, %v9457_v16  ;;  %6979 = vmatpush.bf16.msrb.mxu1 %v10839_v32 }
 0x3be   : > { %v3996_v2 = vmul.f32 %v12445_v5, %v3956_v54  ;;  %v9636_v9 = vor.u32 %v10857_v25, %v9635_v23  ;;  %v5386_v36 = vld [vmem:[#allocation2 + $0x18] sm:$0xe]  ;;  %v4918_v41 = vrot.slane %v4917_v1, 4  ;;  %5346 = vst [vmem:[#allocation4 + $0x1c] sm:$0xf] %v4913_v58 }
 0x3bf   : > { %v4828_v7 = vld [vmem:[#allocation2 + $0x18] sm:$0xf]  ;;  %v12560_v56 = vrot.slane %v4305_v52, 7  ;;  %4790 = vst [vmem:[#allocation4 + $0x30] sm:$0xf] %v4754_v55  ;;  %v9617_v1 = vrot.slane %v5386_v36, 9 }
 0x3c0   : > { %v4036_v0 = vadd.f32 %v12451_v22, %v3996_v2  ;;  %6320 = vmatmul.bf16.vlgmr.msra.gmra.mxu1 %v9636_v9  ;;  %v4119_v29 = vld [vmem:[#allocation2 + $0x3c] sm:$0x1]  ;;  %v4925_v44 = vshrl.u32 %v4828_v7, 16  ;;  %v4634_v19 = vld [vmem:[#allocation2 + $0x24] sm:$0xf]  ;;  %v3879_v51 = vpop.f32.mrf.mxu0  ;;  %v4923_v54 = vsel %vm11614_vm2, %v4918_v41, %v4922_v24  ;;  %v4928_v50 = vshll.u32 %v4828_v7, 16 }
 0x3c1   : > { %v10858_v33 = vld [vmem:[#allocation4 + $0x28] sm:$0xf0]  ;;  %v4120_v31 = vsel %vm12403_vm8, 0, %v4119_v29  ;;  %v4310_v23 = vor.u32 %v4308_v35, %v12560_v56  ;;  %v3880_v58 = vadd.f32 %v3879_v51, %v12364_v45  ;;  %v9643_v16 = vld [vmem:[#allocation4 + $0x20] sm:$0xf]  ;;  %v12572_v45 = vpop.f32.mrf.mxu2 }
 0x3c2   : > { %v4072_v25 = vmax.f32 %v4036_v0, 0.0  ;;  %5347 = vst [vmem:[#allocation4 + $0x28] sm:$0xf] %v4923_v54  ;;  %v9644_v61 = vor.u32 %v10858_v33, %v9643_v16  ;;  %v4927_v55 = vrot.slane %v4925_v44, 4  ;;  %v4930_v52 = vrot.slane %v4928_v50, 5 }
 0x3c3   : > { %4121 = vst [vmem:[#allocation2 + $0x3c] sm:$0x1] %v4120_v31  ;;  %v4635_v2 = vsel %vm12413_vm11, %v4310_v23, %v4634_v19  ;;  %v3957_v41 = vadd.f32 %v3880_v58, %v12236_v27  ;;  %3918 = vmatmul.bf16.gmra.mxu0 %v9458_v12  ;;  %v4755_v7 = vld [vmem:[#allocation2 + $0x1c] sm:$0xf]  ;;  %v4311_v44 = vrot.slane %v12560_v56, 4  ;;  %v12579_v56 = vpop.f32.mrf.mxu3 }
 0x3c4   : > { %v4222_v9 = vpack.c.bf16 %v4072_v25, %v4072_v25  ;;  %v5387_v24 = vld [vmem:[#allocation2 + $0x1c] sm:$0xf]  ;;  %4636 = vst [vmem:[#allocation2 + $0x24] sm:$0xf] %v4635_v2  ;;  %6498 = vmatmul.bf16.vlgmr.msrb.gmra.mxu3 %v9644_v61  ;;  %v5388_v32 = vld [vmem:[#allocation2 + $0x20] sm:$0x1]  ;;  %v4931_v29 = vor.u32 %v4930_v52, %v4927_v55 }
 0x3c5   : > { %v4829_v35 = vld [vmem:[#allocation2 + $0x1c] sm:$0xf]  ;;  %v5504_v0 = vrot.slane %v5387_v24, 5  ;;  %v3997_v19 = vmul.f32 %v12445_v5, %v3957_v41  ;;  %4791 = vst [vmem:[#allocation4 + $0x3c] sm:$0xf] %v4755_v7  ;;  %v5507_v50 = vrot.slane %v5388_v32, 5 }
 0x3c6   : > { %v4934_v36 = vshll.u32 %v4829_v35, 16  ;;  %v4313_v51 = vshrl.u32 %v4222_v9, 16  ;;  %v4316_v33 = vshll.u32 %v4222_v9, 16  ;;  %v4638_v27 = vld [vmem:[#allocation2 + $0x2c] sm:$0x1]  ;;  %v4932_v16 = vrot.slane %v4931_v29, 4 }
 0x3c7   : > { %v10856_v12 = vld [vmem:[#allocation4 + $0x1c] sm:$0xf]  ;;  %v5505_v54 = vsel %vm11729_vm5, %v9617_v1, %v5504_v0  ;;  %v5506_v31 = vrot.slane %v5504_v0, 4  ;;  %v4830_v23 = vld [vmem:[#allocation2 + $0x20] sm:$0x1]  ;;  %v4037_v58 = vadd.f32 %v12451_v22, %v3997_v19  ;;  %13947 = vst [vmem:[#allocation52_spill] sm:$0xff] %v12579_v56 }
 0x3c8   : > { %v4315_v25 = vrot.slane %v4313_v51, 7  ;;  %5654 = vst [vmem:[#allocation4 + $0x38] sm:$0xf] %v5505_v54  ;;  %v4936_v61 = vrot.slane %v4934_v36, 5  ;;  %v3881_v52 = vpop.f32.mrf.mxu0  ;;  %v4938_v9 = vshrl.u32 %v4829_v35, 16  ;;  %v4944_v41 = vshll.u32 %v4830_v23, 16 }
 0x3c9   : > { %v9637_v55 = vld [vmem:[#allocation4 + $0x24] sm:$0xf0]  ;;  %v5508_v2 = vsel %vm11729_vm5, %v5506_v31, %v5507_v50  ;;  %v4176_v7 = vld [vmem:[#allocation2 + $0x44] sm:$0xf]  ;;  %v4073_v32 = vmax.f32 %v4037_v58, 0.0  ;;  %v3882_v51 = vadd.f32 %v3881_v52, %v12370_v30 }
 0x3ca   : > { %v4318_v1 = vor.u32 %v4316_v33, %v4315_v25  ;;  %v4320_v24 = vrot.slane %v4315_v25, 4  ;;  %v9640_v0 = vor.u32 %v10856_v12, %v9637_v55  ;;  %5655 = vst [vmem:[#allocation4 + $0x44] sm:$0xf] %v5508_v2  ;;  %v9469_v19 = vld [vmem:[#allocation3 + $0x170] sm:$0xf]  ;;  %v4937_v36 = vsel %vm11614_vm2, %v4932_v16, %v4936_v61 }
 0x3cb   : > { %v10747_v29 = vld [vmem:[#allocation3 + $0x178] sm:$0xf0]  ;;  %v4940_v54 = vrot.slane %v4938_v9, 4  ;;  %v4223_v31 = vpack.c.bf16 %v4073_v32, %v4073_v32  ;;  %v9647_v33 = vld [vmem:[#allocation4 + $0x30] sm:$0xf]  ;;  %v4177_v12 = vsel %vm12413_vm11, 0, %v4176_v7  ;;  %v3958_v30 = vadd.f32 %v3882_v51, %v12240_v11 }
 0x3cc   : > { %v4319_v56 = vsel %vm12489_vm13, %v4311_v44, %v4318_v1  ;;  %v4639_v35 = vsel %vm12403_vm8, %v4320_v24, %v4638_v27  ;;  %6409 = vmatmul.bf16.vlgmr.msra.gmra.mxu2 %v9640_v0  ;;  %5348 = vst [vmem:[#allocation4 + $0x34] sm:$0xf] %v4937_v36  ;;  %v10860_v50 = vld [vmem:[#allocation4 + $0x38] sm:$0xf0]  ;;  %v4756_v25 = vld [vmem:[#allocation2 + $0x24] sm:$0xf]  ;;  %v12594_v24 = vpop.f32.mrf.mxu2  ;;  %v9470_v7 = vor.u32 %v10747_v29, %v9469_v19 }
 0x3cd   : > { %4637 = vst [vmem:[#allocation2 + $0x28] sm:$0xf] %v4319_v56  ;;  %v4941_v23 = vor.u32 %v4940_v54, %v4936_v61  ;;  %v4322_v58 = vshrl.u32 %v4223_v31, 16  ;;  %v9648_v16 = vor.u32 %v10860_v50, %v9647_v33  ;;  %v4946_v44 = vrot.slane %v4944_v41, 5  ;;  %v4122_v55 = vld [vmem:[#allocation2 + $0x48] sm:$0x1] }
 0x3ce   : > { %4640 = vst [vmem:[#allocation2 + $0x2c] sm:$0x1] %v4639_v35  ;;  %v5389_v52 = vld [vmem:[#allocation2 + $0x24] sm:$0xe]  ;;  %v4641_v27 = vld [vmem:[#allocation2 + $0x30] sm:$0xf]  ;;  %v3998_v2 = vmul.f32 %v12445_v5, %v3958_v30 }
 0x3cf   : > { %v9655_v9 = vld [vmem:[#allocation4 + $0x38] sm:$0xf]  ;;  %v4942_v1 = vrot.slane %v4941_v23, 4  ;;  %4178 = vst [vmem:[#allocation2 + $0x44] sm:$0xf] %v4177_v12  ;;  %v4123_v11 = vsel %vm12403_vm8, 0, %v4122_v55 }
 0x3d0   : > { %v12598_v56 = vrot.slane %v4322_v58, 7  ;;  %v4325_v61 = vshll.u32 %v4223_v31, 16  ;;  %6325 = vmatmul.bf16.gmra.mxu1 %v9648_v16  ;;  %4792 = vst [vmem:[#allocation4 + $0x48] sm:$0xf] %v4756_v25  ;;  %v4831_v41 = vld [vmem:[#allocation2 + $0x24] sm:$0xf]  ;;  %v4038_v32 = vadd.f32 %v12451_v22, %v3998_v2  ;;  %v3884_v0 = vpop.f32.mrf.mxu0  ;;  %v12605_v31 = vpop.f32.mrf.mxu3 }
 0x3d1   : > { %v10861_v51 = vld [vmem:[#allocation4 + $0x40] sm:$0xf0]  ;;  %v4947_v36 = vsel %vm11614_vm2, %v4942_v1, %v4946_v44  ;;  %4124 = vst [vmem:[#allocation2 + $0x48] sm:$0x1] %v4123_v11  ;;  %v4949_v54 = vshrl.u32 %v4831_v41, 16  ;;  %v3885_v33 = vadd.f32 %v3884_v0, %v12379_v21  ;;  %v9618_v29 = vrot.slane %v5389_v52, 9 }
 0x3d2   : > { %v4327_v35 = vor.u32 %v4325_v61, %v12598_v56  ;;  %v9656_v12 = vor.u32 %v10861_v51, %v9655_v9  ;;  %5349 = vst [vmem:[#allocation4 + $0x40] sm:$0xf] %v4947_v36  ;;  %v4074_v19 = vmax.f32 %v4038_v32, 0.0  ;;  %v4952_v50 = vshll.u32 %v4831_v41, 16  ;;  %v10846_v41 = vld [vmem:[#allocation10 + $0x70] sm:$0xff] }
 0x3d3   : > { %13948 = vst [vmem:[#allocation27_spill] sm:$0xff] %v12605_v31  ;;  %v4951_v30 = vrot.slane %v4949_v54, 4  ;;  %v3959_v25 = vadd.f32 %v3885_v33, %v12246_v3  ;;  %3923 = vmatmul.bf16.gmra.mxu0 %v9470_v7  ;;  %v10859_v61 = vld [vmem:[#allocation4 + $0x34] sm:$0xf]  ;;  %v4328_v32 = vrot.slane %v12598_v56, 4  ;;  %7069 = vmatpush.bf16.msrb.mxu2 %v10846_v41 }
 0x3d4   : > { %v4642_v23 = vsel %vm12413_vm11, %v4327_v35, %v4641_v27  ;;  %v4757_v58 = vld [vmem:[#allocation2 + $0x28] sm:$0xf]  ;;  %v4224_v55 = vpack.c.bf16 %v4074_v19, %v4074_v19  ;;  %6503 = vmatmul.bf16.gmra.mxu3 %v9656_v12  ;;  %v4954_v9 = vrot.slane %v4952_v50, 5  ;;  %v4645_v51 = vld [vmem:[#allocation2 + $0x38] sm:$0x1]  ;;  %v12615_v50 = vpop.f32.mrf.mxu2 }
 0x3d5   : > { %v5390_v16 = vld [vmem:[#allocation2 + $0x28] sm:$0xf]  ;;  %4643 = vst [vmem:[#allocation2 + $0x30] sm:$0xf] %v4642_v23  ;;  %v5391_v21 = vld [vmem:[#allocation2 + $0x2c] sm:$0x1]  ;;  %v3999_v1 = vmul.f32 %v12445_v5, %v3959_v25 }
 0x3d6   : > { %v4832_v44 = vld [vmem:[#allocation2 + $0x28] sm:$0xf]  ;;  %v5511_v2 = vrot.slane %v5390_v16, 5  ;;  %4793 = vst [vmem:[#allocation4 + $0x54] sm:$0xf] %v4757_v58  ;;  %v4330_v11 = vshrl.u32 %v4224_v55, 16  ;;  %v4955_v35 = vor.u32 %v4954_v9, %v4951_v30 }
 0x3d7   : > { %v4958_v52 = vshll.u32 %v4832_v44, 16  ;;  %v5514_v7 = vrot.slane %v5391_v21, 5  ;;  %v4333_v0 = vshll.u32 %v4224_v55, 16  ;;  %v4039_v36 = vadd.f32 %v12451_v22, %v3999_v1  ;;  %v4833_v54 = vld [vmem:[#allocation2 + $0x2c] sm:$0x1] }
 0x3d8   : > { %v5512_v27 = vsel %vm11729_vm5, %v9618_v29, %v5511_v2  ;;  %v5513_v3 = vrot.slane %v5511_v2, 4  ;;  %v4332_v33 = vrot.slane %v4330_v11, 7  ;;  %v3886_v19 = vpop.f32.mrf.mxu0  ;;  %v4962_v25 = vshrl.u32 %v4832_v44, 16  ;;  %v4179_v21 = vld [vmem:[#allocation2 + $0x50] sm:$0xf] }
 0x3d9   : > { %5656 = vst [vmem:[#allocation4 + $0x50] sm:$0xf] %v5512_v27  ;;  %v9649_v12 = vld [vmem:[#allocation4 + $0x3c] sm:$0xf0]  ;;  %v4960_v23 = vrot.slane %v4958_v52, 5  ;;  %v4075_v58 = vmax.f32 %v4039_v36, 0.0  ;;  %v3887_v16 = vadd.f32 %v3886_v19, %v12385_v34 }
 0x3da   : > { %v5515_v29 = vsel %vm11729_vm5, %v5513_v3, %v5514_v7  ;;  %v9652_v56 = vor.u32 %v10859_v61, %v9649_v12  ;;  %v4956_v55 = vrot.slane %v4955_v35, 4  ;;  %v4335_v2 = vor.u32 %v4333_v0, %v4332_v33  ;;  %v9659_v31 = vld [vmem:[#allocation4 + $0x48] sm:$0xf]  ;;  %v10750_v52 = vld [vmem:[#allocation3 + $0x190] sm:$0xf0]  ;;  %v12623_v61 = vpop.f32.mrf.mxu3 }
 0x3db   : > { %5657 = vst [vmem:[#allocation4 + $0x5c] sm:$0xf] %v5515_v29  ;;  %v4337_v30 = vrot.slane %v4332_v33, 4  ;;  %v4964_v9 = vrot.slane %v4962_v25, 4  ;;  %v4968_v1 = vshll.u32 %v4833_v54, 16  ;;  %v4225_v11 = vpack.c.bf16 %v4075_v58, %v4075_v58 }
 0x3dc   : > { %6414 = vmatmul.bf16.gmra.mxu2 %v9652_v56  ;;  %v3960_v27 = vadd.f32 %v3887_v16, %v12250_v8  ;;  %v9481_v3 = vld [vmem:[#allocation3 + $0x188] sm:$0xf]  ;;  %v4961_v44 = vsel %vm11614_vm2, %v4956_v55, %v4960_v23  ;;  %v4336_v34 = vsel %vm12489_vm13, %v4328_v32, %v4335_v2  ;;  %v4180_v8 = vsel %vm12413_vm11, 0, %v4179_v21  ;;  %v4758_v33 = vld [vmem:[#allocation2 + $0x30] sm:$0xf] }
 0x3dd   : > { %v4646_v7 = vsel %vm12403_vm8, %v4337_v30, %v4645_v51  ;;  %v10863_v41 = vld [vmem:[#allocation4 + $0x50] sm:$0xf0]  ;;  %v4965_v0 = vor.u32 %v4964_v9, %v4960_v23  ;;  %5350 = vst [vmem:[#allocation4 + $0x4c] sm:$0xf] %v4961_v44  ;;  %v4339_v36 = vshrl.u32 %v4225_v11, 16  ;;  %v3791_v12 = vadd.f32 %v12394_v20, %v12392_v47  ;;  %v10838_v51 = vld [vmem:[#allocation10 + $0x30] sm:$0xff] }
 0x3de   : > { %4644 = vst [vmem:[#allocation2 + $0x34] sm:$0xf] %v4336_v34  ;;  %v4000_v54 = vmul.f32 %v12445_v5, %v3960_v27  ;;  %v9660_v35 = vor.u32 %v10863_v41, %v9659_v31  ;;  %v4648_v32 = vld [vmem:[#allocation2 + $0x3c] sm:$0xf]  ;;  %v4970_v29 = vrot.slane %v4968_v1, 5  ;;  %v4342_v23 = vshll.u32 %v4225_v11, 16  ;;  %6980 = vmatpush.bf16.msrb.mxu1 %v10838_v51  ;;  %v12642_v27 = vpop.f32.mrf.mxu2 }
 0x3df   : > { %4647 = vst [vmem:[#allocation2 + $0x38] sm:$0x1] %v4646_v7  ;;  %v4966_v19 = vrot.slane %v4965_v0, 4  ;;  %v12634_v25 = vrot.slane %v4339_v36, 7  ;;  %v9482_v56 = vor.u32 %v10750_v52, %v9481_v3  ;;  %v4125_v55 = vld [vmem:[#allocation2 + $0x54] sm:$0x1]  ;;  %v3041_v36 = vadd.f32 %v12242_v38, %v12260_v39 }
 0x3e0   : > { %v4040_v58 = vadd.f32 %v12451_v22, %v4000_v54  ;;  %6330 = vmatmul.bf16.gmra.mxu1 %v9660_v35  ;;  %v9667_v16 = vld [vmem:[#allocation4 + $0x50] sm:$0xf]  ;;  %4181 = vst [vmem:[#allocation2 + $0x50] sm:$0xf] %v4180_v8  ;;  %v3889_v31 = vpop.f32.mrf.mxu0  ;;  %v4126_v20 = vsel %vm12403_vm8, 0, %v4125_v55  ;;  %v3793_v54 = vadd.f32 %v12411_v43, %v12409_v13 }
 0x3e1   : > { %v4971_v47 = vsel %vm11614_vm2, %v4966_v19, %v4970_v29  ;;  %4794 = vst [vmem:[#allocation4 + $0x60] sm:$0xf] %v4758_v33  ;;  %v4344_v2 = vor.u32 %v4342_v23, %v12634_v25  ;;  %v3890_v9 = vadd.f32 %v3889_v31, %v3791_v12  ;;  %v4834_v1 = vld [vmem:[#allocation2 + $0x30] sm:$0xf]  ;;  %v4652_v29 = vld [vmem:[#allocation2 + $0x44] sm:$0x1] }
 0x3e2   : > { %v10864_v21 = vld [vmem:[#allocation4 + $0x58] sm:$0xf0]  ;;  %v4076_v30 = vmax.f32 %v4040_v58, 0.0  ;;  %5351 = vst [vmem:[#allocation4 + $0x58] sm:$0xf] %v4971_v47  ;;  %v4973_v3 = vshrl.u32 %v4834_v1, 16  ;;  %v12652_v12 = vpop.f32.mrf.mxu3 }
 0x3e3   : > { %v9668_v11 = vor.u32 %v10864_v21, %v9667_v16  ;;  %4127 = vst [vmem:[#allocation2 + $0x54] sm:$0x1] %v4126_v20  ;;  %v4649_v52 = vsel %vm12413_vm11, %v4344_v2, %v4648_v32  ;;  %v3961_v34 = vadd.f32 %v3890_v9, %v12256_v57  ;;  %3928 = vmatmul.bf16.gmra.mxu0 %v9482_v56  ;;  %v5392_v7 = vld [vmem:[#allocation2 + $0x30] sm:$0xe]  ;;  %v4976_v41 = vshll.u32 %v4834_v1, 16 }
 0x3e4   : > { %v4226_v44 = vpack.c.bf16 %v4076_v30, %v4076_v30  ;;  %4650 = vst [vmem:[#allocation2 + $0x3c] sm:$0xf] %v4649_v52  ;;  %v4345_v32 = vrot.slane %v12634_v25, 4  ;;  %v9619_v51 = vrot.slane %v5392_v7, 9  ;;  %v10862_v39 = vld [vmem:[#allocation4 + $0x4c] sm:$0xf] }
 0x3e5   : > { %6508 = vmatmul.bf16.gmra.mxu3 %v9668_v11  ;;  %v4759_v0 = vld [vmem:[#allocation2 + $0x34] sm:$0xf]  ;;  %v4001_v33 = vmul.f32 %v12445_v5, %v3961_v34  ;;  %v4975_v13 = vrot.slane %v4973_v3, 4  ;;  %v4978_v21 = vrot.slane %v4976_v41, 5  ;;  %v12658_v9 = vld [vmem:[#allocation3 + $0x1a0] sm:$0xf] }
 0x3e6   : > { %v5393_v8 = vld [vmem:[#allocation2 + $0x34] sm:$0xf]  ;;  %v4347_v35 = vshrl.u32 %v4226_v44, 16  ;;  %4795 = vst [vmem:[#allocation4 + $0x6c] sm:$0xf] %v4759_v0  ;;  %v4350_v19 = vshll.u32 %v4226_v44, 16 }
 0x3e7   : > { %v5394_v57 = vld [vmem:[#allocation2 + $0x38] sm:$0x1]  ;;  %v5518_v23 = vrot.slane %v5393_v8, 5  ;;  %v4835_v58 = vld [vmem:[#allocation2 + $0x34] sm:$0xf]  ;;  %v4041_v38 = vadd.f32 %v12451_v22, %v4001_v33  ;;  %v4979_v44 = vor.u32 %v4978_v21, %v4975_v13 }
 0x3e8   : > { %v4349_v56 = vrot.slane %v4347_v35, 7  ;;  %v5521_v16 = vrot.slane %v5394_v57, 5  ;;  %v3891_v55 = vpop.f32.mrf.mxu0  ;;  %v4982_v47 = vshll.u32 %v4835_v58, 16  ;;  %v12660_v1 = vld [vmem:[#allocation3 + $0x1a8] sm:$0xf0]  ;;  %v4986_v35 = vshrl.u32 %v4835_v58, 16 }
 0x3e9   : > { %v9661_v43 = vld [vmem:[#allocation4 + $0x54] sm:$0xf0]  ;;  %v5519_v5 = vsel %vm11729_vm5, %v9619_v51, %v5518_v23  ;;  %v5520_v31 = vrot.slane %v5518_v23, 4  ;;  %v4077_v2 = vmax.f32 %v4041_v38, 0.0  ;;  %v3892_v22 = vadd.f32 %v3891_v55, %v3793_v54  ;;  %v9671_v11 = vld [vmem:[#allocation4 + $0x60] sm:$0xf]  ;;  %v12670_v51 = vpop.f32.mrf.mxu2 }
 0x3ea   : > { %v4352_v25 = vor.u32 %v4350_v19, %v4349_v56  ;;  %v4354_v20 = vrot.slane %v4349_v56, 4  ;;  %v9664_v30 = vor.u32 %v10862_v39, %v9661_v43  ;;  %5658 = vst [vmem:[#allocation4 + $0x68] sm:$0xf] %v5519_v5  ;;  %v4836_v52 = vld [vmem:[#allocation2 + $0x38] sm:$0x1]  ;;  %v4984_v34 = vrot.slane %v4982_v47, 5  ;;  %v12686_v21 = vpop.f32.mrf.mxu3 }
 0x3eb   : > { %v5522_v3 = vsel %vm11729_vm5, %v5520_v31, %v5521_v16  ;;  %v4182_v7 = vld [vmem:[#allocation2 + $0x5c] sm:$0xf]  ;;  %v4227_v8 = vpack.c.bf16 %v4077_v2, %v4077_v2  ;;  %v3796_v54 = vadd.f32 %v12424_v4, %v12426_v63  ;;  %v3962_v57 = vadd.f32 %v3892_v22, %v3041_v36  ;;  %v4655_v16 = vld [vmem:[#allocation2 + $0x48] sm:$0xf]  ;;  %v12675_v58 = vld [vmem:[%s13792_s2] ss:$0 sm:$0xff] }
 0x3ec   : > { %v4353_v41 = vsel %vm12489_vm13, %v4345_v32, %v4352_v25  ;;  %v4653_v0 = vsel %vm12403_vm8, %v4354_v20, %v4652_v29  ;;  %6419 = vmatmul.bf16.gmra.mxu2 %v9664_v30  ;;  %5659 = vst [vmem:[#allocation4 + $0x74] sm:$0xf] %v5522_v3  ;;  %v4760_v33 = vld [vmem:[#allocation2 + $0x3c] sm:$0xf]  ;;  %v4980_v23 = vrot.slane %v4979_v44, 4  ;;  %v4988_v38 = vrot.slane %v4986_v35, 4 }
 0x3ed   : > { %4651 = vst [vmem:[#allocation2 + $0x40] sm:$0xf] %v4353_v41  ;;  %v10866_v19 = vld [vmem:[#allocation4 + $0x68] sm:$0xf0]  ;;  %v4356_v56 = vshrl.u32 %v4227_v8, 16  ;;  %v4992_v39 = vshll.u32 %v4836_v52, 16  ;;  %v4002_v4 = vmul.f32 %v12675_v58, %v3962_v57  ;;  %v9494_v63 = vor.u32 %v12660_v1, %v12658_v9 }
 0x3ee   : > { %4654 = vst [vmem:[#allocation2 + $0x44] sm:$0x1] %v4653_v0  ;;  %v9672_v32 = vor.u32 %v10866_v19, %v9671_v11  ;;  %v10983_v29 = vld [vmem:[#allocation10 + $0x1b8] sm:$0xff]  ;;  %v4985_v36 = vsel %vm11614_vm2, %v4980_v23, %v4984_v34  ;;  %v4183_v13 = vsel %vm12413_vm11, 0, %v4182_v7  ;;  %v4359_v5 = vshll.u32 %v4227_v8, 16 }
 0x3ef   : > { %4796 = vst [vmem:[#allocation4 + $0x78] sm:$0xf] %v4760_v33  ;;  %v4128_v43 = vld [vmem:[#allocation2 + $0x60] sm:$0x1]  ;;  %v12684_v55 = vrot.slane %v4356_v56, 7  ;;  %v4989_v31 = vor.u32 %v4988_v38, %v4984_v34  ;;  %7760 = vmatpush.bf16.msra.mxu0 %v10983_v29  ;;  %v4994_v3 = vrot.slane %v4992_v39, 5  ;;  %v3046_v29 = vadd.f32 %v12252_v17, %v12271_v18 }
 0x3f0   : > { %6335 = vmatmul.bf16.gmra.mxu1 %v9672_v32  ;;  %5352 = vst [vmem:[#allocation4 + $0x64] sm:$0xf] %v4985_v36  ;;  %v4129_v47 = vsel %vm12403_vm8, 0, %v4128_v43  ;;  %v12693_v25 = vld [vmem:[%s13793_s3] ss:$0 sm:$0xff]  ;;  %v3894_v2 = vpop.f32.mrf.mxu0 }
 0x3f1   : > { %v4042_v20 = vadd.f32 %v12693_v25, %v4002_v4  ;;  %v9679_v30 = vld [vmem:[#allocation4 + $0x68] sm:$0xf]  ;;  %4184 = vst [vmem:[#allocation2 + $0x5c] sm:$0xf] %v4183_v13  ;;  %v5395_v9 = vld [vmem:[#allocation2 + $0x3c] sm:$0xe]  ;;  %v4361_v1 = vor.u32 %v4359_v5, %v12684_v55  ;;  %v3895_v22 = vadd.f32 %v3894_v2, %v3796_v54  ;;  %v3798_v4 = vadd.f32 %v12434_v10, %v12438_v6  ;;  %v12707_v36 = vpop.f32.mrf.mxu2 }
 0x3f2   : > { %v4990_v11 = vrot.slane %v4989_v31, 4  ;;  %4130 = vst [vmem:[#allocation2 + $0x60] sm:$0x1] %v4129_v47  ;;  %v4837_v52 = vld [vmem:[#allocation2 + $0x3c] sm:$0xf]  ;;  %v9620_v7 = vrot.slane %v5395_v9, 9 }
 0x3f3   : > { %v4078_v44 = vmax.f32 %v4042_v20, 0.0  ;;  %v10867_v34 = vld [vmem:[#allocation4 + $0x70] sm:$0xf0]  ;;  %v4997_v41 = vshrl.u32 %v4837_v52, 16  ;;  %v5000_v0 = vshll.u32 %v4837_v52, 16  ;;  %v4656_v8 = vsel %vm12413_vm11, %v4361_v1, %v4655_v16  ;;  %3933 = vmatmul.bf16.gmra.mxu0 %v9494_v63 }
 0x3f4   : > { %v3963_v35 = vadd.f32 %v3895_v22, %v12267_v49  ;;  %v9680_v33 = vor.u32 %v10867_v34, %v9679_v30  ;;  %v4995_v57 = vsel %vm11614_vm2, %v4990_v11, %v4994_v3  ;;  %v4761_v54 = vld [vmem:[#allocation2 + $0x40] sm:$0xf]  ;;  %4657 = vst [vmem:[#allocation2 + $0x48] sm:$0xf] %v4656_v8  ;;  %v4659_v5 = vld [vmem:[#allocation2 + $0x50] sm:$0x1]  ;;  %v12713_v11 = vpop.f32.mrf.mxu3 }
 0x3f5   : > { %v5396_v19 = vld [vmem:[#allocation2 + $0x40] sm:$0xf]  ;;  %v4228_v56 = vpack.c.bf16 %v4078_v44, %v4078_v44  ;;  %v5397_v32 = vld [vmem:[#allocation2 + $0x44] sm:$0x1]  ;;  %v4999_v39 = vrot.slane %v4997_v41, 4  ;;  %v5002_v49 = vrot.slane %v5000_v0, 5 }
 0x3f6   : > { %v4838_v23 = vld [vmem:[#allocation2 + $0x40] sm:$0xf]  ;;  %v5525_v38 = vrot.slane %v5396_v19, 5  ;;  %v4003_v16 = vmul.f32 %v12675_v58, %v3963_v35  ;;  %6513 = vmatmul.bf16.gmra.mxu3 %v9680_v33  ;;  %5353 = vst [vmem:[#allocation4 + $0x70] sm:$0xf] %v4995_v57  ;;  %v5528_v43 = vrot.slane %v5397_v32, 5 }
 0x3f7   : > { %v4364_v63 = vshrl.u32 %v4228_v56, 16  ;;  %4797 = vst [vmem:[#allocation4 + $0x84] sm:$0xf] %v4761_v54  ;;  %v5003_v18 = vor.u32 %v5002_v49, %v4999_v39  ;;  %v5006_v47 = vshll.u32 %v4838_v23, 16  ;;  %v4362_v20 = vrot.slane %v12684_v55, 4  ;;  %v10845_v44 = vld [vmem:[#allocation10 + $0x68] sm:$0xff] }
 0x3f8   : > { %v5526_v13 = vsel %vm11729_vm5, %v9620_v7, %v5525_v38  ;;  %v4043_v31 = vadd.f32 %v12693_v25, %v4003_v16  ;;  %v5527_v17 = vrot.slane %v5525_v38, 4  ;;  %v4367_v30 = vshll.u32 %v4228_v56, 16  ;;  %v3896_v10 = vpop.f32.mrf.mxu0  ;;  %v4839_v6 = vld [vmem:[#allocation2 + $0x44] sm:$0x1]  ;;  %v4185_v34 = vld [vmem:[#allocation2 + $0x68] sm:$0xf]  ;;  %7070 = vmatpush.bf16.msrb.mxu2 %v10845_v44 }
 0x3f9   : > { %5660 = vst [vmem:[#allocation4 + $0x80] sm:$0xf] %v5526_v13  ;;  %v4366_v2 = vrot.slane %v4364_v63, 7  ;;  %v5010_v9 = vshrl.u32 %v4838_v23, 16  ;;  %v3897_v22 = vadd.f32 %v3896_v10, %v3798_v4  ;;  %v5004_v52 = vrot.slane %v5003_v18, 4  ;;  %v10982_v7 = vld [vmem:[#allocation10 + $0x1b0] sm:$0xff]  ;;  %v12738_v44 = vpop.f32.mrf.mxu2 }
 0x3fa   : > { %v4079_v1 = vmax.f32 %v4043_v31, 0.0  ;;  %v5529_v3 = vsel %vm11729_vm5, %v5527_v17, %v5528_v43  ;;  %v10865_v8 = vld [vmem:[#allocation4 + $0x64] sm:$0xf]  ;;  %v12717_v55 = vld [vmem:[#allocation3 + $0x1b8] sm:$0xf]  ;;  %v5008_v33 = vrot.slane %v5006_v47, 5  ;;  %7761 = vmatpush.bf16.msra.mxu0 %v10982_v7  ;;  %v3801_v43 = vadd.f32 %v12455_v26, %v12465_v15 }
 0x3fb   : > { %v4369_v41 = vor.u32 %v4367_v30, %v4366_v2  ;;  %v4371_v0 = vrot.slane %v4366_v2, 4  ;;  %v12719_v35 = vld [vmem:[#allocation3 + $0x1c0] sm:$0xf0]  ;;  %5661 = vst [vmem:[#allocation4 + $0x8c] sm:$0xf] %v5529_v3  ;;  %v5012_v57 = vrot.slane %v5010_v9, 4  ;;  %v3964_v19 = vadd.f32 %v3897_v22, %v3046_v29 }
 0x3fc   : > { %v4229_v54 = vpack.c.bf16 %v4079_v1, %v4079_v1  ;;  %v9683_v23 = vld [vmem:[#allocation4 + $0x78] sm:$0xf]  ;;  %v5016_v56 = vshll.u32 %v4839_v6, 16  ;;  %v4186_v32 = vsel %vm12413_vm11, 0, %v4185_v34  ;;  %v4762_v39 = vld [vmem:[#allocation2 + $0x48] sm:$0xf]  ;;  %v5009_v63 = vsel %vm11614_vm2, %v5004_v52, %v5008_v33 }
 0x3fd   : > { %v10981_v38 = vld [vmem:[#allocation10 + $0x1a8] sm:$0xff]  ;;  %v4370_v16 = vsel %vm12489_vm13, %v4362_v20, %v4369_v41  ;;  %v4660_v49 = vsel %vm12403_vm8, %v4371_v0, %v4659_v5  ;;  %v9673_v4 = vld [vmem:[#allocation4 + $0x6c] sm:$0xf0]  ;;  %v5013_v29 = vor.u32 %v5012_v57, %v5008_v33  ;;  %4187 = vst [vmem:[#allocation2 + $0x68] sm:$0xf] %v4186_v32  ;;  %v4004_v18 = vmul.f32 %v12675_v58, %v3964_v19 }
 0x3fe   : > { %v1112_v13 = vld [vmem:[%s11589_s23 + $0xe4] sm:$0xe]  ;;  %4658 = vst [vmem:[#allocation2 + $0x4c] sm:$0xf] %v4370_v16  ;;  %v4373_v31 = vshrl.u32 %v4229_v54, 16  ;;  %v9676_v17 = vor.u32 %v10865_v8, %v9673_v4  ;;  %v4376_v20 = vshll.u32 %v4229_v54, 16  ;;  %v9506_v26 = vor.u32 %v12719_v35, %v12717_v55  ;;  %7762 = vmatpush.bf16.msra.mxu0 %v10981_v38  ;;  %v12750_v38 = vpop.f32.mrf.mxu3 }
 0x3ff   : > { %v10869_v47 = vld [vmem:[#allocation4 + $0x80] sm:$0xf0]  ;;  %4661 = vst [vmem:[#allocation2 + $0x50] sm:$0x1] %v4660_v49  ;;  %v4662_v2 = vld [vmem:[#allocation2 + $0x54] sm:$0xf]  ;;  %v4044_v1 = vadd.f32 %v12693_v25, %v4004_v18 }
 0x400   : > { %v9684_v5 = vor.u32 %v10869_v47, %v9683_v23  ;;  %v5014_v30 = vrot.slane %v5013_v29, 4  ;;  %v5018_v10 = vrot.slane %v5016_v56, 5  ;;  %v10980_v6 = vld [vmem:[#allocation10 + $0x1a0] sm:$0xff]  ;;  %v12733_v9 = vrot.slane %v4373_v31, 7  ;;  %6424 = vmatmul.bf16.gmra.mxu2 %v9676_v17  ;;  %v9691_v15 = vld [vmem:[#allocation4 + $0x80] sm:$0xf]  ;;  %v3899_v52 = vpop.f32.mrf.mxu0 }
 0x401   : > { %5354 = vst [vmem:[#allocation4 + $0x7c] sm:$0xf] %v5009_v63  ;;  %v10837_v22 = vld [vmem:[#allocation10 + $0x28] sm:$0xff]  ;;  %v4131_v3 = vld [vmem:[#allocation2 + $0x6c] sm:$0x1]  ;;  %v8678_v0 = vrot.slane %v1112_v13, 9  ;;  %v3900_v35 = vadd.f32 %v3899_v52, %v3801_v43 }
 0x402   : > { %6340 = vmatmul.bf16.gmra.mxu1 %v9684_v5  ;;  %v5019_v34 = vsel %vm11614_vm2, %v5014_v30, %v5018_v10  ;;  %4798 = vst [vmem:[#allocation4 + $0x90] sm:$0xf] %v4762_v39  ;;  %v4132_v7 = vsel %vm12403_vm8, 0, %v4131_v3  ;;  %v1113_v41 = vld [vmem:[%s11589_s23 + $0xe8] sm:$0xf]  ;;  %v4378_v8 = vor.u32 %v4376_v20, %v12733_v9  ;;  %v4080_v55 = vmax.f32 %v4044_v1, 0.0  ;;  %7763 = vmatpush.bf16.msra.mxu0 %v10980_v6 }
 0x403   : > { %v10870_v33 = vld [vmem:[#allocation4 + $0x88] sm:$0xf0]  ;;  %5355 = vst [vmem:[#allocation4 + $0x88] sm:$0xf] %v5019_v34  ;;  %6981 = vmatpush.bf16.msrb.mxu1 %v10837_v22  ;;  %v1313_v19 = vrot.slane %v1113_v41, 5  ;;  %v3965_v32 = vadd.f32 %v3900_v35, %v12278_v40  ;;  %3938 = vmatmul.bf16.gmra.mxu0 %v9506_v26  ;;  %v4379_v13 = vrot.slane %v12733_v9, 4 }
 0x404   : > { %v9692_v57 = vor.u32 %v10870_v33, %v9691_v15  ;;  %4133 = vst [vmem:[#allocation2 + $0x6c] sm:$0x1] %v4132_v7  ;;  %v1114_v54 = vld [vmem:[%s11589_s23 + $0xec] sm:$0x1]  ;;  %v4663_v23 = vsel %vm12413_vm11, %v4378_v8, %v4662_v2  ;;  %v4230_v56 = vpack.c.bf16 %v4080_v55, %v4080_v55  ;;  %v5398_v16 = vld [vmem:[#allocation2 + $0x48] sm:$0xe] }
 0x405   : > { %v1316_v39 = vrot.slane %v1114_v54, 5  ;;  %4664 = vst [vmem:[#allocation2 + $0x54] sm:$0xf] %v4663_v23  ;;  %v4763_v49 = vld [vmem:[#allocation2 + $0x4c] sm:$0xf]  ;;  %v1314_v4 = vsel %vm11729_vm5, %v8678_v0, %v1313_v19  ;;  %v1315_v63 = vrot.slane %v1313_v19, 4  ;;  %v4005_v31 = vmul.f32 %v12675_v58, %v3965_v32  ;;  %v12763_v54 = vpop.f32.mrf.mxu2 }
 0x406   : > { %v10979_v29 = vld [vmem:[#allocation10 + $0x198] sm:$0xff]  ;;  %v4381_v43 = vshrl.u32 %v4230_v56, 16  ;;  %6518 = vmatmul.bf16.gmra.mxu3 %v9692_v57  ;;  %4799 = vst [vmem:[#allocation4 + $0x9c] sm:$0xf] %v4763_v49  ;;  %v5399_v40 = vld [vmem:[#allocation2 + $0x4c] sm:$0xf] }
 0x407   : > { %v4384_v17 = vshll.u32 %v4230_v56, 16  ;;  %v4666_v18 = vld [vmem:[#allocation2 + $0x5c] sm:$0x1]  ;;  %v1317_v47 = vsel %vm11729_vm5, %v1315_v63, %v1316_v39  ;;  %1396 = vst [vmem:[#allocation3 + $0x1d0] sm:$0xf] %v1314_v4  ;;  %v9621_v2 = vrot.slane %v5398_v16, 9  ;;  %v4045_v30 = vadd.f32 %v12693_v25, %v4005_v31  ;;  %7764 = vmatpush.bf16.msra.mxu0 %v10979_v29 }
 0x408   : > { %v5400_v20 = vld [vmem:[#allocation2 + $0x50] sm:$0x1]  ;;  %v4383_v5 = vrot.slane %v4381_v43, 7  ;;  %v10868_v10 = vld [vmem:[#allocation4 + $0x7c] sm:$0xf]  ;;  %v5532_v6 = vrot.slane %v5399_v40, 5  ;;  %v3901_v52 = vpop.f32.mrf.mxu0 }
 0x409   : > { %1397 = vst [vmem:[#allocation3 + $0x1dc] sm:$0xf] %v1317_v47  ;;  %v13949_v9 = vld [vmem:[#allocation42_spill] sm:$0xff]  ;;  %v13950_v1 = vld [vmem:[#allocation39_spill] sm:$0xff]  ;;  %v5535_v34 = vrot.slane %v5400_v20, 5  ;;  %v4081_v55 = vmax.f32 %v4045_v30, 0.0 }
 0x40a   : > { %v3051_v26 = vadd.f32 %v13950_v1, %v13949_v9  ;;  %v13951_v15 = vld [vmem:[#allocation23_spill] sm:$0xff]  ;;  %v9685_v3 = vld [vmem:[#allocation4 + $0x84] sm:$0xf0]  ;;  %v4840_v7 = vld [vmem:[#allocation2 + $0x48] sm:$0xf]  ;;  %v4386_v0 = vor.u32 %v4384_v17, %v4383_v5  ;;  %v4388_v8 = vrot.slane %v4383_v5, 4  ;;  %v5533_v23 = vsel %vm11729_vm5, %v9621_v2, %v5532_v6 }
 0x40b   : > { %v3803_v22 = vadd.f32 %v13951_v15, %v12476_v59  ;;  %v10978_v41 = vld [vmem:[#allocation10 + $0x190] sm:$0xff]  ;;  %v9688_v35 = vor.u32 %v10868_v10, %v9685_v3  ;;  %v4841_v33 = vld [vmem:[#allocation2 + $0x4c] sm:$0xf]  ;;  %v9695_v19 = vld [vmem:[#allocation4 + $0x90] sm:$0xf]  ;;  %v5534_v56 = vrot.slane %v5532_v6, 4  ;;  %v4231_v49 = vpack.c.bf16 %v4081_v55, %v4081_v55 }
 0x40c   : > { %v4842_v59 = vld [vmem:[#allocation2 + $0x50] sm:$0x1]  ;;  %v5021_v32 = vshrl.u32 %v4840_v7, 16  ;;  %v4387_v39 = vsel %vm12489_vm13, %v4379_v13, %v4386_v0  ;;  %v4667_v16 = vsel %vm12403_vm8, %v4388_v8, %v4666_v18  ;;  %5662 = vst [vmem:[#allocation4 + $0x98] sm:$0xf] %v5533_v23  ;;  %v5024_v4 = vshll.u32 %v4840_v7, 16  ;;  %7765 = vmatpush.bf16.msra.mxu0 %v10978_v41  ;;  %v12773_v18 = vpop.f32.mrf.mxu3 }
 0x40d   : > { %v3902_v57 = vadd.f32 %v3901_v52, %v3803_v22  ;;  %v4188_v63 = vld [vmem:[#allocation2 + $0x74] sm:$0xf]  ;;  %4665 = vst [vmem:[#allocation2 + $0x58] sm:$0xf] %v4387_v39  ;;  %v5536_v17 = vsel %vm11729_vm5, %v5534_v56, %v5535_v34  ;;  %v5030_v20 = vshll.u32 %v4841_v33, 16  ;;  %v4390_v13 = vshrl.u32 %v4231_v49, 16 }
 0x40e   : > { %v10977_v29 = vld [vmem:[#allocation10 + $0x188] sm:$0xff]  ;;  %v5023_v47 = vrot.slane %v5021_v32, 4  ;;  %4668 = vst [vmem:[#allocation2 + $0x5c] sm:$0x1] %v4667_v16  ;;  %v4393_v2 = vshll.u32 %v4231_v49, 16  ;;  %v3806_v10 = vadd.f32 %v12485_v60, %v12499_v14  ;;  %v5026_v1 = vrot.slane %v5024_v4, 5 }
 0x40f   : > { %v4764_v43 = vld [vmem:[#allocation2 + $0x54] sm:$0xf]  ;;  %v3966_v31 = vadd.f32 %v3902_v57, %v3051_v26  ;;  %v9517_v30 = vld [vmem:[#allocation3 + $0x1d0] sm:$0xf]  ;;  %5663 = vst [vmem:[#allocation4 + $0xa4] sm:$0xf] %v5536_v17 }
 0x410   : > { %v10872_v40 = vld [vmem:[#allocation4 + $0x98] sm:$0xf0]  ;;  %v5032_v26 = vrot.slane %v5030_v20, 5  ;;  %v12778_v15 = vrot.slane %v4390_v13, 7  ;;  %6429 = vmatmul.bf16.gmra.mxu2 %v9688_v35  ;;  %v5034_v3 = vshrl.u32 %v4841_v33, 16  ;;  %v5040_v52 = vshll.u32 %v4842_v59, 16  ;;  %v3904_v41 = vpop.f32.mrf.mxu0  ;;  %7766 = vmatpush.bf16.msra.mxu0 %v10977_v29 }
 0x411   : > { %v9696_v5 = vor.u32 %v10872_v40, %v9695_v19  ;;  %v4006_v6 = vmul.f32 %v12675_v58, %v3966_v31  ;;  %v10759_v9 = vld [vmem:[#allocation3 + $0x1d8] sm:$0xf0]  ;;  %4800 = vst [vmem:[#allocation4 + $0xa8] sm:$0xf] %v4764_v43  ;;  %v4669_v34 = vld [vmem:[#allocation2 + $0x60] sm:$0xf]  ;;  %v5027_v0 = vor.u32 %v5026_v1, %v5023_v47  ;;  %v3905_v57 = vadd.f32 %v3904_v41, %v3806_v10  ;;  %v12789_v31 = vpop.f32.mrf.mxu2 }
 0x412   : > { %v9518_v22 = vor.u32 %v10759_v9, %v9517_v30  ;;  %v4189_v60 = vsel %vm12413_vm11, 0, %v4188_v63  ;;  %v4134_v14 = vld [vmem:[#allocation2 + $0x78] sm:$0x1]  ;;  %v10976_v8 = vld [vmem:[#allocation10 + $0x180] sm:$0xff]  ;;  %v4395_v55 = vor.u32 %v4393_v2, %v12778_v15  ;;  %v5036_v35 = vrot.slane %v5034_v3, 4  ;;  %v13952_v39 = vld [vmem:[#allocation46_spill] sm:$0xff] }
 0x413   : > { %v4046_v7 = vadd.f32 %v12693_v25, %v4006_v6  ;;  %6345 = vmatmul.bf16.gmra.mxu1 %v9696_v5  ;;  %4190 = vst [vmem:[#allocation2 + $0x74] sm:$0xf] %v4189_v60  ;;  %v5401_v33 = vld [vmem:[#allocation2 + $0x54] sm:$0xe]  ;;  %v5028_v23 = vrot.slane %v5027_v0, 4  ;;  %v5042_v56 = vrot.slane %v5040_v52, 5  ;;  %v3967_v16 = vadd.f32 %v3905_v57, %v13952_v39 }
 0x414   : > { %v4135_v59 = vsel %vm12403_vm8, 0, %v4134_v14  ;;  %v4670_v32 = vsel %vm12413_vm11, %v4395_v55, %v4669_v34  ;;  %3943 = vmatmul.bf16.gmra.mxu0 %v9518_v22  ;;  %v9703_v49 = vld [vmem:[#allocation4 + $0x98] sm:$0xf]  ;;  %v5037_v4 = vor.u32 %v5036_v35, %v5032_v26  ;;  %v4765_v63 = vld [vmem:[#allocation2 + $0x58] sm:$0xf]  ;;  %v9622_v47 = vrot.slane %v5401_v33, 9  ;;  %v12801_v60 = vpop.f32.mrf.mxu3 }
 0x415   : > { %v4082_v19 = vmax.f32 %v4046_v7, 0.0  ;;  %4136 = vst [vmem:[#allocation2 + $0x78] sm:$0x1] %v4135_v59  ;;  %v5402_v29 = vld [vmem:[#allocation2 + $0x58] sm:$0xf]  ;;  %v5033_v40 = vsel %vm11614_vm2, %v5028_v23, %v5032_v26  ;;  %7767 = vmatpush.bf16.msra.mxu0 %v10976_v8  ;;  %v10844_v20 = vld [vmem:[#allocation10 + $0x60] sm:$0xff]  ;;  %v4007_v13 = vmul.f32 %v12675_v58, %v3967_v16 }
 0x416   : > { %4671 = vst [vmem:[#allocation2 + $0x60] sm:$0xf] %v4670_v32  ;;  %v5403_v17 = vld [vmem:[#allocation2 + $0x5c] sm:$0x1]  ;;  %v5038_v5 = vrot.slane %v5037_v4, 4  ;;  %v5539_v30 = vrot.slane %v5402_v29, 5  ;;  %7071 = vmatpush.bf16.msrb.mxu2 %v10844_v20 }
 0x417   : > { %v4232_v43 = vpack.c.bf16 %v4082_v19, %v4082_v19  ;;  %v10873_v2 = vld [vmem:[#allocation4 + $0xa0] sm:$0xf0]  ;;  %5356 = vst [vmem:[#allocation4 + $0x94] sm:$0xf] %v5033_v40  ;;  %v13953_v10 = vld [vmem:[#allocation49_spill] sm:$0xff]  ;;  %v4047_v41 = vadd.f32 %v12693_v25, %v4007_v13  ;;  %v4396_v57 = vrot.slane %v12778_v15, 4 }
 0x418   : > { %v13954_v6 = vld [vmem:[#allocation41_spill] sm:$0xff]  ;;  %v13956_v22 = vld [vmem:[#allocation51_spill] sm:$0xff]  ;;  %v9704_v34 = vor.u32 %v10873_v2, %v9703_v49  ;;  %4801 = vst [vmem:[#allocation4 + $0xb4] sm:$0xf] %v4765_v63  ;;  %v4843_v26 = vld [vmem:[#allocation2 + $0x54] sm:$0xf]  ;;  %v5043_v0 = vsel %vm11614_vm2, %v5038_v5, %v5042_v56  ;;  %v5540_v14 = vsel %vm11729_vm5, %v9622_v47, %v5539_v30  ;;  %v3906_v19 = vpop.f32.mrf.mxu0 }
 0x419   : > { %v3056_v9 = vadd.f32 %v13954_v6, %v13953_v10  ;;  %v13955_v1 = vld [vmem:[#allocation25_spill] sm:$0xff]  ;;  %v4398_v52 = vshrl.u32 %v4232_v43, 16  ;;  %v5541_v8 = vrot.slane %v5539_v30, 4  ;;  %v4844_v55 = vld [vmem:[#allocation2 + $0x58] sm:$0xf]  ;;  %v4401_v33 = vshll.u32 %v4232_v43, 16 }
 0x41a   : > { %v3808_v3 = vadd.f32 %v13956_v22, %v13955_v1  ;;  %v4673_v7 = vld [vmem:[#allocation2 + $0x68] sm:$0x1]  ;;  %6523 = vmatmul.bf16.gmra.mxu3 %v9704_v34  ;;  %5357 = vst [vmem:[#allocation4 + $0xa0] sm:$0xf] %v5043_v0  ;;  %v5542_v23 = vrot.slane %v5403_v17, 5  ;;  %v4083_v59 = vmax.f32 %v4047_v41, 0.0  ;;  %v12813_v34 = vpop.f32.mrf.mxu2 }
 0x41b   : > { %v4400_v35 = vrot.slane %v4398_v52, 7  ;;  %5664 = vst [vmem:[#allocation4 + $0xb0] sm:$0xf] %v5540_v14  ;;  %v5045_v39 = vshrl.u32 %v4843_v26, 16  ;;  %v5048_v56 = vshll.u32 %v4843_v26, 16  ;;  %v5054_v29 = vshll.u32 %v4844_v55, 16 }
 0x41c   : > { %v3907_v32 = vadd.f32 %v3906_v19, %v3808_v3  ;;  %v5543_v4 = vsel %vm11729_vm5, %v5541_v8, %v5542_v23  ;;  %v4845_v63 = vld [vmem:[#allocation2 + $0x5c] sm:$0x1]  ;;  %v4191_v40 = vld [vmem:[#allocation2 + $0x80] sm:$0xf]  ;;  %v4233_v15 = vpack.c.bf16 %v4083_v59, %v4083_v59  ;;  %v10929_v30 = vld [vmem:[#allocation4 + $0x38] sm:$0xf0] }
 0x41d   : > { %v4403_v16 = vor.u32 %v4401_v33, %v4400_v35  ;;  %v4405_v49 = vrot.slane %v4400_v35, 4  ;;  %5665 = vst [vmem:[#allocation4 + $0xbc] sm:$0xf] %v5543_v4  ;;  %v5047_v43 = vrot.slane %v5045_v39, 4  ;;  %v5050_v20 = vrot.slane %v5048_v56, 5  ;;  %v10836_v14 = vld [vmem:[#allocation10 + $0x20] sm:$0xff] }
 0x41e   : > { %v3968_v47 = vadd.f32 %v3907_v32, %v3056_v9  ;;  %v4766_v13 = vld [vmem:[#allocation2 + $0x60] sm:$0xf]  ;;  %v5056_v10 = vrot.slane %v5054_v29, 5  ;;  %v5058_v6 = vshrl.u32 %v4844_v55, 16  ;;  %v4407_v1 = vshrl.u32 %v4233_v15, 16  ;;  %v13957_v8 = vld [vmem:[#allocation50_spill] sm:$0xff]  ;;  %6982 = vmatpush.bf16.msrb.mxu1 %v10836_v14 }
 0x41f   : > { %v4404_v17 = vsel %vm12489_vm13, %v4396_v57, %v4403_v16  ;;  %v4674_v2 = vsel %vm12403_vm8, %v4405_v49, %v4673_v7  ;;  %v9707_v5 = vld [vmem:[#allocation4 + $0xa8] sm:$0xf]  ;;  %4802 = vst [vmem:[#allocation4 + $0xc0] sm:$0xf] %v4766_v13  ;;  %v10871_v22 = vld [vmem:[#allocation4 + $0x94] sm:$0xf]  ;;  %v5051_v52 = vor.u32 %v5050_v20, %v5047_v43 }
 0x420   : > { %4672 = vst [vmem:[#allocation2 + $0x64] sm:$0xf] %v4404_v17  ;;  %v4008_v9 = vmul.f32 %v12675_v58, %v3968_v47  ;;  %v10875_v3 = vld [vmem:[#allocation4 + $0xb0] sm:$0xf0]  ;;  %v5060_v41 = vrot.slane %v5058_v6, 4  ;;  %v5064_v0 = vshll.u32 %v4845_v63, 16  ;;  %v3909_v39 = vpop.f32.mrf.mxu0 }
 0x421   : > { %4675 = vst [vmem:[#allocation2 + $0x68] sm:$0x1] %v4674_v2  ;;  %v9708_v26 = vor.u32 %v10875_v3, %v9707_v5  ;;  %v4192_v7 = vsel %vm12413_vm11, 0, %v4191_v40  ;;  %v13958_v55 = vld [vmem:[#allocation53_spill] sm:$0xff]  ;;  %v12819_v35 = vrot.slane %v4407_v1, 7  ;;  %v4410_v33 = vshll.u32 %v4233_v15, 16  ;;  %v12823_v40 = vpop.f32.mrf.mxu3 }
 0x422   : > { %v3811_v57 = vadd.f32 %v13958_v55, %v13957_v8  ;;  %v9697_v19 = vld [vmem:[#allocation4 + $0x9c] sm:$0xf0]  ;;  %v4048_v23 = vadd.f32 %v12693_v25, %v4008_v9  ;;  %4193 = vst [vmem:[#allocation2 + $0x80] sm:$0xf] %v4192_v7  ;;  %v4676_v59 = vld [vmem:[#allocation2 + $0x6c] sm:$0xf]  ;;  %v5061_v49 = vor.u32 %v5060_v41, %v5056_v10 }
 0x423   : > { %v9700_v32 = vor.u32 %v10871_v22, %v9697_v19  ;;  %6350 = vmatmul.bf16.gmra.mxu1 %v9708_v26  ;;  %v10211_v56 = vld [vmem:[#allocation4 + $0x30] sm:$0xf]  ;;  %v5052_v16 = vrot.slane %v5051_v52, 4  ;;  %v4412_v4 = vor.u32 %v4410_v33, %v12819_v35  ;;  %v5066_v13 = vrot.slane %v5064_v0, 5  ;;  %v4137_v17 = vld [vmem:[#allocation2 + $0x84] sm:$0x1] }
 0x424   : > { %v4084_v63 = vmax.f32 %v4048_v23, 0.0  ;;  %v3910_v29 = vadd.f32 %v3909_v39, %v3811_v57  ;;  %v10212_v47 = vor.u32 %v10929_v30, %v10211_v56  ;;  %v10876_v15 = vld [vmem:[#allocation4 + $0xb8] sm:$0xf0]  ;;  %v5062_v20 = vrot.slane %v5061_v49, 4  ;;  %v13959_v6 = vld [vmem:[#allocation29_spill] sm:$0xff]  ;;  %v13960_v41 = vld [vmem:[#allocation24_spill] sm:$0xff] }
 0x425   : > { %6434 = vmatmul.bf16.gmra.mxu2 %v9700_v32  ;;  %v5057_v43 = vsel %vm11614_vm2, %v5052_v16, %v5056_v10  ;;  %v4677_v2 = vsel %vm12413_vm11, %v4412_v4, %v4676_v59  ;;  %v9715_v22 = vld [vmem:[#allocation4 + $0xb0] sm:$0xf]  ;;  %v5404_v9 = vld [vmem:[#allocation2 + $0x60] sm:$0xe]  ;;  %v4138_v55 = vsel %vm12403_vm8, 0, %v4137_v17  ;;  %v4413_v33 = vrot.slane %v12819_v35, 4 }
 0x426   : > { %v4234_v5 = vpack.c.bf16 %v4084_v63, %v4084_v63  ;;  %v3969_v1 = vadd.f32 %v3910_v29, %v13959_v6  ;;  %7768 = vmatmul.bf16.vlgmr.msra.gmra.mxu0 %v10212_v47  ;;  %v4846_v3 = vld [vmem:[#allocation2 + $0x60] sm:$0xf]  ;;  %4678 = vst [vmem:[#allocation2 + $0x6c] sm:$0xf] %v4677_v2  ;;  %v9716_v30 = vor.u32 %v10876_v15, %v9715_v22  ;;  %v13961_v0 = vld [vmem:[#allocation45_spill] sm:$0xff]  ;;  %v9623_v59 = vrot.slane %v5404_v9, 9  ;;  %v12841_v29 = vpop.f32.mrf.mxu2 }
 0x427   : > { %v5067_v52 = vsel %vm11614_vm2, %v5062_v20, %v5066_v13  ;;  %v4767_v26 = vld [vmem:[#allocation2 + $0x64] sm:$0xf]  ;;  %v3061_v7 = vadd.f32 %v13961_v0, %v13960_v41  ;;  %5358 = vst [vmem:[#allocation4 + $0xac] sm:$0xf] %v5057_v43  ;;  %v4680_v23 = vld [vmem:[#allocation2 + $0x74] sm:$0x1] }
 0x428   : > { %v5405_v10 = vld [vmem:[#allocation2 + $0x64] sm:$0xf]  ;;  %v4415_v14 = vshrl.u32 %v4234_v5, 16  ;;  %v4009_v8 = vmul.f32 %v12675_v58, %v3969_v1  ;;  %v5406_v57 = vld [vmem:[#allocation2 + $0x68] sm:$0x1]  ;;  %v4418_v19 = vshll.u32 %v4234_v5, 16  ;;  %v3911_v47 = vpop.f32.mrf.mxu0 }
 0x429   : > { %5359 = vst [vmem:[#allocation4 + $0xb8] sm:$0xf] %v5067_v52  ;;  %v5546_v32 = vrot.slane %v5405_v10, 5  ;;  %v13962_v39 = vld [vmem:[#allocation54_spill] sm:$0xff]  ;;  %v4847_v4 = vld [vmem:[#allocation2 + $0x64] sm:$0xf]  ;;  %v12851_v10 = vpop.f32.mrf.mxu3 }
 0x42a   : > { %v3813_v56 = vadd.f32 %v13962_v39, %v12548_v62  ;;  %v4417_v16 = vrot.slane %v4415_v14, 7  ;;  %v4049_v49 = vadd.f32 %v12693_v25, %v4009_v8  ;;  %4803 = vst [vmem:[#allocation4 + $0xcc] sm:$0xf] %v4767_v26  ;;  %v5069_v63 = vshrl.u32 %v4846_v3, 16  ;;  %6528 = vmatmul.bf16.gmra.mxu3 %v9716_v30  ;;  %v4848_v6 = vld [vmem:[#allocation2 + $0x68] sm:$0x1] }
 0x42b   : > { %4139 = vst [vmem:[#allocation2 + $0x84] sm:$0x1] %v4138_v55  ;;  %v5547_v35 = vsel %vm11729_vm5, %v9623_v59, %v5546_v32  ;;  %v5548_v15 = vrot.slane %v5546_v32, 4  ;;  %v5549_v43 = vrot.slane %v5406_v57, 5  ;;  %v5072_v20 = vshll.u32 %v4846_v3, 16 }
 0x42c   : > { %v4420_v13 = vor.u32 %v4418_v19, %v4417_v16  ;;  %v4422_v17 = vrot.slane %v4417_v16, 4  ;;  %v4085_v62 = vmax.f32 %v4049_v49, 0.0  ;;  %v3912_v2 = vadd.f32 %v3911_v47, %v3813_v56  ;;  %5666 = vst [vmem:[#allocation4 + $0xc8] sm:$0xf] %v5547_v35  ;;  %v4194_v41 = vld [vmem:[#allocation2 + $0x8c] sm:$0xf] }
 0x42d   : > { %v5550_v5 = vsel %vm11729_vm5, %v5548_v15, %v5549_v43  ;;  %v5071_v1 = vrot.slane %v5069_v63, 4  ;;  %v5074_v22 = vrot.slane %v5072_v20, 5  ;;  %v5078_v9 = vshll.u32 %v4847_v4, 16  ;;  %v4768_v0 = vld [vmem:[#allocation2 + $0x6c] sm:$0xf] }
 0x42e   : > { %v4421_v30 = vsel %vm12489_vm13, %v4413_v33, %v4420_v13  ;;  %v4681_v52 = vsel %vm12403_vm8, %v4422_v17, %v4680_v23  ;;  %v4235_v26 = vpack.c.bf16 %v4085_v62, %v4085_v62  ;;  %v3970_v3 = vadd.f32 %v3912_v2, %v3061_v7  ;;  %5667 = vst [vmem:[#allocation4 + $0xd4] sm:$0xf] %v5550_v5  ;;  %v10874_v14 = vld [vmem:[#allocation4 + $0xac] sm:$0xf]  ;;  %v9719_v8 = vld [vmem:[#allocation4 + $0xc0] sm:$0xf] }
 0x42f   : > { %4679 = vst [vmem:[#allocation2 + $0x70] sm:$0xf] %v4421_v30  ;;  %v10932_v55 = vld [vmem:[#allocation4 + $0x50] sm:$0xf0]  ;;  %v5075_v57 = vor.u32 %v5074_v22, %v5071_v1  ;;  %v5080_v19 = vrot.slane %v5078_v9, 5  ;;  %v5082_v59 = vshrl.u32 %v4847_v4, 16  ;;  %v3816_v33 = vadd.f32 %v12558_v53, %v12572_v45  ;;  %v12864_v30 = vpop.f32.mrf.mxu2 }
 0x430   : > { %4682 = vst [vmem:[#allocation2 + $0x74] sm:$0x1] %v4681_v52  ;;  %v4424_v32 = vshrl.u32 %v4235_v26, 16  ;;  %v4427_v23 = vshll.u32 %v4235_v26, 16  ;;  %v9709_v39 = vld [vmem:[#allocation4 + $0xb4] sm:$0xf0]  ;;  %v4010_v7 = vmul.f32 %v12675_v58, %v3970_v3  ;;  %v3914_v20 = vpop.f32.mrf.mxu0 }
 0x431   : > { %v9712_v56 = vor.u32 %v10874_v14, %v9709_v39  ;;  %v10878_v16 = vld [vmem:[#allocation4 + $0xc8] sm:$0xf0]  ;;  %v5076_v49 = vrot.slane %v5075_v57, 4  ;;  %v5084_v63 = vrot.slane %v5082_v59, 4  ;;  %v5088_v47 = vshll.u32 %v4848_v6, 16 }
 0x432   : > { %v12856_v35 = vrot.slane %v4424_v32, 7  ;;  %v4050_v15 = vadd.f32 %v12693_v25, %v4010_v7  ;;  %v9720_v43 = vor.u32 %v10878_v16, %v9719_v8  ;;  %v10223_v4 = vld [vmem:[#allocation4 + $0x48] sm:$0xf]  ;;  %v4195_v53 = vsel %vm12413_vm11, 0, %v4194_v41  ;;  %4804 = vst [vmem:[#allocation4 + $0xd8] sm:$0xf] %v4768_v0 }
 0x433   : > { %v4683_v45 = vld [vmem:[#allocation2 + $0x78] sm:$0xf]  ;;  %v5081_v13 = vsel %vm11614_vm2, %v5076_v49, %v5080_v19  ;;  %v5085_v17 = vor.u32 %v5084_v63, %v5080_v19  ;;  %4196 = vst [vmem:[#allocation2 + $0x8c] sm:$0xf] %v4195_v53  ;;  %v5407_v62 = vld [vmem:[#allocation2 + $0x6c] sm:$0xe]  ;;  %v3915_v6 = vadd.f32 %v3914_v20, %v3816_v33  ;;  %v10224_v22 = vor.u32 %v10932_v55, %v10223_v4  ;;  %v12871_v33 = vpop.f32.mrf.mxu1  ;;  %v12876_v63 = vpop.f32.mrf.mxu3 }
 0x434   : > { %v4429_v2 = vor.u32 %v4427_v23, %v12856_v35  ;;  %v4086_v5 = vmax.f32 %v4050_v15, 0.0  ;;  %6355 = vmatmul.bf16.gmra.mxu1 %v9720_v43  ;;  %v9727_v1 = vld [vmem:[#allocation4 + $0xc8] sm:$0xf]  ;;  %5360 = vst [vmem:[#allocation4 + $0xc4] sm:$0xf] %v5081_v13  ;;  %v5090_v3 = vrot.slane %v5088_v47, 5 }
 0x435   : > { %v4140_v9 = vld [vmem:[#allocation2 + $0x90] sm:$0x1]  ;;  %6439 = vmatmul.bf16.gmra.mxu2 %v9712_v56  ;;  %v10879_v52 = vld [vmem:[#allocation4 + $0xd0] sm:$0xf0]  ;;  %v5086_v26 = vrot.slane %v5085_v17, 4  ;;  %v13963_v8 = vld [vmem:[#allocation31_spill] sm:$0xff] }
 0x436   : > { %v4141_v41 = vsel %vm12403_vm8, 0, %v4140_v9  ;;  %v4684_v0 = vsel %vm12413_vm11, %v4429_v2, %v4683_v45  ;;  %v4236_v14 = vpack.c.bf16 %v4086_v5, %v4086_v5  ;;  %v3971_v57 = vadd.f32 %v3915_v6, %v13963_v8  ;;  %7773 = vmatmul.bf16.gmra.mxu0 %v10224_v22  ;;  %v4769_v19 = vld [vmem:[#allocation2 + $0x70] sm:$0xf]  ;;  %v10843_v56 = vld [vmem:[#allocation10 + $0x58] sm:$0xff]  ;;  %v4849_v9 = vld [vmem:[#allocation2 + $0x6c] sm:$0xf] }
 0x437   : > { %v5408_v55 = vld [vmem:[#allocation2 + $0x70] sm:$0xf]  ;;  %v9624_v59 = vrot.slane %v5407_v62, 9  ;;  %4685 = vst [vmem:[#allocation2 + $0x78] sm:$0xf] %v4684_v0  ;;  %v9728_v32 = vor.u32 %v10879_v52, %v9727_v1  ;;  %v5091_v23 = vsel %vm11614_vm2, %v5086_v26, %v5090_v3  ;;  %7072 = vmatpush.bf16.msrb.mxu2 %v10843_v56  ;;  %v13964_v4 = vld [vmem:[#allocation52_spill] sm:$0xff] }
 0x438   : > { %v5409_v39 = vld [vmem:[#allocation2 + $0x74] sm:$0x1]  ;;  %v5553_v7 = vrot.slane %v5408_v55, 5  ;;  %v4432_v16 = vshrl.u32 %v4236_v14, 16  ;;  %v4011_v49 = vmul.f32 %v12675_v58, %v3971_v57  ;;  %5361 = vst [vmem:[#allocation4 + $0xd0] sm:$0xf] %v5091_v23  ;;  %v3818_v53 = vadd.f32 %v13964_v4, %v12594_v24  ;;  %v3916_v1 = vpop.f32.mrf.mxu0 }
 0x439   : > { %4805 = vst [vmem:[#allocation4 + $0xe4] sm:$0xf] %v4769_v19  ;;  %v5556_v43 = vrot.slane %v5409_v39, 5  ;;  %v4435_v20 = vshll.u32 %v4236_v14, 16  ;;  %v4687_v13 = vld [vmem:[#allocation2 + $0x80] sm:$0x1] }
 0x43a   : > { %v5554_v47 = vsel %vm11729_vm5, %v9624_v59, %v5553_v7  ;;  %v5555_v15 = vrot.slane %v5553_v7, 4  ;;  %v4434_v45 = vrot.slane %v4432_v16, 7  ;;  %v4051_v17 = vadd.f32 %v12693_v25, %v4011_v49  ;;  %4142 = vst [vmem:[#allocation2 + $0x90] sm:$0x1] %v4141_v41  ;;  %v13965_v62 = vld [vmem:[#allocation26_spill] sm:$0xff]  ;;  %v13966_v2 = vld [vmem:[#allocation28_spill] sm:$0xff]  ;;  %6533 = vmatmul.bf16.gmra.mxu3 %v9728_v32  ;;  %v12894_v49 = vpop.f32.mrf.mxu2 }
 0x43b   : > { %v3066_v5 = vadd.f32 %v13966_v2, %v13965_v62  ;;  %v4430_v6 = vrot.slane %v12856_v35, 4  ;;  %5668 = vst [vmem:[#allocation4 + $0xe0] sm:$0xf] %v5554_v47  ;;  %v3917_v3 = vadd.f32 %v3916_v1, %v3818_v53  ;;  %v4850_v0 = vld [vmem:[#allocation2 + $0x70] sm:$0xf]  ;;  %v5093_v14 = vshrl.u32 %v4849_v9, 16 }
 0x43c   : > { %v5557_v22 = vsel %vm11729_vm5, %v5555_v15, %v5556_v43  ;;  %v4437_v52 = vor.u32 %v4435_v20, %v4434_v45  ;;  %v4439_v24 = vrot.slane %v4434_v45, 4  ;;  %v4087_v26 = vmax.f32 %v4051_v17, 0.0  ;;  %v10877_v59 = vld [vmem:[#allocation4 + $0xc4] sm:$0xf]  ;;  %v9731_v23 = vld [vmem:[#allocation4 + $0xd8] sm:$0xf] }
 0x43d   : > { %5669 = vst [vmem:[#allocation4 + $0xec] sm:$0xf] %v5557_v22  ;;  %v5096_v41 = vshll.u32 %v4849_v9, 16  ;;  %v5102_v8 = vshll.u32 %v4850_v0, 16  ;;  %v5106_v57 = vshrl.u32 %v4850_v0, 16  ;;  %v3972_v32 = vadd.f32 %v3917_v3, %v3066_v5  ;;  %v13967_v56 = vld [vmem:[#allocation27_spill] sm:$0xff]  ;;  %v12896_v15 = vpop.f32.mrf.mxu1 }
 0x43e   : > { %v4438_v35 = vsel %vm12489_vm13, %v4430_v6, %v4437_v52  ;;  %v4688_v19 = vsel %vm12403_vm8, %v4439_v24, %v4687_v13  ;;  %v4237_v55 = vpack.c.bf16 %v4087_v26, %v4087_v26  ;;  %v4851_v39 = vld [vmem:[#allocation2 + $0x74] sm:$0x1]  ;;  %v4197_v7 = vld [vmem:[#allocation2 + $0x98] sm:$0xf]  ;;  %v3821_v16 = vadd.f32 %v13967_v56, %v12615_v50  ;;  %v10935_v5 = vld [vmem:[#allocation4 + $0x68] sm:$0xf0]  ;;  %v12902_v26 = vpop.f32.mrf.mxu3 }
 0x43f   : > { %4686 = vst [vmem:[#allocation2 + $0x7c] sm:$0xf] %v4438_v35  ;;  %v9721_v47 = vld [vmem:[#allocation4 + $0xcc] sm:$0xf0]  ;;  %v5095_v43 = vrot.slane %v5093_v14, 4  ;;  %v5098_v4 = vrot.slane %v5096_v41, 5  ;;  %v4012_v13 = vmul.f32 %v12675_v58, %v3972_v32 }
 0x440   : > { %4689 = vst [vmem:[#allocation2 + $0x80] sm:$0x1] %v4688_v19  ;;  %v4441_v53 = vshrl.u32 %v4237_v55, 16  ;;  %v4444_v45 = vshll.u32 %v4237_v55, 16  ;;  %v9724_v20 = vor.u32 %v10877_v59, %v9721_v47  ;;  %v10881_v17 = vld [vmem:[#allocation4 + $0xe0] sm:$0xf0]  ;;  %v3919_v58 = vpop.f32.mrf.mxu0 }
 0x441   : > { %v9732_v62 = vor.u32 %v10881_v17, %v9731_v23  ;;  %v10235_v2 = vld [vmem:[#allocation4 + $0x60] sm:$0xf]  ;;  %v5099_v6 = vor.u32 %v5098_v4, %v5095_v43  ;;  %v5104_v50 = vrot.slane %v5102_v8, 5  ;;  %v5108_v1 = vrot.slane %v5106_v57, 4  ;;  %v10835_v22 = vld [vmem:[#allocation10 + $0x18] sm:$0xff]  ;;  %v13968_v43 = vld [vmem:[#allocation34_spill] sm:$0xff] }
 0x442   : > { %v12899_v9 = vrot.slane %v4441_v53, 7  ;;  %v4690_v52 = vld [vmem:[#allocation2 + $0x84] sm:$0xf]  ;;  %v4052_v24 = vadd.f32 %v12693_v25, %v4012_v13  ;;  %v5112_v3 = vshll.u32 %v4851_v39, 16  ;;  %v4198_v0 = vsel %vm12413_vm11, 0, %v4197_v7  ;;  %6983 = vmatpush.bf16.msrb.mxu1 %v10835_v22 }
 0x443   : > { %v5100_v41 = vrot.slane %v5099_v6, 4  ;;  %v5109_v35 = vor.u32 %v5108_v1, %v5104_v50  ;;  %4199 = vst [vmem:[#allocation2 + $0x98] sm:$0xf] %v4198_v0  ;;  %v3920_v19 = vadd.f32 %v3919_v58, %v3821_v16  ;;  %v10236_v55 = vor.u32 %v10935_v5, %v10235_v2  ;;  %v4770_v59 = vld [vmem:[#allocation2 + $0x78] sm:$0xf]  ;;  %v13970_v22 = vld [vmem:[#allocation32_spill] sm:$0xff] }
 0x444   : > { %v10882_v14 = vld [vmem:[#allocation4 + $0xe8] sm:$0xf0]  ;;  %v4446_v8 = vor.u32 %v4444_v45, %v12899_v9  ;;  %v4088_v57 = vmax.f32 %v4052_v24, 0.0  ;;  %6360 = vmatmul.bf16.gmra.mxu1 %v9732_v62  ;;  %v4143_v25 = vld [vmem:[#allocation2 + $0x9c] sm:$0x1]  ;;  %v5114_v7 = vrot.slane %v5112_v3, 5  ;;  %v12926_v24 = vpop.f32.mrf.mxu2  ;;  %v3823_v58 = vadd.f32 %v12623_v61, %v12642_v27 }
 0x445   : > { %6444 = vmatmul.bf16.gmra.mxu2 %v9724_v20  ;;  %v9739_v32 = vld [vmem:[#allocation4 + $0xe0] sm:$0xf]  ;;  %v5105_v23 = vsel %vm11614_vm2, %v5100_v41, %v5104_v50  ;;  %v5110_v39 = vrot.slane %v5109_v35, 4  ;;  %4806 = vst [vmem:[#allocation4 + $0xf0] sm:$0xf] %v4770_v59  ;;  %v3973_v4 = vadd.f32 %v3920_v19, %v13968_v43  ;;  %v4144_v53 = vsel %vm12403_vm8, 0, %v4143_v25  ;;  %v12914_v45 = vpop.f32.mrf.mxu1 }
 0x446   : > { %v4691_v56 = vsel %vm12413_vm11, %v4446_v8, %v4690_v52  ;;  %v4238_v47 = vpack.c.bf16 %v4088_v57, %v4088_v57  ;;  %7778 = vmatmul.bf16.gmra.mxu0 %v10236_v55  ;;  %5362 = vst [vmem:[#allocation4 + $0xdc] sm:$0xf] %v5105_v23  ;;  %v4771_v16 = vld [vmem:[#allocation2 + $0x7c] sm:$0xf]  ;;  %v9740_v20 = vor.u32 %v10882_v14, %v9739_v32  ;;  %v5410_v17 = vld [vmem:[#allocation2 + $0x78] sm:$0xe] }
 0x447   : > { %4692 = vst [vmem:[#allocation2 + $0x84] sm:$0xf] %v4691_v56  ;;  %v5115_v13 = vsel %vm11614_vm2, %v5110_v39, %v5114_v7  ;;  %v5411_v62 = vld [vmem:[#allocation2 + $0x7c] sm:$0xf]  ;;  %v12921_v5 = vld [vmem:[%s13792_s2] ss:$0 sm:$0xff]  ;;  %v12936_v19 = vpop.f32.mrf.mxu3 }
 0x448   : > { %v4449_v2 = vshrl.u32 %v4238_v47, 16  ;;  %v4013_v6 = vmul.f32 %v12921_v5, %v3973_v4  ;;  %5363 = vst [vmem:[#allocation4 + $0xe8] sm:$0xf] %v5115_v13  ;;  %v5412_v50 = vld [vmem:[#allocation2 + $0x80] sm:$0x1]  ;;  %v13969_v1 = vld [vmem:[#allocation35_spill] sm:$0xff]  ;;  %v3921_v59 = vpop.f32.mrf.mxu0 }
 0x449   : > { %v3071_v52 = vadd.f32 %v13970_v22, %v13969_v1  ;;  %4807 = vst [vmem:[#allocation4 + $0xfc] sm:$0xf] %v4771_v16  ;;  %v9625_v3 = vrot.slane %v5410_v17, 9  ;;  %v5560_v0 = vrot.slane %v5411_v62, 5  ;;  %v4452_v41 = vshll.u32 %v4238_v47, 16 }
 0x44a   : > { %v4451_v14 = vrot.slane %v4449_v2, 7  ;;  %v4694_v35 = vld [vmem:[#allocation2 + $0x8c] sm:$0x1]  ;;  %v12933_v8 = vld [vmem:[%s13793_s3] ss:$0 sm:$0xff]  ;;  %v4447_v55 = vrot.slane %v12899_v9, 4  ;;  %6538 = vmatmul.bf16.gmra.mxu3 %v9740_v20  ;;  %v3922_v56 = vadd.f32 %v3921_v59, %v3823_v58 }
 0x44b   : > { %v4053_v57 = vadd.f32 %v12933_v8, %v4013_v6  ;;  %4145 = vst [vmem:[#allocation2 + $0x9c] sm:$0x1] %v4144_v53  ;;  %v5561_v61 = vsel %vm11729_vm5, %v9625_v3, %v5560_v0  ;;  %v5562_v27 = vrot.slane %v5560_v0, 4  ;;  %v5563_v25 = vrot.slane %v5412_v50, 5  ;;  %v4852_v32 = vld [vmem:[#allocation2 + $0x78] sm:$0xf] }
 0x44c   : > { %v4454_v23 = vor.u32 %v4452_v41, %v4451_v14  ;;  %v4456_v39 = vrot.slane %v4451_v14, 4  ;;  %5670 = vst [vmem:[#allocation4 + $0xf8] sm:$0xf] %v5561_v61  ;;  %v4853_v4 = vld [vmem:[#allocation2 + $0x7c] sm:$0xf]  ;;  %v5117_v16 = vshrl.u32 %v4852_v32, 16  ;;  %v3974_v17 = vadd.f32 %v3922_v56, %v3071_v52 }
 0x44d   : > { %v4089_v7 = vmax.f32 %v4053_v57, 0.0  ;;  %v10880_v47 = vld [vmem:[#allocation4 + $0xdc] sm:$0xf]  ;;  %v5564_v43 = vsel %vm11729_vm5, %v5562_v27, %v5563_v25  ;;  %v5120_v9 = vshll.u32 %v4852_v32, 16  ;;  %v9743_v62 = vld [vmem:[#allocation4 + $0xf0] sm:$0xf]  ;;  %v3826_v50 = vadd.f32 %v12652_v12, %v12670_v51  ;;  %v12949_v22 = vpop.f32.mrf.mxu1 }
 0x44e   : > { %v4455_v53 = vsel %vm12489_vm13, %v4447_v55, %v4454_v23  ;;  %v4695_v20 = vsel %vm12403_vm8, %v4456_v39, %v4694_v35  ;;  %5671 = vst [vmem:[#allocation4 + $0x104] sm:$0xf] %v5564_v43  ;;  %v4854_v2 = vld [vmem:[#allocation2 + $0x80] sm:$0x1]  ;;  %v4200_v6 = vld [vmem:[#allocation2 + $0xa4] sm:$0xf]  ;;  %v4014_v35 = vmul.f32 %v12921_v5, %v3974_v17 }
 0x44f   : > { %v4239_v13 = vpack.c.bf16 %v4089_v7, %v4089_v7  ;;  %4693 = vst [vmem:[#allocation2 + $0x88] sm:$0xf] %v4455_v53  ;;  %v9733_v1 = vld [vmem:[#allocation4 + $0xe4] sm:$0xf0]  ;;  %v5119_v3 = vrot.slane %v5117_v16, 4  ;;  %v5122_v0 = vrot.slane %v5120_v9, 5  ;;  %v6410_v57 = vpop.f32.mrf.mxu2  ;;  %v12958_v39 = vpop.f32.mrf.mxu3 }
 0x450   : > { %4696 = vst [vmem:[#allocation2 + $0x8c] sm:$0x1] %v4695_v20  ;;  %v9736_v41 = vor.u32 %v10880_v47, %v9733_v1  ;;  %v10884_v52 = vld [vmem:[#allocation4 + $0xf8] sm:$0xf0]  ;;  %v10938_v59 = vld [vmem:[#allocation4 + $0x80] sm:$0xf0]  ;;  %v4054_v32 = vadd.f32 %v12933_v8, %v4014_v35  ;;  %v12956_v23 = vadd.f32 %v6410_v57, %v12896_v15  ;;  %v3924_v43 = vpop.f32.mrf.mxu0 }
 0x451   : > { %v4458_v58 = vshrl.u32 %v4239_v13, 16  ;;  %v4461_v14 = vshll.u32 %v4239_v13, 16  ;;  %v9744_v55 = vor.u32 %v10884_v52, %v9743_v62  ;;  %v5123_v61 = vor.u32 %v5122_v0, %v5119_v3  ;;  %v4772_v12 = vld [vmem:[#allocation2 + $0x84] sm:$0xf]  ;;  %v10247_v7 = vld [vmem:[#allocation4 + $0x78] sm:$0xf] }
 0x452   : > { %v5126_v27 = vshll.u32 %v4853_v4, 16  ;;  %v5130_v25 = vshrl.u32 %v4853_v4, 16  ;;  %v5136_v56 = vshll.u32 %v4854_v2, 16  ;;  %4808 = vst [vmem:[#allocation4 + $0x108] sm:$0xf] %v4772_v12  ;;  %v4201_v4 = vsel %vm12413_vm11, 0, %v4200_v6 }
 0x453   : > { %v12952_v51 = vrot.slane %v4458_v58, 7  ;;  %v4697_v47 = vld [vmem:[#allocation2 + $0x90] sm:$0xf]  ;;  %v5124_v16 = vrot.slane %v5123_v61, 4  ;;  %v4090_v13 = vmax.f32 %v4054_v32, 0.0  ;;  %v3925_v17 = vadd.f32 %v3924_v43, %v3826_v50  ;;  %v13971_v35 = vld [vmem:[#allocation37_spill] sm:$0xff] }
 0x454   : > { %v5128_v9 = vrot.slane %v5126_v27, 5  ;;  %v5132_v53 = vrot.slane %v5130_v25, 4  ;;  %6365 = vmatmul.bf16.gmra.mxu1 %v9744_v55  ;;  %v10248_v15 = vor.u32 %v10938_v59, %v10247_v7  ;;  %4202 = vst [vmem:[#allocation2 + $0xa4] sm:$0xf] %v4201_v4  ;;  %v4146_v3 = vld [vmem:[#allocation2 + $0xa8] sm:$0x1] }
 0x455   : > { %v4463_v20 = vor.u32 %v4461_v14, %v12952_v51  ;;  %6449 = vmatmul.bf16.gmra.mxu2 %v9736_v41  ;;  %v10885_v62 = vld [vmem:[#allocation4 + $0x100] sm:$0xf0]  ;;  %v4240_v58 = vpack.c.bf16 %v4090_v13, %v4090_v13  ;;  %v3975_v6 = vadd.f32 %v3925_v17, %v13971_v35  ;;  %v9751_v52 = vld [vmem:[#allocation4 + $0xf8] sm:$0xf]  ;;  %v5138_v14 = vrot.slane %v5136_v56, 5  ;;  %v12968_v50 = vpop.f32.mrf.mxu1  ;;  %v13972_v7 = vld [vmem:[#allocation33_spill] sm:$0xff] }
 0x456   : > { %v5129_v2 = vsel %vm11614_vm2, %v5124_v16, %v5128_v9  ;;  %v5133_v1 = vor.u32 %v5132_v53, %v5128_v9  ;;  %7783 = vmatmul.bf16.gmra.mxu0 %v10248_v15  ;;  %v4773_v57 = vld [vmem:[#allocation2 + $0x88] sm:$0xf]  ;;  %v9752_v41 = vor.u32 %v10885_v62, %v9751_v52  ;;  %v5413_v59 = vld [vmem:[#allocation2 + $0x84] sm:$0xe]  ;;  %v10842_v61 = vld [vmem:[#allocation10 + $0x50] sm:$0xff]  ;;  %v4147_v12 = vsel %vm12403_vm8, 0, %v4146_v3 }
 0x457   : > { %v4698_v0 = vsel %vm12413_vm11, %v4463_v20, %v4697_v47  ;;  %v4466_v27 = vshrl.u32 %v4240_v58, 16  ;;  %v4015_v25 = vmul.f32 %v12921_v5, %v3975_v6  ;;  %5364 = vst [vmem:[#allocation4 + $0xf4] sm:$0xf] %v5129_v2  ;;  %v5414_v32 = vld [vmem:[#allocation2 + $0x88] sm:$0xf]  ;;  %v13973_v47 = vld [vmem:[#allocation30_spill] sm:$0xff]  ;;  %v3828_v56 = vadd.f32 %v12686_v21, %v12707_v36  ;;  %v6412_v9 = vpop.f32.mrf.mxu2  ;;  %7073 = vmatpush.bf16.msrb.mxu2 %v10842_v61  ;;  %v12983_v62 = vpop.f32.mrf.mxu3 }
 0x458   : > { %4699 = vst [vmem:[#allocation2 + $0x90] sm:$0xf] %v4698_v0  ;;  %v5134_v55 = vrot.slane %v5133_v1, 4  ;;  %v3076_v43 = vadd.f32 %v13973_v47, %v13972_v7  ;;  %v4701_v16 = vld [vmem:[#allocation2 + $0x98] sm:$0x1]  ;;  %v4469_v13 = vshll.u32 %v4240_v58, 16  ;;  %v12981_v15 = vadd.f32 %v6412_v9, %v12914_v45  ;;  %v3926_v36 = vpop.f32.mrf.mxu0 }
 0x459   : > { %4809 = vst [vmem:[#allocation4 + $0x114] sm:$0xf] %v4773_v57  ;;  %v5415_v4 = vld [vmem:[#allocation2 + $0x8c] sm:$0x1]  ;;  %v4468_v20 = vrot.slane %v4466_v27, 7  ;;  %v4055_v17 = vadd.f32 %v12933_v8, %v4015_v25  ;;  %v4464_v21 = vrot.slane %v12952_v51, 4  ;;  %v3927_v52 = vadd.f32 %v3926_v36, %v3828_v56 }
 0x45a   : > { %v5139_v53 = vsel %vm11614_vm2, %v5134_v55, %v5138_v14  ;;  %v4855_v2 = vld [vmem:[#allocation2 + $0x84] sm:$0xf]  ;;  %6543 = vmatmul.bf16.gmra.mxu3 %v9752_v41  ;;  %4148 = vst [vmem:[#allocation2 + $0xa8] sm:$0x1] %v4147_v12  ;;  %v9626_v1 = vrot.slane %v5413_v59, 9  ;;  %v5567_v3 = vrot.slane %v5414_v32, 5 }
 0x45b   : > { %5365 = vst [vmem:[#allocation4 + $0x100] sm:$0xf] %v5139_v53  ;;  %v5570_v0 = vrot.slane %v5415_v4, 5  ;;  %v4471_v35 = vor.u32 %v4469_v13, %v4468_v20  ;;  %v4473_v6 = vrot.slane %v4468_v20, 4  ;;  %v4091_v58 = vmax.f32 %v4055_v17, 0.0 }
 0x45c   : > { %v5568_v45 = vsel %vm11729_vm5, %v9626_v1, %v5567_v3  ;;  %v5569_v14 = vrot.slane %v5567_v3, 4  ;;  %v5141_v57 = vshrl.u32 %v4855_v2, 16  ;;  %v5144_v55 = vshll.u32 %v4855_v2, 16  ;;  %v9755_v27 = vld [vmem:[#allocation4 + $0x108] sm:$0xf] }
 0x45d   : > { %v4472_v61 = vsel %vm12489_vm13, %v4464_v21, %v4471_v35  ;;  %v4702_v51 = vsel %vm12403_vm8, %v4473_v6, %v4701_v16  ;;  %v4241_v41 = vpack.c.bf16 %v4091_v58, %v4091_v58  ;;  %v3976_v59 = vadd.f32 %v3927_v52, %v3076_v43  ;;  %5672 = vst [vmem:[#allocation4 + $0x110] sm:$0xf] %v5568_v45  ;;  %v4856_v25 = vld [vmem:[#allocation2 + $0x88] sm:$0xf]  ;;  %v4857_v12 = vld [vmem:[#allocation2 + $0x8c] sm:$0x1]  ;;  %v12992_v7 = vpop.f32.mrf.mxu1 }
 0x45e   : > { %4700 = vst [vmem:[#allocation2 + $0x94] sm:$0xf] %v4472_v61  ;;  %v10883_v32 = vld [vmem:[#allocation4 + $0xf4] sm:$0xf]  ;;  %v5571_v47 = vsel %vm11729_vm5, %v5569_v14, %v5570_v0  ;;  %v10941_v56 = vld [vmem:[#allocation4 + $0x98] sm:$0xf0]  ;;  %v3831_v4 = vadd.f32 %v12713_v11, %v12738_v44 }
 0x45f   : > { %v5143_v9 = vrot.slane %v5141_v57, 4  ;;  %v5146_v53 = vrot.slane %v5144_v55, 5  ;;  %4703 = vst [vmem:[#allocation2 + $0x98] sm:$0x1] %v4702_v51  ;;  %v4475_v16 = vshrl.u32 %v4241_v41, 16  ;;  %v4478_v43 = vshll.u32 %v4241_v41, 16  ;;  %v6415_v21 = vpop.f32.mrf.mxu2  ;;  %v13005_v52 = vpop.f32.mrf.mxu3 }
 0x460   : > { %v4016_v20 = vmul.f32 %v12921_v5, %v3976_v59  ;;  %v10887_v13 = vld [vmem:[#allocation4 + $0x110] sm:$0xf0]  ;;  %v4704_v17 = vld [vmem:[#allocation2 + $0x9c] sm:$0xf]  ;;  %5673 = vst [vmem:[#allocation4 + $0x11c] sm:$0xf] %v5571_v47  ;;  %v13003_v44 = vadd.f32 %v6415_v21, %v12949_v22  ;;  %v3929_v55 = vpop.f32.mrf.mxu0 }
 0x461   : > { %v9756_v36 = vor.u32 %v10887_v13, %v9755_v27  ;;  %v10259_v1 = vld [vmem:[#allocation4 + $0x90] sm:$0xf]  ;;  %v5147_v3 = vor.u32 %v5146_v53, %v5143_v9  ;;  %v5150_v0 = vshll.u32 %v4856_v25, 16  ;;  %v5154_v35 = vshrl.u32 %v4856_v25, 16  ;;  %v4203_v45 = vld [vmem:[#allocation2 + $0xb0] sm:$0xf] }
 0x462   : > { %v9745_v2 = vld [vmem:[#allocation4 + $0xfc] sm:$0xf0]  ;;  %v12999_v6 = vrot.slane %v4475_v16, 7  ;;  %v4056_v11 = vadd.f32 %v12933_v8, %v4016_v20  ;;  %v4774_v57 = vld [vmem:[#allocation2 + $0x90] sm:$0xf]  ;;  %v5160_v59 = vshll.u32 %v4857_v12, 16  ;;  %v10260_v47 = vor.u32 %v10941_v56, %v10259_v1 }
 0x463   : > { %v9748_v58 = vor.u32 %v10883_v32, %v9745_v2  ;;  %v10834_v14 = vld [vmem:[#allocation10 + $0x10] sm:$0xff]  ;;  %v5148_v61 = vrot.slane %v5147_v3, 4  ;;  %v5152_v51 = vrot.slane %v5150_v0, 5  ;;  %v5156_v41 = vrot.slane %v5154_v35, 4  ;;  %4810 = vst [vmem:[#allocation4 + $0x120] sm:$0xf] %v4774_v57 }
 0x464   : > { %v4480_v27 = vor.u32 %v4478_v43, %v12999_v6  ;;  %v4092_v25 = vmax.f32 %v4056_v11, 0.0  ;;  %6370 = vmatmul.bf16.gmra.mxu1 %v9756_v36  ;;  %v3930_v32 = vadd.f32 %v3929_v55, %v3831_v4  ;;  %v4149_v9 = vld [vmem:[#allocation2 + $0xb4] sm:$0x1]  ;;  %v4481_v22 = vrot.slane %v12999_v6, 4  ;;  %v13974_v13 = vld [vmem:[#allocation19_spill] sm:$0xff] }
 0x465   : > { %6454 = vmatmul.bf16.gmra.mxu2 %v9748_v58  ;;  %v5153_v53 = vsel %vm11614_vm2, %v5148_v61, %v5152_v51  ;;  %v5157_v16 = vor.u32 %v5156_v41, %v5152_v51  ;;  %v4204_v20 = vsel %vm12413_vm11, 0, %v4203_v45  ;;  %6984 = vmatpush.bf16.msrb.mxu1 %v10834_v14  ;;  %v9763_v4 = vld [vmem:[#allocation4 + $0x110] sm:$0xf]  ;;  %v5162_v56 = vrot.slane %v5160_v59, 5  ;;  %v4775_v21 = vld [vmem:[#allocation2 + $0x94] sm:$0xf]  ;;  %v13016_v36 = vpop.f32.mrf.mxu1 }
 0x466   : > { %v4705_v12 = vsel %vm12413_vm11, %v4480_v27, %v4704_v17  ;;  %v4242_v43 = vpack.c.bf16 %v4092_v25, %v4092_v25  ;;  %v3977_v2 = vadd.f32 %v3930_v32, %v13974_v13  ;;  %7788 = vmatmul.bf16.gmra.mxu0 %v10260_v47  ;;  %5366 = vst [vmem:[#allocation4 + $0x10c] sm:$0xf] %v5153_v53  ;;  %v4150_v3 = vsel %vm12403_vm8, 0, %v4149_v9  ;;  %v5416_v0 = vld [vmem:[#allocation2 + $0x90] sm:$0xe] }
 0x467   : > { %4706 = vst [vmem:[#allocation2 + $0x9c] sm:$0xf] %v4705_v12  ;;  %v5158_v1 = vrot.slane %v5157_v16, 4  ;;  %v10888_v58 = vld [vmem:[#allocation4 + $0x118] sm:$0xf0]  ;;  %v3833_v11 = vadd.f32 %v12750_v38, %v12763_v54  ;;  %v6417_v45 = vpop.f32.mrf.mxu2  ;;  %v9627_v32 = vrot.slane %v5416_v0, 9 }
 0x468   : > { %v4483_v35 = vshrl.u32 %v4242_v43, 16  ;;  %v4486_v6 = vshll.u32 %v4242_v43, 16  ;;  %v4017_v17 = vmul.f32 %v12921_v5, %v3977_v2  ;;  %4205 = vst [vmem:[#allocation2 + $0xb0] sm:$0xf] %v4204_v20  ;;  %v9764_v14 = vor.u32 %v10888_v58, %v9763_v4  ;;  %v5417_v55 = vld [vmem:[#allocation2 + $0x94] sm:$0xf]  ;;  %v13029_v25 = vpop.f32.mrf.mxu3  ;;  %v3931_v9 = vpop.f32.mrf.mxu0 }
 0x469   : > { %v5163_v57 = vsel %vm11614_vm2, %v5158_v1, %v5162_v56  ;;  %4811 = vst [vmem:[#allocation4 + $0x12c] sm:$0xf] %v4775_v21  ;;  %v5418_v61 = vld [vmem:[#allocation2 + $0x98] sm:$0x1]  ;;  %v4708_v41 = vld [vmem:[#allocation2 + $0xa4] sm:$0x1]  ;;  %v13027_v27 = vadd.f32 %v6417_v45, %v12968_v50  ;;  %v3932_v2 = vadd.f32 %v3931_v9, %v3833_v11 }
 0x46a   : > { %v4485_v51 = vrot.slane %v4483_v35, 7  ;;  %v4057_v59 = vadd.f32 %v12933_v8, %v4017_v17  ;;  %5367 = vst [vmem:[#allocation4 + $0x118] sm:$0xf] %v5163_v57  ;;  %v13975_v38 = vld [vmem:[#allocation36_spill] sm:$0xff]  ;;  %6548 = vmatmul.bf16.gmra.mxu3 %v9764_v14  ;;  %v5574_v53 = vrot.slane %v5417_v55, 5  ;;  %v5577_v16 = vrot.slane %v5418_v61, 5 }
 0x46b   : > { %v13976_v54 = vld [vmem:[#allocation40_spill] sm:$0xff]  ;;  %4151 = vst [vmem:[#allocation2 + $0xb4] sm:$0x1] %v4150_v3  ;;  %v4858_v20 = vld [vmem:[#allocation2 + $0x90] sm:$0xf]  ;;  %v3836_v14 = vadd.f32 %v12773_v18, %v12789_v31 }
 0x46c   : > { %v3081_v47 = vadd.f32 %v13976_v54, %v13975_v38  ;;  %v4488_v12 = vor.u32 %v4486_v6, %v4485_v51  ;;  %v4490_v43 = vrot.slane %v4485_v51, 4  ;;  %v4093_v13 = vmax.f32 %v4057_v59, 0.0  ;;  %v10271_v56 = vld [vmem:[#allocation4 + $0xa8] sm:$0xf]  ;;  %v10944_v21 = vld [vmem:[#allocation4 + $0xb0] sm:$0xf0] }
 0x46d   : > { %v5575_v50 = vsel %vm11729_vm5, %v9627_v32, %v5574_v53  ;;  %v5576_v4 = vrot.slane %v5574_v53, 4  ;;  %v5165_v1 = vshrl.u32 %v4858_v20, 16  ;;  %v5168_v0 = vshll.u32 %v4858_v20, 16  ;;  %v9767_v6 = vld [vmem:[#allocation4 + $0x120] sm:$0xf]  ;;  %v13041_v55 = vpop.f32.mrf.mxu1 }
 0x46e   : > { %v4489_v35 = vsel %vm12489_vm13, %v4481_v22, %v4488_v12  ;;  %v4709_v3 = vsel %vm12403_vm8, %v4490_v43, %v4708_v41  ;;  %v4243_v17 = vpack.c.bf16 %v4093_v13, %v4093_v13  ;;  %v3978_v58 = vadd.f32 %v3932_v2, %v3081_v47  ;;  %5674 = vst [vmem:[#allocation4 + $0x128] sm:$0xf] %v5575_v50  ;;  %v4859_v45 = vld [vmem:[#allocation2 + $0x94] sm:$0xf]  ;;  %v4860_v11 = vld [vmem:[#allocation2 + $0x98] sm:$0x1] }
 0x46f   : > { %4707 = vst [vmem:[#allocation2 + $0xa0] sm:$0xf] %v4489_v35  ;;  %v10886_v57 = vld [vmem:[#allocation4 + $0x10c] sm:$0xf]  ;;  %v5578_v61 = vsel %vm11729_vm5, %v5576_v4, %v5577_v16  ;;  %v5167_v22 = vrot.slane %v5165_v1, 4  ;;  %v5170_v51 = vrot.slane %v5168_v0, 5  ;;  %v10272_v54 = vor.u32 %v10944_v21, %v10271_v56  ;;  %v6420_v53 = vpop.f32.mrf.mxu2 }
 0x470   : > { %4710 = vst [vmem:[#allocation2 + $0xa4] sm:$0x1] %v4709_v3  ;;  %v4492_v41 = vshrl.u32 %v4243_v17, 16  ;;  %v4495_v59 = vshll.u32 %v4243_v17, 16  ;;  %v4018_v32 = vmul.f32 %v12921_v5, %v3978_v58  ;;  %v10890_v38 = vld [vmem:[#allocation4 + $0x128] sm:$0xf0]  ;;  %v13050_v2 = vadd.f32 %v6420_v53, %v12992_v7  ;;  %v13052_v50 = vpop.f32.mrf.mxu3  ;;  %v3934_v21 = vpop.f32.mrf.mxu0 }
 0x471   : > { %v4711_v47 = vld [vmem:[#allocation2 + $0xa8] sm:$0xf]  ;;  %v9757_v9 = vld [vmem:[#allocation4 + $0x114] sm:$0xf0]  ;;  %v9768_v18 = vor.u32 %v10890_v38, %v9767_v6  ;;  %5675 = vst [vmem:[#allocation4 + $0x134] sm:$0xf] %v5578_v61  ;;  %v5171_v31 = vor.u32 %v5170_v51, %v5167_v22 }
 0x472   : > { %v5174_v20 = vshll.u32 %v4859_v45, 16  ;;  %v5178_v12 = vshrl.u32 %v4859_v45, 16  ;;  %v13046_v43 = vrot.slane %v4492_v41, 7  ;;  %v9760_v16 = vor.u32 %v10886_v57, %v9757_v9  ;;  %v4206_v4 = vld [vmem:[#allocation2 + $0xbc] sm:$0xf] }
 0x473   : > { %v4058_v13 = vadd.f32 %v12933_v8, %v4018_v32  ;;  %v4776_v56 = vld [vmem:[#allocation2 + $0x9c] sm:$0xf]  ;;  %v5172_v1 = vrot.slane %v5171_v31, 4  ;;  %v5184_v3 = vshll.u32 %v4860_v11, 16  ;;  %v3935_v45 = vadd.f32 %v3934_v21, %v3836_v14  ;;  %v4152_v57 = vld [vmem:[#allocation2 + $0xc0] sm:$0x1] }
 0x474   : > { %v5176_v0 = vrot.slane %v5174_v20, 5  ;;  %v5180_v35 = vrot.slane %v5178_v12, 4  ;;  %4812 = vst [vmem:[#allocation4 + $0x138] sm:$0xf] %v4776_v56  ;;  %v4497_v17 = vor.u32 %v4495_v59, %v13046_v43  ;;  %v4498_v58 = vrot.slane %v13046_v43, 4  ;;  %6375 = vmatmul.bf16.gmra.mxu1 %v9768_v18  ;;  %v13977_v59 = vld [vmem:[#allocation20_spill] sm:$0xff] }
 0x475   : > { %v4094_v6 = vmax.f32 %v4058_v13, 0.0  ;;  %6459 = vmatmul.bf16.gmra.mxu2 %v9760_v16  ;;  %v5186_v22 = vrot.slane %v5184_v3, 5  ;;  %v4207_v51 = vsel %vm12413_vm11, 0, %v4206_v4  ;;  %v3979_v32 = vadd.f32 %v3935_v45, %v13977_v59  ;;  %v9775_v38 = vld [vmem:[#allocation4 + $0x128] sm:$0xf]  ;;  %v13065_v53 = vpop.f32.mrf.mxu1  ;;  %v10841_v20 = vld [vmem:[#allocation10 + $0x48] sm:$0xff] }
 0x476   : > { %v5177_v7 = vsel %vm11614_vm2, %v5172_v1, %v5176_v0  ;;  %v5181_v61 = vor.u32 %v5180_v35, %v5176_v0  ;;  %v4712_v11 = vsel %vm12413_vm11, %v4497_v17, %v4711_v47  ;;  %7793 = vmatmul.bf16.gmra.mxu0 %v10272_v54  ;;  %v4777_v14 = vld [vmem:[#allocation2 + $0xa0] sm:$0xf]  ;;  %v4153_v9 = vsel %vm12403_vm8, 0, %v4152_v57  ;;  %v5419_v31 = vld [vmem:[#allocation2 + $0x9c] sm:$0xe]  ;;  %7074 = vmatpush.bf16.msrb.mxu2 %v10841_v20  ;;  %v13978_v45 = vld [vmem:[#allocation38_spill] sm:$0xff] }
 0x477   : > { %v4244_v41 = vpack.c.bf16 %v4094_v6, %v4094_v6  ;;  %5368 = vst [vmem:[#allocation4 + $0x124] sm:$0xf] %v5177_v7  ;;  %v4019_v47 = vmul.f32 %v12921_v5, %v3979_v32  ;;  %v3838_v54 = vadd.f32 %v12801_v60, %v12813_v34  ;;  %v6422_v13 = vpop.f32.mrf.mxu2  ;;  %v5420_v21 = vld [vmem:[#allocation2 + $0xa0] sm:$0xf]  ;;  %v5421_v1 = vld [vmem:[#allocation2 + $0xa4] sm:$0x1] }
 0x478   : > { %4713 = vst [vmem:[#allocation2 + $0xa8] sm:$0xf] %v4712_v11  ;;  %v5182_v18 = vrot.slane %v5181_v61, 4  ;;  %v10891_v16 = vld [vmem:[#allocation4 + $0x130] sm:$0xf0]  ;;  %v13074_v17 = vadd.f32 %v6422_v13, %v13016_v36  ;;  %v9628_v6 = vrot.slane %v5419_v31, 9  ;;  %v3936_v7 = vpop.f32.mrf.mxu0 }
 0x479   : > { %v4500_v12 = vshrl.u32 %v4244_v41, 16  ;;  %v4503_v43 = vshll.u32 %v4244_v41, 16  ;;  %4208 = vst [vmem:[#allocation2 + $0xbc] sm:$0xf] %v4207_v51  ;;  %v9776_v4 = vor.u32 %v10891_v16, %v9775_v38  ;;  %v4715_v35 = vld [vmem:[#allocation2 + $0xb0] sm:$0x1]  ;;  %v4059_v3 = vadd.f32 %v12933_v8, %v4019_v47  ;;  %v13078_v57 = vpop.f32.mrf.mxu3 }
 0x47a   : > { %v5187_v56 = vsel %vm11614_vm2, %v5182_v18, %v5186_v22  ;;  %4813 = vst [vmem:[#allocation4 + $0x144] sm:$0xf] %v4777_v14  ;;  %v13979_v60 = vld [vmem:[#allocation43_spill] sm:$0xff]  ;;  %v5581_v61 = vrot.slane %v5420_v21, 5  ;;  %v5584_v22 = vrot.slane %v5421_v1, 5  ;;  %v3937_v32 = vadd.f32 %v3936_v7, %v3838_v54 }
 0x47b   : > { %v4502_v0 = vrot.slane %v4500_v12, 7  ;;  %5369 = vst [vmem:[#allocation4 + $0x130] sm:$0xf] %v5187_v56  ;;  %v3086_v34 = vadd.f32 %v13979_v60, %v13978_v45  ;;  %6553 = vmatmul.bf16.gmra.mxu3 %v9776_v4  ;;  %v4861_v51 = vld [vmem:[#allocation2 + $0x9c] sm:$0xf]  ;;  %v4095_v59 = vmax.f32 %v4059_v3, 0.0 }
 0x47c   : > { %4154 = vst [vmem:[#allocation2 + $0xc0] sm:$0x1] %v4153_v9  ;;  %v5582_v36 = vsel %vm11729_vm5, %v9628_v6, %v5581_v61  ;;  %v5583_v38 = vrot.slane %v5581_v61, 4  ;;  %v5189_v14 = vshrl.u32 %v4861_v51, 16  ;;  %v5192_v18 = vshll.u32 %v4861_v51, 16 }
 0x47d   : > { %v4505_v11 = vor.u32 %v4503_v43, %v4502_v0  ;;  %v4507_v41 = vrot.slane %v4502_v0, 4  ;;  %v4245_v9 = vpack.c.bf16 %v4095_v59, %v4095_v59  ;;  %v3980_v12 = vadd.f32 %v3937_v32, %v3086_v34  ;;  %v9779_v47 = vld [vmem:[#allocation4 + $0x138] sm:$0xf]  ;;  %5676 = vst [vmem:[#allocation4 + $0x140] sm:$0xf] %v5582_v36 }
 0x47e   : > { %v4862_v43 = vld [vmem:[#allocation2 + $0xa0] sm:$0xf]  ;;  %v4863_v16 = vld [vmem:[#allocation2 + $0xa4] sm:$0x1]  ;;  %v10889_v54 = vld [vmem:[#allocation4 + $0x124] sm:$0xf]  ;;  %v5585_v13 = vsel %vm11729_vm5, %v5583_v38, %v5584_v22 }
 0x47f   : > { %v4506_v31 = vsel %vm12489_vm13, %v4498_v58, %v4505_v11  ;;  %v4716_v20 = vsel %vm12403_vm8, %v4507_v41, %v4715_v35  ;;  %v10947_v4 = vld [vmem:[#allocation4 + $0xc8] sm:$0xf0]  ;;  %v5191_v56 = vrot.slane %v5189_v14, 4  ;;  %v5194_v21 = vrot.slane %v5192_v18, 5  ;;  %v4209_v1 = vld [vmem:[#allocation2 + $0xc8] sm:$0xf]  ;;  %v13091_v6 = vpop.f32.mrf.mxu1 }
 0x480   : > { %4714 = vst [vmem:[#allocation2 + $0xac] sm:$0xf] %v4506_v31  ;;  %v3841_v58 = vadd.f32 %v12823_v40, %v12841_v29  ;;  %v4509_v0 = vshrl.u32 %v4245_v9, 16  ;;  %v4512_v35 = vshll.u32 %v4245_v9, 16  ;;  %v4020_v3 = vmul.f32 %v12921_v5, %v3980_v12  ;;  %v10283_v7 = vld [vmem:[#allocation4 + $0xc0] sm:$0xf]  ;;  %v3939_v38 = vpop.f32.mrf.mxu0 }
 0x481   : > { %4717 = vst [vmem:[#allocation2 + $0xb0] sm:$0x1] %v4716_v20  ;;  %v10893_v45 = vld [vmem:[#allocation4 + $0x140] sm:$0xf0]  ;;  %v5195_v61 = vor.u32 %v5194_v21, %v5191_v56  ;;  %v5198_v22 = vshll.u32 %v4862_v43, 16  ;;  %v5202_v51 = vshrl.u32 %v4862_v43, 16  ;;  %v13096_v36 = vpop.f32.mrf.mxu3 }
 0x482   : > { %v9769_v60 = vld [vmem:[#allocation4 + $0x12c] sm:$0xf0]  ;;  %v9780_v34 = vor.u32 %v10893_v45, %v9779_v47  ;;  %5677 = vst [vmem:[#allocation4 + $0x14c] sm:$0xf] %v5585_v13  ;;  %v13093_v11 = vrot.slane %v4509_v0, 7  ;;  %v4060_v40 = vadd.f32 %v12933_v8, %v4020_v3  ;;  %v5208_v29 = vshll.u32 %v4863_v16, 16 }
 0x483   : > { %v4718_v41 = vld [vmem:[#allocation2 + $0xb4] sm:$0xf]  ;;  %v9772_v59 = vor.u32 %v10889_v54, %v9769_v60  ;;  %v5196_v14 = vrot.slane %v5195_v61, 4  ;;  %v5200_v18 = vrot.slane %v5198_v22, 5  ;;  %v5204_v31 = vrot.slane %v5202_v51, 4  ;;  %v6425_v16 = vpop.f32.mrf.mxu2  ;;  %v13980_v3 = vld [vmem:[#allocation47_spill] sm:$0xff] }
 0x484   : > { %v10833_v32 = vld [vmem:[#allocation10 + $0x8] sm:$0xff]  ;;  %v4210_v20 = vsel %vm12413_vm11, 0, %v4209_v1  ;;  %v4778_v9 = vld [vmem:[#allocation2 + $0xa8] sm:$0xf]  ;;  %v4514_v12 = vor.u32 %v4512_v35, %v13093_v11  ;;  %v4096_v47 = vmax.f32 %v4060_v40, 0.0  ;;  %6380 = vmatmul.bf16.gmra.mxu1 %v9780_v34  ;;  %v3940_v43 = vadd.f32 %v3939_v38, %v3841_v58 }
 0x485   : > { %v10284_v54 = vor.u32 %v10947_v4, %v10283_v7  ;;  %4211 = vst [vmem:[#allocation2 + $0xc8] sm:$0xf] %v4210_v20  ;;  %6464 = vmatmul.bf16.gmra.mxu2 %v9772_v59  ;;  %v5201_v13 = vsel %vm11614_vm2, %v5196_v14, %v5200_v18  ;;  %v5205_v56 = vor.u32 %v5204_v31, %v5200_v18  ;;  %v4155_v21 = vld [vmem:[#allocation2 + $0xcc] sm:$0x1]  ;;  %v9787_v45 = vld [vmem:[#allocation4 + $0x140] sm:$0xf] }
 0x486   : > { %6985 = vmatpush.bf16.msrb.mxu1 %v10833_v32  ;;  %4814 = vst [vmem:[#allocation4 + $0x150] sm:$0xf] %v4778_v9  ;;  %v4719_v1 = vsel %vm12413_vm11, %v4514_v12, %v4718_v41  ;;  %v4246_v0 = vpack.c.bf16 %v4096_v47, %v4096_v47  ;;  %v13106_v35 = vadd.f32 %v6425_v16, %v13041_v55  ;;  %v5210_v34 = vrot.slane %v5208_v29, 5  ;;  %v4722_v55 = vld [vmem:[#allocation2 + $0xbc] sm:$0x1]  ;;  %v13981_v9 = vld [vmem:[#allocation44_spill] sm:$0xff] }
 0x487   : > { %v3981_v58 = vadd.f32 %v3940_v43, %v13980_v3  ;;  %7798 = vmatmul.bf16.gmra.mxu0 %v10284_v54  ;;  %v4779_v4 = vld [vmem:[#allocation2 + $0xac] sm:$0xf]  ;;  %4720 = vst [vmem:[#allocation2 + $0xb4] sm:$0xf] %v4719_v1  ;;  %v5206_v60 = vrot.slane %v5205_v56, 4  ;;  %v13110_v22 = vpop.f32.mrf.mxu1  ;;  %v4156_v41 = vsel %vm12403_vm8, 0, %v4155_v21  ;;  %v3843_v29 = vadd.f32 %v12851_v10, %v12864_v30 }
 0x488   : > { %v4517_v7 = vshrl.u32 %v4246_v0, 16  ;;  %5370 = vst [vmem:[#allocation4 + $0x13c] sm:$0xf] %v5201_v13  ;;  %v5422_v32 = vld [vmem:[#allocation2 + $0xa8] sm:$0xe]  ;;  %v4520_v18 = vshll.u32 %v4246_v0, 16  ;;  %v3941_v16 = vpop.f32.mrf.mxu0 }
 0x489   : > { %v4021_v61 = vmul.f32 %v12921_v5, %v3981_v58  ;;  %v10894_v51 = vld [vmem:[#allocation4 + $0x148] sm:$0xf0]  ;;  %v5211_v40 = vsel %vm11614_vm2, %v5206_v60, %v5210_v34  ;;  %4815 = vst [vmem:[#allocation4 + $0x15c] sm:$0xf] %v4779_v4  ;;  %v5423_v38 = vld [vmem:[#allocation2 + $0xac] sm:$0xf]  ;;  %v13122_v54 = vpop.f32.mrf.mxu3  ;;  %v3942_v1 = vadd.f32 %v3941_v16, %v3843_v29 }
 0x48a   : > { %v9788_v59 = vor.u32 %v10894_v51, %v9787_v45  ;;  %v4519_v14 = vrot.slane %v4517_v7, 7  ;;  %5371 = vst [vmem:[#allocation4 + $0x148] sm:$0xf] %v5211_v40  ;;  %v5424_v20 = vld [vmem:[#allocation2 + $0xb0] sm:$0x1]  ;;  %v13982_v12 = vld [vmem:[#allocation21_spill] sm:$0xff] }
 0x48b   : > { %v4061_v31 = vadd.f32 %v12933_v8, %v4021_v61  ;;  %v3091_v47 = vadd.f32 %v13982_v12, %v13981_v9  ;;  %v4515_v43 = vrot.slane %v13093_v11, 4  ;;  %4157 = vst [vmem:[#allocation2 + $0xcc] sm:$0x1] %v4156_v41  ;;  %v9629_v13 = vrot.slane %v5422_v32, 9  ;;  %v4864_v0 = vld [vmem:[#allocation2 + $0xa8] sm:$0xf]  ;;  %v6427_v3 = vpop.f32.mrf.mxu2 }
 0x48c   : > { %6558 = vmatmul.bf16.gmra.mxu3 %v9788_v59  ;;  %v5588_v56 = vrot.slane %v5423_v38, 5  ;;  %v4522_v21 = vor.u32 %v4520_v18, %v4519_v14  ;;  %v4524_v10 = vrot.slane %v4519_v14, 4  ;;  %v5591_v45 = vrot.slane %v5424_v20, 5  ;;  %v10295_v60 = vld [vmem:[#allocation4 + $0xd8] sm:$0xf] }
 0x48d   : > { %v4097_v30 = vmax.f32 %v4061_v31, 0.0  ;;  %v10950_v11 = vld [vmem:[#allocation4 + $0xe0] sm:$0xf0]  ;;  %v5213_v34 = vshrl.u32 %v4864_v0, 16  ;;  %v13131_v41 = vadd.f32 %v6427_v3, %v13065_v53  ;;  %v9791_v59 = vld [vmem:[#allocation4 + $0x150] sm:$0xf]  ;;  %v3982_v29 = vadd.f32 %v3942_v1, %v3091_v47 }
 0x48e   : > { %v5589_v58 = vsel %vm11729_vm5, %v9629_v13, %v5588_v56  ;;  %v5590_v4 = vrot.slane %v5588_v56, 4  ;;  %v4523_v7 = vsel %vm12489_vm13, %v4515_v43, %v4522_v21  ;;  %v4723_v61 = vsel %vm12403_vm8, %v4524_v10, %v4722_v55  ;;  %v4865_v40 = vld [vmem:[#allocation2 + $0xac] sm:$0xf]  ;;  %v4212_v32 = vld [vmem:[#allocation2 + $0xd4] sm:$0xf]  ;;  %v10855_v3 = vld [vmem:[#allocation10 + $0xb8] sm:$0xff] }
 0x48f   : > { %v4247_v51 = vpack.c.bf16 %v4097_v30, %v4097_v30  ;;  %5678 = vst [vmem:[#allocation4 + $0x158] sm:$0xf] %v5589_v58  ;;  %v10892_v38 = vld [vmem:[#allocation4 + $0x13c] sm:$0xf]  ;;  %v4866_v18 = vld [vmem:[#allocation2 + $0xb0] sm:$0x1]  ;;  %v3846_v55 = vadd.f32 %v12876_v63, %v12894_v49  ;;  %v10296_v43 = vor.u32 %v10950_v11, %v10295_v60  ;;  %v4022_v13 = vmul.f32 %v12921_v5, %v3982_v29 }
 0x490   : > { %4721 = vst [vmem:[#allocation2 + $0xb8] sm:$0xf] %v4523_v7  ;;  %v5592_v14 = vsel %vm11729_vm5, %v5590_v4, %v5591_v45  ;;  %v5215_v31 = vrot.slane %v5213_v34, 4  ;;  %v5216_v20 = vshll.u32 %v4864_v0, 16  ;;  %v13137_v53 = vpop.f32.mrf.mxu1  ;;  %v10896_v12 = vld [vmem:[#allocation4 + $0x158] sm:$0xf0]  ;;  %7157 = vmatpush.bf16.msra.mxu3 %v10855_v3 }
 0x491   : > { %4724 = vst [vmem:[#allocation2 + $0xbc] sm:$0x1] %v4723_v61  ;;  %v4526_v9 = vshrl.u32 %v4247_v51, 16  ;;  %v9781_v16 = vld [vmem:[#allocation4 + $0x144] sm:$0xf0]  ;;  %v9792_v56 = vor.u32 %v10896_v12, %v9791_v59  ;;  %v5222_v21 = vshll.u32 %v4865_v40, 16  ;;  %v4062_v49 = vadd.f32 %v12933_v8, %v4022_v13  ;;  %v3944_v58 = vpop.f32.mrf.mxu0  ;;  %v13146_v7 = vpop.f32.mrf.mxu3 }
 0x492   : > { %5679 = vst [vmem:[#allocation4 + $0x164] sm:$0xf] %v5592_v14  ;;  %v5218_v47 = vrot.slane %v5216_v20, 5  ;;  %v4529_v30 = vshll.u32 %v4247_v51, 16  ;;  %v9784_v1 = vor.u32 %v10892_v38, %v9781_v16  ;;  %v5226_v0 = vshrl.u32 %v4865_v40, 16  ;;  %v13983_v38 = vld [vmem:[#allocation48_spill] sm:$0xff] }
 0x493   : > { %v13140_v10 = vrot.slane %v4526_v9, 7  ;;  %v4725_v63 = vld [vmem:[#allocation2 + $0xc0] sm:$0xf]  ;;  %v5224_v45 = vrot.slane %v5222_v21, 5  ;;  %v4213_v60 = vsel %vm12413_vm11, 0, %v4212_v32  ;;  %v3945_v61 = vadd.f32 %v3944_v58, %v3846_v55  ;;  %v6430_v32 = vpop.f32.mrf.mxu2 }
 0x494   : > { %v5219_v4 = vor.u32 %v5218_v47, %v5215_v31  ;;  %v5425_v11 = vld [vmem:[#allocation2 + $0xb4] sm:$0xe]  ;;  %6385 = vmatmul.bf16.gmra.mxu1 %v9792_v56  ;;  %v5228_v51 = vrot.slane %v5226_v0, 4  ;;  %v5232_v59 = vshll.u32 %v4866_v18, 16  ;;  %4214 = vst [vmem:[#allocation2 + $0xd4] sm:$0xf] %v4213_v60  ;;  %v13152_v29 = vadd.f32 %v12871_v33, %v13983_v38 }
 0x495   : > { %v4531_v34 = vor.u32 %v4529_v30, %v13140_v10  ;;  %v13148_v40 = vld [vmem:[#allocation2 + $0xb4] sm:$0xf]  ;;  %6469 = vmatmul.bf16.gmra.mxu2 %v9784_v1  ;;  %v4098_v14 = vmax.f32 %v4062_v49, 0.0  ;;  %v9630_v9 = vrot.slane %v5425_v11, 9  ;;  %v13157_v55 = vadd.f32 %v6430_v32, %v13091_v6 }
 0x496   : > { %v5220_v31 = vrot.slane %v5219_v4, 4  ;;  %v4780_v20 = vld [vmem:[#allocation2 + $0xb4] sm:$0xf]  ;;  %v9799_v13 = vld [vmem:[#allocation4 + $0x158] sm:$0xf]  ;;  %v5229_v56 = vor.u32 %v5228_v51, %v5224_v45  ;;  %v5237_v3 = vshrl.u32 %v13148_v40, 16  ;;  %v3848_v6 = vadd.f32 %v12902_v26, %v12926_v24 }
 0x497   : > { %v4726_v12 = vsel %vm12413_vm11, %v4531_v34, %v4725_v63  ;;  %v13984_v18 = vld [vmem:[#allocation22_spill] sm:$0xff]  ;;  %7803 = vmatmul.bf16.gmra.mxu0 %v10296_v43  ;;  %v4781_v47 = vld [vmem:[#allocation2 + $0xb8] sm:$0xf]  ;;  %v4248_v21 = vpack.c.bf16 %v4098_v14, %v4098_v14  ;;  %v5234_v4 = vrot.slane %v5232_v59, 5  ;;  %v4532_v60 = vrot.slane %v13140_v10, 4  ;;  %v10840_v59 = vld [vmem:[#allocation10 + $0x40] sm:$0xff] }
 0x498   : > { %v3983_v16 = vadd.f32 %v3945_v61, %v13984_v18  ;;  %v5426_v33 = vld [vmem:[#allocation2 + $0xb8] sm:$0xf]  ;;  %4727 = vst [vmem:[#allocation2 + $0xc0] sm:$0xf] %v4726_v12  ;;  %v5225_v30 = vsel %vm11614_vm2, %v5220_v31, %v5224_v45  ;;  %v5427_v1 = vld [vmem:[#allocation2 + $0xbc] sm:$0x1]  ;;  %v13166_v49 = vpop.f32.mrf.mxu1  ;;  %7075 = vmatpush.bf16.msrb.mxu2 %v10840_v59 }
 0x499   : > { %v5595_v0 = vrot.slane %v5426_v33, 5  ;;  %v10897_v43 = vld [vmem:[#allocation4 + $0x160] sm:$0xf0]  ;;  %v5230_v58 = vrot.slane %v5229_v56, 4  ;;  %5372 = vst [vmem:[#allocation4 + $0x154] sm:$0xf] %v5225_v30  ;;  %v3946_v31 = vpop.f32.mrf.mxu0 }
 0x49a   : > { %v4023_v63 = vmul.f32 %v12921_v5, %v3983_v16  ;;  %v4534_v11 = vshrl.u32 %v4248_v21, 16  ;;  %v9800_v34 = vor.u32 %v10897_v43, %v9799_v13  ;;  %4816 = vst [vmem:[#allocation4 + $0x168] sm:$0xf] %v4780_v20  ;;  %v4868_v61 = vld [vmem:[#allocation2 + $0xb8] sm:$0xf]  ;;  %v5598_v38 = vrot.slane %v5427_v1, 5 }
 0x49b   : > { %v5596_v45 = vsel %vm11729_vm5, %v9630_v9, %v5595_v0  ;;  %v4729_v51 = vld [vmem:[#allocation2 + $0xc8] sm:$0x1]  ;;  %v5235_v5 = vsel %vm11614_vm2, %v5230_v58, %v5234_v4  ;;  %4817 = vst [vmem:[#allocation4 + $0x174] sm:$0xf] %v4781_v47  ;;  %v5597_v24 = vrot.slane %v5595_v0, 4  ;;  %v10854_v14 = vld [vmem:[#allocation10 + $0xb0] sm:$0xff]  ;;  %v3947_v18 = vadd.f32 %v3946_v31, %v3848_v6 }
 0x49c   : > { %v4063_v26 = vadd.f32 %v12933_v8, %v4023_v63  ;;  %v4536_v32 = vrot.slane %v4534_v11, 7  ;;  %v4537_v10 = vshll.u32 %v4248_v21, 16  ;;  %6563 = vmatmul.bf16.gmra.mxu3 %v9800_v34  ;;  %5373 = vst [vmem:[#allocation4 + $0x160] sm:$0xf] %v5235_v5  ;;  %v5239_v20 = vrot.slane %v5237_v3, 4  ;;  %v10832_v13 = vld [vmem:[#allocation10] sm:$0xff]  ;;  %v6432_v21 = vpop.f32.mrf.mxu2 }
 0x49d   : > { %v5240_v9 = vshll.u32 %v13148_v40, 16  ;;  %v5599_v8 = vsel %vm11729_vm5, %v5597_v24, %v5598_v38  ;;  %5680 = vst [vmem:[#allocation4 + $0x170] sm:$0xf] %v5596_v45  ;;  %v5246_v16 = vshll.u32 %v4868_v61, 16  ;;  %7158 = vmatpush.bf16.msra.mxu3 %v10854_v14  ;;  %v10853_v56 = vld [vmem:[#allocation10 + $0xa8] sm:$0xff]  ;;  %v5250_v1 = vshrl.u32 %v4868_v61, 16  ;;  %v13180_v3 = vpop.f32.mrf.mxu3  ;;  %6986 = vmatpush.bf16.msrb.mxu1 %v10832_v13 }
 0x49e   : > { %v4099_v12 = vmax.f32 %v4063_v26, 0.0  ;;  %v4539_v47 = vor.u32 %v4537_v10, %v4536_v32  ;;  %v4541_v33 = vrot.slane %v4536_v32, 4  ;;  %5681 = vst [vmem:[#allocation4 + $0x17c] sm:$0xf] %v5599_v8  ;;  %v13178_v40 = vadd.f32 %v6432_v21, %v13110_v22  ;;  %v4869_v63 = vld [vmem:[#allocation2 + $0xbc] sm:$0x1] }
 0x49f   : > { %v5242_v30 = vrot.slane %v5240_v9, 5  ;;  %v3984_v6 = vadd.f32 %v3947_v18, %v13152_v29  ;;  %v5248_v43 = vrot.slane %v5246_v16, 5  ;;  %v4782_v58 = vld [vmem:[#allocation2 + $0xc0] sm:$0xf]  ;;  %v10953_v34 = vld [vmem:[#allocation4 + $0xf8] sm:$0xf0] }
 0x4a0   : > { %v4249_v0 = vpack.c.bf16 %v4099_v12, %v4099_v12  ;;  %v4540_v4 = vsel %vm12489_vm13, %v4532_v60, %v4539_v47  ;;  %v4730_v11 = vsel %vm12403_vm8, %v4541_v33, %v4729_v51  ;;  %v5252_v61 = vrot.slane %v5250_v1, 4  ;;  %4818 = vst [vmem:[#allocation4 + $0x180] sm:$0xf] %v4782_v58  ;;  %v10895_v26 = vld [vmem:[#allocation4 + $0x154] sm:$0xf]  ;;  %v13190_v24 = vpop.f32.mrf.mxu1  ;;  %v10851_v58 = vld [vmem:[#allocation10 + $0x98] sm:$0xff] }
 0x4a1   : > { %v5243_v45 = vor.u32 %v5242_v30, %v5239_v20  ;;  %4728 = vst [vmem:[#allocation2 + $0xc4] sm:$0xf] %v4540_v4  ;;  %v11251_v29 = vld [vmem:[%s13792_s2] ss:$0 sm:$0xff]  ;;  %7159 = vmatpush.bf16.msra.mxu3 %v10853_v56  ;;  %v10852_v60 = vld [vmem:[#allocation10 + $0xa0] sm:$0xff]  ;;  %v5256_v10 = vshll.u32 %v4869_v63, 16 }
 0x4a2   : > { %v4543_v22 = vshrl.u32 %v4249_v0, 16  ;;  %v4024_v5 = vmul.f32 %v11251_v29, %v3984_v6  ;;  %v9803_v38 = vld [vmem:[#allocation4 + $0x168] sm:$0xf]  ;;  %4731 = vst [vmem:[#allocation2 + $0xc8] sm:$0x1] %v4730_v11  ;;  %v5253_v32 = vor.u32 %v5252_v61, %v5248_v43  ;;  %v4546_v20 = vshll.u32 %v4249_v0, 16 }
 0x4a3   : > { %v10899_v59 = vld [vmem:[#allocation4 + $0x170] sm:$0xf0]  ;;  %v10307_v51 = vld [vmem:[#allocation4 + $0xf0] sm:$0xf]  ;;  %v5244_v14 = vrot.slane %v5243_v45, 4  ;;  %v5258_v21 = vrot.slane %v5256_v10, 5 }
 0x4a4   : > { %v13192_v31 = vrot.slane %v4543_v22, 7  ;;  %v9793_v9 = vld [vmem:[#allocation4 + $0x15c] sm:$0xf0]  ;;  %v11252_v12 = vld [vmem:[%s13793_s3] ss:$0 sm:$0xff]  ;;  %v9804_v8 = vor.u32 %v10899_v59, %v9803_v38  ;;  %v5254_v33 = vrot.slane %v5253_v32, 4  ;;  %v10308_v63 = vor.u32 %v10953_v34, %v10307_v51 }
 0x4a5   : > { %v4064_v18 = vadd.f32 %v11252_v12, %v4024_v5  ;;  %v5428_v16 = vld [vmem:[#allocation2 + $0xc0] sm:$0xe]  ;;  %v4732_v13 = vld [vmem:[#allocation2 + $0xcc] sm:$0xf]  ;;  %v9796_v56 = vor.u32 %v10895_v26, %v9793_v9  ;;  %v5249_v47 = vsel %vm11614_vm2, %v5244_v14, %v5248_v43  ;;  %v10900_v0 = vld [vmem:[#allocation4 + $0x178] sm:$0xf0]  ;;  %7160 = vmatpush.bf16.msra.mxu3 %v10852_v60  ;;  %v13205_v26 = vpop.f32.mrf.mxu3 }
 0x4a6   : > { %v4870_v30 = vld [vmem:[#allocation2 + $0xc0] sm:$0xf]  ;;  %v4548_v1 = vor.u32 %v4546_v20, %v13192_v31  ;;  %6390 = vmatmul.bf16.gmra.mxu1 %v9804_v8  ;;  %5374 = vst [vmem:[#allocation4 + $0x16c] sm:$0xf] %v5249_v47  ;;  %v4549_v4 = vrot.slane %v13192_v31, 4  ;;  %v5259_v45 = vsel %vm11614_vm2, %v5254_v33, %v5258_v21  ;;  %v9631_v43 = vrot.slane %v5428_v16, 9 }
 0x4a7   : > { %v4100_v6 = vmax.f32 %v4064_v18, 0.0  ;;  %6474 = vmatmul.bf16.gmra.mxu2 %v9796_v56  ;;  %v9811_v11 = vld [vmem:[#allocation4 + $0x170] sm:$0xf]  ;;  %7808 = vmatmul.bf16.gmra.mxu0 %v10308_v63  ;;  %5375 = vst [vmem:[#allocation4 + $0x178] sm:$0xf] %v5259_v45  ;;  %v5261_v34 = vshrl.u32 %v4870_v30, 16 }
 0x4a8   : > { %v4733_v61 = vsel %vm12413_vm11, %v4548_v1, %v4732_v13  ;;  %v5264_v29 = vshll.u32 %v4870_v30, 16  ;;  %v10850_v5 = vld [vmem:[#allocation10 + $0x90] sm:$0xff]  ;;  %v9812_v38 = vor.u32 %v10900_v0, %v9811_v11  ;;  %v4783_v60 = vld [vmem:[#allocation2 + $0xc4] sm:$0xf]  ;;  %v13985_v51 = vmov 0   ;;  %v6435_v10 = vpop.f32.mrf.mxu2  ;;  %v13208_v31 = vpop.f32.mrf.mxu1  ;;  %v10849_v11 = vld [vmem:[#allocation10 + $0x88] sm:$0xff] }
 0x4a9   : > { %v4250_v22 = vpack.c.bf16 %v4100_v6, %v4100_v6  ;;  %4734 = vst [vmem:[#allocation2 + $0xcc] sm:$0xf] %v4733_v61  ;;  %v5429_v59 = vld [vmem:[#allocation2 + $0xc4] sm:$0xf]  ;;  %v5430_v37 = vld [vmem:[#allocation2 + $0xc8] sm:$0x1]  ;;  %7161 = vmatpush.bf16.msra.mxu3 %v10851_v58  ;;  %v13211_v20 = vadd.f32 %v6435_v10, %v13137_v53 }
 0x4aa   : > { %4747 = vst [vmem:[#allocation2 + $0xcc] sm:$0xf] %v13985_v51  ;;  %v5602_v9 = vrot.slane %v5429_v59, 5  ;;  %v5605_v12 = vrot.slane %v5430_v37, 5  ;;  %v4871_v18 = vld [vmem:[#allocation2 + $0xc4] sm:$0xf] }
 0x4ab   : > { %v4551_v14 = vshrl.u32 %v4250_v22, 16  ;;  %v4554_v32 = vshll.u32 %v4250_v22, 16  ;;  %4819 = vst [vmem:[#allocation4 + $0x18c] sm:$0xf] %v4783_v60  ;;  %v4872_v16 = vld [vmem:[#allocation2 + $0xc8] sm:$0x1] }
 0x4ac   : > { %v5263_v13 = vrot.slane %v5261_v34, 4  ;;  %v5266_v56 = vrot.slane %v5264_v29, 5  ;;  %v5270_v47 = vshll.u32 %v4871_v18, 16  ;;  %v4736_v33 = vld [vmem:[#allocation2 + $0xd4] sm:$0x1]  ;;  %6568 = vmatmul.bf16.gmra.mxu3 %v9812_v38  ;;  %v5603_v21 = vsel %vm11729_vm5, %v9631_v43, %v5602_v9  ;;  %v10848_v37 = vld [vmem:[#allocation10 + $0x80] sm:$0xff] }
 0x4ad   : > { %v4553_v8 = vrot.slane %v4551_v14, 7  ;;  %v5604_v30 = vrot.slane %v5602_v9, 4  ;;  %v5274_v1 = vshrl.u32 %v4871_v18, 16  ;;  %v5280_v6 = vshll.u32 %v4872_v16, 16  ;;  %5682 = vst [vmem:[#allocation4 + $0x188] sm:$0xf] %v5603_v21  ;;  %7162 = vmatpush.bf16.msra.mxu3 %v10850_v5  ;;  %v13221_v34 = vpop.f32.mrf.mxu3 }
 0x4ae   : > { %v5267_v63 = vor.u32 %v5266_v56, %v5263_v13  ;;  %v5272_v58 = vrot.slane %v5270_v47, 5  ;;  %v9805_v29 = vld [vmem:[#allocation4 + $0x174] sm:$0xf0]  ;;  %v10898_v60 = vld [vmem:[#allocation4 + $0x16c] sm:$0xf] }
 0x4af   : > { %v4556_v0 = vor.u32 %v4554_v32, %v4553_v8  ;;  %v4558_v53 = vrot.slane %v4553_v8, 4  ;;  %v5606_v45 = vsel %vm11729_vm5, %v5604_v30, %v5605_v12  ;;  %v5276_v61 = vrot.slane %v5274_v1, 4  ;;  %v9815_v59 = vld [vmem:[#allocation4 + $0x180] sm:$0xf]  ;;  %v10956_v5 = vld [vmem:[#allocation4 + $0x110] sm:$0xf0] }
 0x4b0   : > { %5683 = vst [vmem:[#allocation4 + $0x194] sm:$0xf] %v5606_v45  ;;  %v5268_v38 = vrot.slane %v5267_v63, 4  ;;  %v6437_v32 = vpop.f32.mrf.mxu2  ;;  %v9808_v12 = vor.u32 %v10898_v60, %v9805_v29  ;;  %v10319_v16 = vld [vmem:[#allocation4 + $0x108] sm:$0xf] }
 0x4b1   : > { %v4557_v22 = vsel %vm12489_vm13, %v4549_v4, %v4556_v0  ;;  %v4737_v43 = vsel %vm12403_vm8, %v4558_v53, %v4736_v33  ;;  %v5277_v14 = vor.u32 %v5276_v61, %v5272_v58  ;;  %v5282_v4 = vrot.slane %v5280_v6, 5  ;;  %7163 = vmatpush.bf16.msra.mxu3 %v10849_v11  ;;  %v13229_v18 = vpop.f32.mrf.mxu1  ;;  %v4751_v56 = vld [vmem:[#allocation2 + $0x4] sm:$0xf]  ;;  %v5380_v47 = vld [vmem:[#allocation2] sm:$0xe] }
 0x4b2   : > { %4735 = vst [vmem:[#allocation2 + $0xd0] sm:$0xf] %v4557_v22  ;;  %v10902_v10 = vld [vmem:[#allocation4 + $0x188] sm:$0xf0]  ;;  %v5273_v46 = vsel %vm11614_vm2, %v5268_v38, %v5272_v58  ;;  %v13227_v9 = vadd.f32 %v6437_v32, %v13166_v49  ;;  %v5382_v21 = vld [vmem:[#allocation2 + $0x8] sm:$0x1]  ;;  %v10320_v0 = vor.u32 %v10956_v5, %v10319_v16 }
 0x4b3   : > { %4738 = vst [vmem:[#allocation2 + $0xd4] sm:$0x1] %v4737_v43  ;;  %v9816_v8 = vor.u32 %v10902_v10, %v9815_v59  ;;  %v5278_v13 = vrot.slane %v5277_v14, 4  ;;  %v5381_v33 = vld [vmem:[#allocation2 + $0x4] sm:$0xf]  ;;  %v9615_v6 = vrot.slane %v5380_v47, 9 }
 0x4b4   : > { %4748 = vst [vmem:[#allocation2 + $0xd0] sm:$0xf] %v13985_v51  ;;  %v9823_v30 = vld [vmem:[#allocation4 + $0x188] sm:$0xf]  ;;  %v5490_v49 = vrot.slane %v5381_v33, 5  ;;  %v5493_v53 = vrot.slane %v5382_v21, 5 }
 0x4b5   : > { %4749 = vst [vmem:[#allocation2 + $0xd4] sm:$0xf] %v13985_v51  ;;  %v5283_v1 = vsel %vm11614_vm2, %v5278_v13, %v5282_v4  ;;  %7164 = vmatpush.bf16.msra.mxu3 %v10848_v37  ;;  %v4822_v63 = vld [vmem:[#allocation2] sm:$0xf]  ;;  %v13236_v61 = vpop.f32.mrf.mxu3  ;;  %v4823_v43 = vld [vmem:[#allocation2 + $0x4] sm:$0xf] }
 0x4b6   : > { %5376 = vst [vmem:[#allocation4 + $0x184] sm:$0xf] %v5273_v46  ;;  %6395 = vmatmul.bf16.gmra.mxu1 %v9816_v8  ;;  %v5491_v51 = vsel %vm11729_vm5, %v9615_v6, %v5490_v49  ;;  %v5492_v11 = vrot.slane %v5490_v49, 4  ;;  %v4877_v45 = vshrl.u32 %v4822_v63, 16  ;;  %v4824_v29 = vld [vmem:[#allocation2 + $0x8] sm:$0x1] }
 0x4b7   : > { %5377 = vst [vmem:[#allocation4 + $0x190] sm:$0xf] %v5283_v1  ;;  %6479 = vmatmul.bf16.gmra.mxu2 %v9808_v12  ;;  %v10903_v58 = vld [vmem:[#allocation4 + $0x190] sm:$0xf0]  ;;  %7813 = vmatmul.bf16.gmra.mxu0 %v10320_v0  ;;  %v4880_v59 = vshll.u32 %v4822_v63, 16  ;;  %v4886_v5 = vshll.u32 %v4823_v43, 16 }
 0x4b8   : > { %v9824_v22 = vor.u32 %v10903_v58, %v9823_v30  ;;  %4787 = vst [vmem:[#allocation4 + $0xc] sm:$0xf] %v4751_v56  ;;  %v5494_v38 = vsel %vm11729_vm5, %v5492_v11, %v5493_v53  ;;  %v4879_v60 = vrot.slane %v4877_v45, 4  ;;  %v10999_v14 = vld [vmem:[#allocation10 + $0x238] sm:$0xff]  ;;  %v6440_v32 = vpop.f32.mrf.mxu2  ;;  %v4890_v10 = vshrl.u32 %v4823_v43, 16 }
 0x4b9   : > { %5650 = vst [vmem:[#allocation4 + $0x8] sm:$0xf] %v5491_v51  ;;  %v4896_v46 = vshll.u32 %v4824_v29, 16  ;;  %v13241_v4 = vadd.f32 %v6440_v32, %v13190_v24  ;;  %v6358_v48 = vpop.f32.mrf.mxu1  ;;  %v4882_v37 = vrot.slane %v4880_v59, 5  ;;  %v4888_v12 = vrot.slane %v4886_v5, 5  ;;  %7938 = vmatpush.bf16.msra.mxu2 %v10999_v14  ;;  %v10991_v8 = vld [vmem:[#allocation10 + $0x1f8] sm:$0xff] }
 0x4ba   : > { %5651 = vst [vmem:[#allocation4 + $0x14] sm:$0xf] %v5494_v38  ;;  %v4892_v16 = vrot.slane %v4890_v10, 4  ;;  %7849 = vmatpush.bf16.msra.mxu1 %v10991_v8  ;;  %v9923_v33 = vld [vmem:[#allocation4] sm:$0xf] }
 0x4bb   : > { %v4883_v13 = vor.u32 %v4882_v37, %v4879_v60  ;;  %v4898_v47 = vrot.slane %v4896_v46, 5  ;;  %v10331_v43 = vld [vmem:[#allocation4 + $0x120] sm:$0xf] }
 0x4bc   : > { %6573 = vmatmul.bf16.gmra.mxu3 %v9824_v22  ;;  %v4893_v56 = vor.u32 %v4892_v16, %v4888_v12  ;;  %v10959_v22 = vld [vmem:[#allocation4 + $0x128] sm:$0xf0] }
 0x4bd   : > { %v4884_v30 = vrot.slane %v4883_v13, 4  ;;  %v13243_v1 = vpop.f32.mrf.mxu3  ;;  %v10901_v53 = vld [vmem:[#allocation4 + $0x184] sm:$0xf]  ;;  %v10332_v60 = vor.u32 %v10959_v22, %v10331_v43 }
 0x4be   : > { %v9817_v6 = vld [vmem:[#allocation4 + $0x18c] sm:$0xf0]  ;;  %v4894_v49 = vrot.slane %v4893_v56, 4  ;;  %v10990_v22 = vld [vmem:[#allocation10 + $0x1f0] sm:$0xff] }
 0x4bf   : > { %v10785_v21 = vld [vmem:[#allocation4 + $0x8] sm:$0xf0]  ;;  %v4889_v24 = vsel %vm11614_vm2, %v4884_v30, %v4888_v12  ;;  %v9820_v11 = vor.u32 %v10901_v53, %v9817_v6  ;;  %v10788_v12 = vld [vmem:[#allocation4 + $0x20] sm:$0xf0]  ;;  %v10343_v30 = vld [vmem:[#allocation4 + $0x138] sm:$0xf]  ;;  %v13261_v6 = vpop.f32.mrf.mxu0  ;;  %7850 = vmatpush.bf16.msra.mxu1 %v10990_v22 }
 0x4c0   : > { %v6442_v0 = vpop.f32.mrf.mxu2  ;;  %v9924_v63 = vor.u32 %v10785_v21, %v9923_v33  ;;  %v4899_v58 = vsel %vm11614_vm2, %v4894_v49, %v4898_v47  ;;  %5344 = vst [vmem:[#allocation4 + $0x4] sm:$0xf] %v4889_v24  ;;  %v9931_v29 = vld [vmem:[#allocation4 + $0x8] sm:$0xf]  ;;  %v9935_v47 = vld [vmem:[#allocation4 + $0x18] sm:$0xf] }
 0x4c1   : > { %v13250_v51 = vadd.f32 %v6442_v0, %v13208_v31  ;;  %v6361_v45 = vpop.f32.mrf.mxu1  ;;  %5345 = vst [vmem:[#allocation4 + $0x10] sm:$0xf] %v4899_v58  ;;  %v10786_v38 = vld [vmem:[#allocation4 + $0x10] sm:$0xf0]  ;;  %v10962_v33 = vld [vmem:[#allocation4 + $0x140] sm:$0xf0]  ;;  %v9936_v21 = vor.u32 %v10788_v12, %v9935_v47 }
 0x4c2   : > { %v9932_v5 = vor.u32 %v10786_v38, %v9931_v29  ;;  %13986 = vst [vmem:[#allocation55_spill] sm:$0xff] %v13261_v6  ;;  %v10998_v49 = vld [vmem:[#allocation10 + $0x230] sm:$0xff]  ;;  %v10789_v0 = vld [vmem:[#allocation4 + $0x28] sm:$0xf0]  ;;  %v10791_v38 = vld [vmem:[#allocation4 + $0x38] sm:$0xf0] }
 0x4c3   : > { %7939 = vmatpush.bf16.msra.mxu2 %v10998_v49  ;;  %v10965_v12 = vld [vmem:[#allocation4 + $0x158] sm:$0xf0]  ;;  %v10355_v47 = vld [vmem:[#allocation4 + $0x150] sm:$0xf]  ;;  %v10794_v22 = vld [vmem:[#allocation4 + $0x50] sm:$0xf0] }
 0x4c4   : > { %v9979_v6 = vld [vmem:[#allocation4 + $0x68] sm:$0xf] }
 0x4c5   : > { %v13252_v59 = vpop.f32.mrf.mxu3 }
 0x4c6   : > { %6987 = vmatmul.bf16.vlgmr.msrb.gmra.mxu1 %v9924_v63 }
 0x4c7   : > { %6484 = vmatmul.bf16.gmra.mxu2 %v9820_v11  ;;  %7818 = vmatmul.bf16.gmra.mxu0 %v10332_v60  ;;  %v10784_v46 = vld [vmem:[#allocation4 + $0x4] sm:$0xf]  ;;  %v13267_v43 = vpop.f32.mrf.mxu0 }
 0x4c8   : > { %v6445_v14 = vpop.f32.mrf.mxu2  ;;  %v9925_v37 = vld [vmem:[#allocation4 + $0xc] sm:$0xf0]  ;;  %13987 = vst [vmem:[#allocation42_spill] sm:$0xff] %v13267_v43  ;;  %v10379_v43 = vld [vmem:[#allocation4 + $0x180] sm:$0xf] }
 0x4c9   : > { %v13255_v32 = vadd.f32 %v6445_v14, %v13229_v18  ;;  %v6363_v31 = vpop.f32.mrf.mxu1  ;;  %v9928_v13 = vor.u32 %v10784_v46, %v9925_v37  ;;  %v10344_v18 = vor.u32 %v10962_v33, %v10343_v30  ;;  %v9947_v37 = vld [vmem:[#allocation4 + $0x30] sm:$0xf]  ;;  %v10356_v33 = vor.u32 %v10965_v12, %v10355_v47  ;;  %v10792_v30 = vld [vmem:[#allocation4 + $0x40] sm:$0xf0]  ;;  %v9959_v12 = vld [vmem:[#allocation4 + $0x48] sm:$0xf] }
 0x4ca   : > { %v9960_v47 = vor.u32 %v10794_v22, %v9959_v12  ;;  %v10797_v12 = vld [vmem:[#allocation4 + $0x68] sm:$0xf0] }
 0x4cc   : > { %7165 = vmatmul.bf16.vlgmr.msra.gmra.mxu3 %v9932_v5  ;;  %v9937_v5 = vld [vmem:[#allocation4 + $0x24] sm:$0xf0] }
 0x4cd   : > { %v13257_v10 = vpop.f32.mrf.mxu3 }
 0x4d0   : > { %v6447_v8 = vpop.f32.mrf.mxu2 }
 0x4d1   : > { %v13259_v16 = vadd.f32 %v6447_v8, %v6358_v48  ;;  %v6366_v56 = vpop.f32.mrf.mxu1  ;;  %v9943_v48 = vld [vmem:[#allocation4 + $0x20] sm:$0xf]  ;;  %v10787_v8 = vld [vmem:[#allocation4 + $0x1c] sm:$0xf] }
 0x4d2   : > { %v9944_v11 = vor.u32 %v10789_v0, %v9943_v48  ;;  %v9955_v0 = vld [vmem:[#allocation4 + $0x38] sm:$0xf] }
 0x4d3   : > { %v9956_v48 = vor.u32 %v10792_v30, %v9955_v0  ;;  %v10997_v30 = vld [vmem:[#allocation10 + $0x228] sm:$0xff] }
 0x4d4   : > { %7940 = vmatpush.bf16.msra.mxu2 %v10997_v30  ;;  %v10793_v30 = vld [vmem:[#allocation4 + $0x4c] sm:$0xf] }
 0x4d5   : > { %v13263_v24 = vpop.f32.mrf.mxu3 }
 0x4d6   : > { %6992 = vmatmul.bf16.gmra.mxu1 %v9936_v21 }
 0x4d7   : > { %7076 = vmatmul.bf16.vlgmr.msrb.gmra.mxu2 %v9928_v13  ;;  %7823 = vmatmul.bf16.gmra.mxu0 %v10344_v18  ;;  %v9940_v13 = vor.u32 %v10787_v8, %v9937_v5  ;;  %v13275_v18 = vpop.f32.mrf.mxu0  ;;  %v10968_v8 = vld [vmem:[#allocation4 + $0x170] sm:$0xf0] }
 0x4d8   : > { %v6450_v53 = vpop.f32.mrf.mxu2  ;;  %13988 = vst [vmem:[#allocation39_spill] sm:$0xff] %v13275_v18 }
 0x4d9   : > { %v13265_v63 = vadd.f32 %v6450_v53, %v6361_v45  ;;  %v6368_v58 = vpop.f32.mrf.mxu1  ;;  %v9948_v45 = vor.u32 %v10791_v38, %v9947_v37 }
 0x4dc   : > { %7170 = vmatmul.bf16.gmra.mxu3 %v9944_v11 }
 0x4dd   : > { %v13269_v29 = vpop.f32.mrf.mxu3 }
 0x4e0   : > { %v6452_v60 = vpop.f32.mrf.mxu2 }
 0x4e1   : > { %v13271_v14 = vadd.f32 %v6452_v60, %v6363_v31  ;;  %v6371_v46 = vpop.f32.mrf.mxu1  ;;  %v9949_v60 = vld [vmem:[#allocation4 + $0x3c] sm:$0xf0] }
 0x4e5   : > { %v13273_v21 = vpop.f32.mrf.mxu3 }
 0x4e6   : > { %6997 = vmatmul.bf16.gmra.mxu1 %v9948_v45  ;;  %v13283_v45 = vpop.f32.mrf.mxu0 }
 0x4e7   : > { %7081 = vmatmul.bf16.gmra.mxu2 %v9940_v13  ;;  %7828 = vmatmul.bf16.gmra.mxu0 %v10356_v33  ;;  %13989 = vst [vmem:[#allocation23_spill] sm:$0xff] %v13283_v45  ;;  %v10790_v13 = vld [vmem:[#allocation4 + $0x34] sm:$0xf]  ;;  %v10989_v45 = vld [vmem:[#allocation10 + $0x1e8] sm:$0xff] }
 0x4e8   : > { %v6455_v49 = vpop.f32.mrf.mxu2  ;;  %v9952_v33 = vor.u32 %v10790_v13, %v9949_v60  ;;  %7851 = vmatpush.bf16.msra.mxu1 %v10989_v45  ;;  %v9961_v13 = vld [vmem:[#allocation4 + $0x54] sm:$0xf0] }
 0x4e9   : > { %v13277_v31 = vadd.f32 %v6455_v49, %v6366_v56  ;;  %v6373_v53 = vpop.f32.mrf.mxu1  ;;  %v10367_v56 = vld [vmem:[#allocation4 + $0x168] sm:$0xf] }
 0x4ea   : > { %v10368_v49 = vor.u32 %v10968_v8, %v10367_v56  ;;  %v9971_v56 = vld [vmem:[#allocation4 + $0x60] sm:$0xf] }
 0x4ec   : > { %7175 = vmatmul.bf16.gmra.mxu3 %v9956_v48  ;;  %v10795_v48 = vld [vmem:[#allocation4 + $0x58] sm:$0xf0] }
 0x4ed   : > { %v13279_v11 = vpop.f32.mrf.mxu3 }
 0x4ee   : > { %v13289_v22 = vpop.f32.mrf.mxu0 }
 0x4ef   : > { %13991 = vst [vmem:[#allocation49_spill] sm:$0xff] %v13289_v22 }
 0x4f0   : > { %v6457_v38 = vpop.f32.mrf.mxu2 }
 0x4f1   : > { %v13281_v5 = vadd.f32 %v6457_v38, %v6368_v58  ;;  %v6376_v37 = vpop.f32.mrf.mxu1  ;;  %v9967_v38 = vld [vmem:[#allocation4 + $0x50] sm:$0xf] }
 0x4f2   : > { %v9968_v18 = vor.u32 %v10795_v48, %v9967_v38  ;;  %v10798_v38 = vld [vmem:[#allocation4 + $0x70] sm:$0xf0] }
 0x4f5   : > { %v13285_v0 = vpop.f32.mrf.mxu3 }
 0x4f6   : > { %7002 = vmatmul.bf16.gmra.mxu1 %v9960_v47  ;;  %13990 = vst [vmem:[#allocation46_spill] sm:$0xff] %v13285_v0 }
 0x4f7   : > { %7086 = vmatmul.bf16.gmra.mxu2 %v9952_v33  ;;  %7833 = vmatmul.bf16.gmra.mxu0 %v10368_v49  ;;  %v10971_v49 = vld [vmem:[#allocation4 + $0x188] sm:$0xf0] }
 0x4f8   : > { %v6460_v58 = vpop.f32.mrf.mxu2  ;;  %v10380_v48 = vor.u32 %v10971_v49, %v10379_v43 }
 0x4f9   : > { %v13287_v28 = vadd.f32 %v6460_v58, %v6371_v46  ;;  %v6378_v42 = vpop.f32.mrf.mxu1  ;;  %v9972_v46 = vor.u32 %v10797_v12, %v9971_v56  ;;  %v9964_v58 = vor.u32 %v10793_v30, %v9961_v13  ;;  %v10800_v12 = vld [vmem:[#allocation4 + $0x80] sm:$0xf0]  ;;  %v9973_v56 = vld [vmem:[#allocation4 + $0x6c] sm:$0xf0]  ;;  %v9983_v30 = vld [vmem:[#allocation4 + $0x78] sm:$0xf] }
 0x4fc   : > { %7180 = vmatmul.bf16.gmra.mxu3 %v9968_v18  ;;  %v13295_v18 = vpop.f32.mrf.mxu0 }
 0x4fd   : > { %13993 = vst [vmem:[#allocation25_spill] sm:$0xff] %v13295_v18 }
 0x4fe   : > { %v13291_v60 = vpop.f32.mrf.mxu3 }
 0x4ff   : > { %13992 = vst [vmem:[#allocation41_spill] sm:$0xff] %v13291_v60  ;;  %v9980_v60 = vor.u32 %v10798_v38, %v9979_v6 }
 0x500   : > { %v6462_v8 = vpop.f32.mrf.mxu2 }
 0x501   : > { %v13293_v47 = vadd.f32 %v6462_v8, %v6373_v53  ;;  %v6381_v33 = vpop.f32.mrf.mxu1 }
 0x506   : > { %7007 = vmatmul.bf16.gmra.mxu1 %v9972_v46  ;;  %v13297_v45 = vpop.f32.mrf.mxu3  ;;  %v10796_v46 = vld [vmem:[#allocation4 + $0x64] sm:$0xf] }
 0x507   : > { %7091 = vmatmul.bf16.gmra.mxu2 %v9964_v58  ;;  %13994 = vst [vmem:[#allocation51_spill] sm:$0xff] %v13297_v45  ;;  %7838 = vmatmul.bf16.gmra.mxu0 %v10380_v48  ;;  %v9984_v58 = vor.u32 %v10800_v12, %v9983_v30  ;;  %v9976_v18 = vor.u32 %v10796_v46, %v9973_v56  ;;  %v10996_v48 = vld [vmem:[#allocation10 + $0x220] sm:$0xff]  ;;  %v10803_v12 = vld [vmem:[#allocation4 + $0x98] sm:$0xf0]  ;;  %v9985_v30 = vld [vmem:[#allocation4 + $0x84] sm:$0xf0] }
 0x508   : > { %v6465_v22 = vpop.f32.mrf.mxu2  ;;  %7941 = vmatpush.bf16.msra.mxu2 %v10996_v48 }
 0x509   : > { %v13299_v53 = vadd.f32 %v6465_v22, %v6376_v37  ;;  %v6383_v8 = vpop.f32.mrf.mxu1  ;;  %v10801_v22 = vld [vmem:[#allocation4 + $0x88] sm:$0xf0] }
 0x50b   : > { %13995 = vst [vmem:[#allocation50_spill] sm:$0xff] %v13299_v53 }
 0x50c   : > { %7185 = vmatmul.bf16.gmra.mxu3 %v9980_v60  ;;  %v9991_v60 = vld [vmem:[#allocation4 + $0x80] sm:$0xf] }
 0x50d   : > { %v9992_v45 = vor.u32 %v10801_v22, %v9991_v60  ;;  %v10804_v22 = vld [vmem:[#allocation4 + $0xa0] sm:$0xf0] }
 0x50f   : > { %v13301_v0 = vpop.f32.mrf.mxu3 }
 0x510   : > { %13996 = vst [vmem:[#allocation53_spill] sm:$0xff] %v13301_v0  ;;  %v6467_v13 = vpop.f32.mrf.mxu2 }
 0x511   : > { %v13303_v43 = vadd.f32 %v6467_v13, %v6378_v42  ;;  %v6386_v49 = vpop.f32.mrf.mxu1  ;;  %v10988_v42 = vld [vmem:[#allocation10 + $0x1e0] sm:$0xff] }
 0x512   : > { %7852 = vmatpush.bf16.msra.mxu1 %v10988_v42 }
 0x513   : > { %13997 = vst [vmem:[#allocation29_spill] sm:$0xff] %v13303_v43 }
 0x516   : > { %7012 = vmatmul.bf16.gmra.mxu1 %v9984_v58  ;;  %v9995_v58 = vld [vmem:[#allocation4 + $0x90] sm:$0xf] }
 0x517   : > { %7096 = vmatmul.bf16.gmra.mxu2 %v9976_v18  ;;  %v13305_v37 = vpop.f32.mrf.mxu3  ;;  %v9996_v48 = vor.u32 %v10803_v12, %v9995_v58  ;;  %v10007_v12 = vld [vmem:[#allocation4 + $0xa8] sm:$0xf] }
 0x518   : > { %13998 = vst [vmem:[#allocation24_spill] sm:$0xff] %v13305_v37  ;;  %v6470_v6 = vpop.f32.mrf.mxu2  ;;  %v10799_v37 = vld [vmem:[#allocation4 + $0x7c] sm:$0xf] }
 0x519   : > { %v13307_v38 = vadd.f32 %v6470_v6, %v6381_v33  ;;  %v6388_v0 = vpop.f32.mrf.mxu1  ;;  %v9988_v43 = vor.u32 %v10799_v37, %v9985_v30 }
 0x51b   : > { %13999 = vst [vmem:[#allocation45_spill] sm:$0xff] %v13307_v38 }
 0x51c   : > { %7190 = vmatmul.bf16.gmra.mxu3 %v9992_v45  ;;  %v10003_v45 = vld [vmem:[#allocation4 + $0x98] sm:$0xf] }
 0x51f   : > { %v13309_v13 = vpop.f32.mrf.mxu3 }
 0x520   : > { %14000 = vst [vmem:[#allocation54_spill] sm:$0xff] %v13309_v13  ;;  %v6472_v56 = vpop.f32.mrf.mxu2  ;;  %v10004_v13 = vor.u32 %v10804_v22, %v10003_v45  ;;  %v10015_v22 = vld [vmem:[#allocation4 + $0xb0] sm:$0xf] }
 0x521   : > { %v13311_v18 = vadd.f32 %v6472_v56, %v6383_v8  ;;  %v10806_v8 = vld [vmem:[#allocation4 + $0xb0] sm:$0xf0] }
 0x522   : > { %v10008_v30 = vor.u32 %v10806_v8, %v10007_v12  ;;  %v10809_v8 = vld [vmem:[#allocation4 + $0xc8] sm:$0xf0]  ;;  %v10009_v12 = vld [vmem:[#allocation4 + $0xb4] sm:$0xf0] }
 0x523   : > { %14001 = vst [vmem:[#allocation31_spill] sm:$0xff] %v13311_v18  ;;  %v6391_v46 = vpop.f32.mrf.mxu1  ;;  %v9997_v18 = vld [vmem:[#allocation4 + $0x9c] sm:$0xf0] }
 0x526   : > { %7017 = vmatmul.bf16.gmra.mxu1 %v9996_v48  ;;  %v10995_v48 = vld [vmem:[#allocation10 + $0x218] sm:$0xff] }
 0x527   : > { %7101 = vmatmul.bf16.gmra.mxu2 %v9988_v43  ;;  %v13313_v33 = vpop.f32.mrf.mxu3  ;;  %v10802_v43 = vld [vmem:[#allocation4 + $0x94] sm:$0xf] }
 0x528   : > { %14002 = vst [vmem:[#allocation52_spill] sm:$0xff] %v13313_v33  ;;  %v10000_v58 = vor.u32 %v10802_v43, %v9997_v18  ;;  %7942 = vmatpush.bf16.msra.mxu2 %v10995_v48  ;;  %v6500_v43 = vadd.f32 %v12936_v19, %v12956_v23  ;;  %v10019_v48 = vld [vmem:[#allocation4 + $0xc0] sm:$0xf] }
 0x52a   : > { %v6475_v6 = vpop.f32.mrf.mxu2 }
 0x52b   : > { %v13315_v60 = vadd.f32 %v6475_v6, %v6386_v49  ;;  %v6393_v42 = vpop.f32.mrf.mxu1  ;;  %v10807_v6 = vld [vmem:[#allocation4 + $0xb8] sm:$0xf0] }
 0x52c   : > { %7195 = vmatmul.bf16.gmra.mxu3 %v10004_v13  ;;  %v10016_v33 = vor.u32 %v10807_v6, %v10015_v22  ;;  %v10810_v6 = vld [vmem:[#allocation4 + $0xd0] sm:$0xf0] }
 0x52f   : > { %v13317_v38 = vpop.f32.mrf.mxu3 }
 0x530   : > { %14003 = vst [vmem:[#allocation26_spill] sm:$0xff] %v13317_v38 }
 0x532   : > { %v6477_v56 = vpop.f32.mrf.mxu2 }
 0x533   : > { %v13319_v53 = vadd.f32 %v6477_v56, %v6388_v0  ;;  %v6396_v37 = vpop.f32.mrf.mxu1  ;;  %v10987_v0 = vld [vmem:[#allocation10 + $0x1d8] sm:$0xff] }
 0x534   : > { %7853 = vmatpush.bf16.msra.mxu1 %v10987_v0  ;;  %v6502_v0 = vadd.f32 %v12958_v39, %v12981_v15 }
 0x535   : > { %14004 = vst [vmem:[#allocation28_spill] sm:$0xff] %v13319_v53 }
 0x536   : > { %7022 = vmatmul.bf16.gmra.mxu1 %v10008_v30 }
 0x537   : > { %7106 = vmatmul.bf16.gmra.mxu2 %v10000_v58  ;;  %v13321_v49 = vpop.f32.mrf.mxu3 }
 0x538   : > { %14005 = vst [vmem:[#allocation27_spill] sm:$0xff] %v13321_v49  ;;  %v10805_v49 = vld [vmem:[#allocation4 + $0xac] sm:$0xf] }
 0x53a   : > { %v6480_v13 = vpop.f32.mrf.mxu2 }
 0x53b   : > { %v13323_v45 = vadd.f32 %v6480_v13, %v6391_v46  ;;  %v6398_v38 = vpop.f32.mrf.mxu1  ;;  %v10020_v13 = vor.u32 %v10809_v8, %v10019_v48  ;;  %v10031_v48 = vld [vmem:[#allocation4 + $0xd8] sm:$0xf] }
 0x53c   : > { %7200 = vmatmul.bf16.gmra.mxu3 %v10016_v33 }
 0x53d   : > { %14006 = vst [vmem:[#allocation34_spill] sm:$0xff] %v13323_v45  ;;  %v10012_v45 = vor.u32 %v10805_v49, %v10009_v12  ;;  %v10021_v49 = vld [vmem:[#allocation4 + $0xcc] sm:$0xf0] }
 0x53f   : > { %v13325_v56 = vpop.f32.mrf.mxu3 }
 0x540   : > { %14007 = vst [vmem:[#allocation35_spill] sm:$0xff] %v13325_v56  ;;  %v10027_v56 = vld [vmem:[#allocation4 + $0xc8] sm:$0xf] }
 0x541   : > { %v10028_v23 = vor.u32 %v10810_v6, %v10027_v56  ;;  %v10994_v56 = vld [vmem:[#allocation10 + $0x210] sm:$0xff] }
 0x542   : > { %v6482_v18 = vpop.f32.mrf.mxu2  ;;  %7943 = vmatpush.bf16.msra.mxu2 %v10994_v56 }
 0x543   : > { %v13329_v30 = vadd.f32 %v6482_v18, %v6393_v42  ;;  %v6988_v58 = vpop.f32.mrf.mxu1 }
 0x544   : > { %v6989_v46 = vadd.f32 %v6988_v58, %v6500_v43  ;;  %v10812_v43 = vld [vmem:[#allocation4 + $0xe0] sm:$0xf0] }
 0x545   : > { %v10032_v15 = vor.u32 %v10812_v43, %v10031_v48  ;;  %v10986_v43 = vld [vmem:[#allocation10 + $0x1d0] sm:$0xff]  ;;  %v10033_v48 = vld [vmem:[#allocation4 + $0xe4] sm:$0xf0] }
 0x546   : > { %7027 = vmatmul.bf16.gmra.mxu1 %v10020_v13  ;;  %v10808_v13 = vld [vmem:[#allocation4 + $0xc4] sm:$0xf] }
 0x547   : > { %7111 = vmatmul.bf16.gmra.mxu2 %v10012_v45  ;;  %v13331_v33 = vpop.f32.mrf.mxu3  ;;  %v6505_v45 = vadd.f32 %v12983_v62, %v13003_v44  ;;  %7854 = vmatpush.bf16.msra.mxu1 %v10986_v43 }
 0x548   : > { %14008 = vst [vmem:[#allocation32_spill] sm:$0xff] %v13331_v33 }
 0x54a   : > { %v6485_v22 = vpop.f32.mrf.mxu2 }
 0x54b   : > { %v13335_v53 = vadd.f32 %v6485_v22, %v6396_v37  ;;  %v6990_v19 = vpop.f32.mrf.mxu1  ;;  %v10024_v37 = vor.u32 %v10808_v13, %v10021_v49  ;;  %v10813_v22 = vld [vmem:[#allocation4 + $0xe8] sm:$0xf0]  ;;  %v10815_v49 = vld [vmem:[#allocation4 + $0xf8] sm:$0xf0]  ;;  %v6510_v13 = vadd.f32 %v13029_v25, %v13050_v2 }
 0x54c   : > { %v6991_v42 = vadd.f32 %v6990_v19, %v6502_v0  ;;  %7205 = vmatmul.bf16.gmra.mxu3 %v10028_v23  ;;  %v6507_v19 = vadd.f32 %v13005_v52, %v13027_v27  ;;  %v10039_v23 = vld [vmem:[#allocation4 + $0xe0] sm:$0xf]  ;;  %v10043_v52 = vld [vmem:[#allocation4 + $0xf0] sm:$0xf]  ;;  %v10811_v27 = vld [vmem:[#allocation4 + $0xdc] sm:$0xf] }
 0x54d   : > { %v10044_v56 = vor.u32 %v10815_v49, %v10043_v52  ;;  %v10818_v49 = vld [vmem:[#allocation4 + $0x110] sm:$0xf0] }
 0x54e   : > { %v10814_v52 = vld [vmem:[#allocation4 + $0xf4] sm:$0xf] }
 0x54f   : > { %v7166_v18 = vpop.f32.mrf.mxu3 }
 0x552   : > { %v6487_v8 = vpop.f32.mrf.mxu2 }
 0x553   : > { %v13339_v12 = vadd.f32 %v6487_v8, %v6398_v38  ;;  %v6993_v58 = vpop.f32.mrf.mxu1  ;;  %v10040_v38 = vor.u32 %v10813_v22, %v10039_v23  ;;  %v6512_v23 = vadd.f32 %v13052_v50, %v13074_v17 }
 0x554   : > { %v6994_v39 = vadd.f32 %v6993_v58, %v6505_v45 }
 0x556   : > { %7032 = vmatmul.bf16.gmra.mxu1 %v10032_v15 }
 0x557   : > { %7116 = vmatmul.bf16.gmra.mxu2 %v10024_v37  ;;  %v7168_v6 = vpop.f32.mrf.mxu3 }
 0x55a   : > { %v7077_v0 = vpop.f32.mrf.mxu2 }
 0x55b   : > { %v7078_v62 = vadd.f32 %v7077_v0, %v6989_v46  ;;  %v6995_v44 = vpop.f32.mrf.mxu1  ;;  %v10816_v0 = vld [vmem:[#allocation4 + $0x100] sm:$0xf0] }
 0x55c   : > { %v6996_v8 = vadd.f32 %v6995_v44, %v6507_v19  ;;  %7210 = vmatmul.bf16.gmra.mxu3 %v10040_v38 }
 0x55d   : > { %v13343_v33 = vadd.f32 %v7166_v18, %v7078_v62  ;;  %v10036_v18 = vor.u32 %v10811_v27, %v10033_v48  ;;  %v10051_v62 = vld [vmem:[#allocation4 + $0xf8] sm:$0xf]  ;;  %v6515_v48 = vadd.f32 %v13078_v57, %v13106_v35  ;;  %v10063_v57 = vld [vmem:[#allocation4 + $0x110] sm:$0xf] }
 0x55e   : > { %v10052_v25 = vor.u32 %v10816_v0, %v10051_v62 }
 0x55f   : > { %v7171_v58 = vpop.f32.mrf.mxu3 }
 0x562   : > { %v7079_v45 = vpop.f32.mrf.mxu2 }
 0x563   : > { %v7080_v15 = vadd.f32 %v7079_v45, %v6991_v42  ;;  %v6998_v37 = vpop.f32.mrf.mxu1  ;;  %v10045_v45 = vld [vmem:[#allocation4 + $0xfc] sm:$0xf0] }
 0x564   : > { %v6999_v46 = vadd.f32 %v6998_v37, %v6510_v13  ;;  %v10055_v37 = vld [vmem:[#allocation4 + $0x108] sm:$0xf]  ;;  %v10048_v27 = vor.u32 %v10814_v52, %v10045_v45  ;;  %v6520_v45 = vadd.f32 %v13122_v54, %v13157_v55 }
 0x565   : > { %v13347_v22 = vadd.f32 %v7168_v6, %v7080_v15  ;;  %v10056_v17 = vor.u32 %v10818_v49, %v10055_v37 }
 0x566   : > { %7037 = vmatmul.bf16.gmra.mxu1 %v10044_v56 }
 0x567   : > { %7121 = vmatmul.bf16.gmra.mxu2 %v10036_v18  ;;  %v7173_v2 = vpop.f32.mrf.mxu3  ;;  %v10819_v18 = vld [vmem:[#allocation4 + $0x118] sm:$0xf0] }
 0x56a   : > { %v7082_v19 = vpop.f32.mrf.mxu2 }
 0x56b   : > { %v7083_v44 = vadd.f32 %v7082_v19, %v6994_v39  ;;  %v7000_v38 = vpop.f32.mrf.mxu1  ;;  %v6517_v19 = vadd.f32 %v13096_v36, %v13131_v41  ;;  %v10067_v36 = vld [vmem:[#allocation4 + $0x120] sm:$0xf]  ;;  %v10817_v41 = vld [vmem:[#allocation4 + $0x10c] sm:$0xf] }
 0x56c   : > { %v7001_v42 = vadd.f32 %v7000_v38, %v6512_v23  ;;  %7215 = vmatmul.bf16.gmra.mxu3 %v10052_v25  ;;  %v10064_v23 = vor.u32 %v10819_v18, %v10063_v57  ;;  %v10985_v38 = vld [vmem:[#allocation10 + $0x1c8] sm:$0xff]  ;;  %v10075_v18 = vld [vmem:[#allocation4 + $0x128] sm:$0xf]  ;;  %v10824_v57 = vld [vmem:[#allocation4 + $0x140] sm:$0xf0] }
 0x56d   : > { %v13351_v43 = vadd.f32 %v7171_v58, %v7083_v44  ;;  %v10993_v58 = vld [vmem:[#allocation10 + $0x208] sm:$0xff]  ;;  %7855 = vmatpush.bf16.msra.mxu1 %v10985_v38 }
 0x56e   : > { %7944 = vmatpush.bf16.msra.mxu2 %v10993_v58  ;;  %v6522_v58 = vadd.f32 %v13146_v7, %v13178_v40 }
 0x56f   : > { %v7176_v56 = vpop.f32.mrf.mxu3 }
 0x572   : > { %v7084_v6 = vpop.f32.mrf.mxu2 }
 0x573   : > { %v7085_v13 = vadd.f32 %v7084_v6, %v6996_v8  ;;  %v7003_v15 = vpop.f32.mrf.mxu1  ;;  %v10057_v6 = vld [vmem:[#allocation4 + $0x114] sm:$0xf0] }
 0x574   : > { %v7004_v50 = vadd.f32 %v7003_v15, %v6515_v48  ;;  %v10060_v52 = vor.u32 %v10817_v41, %v10057_v6  ;;  %v10820_v6 = vld [vmem:[#allocation4 + $0x124] sm:$0xf]  ;;  %v6527_v41 = vadd.f32 %v13205_v26, %v13227_v9  ;;  %v10823_v26 = vld [vmem:[#allocation4 + $0x13c] sm:$0xf] }
 0x575   : > { %v13355_v39 = vadd.f32 %v7173_v2, %v7085_v13  ;;  %v10821_v2 = vld [vmem:[#allocation4 + $0x128] sm:$0xf0] }
 0x576   : > { %7042 = vmatmul.bf16.gmra.mxu1 %v10056_v17  ;;  %v10068_v15 = vor.u32 %v10821_v2, %v10067_v36  ;;  %v10822_v17 = vld [vmem:[#allocation4 + $0x130] sm:$0xf0]  ;;  %v10079_v2 = vld [vmem:[#allocation4 + $0x138] sm:$0xf] }
 0x577   : > { %7126 = vmatmul.bf16.gmra.mxu2 %v10048_v27  ;;  %v7178_v25 = vpop.f32.mrf.mxu3  ;;  %v10076_v55 = vor.u32 %v10822_v17, %v10075_v18  ;;  %v10080_v40 = vor.u32 %v10824_v57, %v10079_v2  ;;  %v10984_v17 = vld [vmem:[#allocation10 + $0x1c0] sm:$0xff]  ;;  %v6530_v18 = vadd.f32 %v13221_v34, %v13241_v4 }
 0x578   : > { %7856 = vmatpush.bf16.msra.mxu1 %v10984_v17 }
 0x57a   : > { %v7087_v0 = vpop.f32.mrf.mxu2 }
 0x57b   : > { %v7088_v35 = vadd.f32 %v7087_v0, %v6999_v46  ;;  %v7005_v8 = vpop.f32.mrf.mxu1 }
 0x57c   : > { %v7006_v62 = vadd.f32 %v7005_v8, %v6517_v19  ;;  %7220 = vmatmul.bf16.gmra.mxu3 %v10064_v23  ;;  %v10069_v8 = vld [vmem:[#allocation4 + $0x12c] sm:$0xf0]  ;;  %v6525_v23 = vadd.f32 %v13180_v3, %v13211_v20  ;;  %v10087_v3 = vld [vmem:[#allocation4 + $0x140] sm:$0xf] }
 0x57d   : > { %v13359_v44 = vadd.f32 %v7176_v56, %v7088_v35 }
 0x57f   : > { %v7181_v27 = vpop.f32.mrf.mxu3 }
 0x582   : > { %v7089_v49 = vpop.f32.mrf.mxu2 }
 0x583   : > { %v7090_v48 = vadd.f32 %v7089_v49, %v7001_v42  ;;  %v7008_v13 = vpop.f32.mrf.mxu1 }
 0x584   : > { %v7009_v46 = vadd.f32 %v7008_v13, %v6520_v45  ;;  %v10072_v45 = vor.u32 %v10820_v6, %v10069_v8  ;;  %v10825_v13 = vld [vmem:[#allocation4 + $0x148] sm:$0xf0]  ;;  %v10093_v6 = vld [vmem:[#allocation4 + $0x15c] sm:$0xf0] }
 0x585   : > { %v13363_v37 = vadd.f32 %v7178_v25, %v7090_v48  ;;  %v10992_v48 = vld [vmem:[#allocation10 + $0x200] sm:$0xff] }
 0x586   : > { %7047 = vmatmul.bf16.gmra.mxu1 %v10068_v15  ;;  %7945 = vmatpush.bf16.msra.mxu2 %v10992_v48  ;;  %v10088_v15 = vor.u32 %v10825_v13, %v10087_v3  ;;  %v10103_v13 = vld [vmem:[#allocation4 + $0x168] sm:$0xf] }
 0x587   : > { %7131 = vmatmul.bf16.gmra.mxu2 %v10060_v52  ;;  %v7183_v49 = vpop.f32.mrf.mxu3 }
 0x58a   : > { %v7092_v56 = vpop.f32.mrf.mxu2 }
 0x58b   : > { %v7093_v0 = vadd.f32 %v7092_v56, %v7004_v50  ;;  %v7010_v54 = vpop.f32.mrf.mxu1 }
 0x58c   : > { %v7011_v42 = vadd.f32 %v7010_v54, %v6522_v58  ;;  %7225 = vmatmul.bf16.gmra.mxu3 %v10076_v55  ;;  %v10081_v58 = vld [vmem:[#allocation4 + $0x144] sm:$0xf0]  ;;  %v10091_v55 = vld [vmem:[#allocation4 + $0x150] sm:$0xf] }
 0x58d   : > { %v13367_v19 = vadd.f32 %v7181_v27, %v7093_v0  ;;  %v10827_v27 = vld [vmem:[#allocation4 + $0x158] sm:$0xf0]  ;;  %v10084_v57 = vor.u32 %v10823_v26, %v10081_v58  ;;  %v10105_v58 = vld [vmem:[#allocation4 + $0x174] sm:$0xf0]  ;;  %v10928_v26 = vld [vmem:[#allocation4 + $0x34] sm:$0xf] }
 0x592   : > { %v7094_v35 = vpop.f32.mrf.mxu2 }
 0x593   : > { %v7095_v38 = vadd.f32 %v7094_v35, %v7006_v62  ;;  %v7013_v25 = vpop.f32.mrf.mxu1  ;;  %v10828_v35 = vld [vmem:[#allocation4 + $0x160] sm:$0xf0] }
 0x594   : > { %v7014_v7 = vadd.f32 %v7013_v25, %v6525_v23  ;;  %v6532_v23 = vadd.f32 %v13236_v61, %v13250_v51 }
 0x595   : > { %v13371_v50 = vadd.f32 %v7183_v49, %v7095_v38  ;;  %v10099_v38 = vld [vmem:[#allocation4 + $0x158] sm:$0xf] }
 0x596   : > { %7052 = vmatmul.bf16.gmra.mxu1 %v10080_v40  ;;  %v10100_v34 = vor.u32 %v10828_v35, %v10099_v38  ;;  %v6535_v40 = vadd.f32 %v13243_v1, %v13255_v32  ;;  %v6542_v35 = vadd.f32 %v13263_v24, %v13271_v14  ;;  %v6547_v14 = vadd.f32 %v13273_v21, %v13281_v5  ;;  %v14009_v5 = vld [vmem:[#allocation46_spill] sm:$0xff] }
 0x597   : > { %7136 = vmatmul.bf16.gmra.mxu2 %v10072_v45 }
 0x59a   : > { %v7097_v36 = vpop.f32.mrf.mxu2 }
 0x59b   : > { %v13375_v20 = vadd.f32 %v7097_v36, %v7009_v46  ;;  %v7015_v62 = vpop.f32.mrf.mxu1  ;;  %v10092_v46 = vor.u32 %v10827_v27, %v10091_v55  ;;  %v10826_v36 = vld [vmem:[#allocation4 + $0x154] sm:$0xf] }
 0x59c   : > { %v7016_v52 = vadd.f32 %v7015_v62, %v6527_v41  ;;  %7230 = vmatmul.bf16.gmra.mxu3 %v10088_v15  ;;  %v10096_v51 = vor.u32 %v10826_v36, %v10093_v6  ;;  %v6537_v62 = vadd.f32 %v13252_v59, %v13259_v16  ;;  %v10111_v15 = vld [vmem:[#allocation4 + $0x170] sm:$0xf]  ;;  %v10219_v6 = vld [vmem:[#allocation4 + $0x38] sm:$0xf] }
 0x5a2   : > { %v7099_v56 = vpop.f32.mrf.mxu2 }
 0x5a3   : > { %v13379_v0 = vadd.f32 %v7099_v56, %v7011_v42  ;;  %v7018_v54 = vpop.f32.mrf.mxu1  ;;  %v10830_v42 = vld [vmem:[#allocation4 + $0x170] sm:$0xf0] }
 0x5a4   : > { %v7019_v9 = vadd.f32 %v7018_v54, %v6530_v18  ;;  %v10104_v61 = vor.u32 %v10830_v42, %v10103_v13  ;;  %v6540_v18 = vadd.f32 %v13257_v10, %v13265_v63  ;;  %v10930_v63 = vld [vmem:[#allocation4 + $0x40] sm:$0xf0] }
 0x5a5   : > { %v10220_v13 = vor.u32 %v10930_v63, %v10219_v6  ;;  %v14012_v63 = vld [vmem:[#allocation29_spill] sm:$0xff] }
 0x5a6   : > { %7057 = vmatmul.bf16.gmra.mxu1 %v10092_v46  ;;  %v10829_v46 = vld [vmem:[#allocation4 + $0x16c] sm:$0xf] }
 0x5a7   : > { %7141 = vmatmul.bf16.gmra.mxu2 %v10084_v57  ;;  %v10108_v16 = vor.u32 %v10829_v46, %v10105_v58  ;;  %v14010_v46 = vld [vmem:[#allocation50_spill] sm:$0xff] }
 0x5aa   : > { %v7102_v8 = vpop.f32.mrf.mxu2 }
 0x5ab   : > { %v13383_v25 = vadd.f32 %v7102_v8, %v7014_v7  ;;  %v7020_v2 = vpop.f32.mrf.mxu1  ;;  %v10831_v7 = vld [vmem:[#allocation4 + $0x178] sm:$0xf0] }
 0x5ac   : > { %v7021_v4 = vadd.f32 %v7020_v2, %v6532_v23  ;;  %7235 = vmatmul.bf16.gmra.mxu3 %v10100_v34  ;;  %v10112_v1 = vor.u32 %v10831_v7, %v10111_v15  ;;  %v10225_v2 = vld [vmem:[#allocation4 + $0x54] sm:$0xf0]  ;;  %v6545_v34 = vadd.f32 %v13269_v29, %v13277_v31  ;;  %v10933_v31 = vld [vmem:[#allocation4 + $0x58] sm:$0xf0]  ;;  %v6550_v7 = vadd.f32 %v13279_v11, %v13287_v28  ;;  %v10934_v15 = vld [vmem:[#allocation4 + $0x64] sm:$0xf] }
 0x5ad   : > { %v10936_v11 = vld [vmem:[#allocation4 + $0x70] sm:$0xf0] }
 0x5b2   : > { %v7104_v49 = vpop.f32.mrf.mxu2 }
 0x5b3   : > { %v13387_v45 = vadd.f32 %v7104_v49, %v7016_v52  ;;  %v7023_v48 = vpop.f32.mrf.mxu1  ;;  %v10213_v52 = vld [vmem:[#allocation4 + $0x3c] sm:$0xf0]  ;;  %v10931_v49 = vld [vmem:[#allocation4 + $0x4c] sm:$0xf] }
 0x5b4   : > { %v7024_v41 = vadd.f32 %v7023_v48, %v6535_v40  ;;  %v10216_v59 = vor.u32 %v10928_v26, %v10213_v52  ;;  %v10228_v48 = vor.u32 %v10931_v49, %v10225_v2  ;;  %v10249_v26 = vld [vmem:[#allocation4 + $0x84] sm:$0xf0] }
 0x5b6   : > { %7062 = vmatmul.bf16.gmra.mxu1 %v10104_v61 }
 0x5b7   : > { %7146 = vmatmul.bf16.gmra.mxu2 %v10096_v51  ;;  %v10237_v51 = vld [vmem:[#allocation4 + $0x6c] sm:$0xf0] }
 0x5ba   : > { %v7107_v3 = vpop.f32.mrf.mxu2 }
 0x5bb   : > { %v13391_v17 = vadd.f32 %v7107_v3, %v7019_v9  ;;  %v7025_v27 = vpop.f32.mrf.mxu1 }
 0x5bc   : > { %v7026_v32 = vadd.f32 %v7025_v27, %v6537_v62  ;;  %7240 = vmatmul.bf16.gmra.mxu3 %v10112_v1  ;;  %v10231_v27 = vld [vmem:[#allocation4 + $0x50] sm:$0xf] }
 0x5bd   : > { %v10232_v52 = vor.u32 %v10933_v31, %v10231_v27  ;;  %v10940_v31 = vld [vmem:[#allocation4 + $0x94] sm:$0xf] }
 0x5c2   : > { %v7109_v56 = vpop.f32.mrf.mxu2 }
 0x5c3   : > { %v13395_v54 = vadd.f32 %v7109_v56, %v7021_v4  ;;  %v7028_v55 = vpop.f32.mrf.mxu1  ;;  %v6552_v56 = vadd.f32 %v14009_v5, %v13293_v47 }
 0x5c4   : > { %v7029_v57 = vadd.f32 %v7028_v55, %v6540_v18 }
 0x5c6   : > { %7857 = vmatmul.bf16.vlgmr.msra.gmra.mxu1 %v10216_v59 }
 0x5c7   : > { %7151 = vmatmul.bf16.gmra.mxu2 %v10108_v16 }
 0x5ca   : > { %v7112_v9 = vpop.f32.mrf.mxu2 }
 0x5cb   : > { %v13399_v8 = vadd.f32 %v7112_v9, %v7024_v41  ;;  %v7030_v23 = vpop.f32.mrf.mxu1 }
 0x5cc   : > { %v7031_v38 = vadd.f32 %v7030_v23, %v6542_v35  ;;  %v10937_v35 = vld [vmem:[#allocation4 + $0x7c] sm:$0xf]  ;;  %v10243_v23 = vld [vmem:[#allocation4 + $0x68] sm:$0xf] }
 0x5cd   : > { %v10252_v2 = vor.u32 %v10937_v35, %v10249_v26  ;;  %v10273_v26 = vld [vmem:[#allocation4 + $0xb4] sm:$0xf0] }
 0x5ce   : > { %v10267_v35 = vld [vmem:[#allocation4 + $0x98] sm:$0xf] }
 0x5d2   : > { %v7114_v10 = vpop.f32.mrf.mxu2 }
 0x5d3   : > { %v13403_v4 = vadd.f32 %v7114_v10, %v7026_v32  ;;  %v7033_v42 = vpop.f32.mrf.mxu1  ;;  %v10240_v32 = vor.u32 %v10934_v15, %v10237_v51  ;;  %v10244_v10 = vor.u32 %v10936_v11, %v10243_v23  ;;  %v14018_v11 = vld [vmem:[#allocation54_spill] sm:$0xff] }
 0x5d4   : > { %v7034_v40 = vadd.f32 %v7033_v42, %v6545_v34  ;;  %v14013_v34 = vld [vmem:[#allocation51_spill] sm:$0xff] }
 0x5d5   : > { %v6557_v42 = vadd.f32 %v14013_v34, %v14012_v63  ;;  %v14020_v63 = vld [vmem:[#allocation52_spill] sm:$0xff] }
 0x5d6   : > { %7862 = vmatmul.bf16.gmra.mxu1 %v10228_v48  ;;  %v10261_v48 = vld [vmem:[#allocation4 + $0x9c] sm:$0xf0] }
 0x5d7   : > { %7946 = vmatmul.bf16.vlgmr.msra.gmra.mxu2 %v10220_v13  ;;  %v10264_v15 = vor.u32 %v10940_v31, %v10261_v48  ;;  %v10946_v31 = vld [vmem:[#allocation4 + $0xc4] sm:$0xf] }
 0x5da   : > { %v7117_v24 = vpop.f32.mrf.mxu2 }
 0x5db   : > { %v13407_v36 = vadd.f32 %v7117_v24, %v7029_v57  ;;  %v7035_v41 = vpop.f32.mrf.mxu1  ;;  %v14011_v57 = vld [vmem:[#allocation41_spill] sm:$0xff]  ;;  %v10939_v24 = vld [vmem:[#allocation4 + $0x88] sm:$0xf0] }
 0x5dc   : > { %v7036_v61 = vadd.f32 %v7035_v41, %v6547_v14  ;;  %v6555_v59 = vadd.f32 %v14011_v57, %v14010_v46  ;;  %v14014_v14 = vld [vmem:[#allocation45_spill] sm:$0xff]  ;;  %v6565_v46 = vadd.f32 %v14018_v11, %v13315_v60  ;;  %v14024_v11 = vld [vmem:[#allocation35_spill] sm:$0xff] }
 0x5dd   : > { %v14015_v41 = vld [vmem:[#allocation53_spill] sm:$0xff] }
 0x5e2   : > { %v7119_v29 = vpop.f32.mrf.mxu2 }
 0x5e3   : > { %v13411_v3 = vadd.f32 %v7119_v29, %v7031_v38  ;;  %v7038_v62 = vpop.f32.mrf.mxu1 }
 0x5e4   : > { %v7039_v1 = vadd.f32 %v7038_v62, %v6550_v7  ;;  %v10255_v7 = vld [vmem:[#allocation4 + $0x80] sm:$0xf] }
 0x5e5   : > { %v10256_v27 = vor.u32 %v10939_v24, %v10255_v7  ;;  %v14021_v24 = vld [vmem:[#allocation34_spill] sm:$0xff]  ;;  %v10279_v7 = vld [vmem:[#allocation4 + $0xb0] sm:$0xf] }
 0x5e6   : > { %7867 = vmatmul.bf16.gmra.mxu1 %v10240_v32  ;;  %v14016_v32 = vld [vmem:[#allocation31_spill] sm:$0xff] }
 0x5e7   : > { %7951 = vmatmul.bf16.gmra.mxu2 %v10232_v52  ;;  %v14017_v52 = vld [vmem:[#allocation24_spill] sm:$0xff] }
 0x5ea   : > { %v7122_v21 = vpop.f32.mrf.mxu2 }
 0x5eb   : > { %v13415_v58 = vadd.f32 %v7122_v21, %v7034_v40  ;;  %v7040_v18 = vpop.f32.mrf.mxu1  ;;  %v6562_v21 = vadd.f32 %v14017_v52, %v14016_v32  ;;  %v14023_v32 = vld [vmem:[#allocation27_spill] sm:$0xff] }
 0x5ec   : > { %v7041_v55 = vadd.f32 %v7040_v18, %v6552_v56  ;;  %v6572_v52 = vadd.f32 %v14023_v32, %v13329_v30 }
 0x5f2   : > { %v7124_v28 = vpop.f32.mrf.mxu2 }
 0x5f3   : > { %v13419_v16 = vadd.f32 %v7124_v28, %v7036_v61  ;;  %v7043_v9 = vpop.f32.mrf.mxu1  ;;  %v6560_v61 = vadd.f32 %v14015_v41, %v14014_v14  ;;  %v14022_v14 = vld [vmem:[#allocation26_spill] sm:$0xff] }
 0x5f4   : > { %v7044_v38 = vadd.f32 %v7043_v9, %v6555_v59  ;;  %v10943_v9 = vld [vmem:[#allocation4 + $0xac] sm:$0xf]  ;;  %v6570_v41 = vadd.f32 %v14022_v14, %v14021_v24  ;;  %v10952_v14 = vld [vmem:[#allocation4 + $0xf4] sm:$0xf] }
 0x5f6   : > { %7872 = vmatmul.bf16.gmra.mxu1 %v10252_v2  ;;  %v10276_v2 = vor.u32 %v10943_v9, %v10273_v26 }
 0x5f7   : > { %7956 = vmatmul.bf16.gmra.mxu2 %v10244_v10 }
 0x5fa   : > { %v7127_v47 = vpop.f32.mrf.mxu2 }
 0x5fb   : > { %v13423_v49 = vadd.f32 %v7127_v47, %v7039_v1  ;;  %v7045_v6 = vpop.f32.mrf.mxu1  ;;  %v14019_v47 = vld [vmem:[#allocation28_spill] sm:$0xff] }
 0x5fc   : > { %v7046_v40 = vadd.f32 %v7045_v6, %v6557_v42  ;;  %v6567_v34 = vadd.f32 %v14020_v63, %v14019_v47 }
 0x602   : > { %v7129_v13 = vpop.f32.mrf.mxu2 }
 0x603   : > { %v13427_v51 = vadd.f32 %v7129_v13, %v7041_v55  ;;  %v7048_v29 = vpop.f32.mrf.mxu1  ;;  %v10942_v55 = vld [vmem:[#allocation4 + $0xa0] sm:$0xf0]  ;;  %v10285_v13 = vld [vmem:[#allocation4 + $0xcc] sm:$0xf0] }
 0x604   : > { %v7049_v62 = vadd.f32 %v7048_v29, %v6560_v61  ;;  %v10268_v10 = vor.u32 %v10942_v55, %v10267_v35  ;;  %v10949_v35 = vld [vmem:[#allocation4 + $0xdc] sm:$0xf] }
 0x606   : > { %7877 = vmatmul.bf16.gmra.mxu1 %v10264_v15 }
 0x607   : > { %7961 = vmatmul.bf16.gmra.mxu2 %v10256_v27  ;;  %v10288_v27 = vor.u32 %v10946_v31, %v10285_v13 }
 0x60a   : > { %v7132_v1 = vpop.f32.mrf.mxu2 }
 0x60b   : > { %v13431_v5 = vadd.f32 %v7132_v1, %v7044_v38  ;;  %v7050_v56 = vpop.f32.mrf.mxu1 }
 0x60c   : > { %v7051_v18 = vadd.f32 %v7050_v56, %v6562_v21 }
 0x612   : > { %v7134_v28 = vpop.f32.mrf.mxu2 }
 0x613   : > { %v13435_v57 = vadd.f32 %v7134_v28, %v7046_v40  ;;  %v7053_v59 = vpop.f32.mrf.mxu1  ;;  %v10945_v40 = vld [vmem:[#allocation4 + $0xb8] sm:$0xf0]  ;;  %v10297_v28 = vld [vmem:[#allocation4 + $0xe4] sm:$0xf0] }
 0x614   : > { %v7054_v23 = vadd.f32 %v7053_v59, %v6565_v46  ;;  %v10280_v1 = vor.u32 %v10945_v40, %v10279_v7  ;;  %v6575_v46 = vadd.f32 %v14024_v11, %v13335_v53  ;;  %v14026_v11 = vld [vmem:[#allocation55_spill] sm:$0xff] }
 0x616   : > { %7882 = vmatmul.bf16.gmra.mxu1 %v10276_v2  ;;  %v10291_v2 = vld [vmem:[#allocation4 + $0xc8] sm:$0xf] }
 0x617   : > { %7966 = vmatmul.bf16.gmra.mxu2 %v10268_v10 }
 0x61a   : > { %v7137_v38 = vpop.f32.mrf.mxu2 }
 0x61b   : > { %v13439_v42 = vadd.f32 %v7137_v38, %v7049_v62  ;;  %v7055_v6 = vpop.f32.mrf.mxu1  ;;  %v10300_v38 = vor.u32 %v10949_v35, %v10297_v28 }
 0x61c   : > { %v7056_v48 = vadd.f32 %v7055_v6, %v6567_v34 }
 0x622   : > { %v7139_v60 = vpop.f32.mrf.mxu2 }
 0x623   : > { %v13443_v61 = vadd.f32 %v7139_v60, %v7051_v18  ;;  %v7058_v29 = vpop.f32.mrf.mxu1  ;;  %v10948_v18 = vld [vmem:[#allocation4 + $0xd0] sm:$0xf0]  ;;  %v10309_v60 = vld [vmem:[#allocation4 + $0xfc] sm:$0xf0] }
 0x624   : > { %v7059_v15 = vadd.f32 %v7058_v29, %v6570_v41  ;;  %v10292_v47 = vor.u32 %v10948_v18, %v10291_v2  ;;  %v10303_v41 = vld [vmem:[#allocation4 + $0xe0] sm:$0xf]  ;;  %v10312_v29 = vor.u32 %v10952_v14, %v10309_v60  ;;  %v13463_v18 = vpop.f32.mrf.mxu0  ;;  %v11113_v2 = vld [vmem:[%s11589_s23 + $0x18] sm:$0xff]  }
 0x625   : > { %v14027_v60 = vld [vmem:[#allocation42_spill] sm:$0xff] }
 0x626   : > { %7887 = vmatmul.bf16.gmra.mxu1 %v10288_v27 }
 0x627   : > { %7971 = vmatmul.bf16.gmra.mxu2 %v10280_v1 }
 0x62a   : > { %v7142_v62 = vpop.f32.mrf.mxu2 }
 0x62b   : > { %v13447_v21 = vadd.f32 %v7142_v62, %v7054_v23  ;;  %v7060_v56 = vpop.f32.mrf.mxu1  ;;  %v14025_v23 = vld [vmem:[#allocation32_spill] sm:$0xff]  ;;  %v10954_v62 = vld [vmem:[#allocation4 + $0x100] sm:$0xf0] }
 0x62c   : > { %v7061_v26 = vadd.f32 %v7060_v56, %v6572_v52  ;;  %v6577_v63 = vadd.f32 %v14025_v23, %v13339_v12  ;;  %v10955_v56 = vld [vmem:[#allocation4 + $0x10c] sm:$0xf]  ;;  %v11003_v23 = vunpack.c.l.bf16 %v11113_v2 }
 0x62e   : > { %v8280_v14 = vrot.slane %v11003_v23, 1 }
 0x632   : > { %v7144_v55 = vpop.f32.mrf.mxu2 }
 0x633   : > { %v13451_v59 = vadd.f32 %v7144_v55, %v7056_v48  ;;  %v7063_v9 = vpop.f32.mrf.mxu1  ;;  %v10951_v48 = vld [vmem:[#allocation4 + $0xe8] sm:$0xf0] }
 0x634   : > { %v7064_v10 = vadd.f32 %v7063_v9, %v6575_v46  ;;  %v10304_v31 = vor.u32 %v10951_v48, %v10303_v41 }
 0x636   : > { %7892 = vmatmul.bf16.gmra.mxu1 %v10300_v38 }
 0x637   : > { %7976 = vmatmul.bf16.gmra.mxu2 %v10292_v47  ;;  %v13471_v47 = vld [vmem:[%s13795_s5] ss:$0 sm:$0xff] }
 0x63a   : > { %v7147_v30 = vpop.f32.mrf.mxu2 }
 0x63b   : > { %v13455_v34 = vadd.f32 %v7147_v30, %v7059_v15  ;;  %v7065_v6 = vpop.f32.mrf.mxu1  ;;  %v10321_v15 = vld [vmem:[#allocation4 + $0x114] sm:$0xf0]  ;;  %v10499_v30 = vld [vmem:[%s11589_s23 + $0x20] sm:$0x1] }
 0x63c   : > { %v7066_v13 = vadd.f32 %v7065_v6, %v6577_v63  ;;  %v10324_v28 = vor.u32 %v10955_v56, %v10321_v15  ;;  %v11004_v63 = vunpack.c.h.bf16 %v11113_v2  ;;  %v8185_v6 = vunpack.c.l.bf16 %v10499_v30  ;;  %v10327_v56 = vld [vmem:[#allocation4 + $0x110] sm:$0xf]  ;;  %v14028_v2 = vld [vmem:[#allocation39_spill] sm:$0xff] }
 0x63e   : > { %v8281_v41 = vrot.slane %v11004_v63, 1 }
 0x642   : > { %v7149_v53 = vpop.f32.mrf.mxu2 }
 0x643   : > { %v13457_v40 = vadd.f32 %v7149_v53, %v7061_v26  ;;  %v7858_v24 = vpop.f32.mrf.mxu1  ;;  %v10315_v26 = vld [vmem:[#allocation4 + $0xf8] sm:$0xf] }
 0x644   : > { %v10316_v55 = vor.u32 %v10954_v62, %v10315_v26  ;;  %v7859_v46 = vadd.f32 %v7858_v24, %v14026_v11  ;;  %v13481_v24 = vld [vmem:[%s13796_s6] ss:$0 sm:$0xff]  ;;  %v8283_v62 = vrot.slane %v8185_v6, 1  ;;  %v8282_v11 = vsel %vm8279_vm14, %v8280_v14, %v8281_v41 }
 0x646   : > { %7897 = vmatmul.bf16.gmra.mxu1 %v10312_v29 }
 0x647   : > { %7981 = vmatmul.bf16.gmra.mxu2 %v10304_v31  ;;  %v10957_v31 = vld [vmem:[#allocation4 + $0x118] sm:$0xf0] }
 0x64a   : > { %v7152_v7 = vpop.f32.mrf.mxu2 }
 0x64b   : > { %v13459_v27 = vadd.f32 %v7152_v7, %v7064_v10  ;;  %v7860_v12 = vpop.f32.mrf.mxu1 }
 0x64c   : > { %v7861_v53 = vadd.f32 %v7860_v12, %v14027_v60  ;;  %v10500_v60 = vld [vmem:[%s11589_s23 + $0x24] sm:$0xff]  }
 0x652   : > { %v7154_v1 = vpop.f32.mrf.mxu2 }
 0x653   : > { %v13461_v32 = vadd.f32 %v7154_v1, %v7066_v13  ;;  %v7863_v52 = vpop.f32.mrf.mxu1  ;;  %v13474_v13 = vpop.f32.mrf.mxu0  ;;  %v10958_v1 = vld [vmem:[#allocation4 + $0x124] sm:$0xf] }
 0x656   : > { %7902 = vmatmul.bf16.gmra.mxu1 %v10324_v28 }
 0x657   : > { %7986 = vmatmul.bf16.gmra.mxu2 %v10316_v55  ;;  %v10328_v55 = vor.u32 %v10957_v31, %v10327_v56  ;;  %v8186_v31 = vunpack.c.l.bf16 %v10500_v60 }
 0x65a   : > { %v7947_v9 = vpop.f32.mrf.mxu2 }
 0x65b   : > { %v7948_v35 = vadd.f32 %v7947_v9, %v7859_v46  ;;  %v7865_v10 = vpop.f32.mrf.mxu1  ;;  %v8284_v9 = vsel %vm8279_vm14, %v8281_v41, %v8283_v62  ;;  %v13490_v63 = vpop.f32.mrf.mxu0  ;;  %v10502_v41 = vld [vmem:[%s11589_s23 + $0x2c] sm:$0x1]  ;;  %v14029_v62 = vld [vmem:[#allocation23_spill] sm:$0xff] }
 0x65c   : > { %v7866_v56 = vadd.f32 %v7865_v10, %v14029_v62 }
 0x65d   : > { %v8027_v38 = vadd.f32 %v7948_v35, %v13343_v33  ;;  %v10333_v33 = vld [vmem:[#allocation4 + $0x12c] sm:$0xf0] }
 0x65e   : > { %v10336_v12 = vor.u32 %v10958_v1, %v10333_v33  ;;  %v8188_v1 = vunpack.c.l.bf16 %v10502_v41 }
 0x65f   : > { %v8063_v48 = vmul.f32 %v13471_v47, %v8027_v38  ;;  %v7864_v38 = vadd.f32 %v7863_v52, %v14028_v2 }
 0x660   : > { %v8288_v2 = vrot.slane %v8188_v1, 1 }
 0x661   : > { %v8099_v26 = vadd.f32 %v13481_v24, %v8063_v48  ;;  %v13494_v48 = vpop.f32.mrf.mxu3 }
 0x662   : > { %v7949_v29 = vpop.f32.mrf.mxu2 }
 0x663   : > { %v7950_v7 = vadd.f32 %v7949_v29, %v7861_v53  ;;  %v7868_v15 = vpop.f32.mrf.mxu1  ;;  %v8392_v35 = vadd.f32 %v8282_v11, %v8099_v26  ;;  %v10345_v26 = vld [vmem:[#allocation4 + $0x144] sm:$0xf0] }
 0x665   : > { %v8028_v28 = vadd.f32 %v7950_v7, %v13347_v22  ;;  %v8424_v33 = vmax.f32 %v8392_v35, 0.0  ;;  %v8187_v7 = vunpack.c.h.bf16 %v10500_v60  ;;  %v10961_v35 = vld [vmem:[#allocation4 + $0x13c] sm:$0xf] }
 0x666   : > { %7907 = vmatmul.bf16.gmra.mxu1 %v10336_v12 }
 0x667   : > { %v8064_v46 = vmul.f32 %v13471_v47, %v8028_v28  ;;  %7991 = vmatmul.bf16.gmra.mxu2 %v10328_v55  ;;  %v8285_v28 = vrot.slane %v8186_v31, 1  ;;  %v8286_v55 = vrot.slane %v8187_v7, 1  ;;  %v14030_v31 = vld [vmem:[#allocation49_spill] sm:$0xff] }
 0x668   : > { %v7869_v7 = vadd.f32 %v7868_v15, %v14030_v31 }
 0x669   : > { %v8100_v30 = vadd.f32 %v13481_v24, %v8064_v46  ;;  %v10960_v46 = vld [vmem:[#allocation4 + $0x130] sm:$0xf0]  ;;  %v8287_v60 = vsel %vm8279_vm14, %v8285_v28, %v8286_v55 }
 0x66a   : > { %v7952_v23 = vpop.f32.mrf.mxu2 }
 0x66b   : > { %v8393_v22 = vadd.f32 %v8284_v9, %v8100_v30  ;;  %v7953_v6 = vadd.f32 %v7952_v23, %v7864_v38  ;;  %v7870_v53 = vpop.f32.mrf.mxu1  ;;  %v10339_v38 = vld [vmem:[#allocation4 + $0x128] sm:$0xf]  ;;  %v10348_v30 = vor.u32 %v10961_v35, %v10345_v26  ;;  %v13503_v23 = vpop.f32.mrf.mxu0 }
 0x66d   : > { %v8425_v14 = vmax.f32 %v8393_v22, 0.0  ;;  %v8029_v29 = vadd.f32 %v7953_v6, %v13351_v43  ;;  %v10340_v6 = vor.u32 %v10960_v46, %v10339_v38  ;;  %v10505_v46 = vld [vmem:[%s11589_s23 + $0x38] sm:$0x1] }
 0x66f   : > { %v11036_v52 = vpack.c.bf16 %v8425_v14, %v8424_v33  ;;  %v8065_v12 = vmul.f32 %v13471_v47, %v8029_v29  ;;  %v13508_v33 = vpop.f32.mrf.mxu3  ;;  %v8289_v29 = vsel %vm8279_vm14, %v8286_v55, %v8288_v2  ;;  %v8191_v2 = vunpack.c.l.bf16 %v10505_v46 }
 0x671   : > { %11037 = vst [vmem:[%s13498_s16] sm:$0xff] %v11036_v52   ;;  %v8101_v22 = vadd.f32 %v13481_v24, %v8065_v12 }
 0x672   : > { %v7954_v11 = vpop.f32.mrf.mxu2 }
 0x673   : > { %v7955_v9 = vadd.f32 %v7954_v11, %v7866_v56  ;;  %v7873_v43 = vpop.f32.mrf.mxu1  ;;  %v8394_v41 = vadd.f32 %v8287_v60, %v8101_v22  ;;  %v11114_v56 = vld [vmem:[%s11589_s23 + $0x30] sm:$0xff]   ;;  %v13517_v38 = vpop.f32.mrf.mxu0 }
 0x674   : > { %v11008_v35 = vunpack.c.h.bf16 %v11114_v56 }
 0x675   : > { %v8030_v10 = vadd.f32 %v7955_v9, %v13355_v39  ;;  %v8426_v26 = vmax.f32 %v8394_v41, 0.0  ;;  %v11007_v9 = vunpack.c.l.bf16 %v11114_v56  ;;  %v10963_v41 = vld [vmem:[#allocation4 + $0x148] sm:$0xf0] }
 0x676   : > { %7912 = vmatmul.bf16.gmra.mxu1 %v10348_v30  ;;  %v14031_v30 = vld [vmem:[#allocation25_spill] sm:$0xff] }
 0x677   : > { %v8066_v14 = vmul.f32 %v13471_v47, %v8030_v10  ;;  %7996 = vmatmul.bf16.gmra.mxu2 %v10340_v6  ;;  %v13519_v15 = vpop.f32.mrf.mxu3  ;;  %v7871_v22 = vadd.f32 %v7870_v53, %v14031_v30  ;;  %v10357_v6 = vld [vmem:[#allocation4 + $0x15c] sm:$0xf0]  ;;  %v8290_v60 = vrot.slane %v11007_v9, 1 }
 0x679   : > { %v8102_v52 = vadd.f32 %v13481_v24, %v8066_v14  ;;  %v8291_v14 = vrot.slane %v11008_v35, 1  ;;  %v7874_v35 = vadd.f32 %v7873_v43, %v13463_v18 }
 0x67a   : > { %v7957_v1 = vpop.f32.mrf.mxu2 }
 0x67b   : > { %v8395_v39 = vadd.f32 %v8289_v29, %v8102_v52  ;;  %v7958_v62 = vadd.f32 %v7957_v1, %v7869_v7  ;;  %v7875_v12 = vpop.f32.mrf.mxu1  ;;  %v10964_v7 = vld [vmem:[#allocation4 + $0x154] sm:$0xf]  ;;  %v8293_v52 = vrot.slane %v8191_v2, 1  ;;  %v10351_v1 = vld [vmem:[#allocation4 + $0x140] sm:$0xf]  ;;  %v8292_v53 = vsel %vm8279_vm14, %v8290_v60, %v8291_v14  ;;  %v13529_v46 = vpop.f32.mrf.mxu0 }
 0x67c   : > { %v7876_v18 = vadd.f32 %v7875_v12, %v13474_v13 }
 0x67d   : > { %v8427_v28 = vmax.f32 %v8395_v39, 0.0  ;;  %v8031_v11 = vadd.f32 %v7958_v62, %v13359_v44  ;;  %v10360_v39 = vor.u32 %v10964_v7, %v10357_v6 }
 0x67f   : > { %v11041_v55 = vpack.c.bf16 %v8427_v28, %v8426_v26  ;;  %v8067_v10 = vmul.f32 %v13471_v47, %v8031_v11  ;;  %v10352_v26 = vor.u32 %v10963_v41, %v10351_v1  ;;  %v8294_v11 = vsel %vm8279_vm14, %v8291_v14, %v8293_v52  ;;  %v10508_v14 = vld [vmem:[%s11589_s23 + $0x44] sm:$0x1] }
 0x680   : > { %v8194_v1 = vunpack.c.l.bf16 %v10508_v14 }
 0x681   : > { %11121 = vst [vmem:[%s13498_s16 + $0x8] sm:$0xff] %v11041_v55   ;;  %v8103_v62 = vadd.f32 %v13481_v24, %v8067_v10  ;;  %v10506_v10 = vld [vmem:[%s11589_s23 + $0x3c] sm:$0xff]  }
 0x682   : > { %v7959_v29 = vpop.f32.mrf.mxu2  ;;  %v8193_v7 = vunpack.c.h.bf16 %v10506_v10 }
 0x683   : > { %v7960_v44 = vadd.f32 %v7959_v29, %v7871_v22  ;;  %v7878_v31 = vpop.f32.mrf.mxu1  ;;  %v8396_v9 = vadd.f32 %v8292_v53, %v8103_v62  ;;  %v10966_v53 = vld [vmem:[#allocation4 + $0x160] sm:$0xf0] }
 0x684   : > { %v7879_v14 = vadd.f32 %v7878_v31, %v13490_v63 }
 0x685   : > { %v8032_v56 = vadd.f32 %v7960_v44, %v13363_v37  ;;  %v13533_v37 = vpop.f32.mrf.mxu3  ;;  %v8428_v60 = vmax.f32 %v8396_v9, 0.0  ;;  %v8192_v44 = vunpack.c.l.bf16 %v10506_v10 }
 0x686   : > { %7917 = vmatmul.bf16.gmra.mxu1 %v10360_v39  ;;  %v10369_v39 = vld [vmem:[#allocation4 + $0x174] sm:$0xf0] }
 0x687   : > { %v8068_v28 = vmul.f32 %v13471_v47, %v8032_v56  ;;  %8001 = vmatmul.bf16.gmra.mxu2 %v10352_v26  ;;  %v8295_v62 = vrot.slane %v8192_v44, 1  ;;  %v8296_v56 = vrot.slane %v8193_v7, 1 }
 0x689   : > { %v8104_v55 = vadd.f32 %v13481_v24, %v8068_v28  ;;  %v13541_v28 = vpop.f32.mrf.mxu0  ;;  %v8297_v10 = vsel %vm8279_vm14, %v8295_v62, %v8296_v56 }
 0x68a   : > { %v7962_v2 = vpop.f32.mrf.mxu2 }
 0x68b   : > { %v8397_v30 = vadd.f32 %v8294_v11, %v8104_v55  ;;  %v7963_v22 = vadd.f32 %v7962_v2, %v7874_v35  ;;  %v7880_v6 = vpop.f32.mrf.mxu1  ;;  %v8298_v35 = vrot.slane %v8194_v1, 1  ;;  %v10363_v55 = vld [vmem:[#allocation4 + $0x158] sm:$0xf] }
 0x68d   : > { %v8429_v29 = vmax.f32 %v8397_v30, 0.0  ;;  %v8033_v41 = vadd.f32 %v7963_v22, %v13367_v19  ;;  %v10967_v19 = vld [vmem:[#allocation4 + $0x16c] sm:$0xf]  ;;  %v13543_v30 = vpop.f32.mrf.mxu3  ;;  %v10364_v22 = vor.u32 %v10966_v53, %v10363_v55  ;;  %v7881_v55 = vadd.f32 %v7880_v6, %v13503_v23 }
 0x68e   : > { %v10372_v2 = vor.u32 %v10967_v19, %v10369_v39 }
 0x68f   : > { %v11046_v52 = vpack.c.bf16 %v8429_v29, %v8428_v60  ;;  %v8069_v43 = vmul.f32 %v13471_v47, %v8033_v41  ;;  %v8299_v29 = vsel %vm8279_vm14, %v8296_v56, %v8298_v35  ;;  %v10511_v56 = vld [vmem:[%s11589_s23 + $0x50] sm:$0x1] }
 0x690   : > { %v8197_v35 = vunpack.c.l.bf16 %v10511_v56  ;;  %v10512_v56 = vld [vmem:[%s11589_s23 + $0x54] sm:$0xff]  }
 0x691   : > { %11122 = vst [vmem:[%s13498_s16 + $0x10] sm:$0xff] %v11046_v52   ;;  %v8105_v13 = vadd.f32 %v13481_v24, %v8069_v43  ;;  %v13555_v39 = vpop.f32.mrf.mxu0 }
 0x692   : > { %v7964_v26 = vpop.f32.mrf.mxu2 }
 0x693   : > { %v7965_v11 = vadd.f32 %v7964_v26, %v7876_v18  ;;  %v7883_v9 = vpop.f32.mrf.mxu1  ;;  %v8398_v41 = vadd.f32 %v8297_v10, %v8105_v13  ;;  %v11115_v18 = vld [vmem:[%s11589_s23 + $0x48] sm:$0xff]   ;;  %v7189_v10 = vadd.f32 %v13508_v33, %v13379_v0 }
 0x694   : > { %v11012_v19 = vunpack.c.h.bf16 %v11115_v18 }
 0x695   : > { %v8034_v12 = vadd.f32 %v7965_v11, %v13371_v50  ;;  %v7187_v50 = vadd.f32 %v13494_v48, %v13375_v20  ;;  %v8430_v62 = vmax.f32 %v8398_v41, 0.0  ;;  %v11011_v11 = vunpack.c.l.bf16 %v11115_v18  ;;  %v13558_v63 = vpop.f32.mrf.mxu3  ;;  %v10381_v48 = vld [vmem:[#allocation4 + $0x18c] sm:$0xf0]  ;;  %v10970_v41 = vld [vmem:[#allocation4 + $0x184] sm:$0xf] }
 0x696   : > { %7922 = vmatmul.bf16.gmra.mxu1 %v10372_v2  ;;  %v8301_v13 = vrot.slane %v11012_v19, 1  ;;  %v10514_v19 = vld [vmem:[%s11589_s23 + $0x5c] sm:$0x1] }
 0x697   : > { %v8070_v60 = vmul.f32 %v13471_v47, %v8034_v12  ;;  %8006 = vmatmul.bf16.gmra.mxu2 %v10364_v22  ;;  %v8300_v2 = vrot.slane %v11011_v11, 1  ;;  %v10969_v22 = vld [vmem:[#allocation4 + $0x178] sm:$0xf0] }
 0x699   : > { %v8106_v44 = vadd.f32 %v13481_v24, %v8070_v60 }
 0x69a   : > { %v7967_v7 = vpop.f32.mrf.mxu2 }
 0x69b   : > { %v8399_v52 = vadd.f32 %v8299_v29, %v8106_v44  ;;  %v7968_v1 = vadd.f32 %v7967_v7, %v7879_v14  ;;  %v7885_v43 = vpop.f32.mrf.mxu1  ;;  %v8303_v14 = vrot.slane %v8197_v35, 1  ;;  %v10375_v44 = vld [vmem:[#allocation4 + $0x170] sm:$0xf]  ;;  %v10384_v7 = vor.u32 %v10970_v41, %v10381_v48 }
 0x69c   : > { %v8198_v48 = vunpack.c.l.bf16 %v10512_v56 }
 0x69d   : > { %v8431_v26 = vmax.f32 %v8399_v52, 0.0  ;;  %v8035_v53 = vadd.f32 %v7968_v1, %v7187_v50  ;;  %v10376_v50 = vor.u32 %v10969_v22, %v10375_v44  ;;  %v8302_v52 = vsel %vm8279_vm14, %v8300_v2, %v8301_v13  ;;  %v13569_v1 = vpop.f32.mrf.mxu0  ;;  %v13573_v18 = vpop.f32.mrf.mxu3  ;;  %v10387_v44 = vld [vmem:[#allocation4 + $0x188] sm:$0xf] }
 0x69e   : > { %v8304_v33 = vsel %vm8279_vm14, %v8301_v13, %v8303_v14  ;;  %v8199_v2 = vunpack.c.h.bf16 %v10512_v56  ;;  %v8305_v41 = vrot.slane %v8198_v48, 1  ;;  %v5431_v48 = vld [vmem:[#allocation2 + $0xcc] sm:$0xe] }
 0x69f   : > { %v11051_v31 = vpack.c.bf16 %v8431_v26, %v8430_v62  ;;  %v8071_v20 = vmul.f32 %v13471_v47, %v8035_v53  ;;  %v7884_v26 = vadd.f32 %v7883_v9, %v13517_v38  ;;  %v10972_v9 = vld [vmem:[#allocation4 + $0x190] sm:$0xf0] }
 0x6a0   : > { %v8306_v14 = vrot.slane %v8199_v2, 1 }
 0x6a1   : > { %11123 = vst [vmem:[%s13498_s16 + $0x18] sm:$0xff] %v11051_v31   ;;  %v8107_v23 = vadd.f32 %v13481_v24, %v8071_v20  ;;  %v7192_v31 = vadd.f32 %v13519_v15, %v13383_v25  ;;  %v7886_v25 = vadd.f32 %v7885_v43, %v13529_v46 }
 0x6a2   : > { %v7969_v12 = vpop.f32.mrf.mxu2  ;;  %v8307_v2 = vsel %vm8279_vm14, %v8305_v41, %v8306_v14 }
 0x6a3   : > { %v7970_v60 = vadd.f32 %v7969_v12, %v7881_v55  ;;  %v13565_v29 = vpop.f32.mrf.mxu1  ;;  %v8400_v62 = vadd.f32 %v8302_v52, %v8107_v23  ;;  %v4784_v23 = vld [vmem:[#allocation2 + $0xcc] sm:$0xf]  ;;  %v10388_v52 = vor.u32 %v10972_v9, %v10387_v44  ;;  %v5433_v9 = vld [vmem:[#allocation2 + $0xd4] sm:$0x1]  ;;  %v9632_v44 = vrot.slane %v5431_v48, 9 }
 0x6a4   : > { %4820 = vst [vmem:[#allocation4 + $0x198] sm:$0xf] %v4784_v23 }
 0x6a5   : > { %v8036_v6 = vadd.f32 %v7970_v60, %v7189_v10  ;;  %v8432_v13 = vmax.f32 %v8400_v62, 0.0  ;;  %v8200_v10 = vunpack.c.l.bf16 %v10514_v19  ;;  %v7194_v62 = vadd.f32 %v13533_v37, %v13387_v45  ;;  %v5432_v37 = vld [vmem:[#allocation2 + $0xd0] sm:$0xf] }
 0x6a6   : > { %7927 = vmatmul.bf16.gmra.mxu1 %v10384_v7  ;;  %v13584_v7 = vpop.f32.mrf.mxu0 }
 0x6a7   : > { %v8072_v0 = vmul.f32 %v13471_v47, %v8036_v6  ;;  %8011 = vmatmul.bf16.gmra.mxu2 %v10376_v50  ;;  %v8308_v15 = vrot.slane %v8200_v10, 1  ;;  %v4785_v6 = vld [vmem:[#allocation2 + $0xd0] sm:$0xf] }
 0x6a8   : > { %4821 = vst [vmem:[#allocation4 + $0x1a4] sm:$0xf] %v4785_v6  ;;  %v5609_v6 = vrot.slane %v5432_v37, 5 }
 0x6a9   : > { %v8108_v53 = vadd.f32 %v13481_v24, %v8072_v0  ;;  %v4873_v0 = vld [vmem:[#allocation2 + $0xcc] sm:$0xf] }
 0x6aa   : > { %v7972_v11 = vpop.f32.mrf.mxu2  ;;  %v5285_v19 = vshrl.u32 %v4873_v0, 16  ;;  %v5288_v46 = vshll.u32 %v4873_v0, 16 }
 0x6ab   : > { %v8401_v35 = vadd.f32 %v8304_v33, %v8108_v53  ;;  %v7973_v55 = vadd.f32 %v7972_v11, %v7884_v26  ;;  %v13581_v20 = vpop.f32.mrf.mxu1  ;;  %v4874_v33 = vld [vmem:[#allocation2 + $0xd0] sm:$0xf]  ;;  %v13590_v26 = vpop.f32.mrf.mxu3  ;;  %v4875_v11 = vld [vmem:[#allocation2 + $0xd4] sm:$0x1] }
 0x6ac   : > { %v5290_v45 = vrot.slane %v5288_v46, 5 }
 0x6ad   : > { %v8433_v12 = vmax.f32 %v8401_v35, 0.0  ;;  %v8037_v22 = vadd.f32 %v7973_v55, %v7192_v31  ;;  %v5294_v31 = vshll.u32 %v4874_v33, 16  ;;  %v5298_v35 = vshrl.u32 %v4874_v33, 16 }
 0x6ae   : > { %v5304_v55 = vshll.u32 %v4875_v11, 16  ;;  %v5612_v33 = vrot.slane %v5433_v9, 5  ;;  %v5610_v11 = vsel %vm11729_vm5, %v9632_v44, %v5609_v6  ;;  %v10517_v9 = vld [vmem:[%s11589_s23 + $0x68] sm:$0x1] }
 0x6af   : > { %v11056_v38 = vpack.c.bf16 %v8433_v12, %v8432_v13  ;;  %v8073_v60 = vmul.f32 %v13471_v47, %v8037_v22  ;;  %v5287_v12 = vrot.slane %v5285_v19, 4  ;;  %v8309_v22 = vsel %vm8279_vm14, %v8306_v14, %v8308_v15  ;;  %v10391_v14 = vld [vmem:[#allocation4 + $0x198] sm:$0xf]  ;;  %5684 = vst [vmem:[#allocation4 + $0x1a0] sm:$0xf] %v5610_v11 }
 0x6b0   : > { %v5296_v10 = vrot.slane %v5294_v31, 5  ;;  %v5306_v0 = vrot.slane %v5304_v55, 5  ;;  %v5611_v19 = vrot.slane %v5609_v6, 4  ;;  %v11116_v55 = vld [vmem:[%s11589_s23 + $0x60] sm:$0xff]  }
 0x6b1   : > { %11124 = vst [vmem:[%s13498_s16 + $0x20] sm:$0xff] %v11056_v38   ;;  %v8109_v43 = vadd.f32 %v13481_v24, %v8073_v60  ;;  %v5300_v38 = vrot.slane %v5298_v35, 4  ;;  %v5291_v23 = vor.u32 %v5290_v45, %v5287_v12  ;;  %v11015_v44 = vunpack.c.l.bf16 %v11116_v55 }
 0x6b2   : > { %v7974_v50 = vpop.f32.mrf.mxu2 }
 0x6b3   : > { %v7975_v53 = vadd.f32 %v7974_v50, %v7886_v25  ;;  %v13592_v56 = vpop.f32.mrf.mxu1  ;;  %v7889_v25 = vadd.f32 %v13565_v29, %v13541_v28  ;;  %v8402_v50 = vadd.f32 %v8307_v2, %v8109_v43  ;;  %v5301_v41 = vor.u32 %v5300_v38, %v5296_v10  ;;  %v13605_v43 = vpop.f32.mrf.mxu0 }
 0x6b4   : > { %v5292_v15 = vrot.slane %v5291_v23, 4  ;;  %v7197_v28 = vadd.f32 %v13543_v30, %v13391_v17  ;;  %v5613_v17 = vsel %vm11729_vm5, %v5611_v19, %v5612_v33  ;;  %v13614_v30 = vpop.f32.mrf.mxu3  ;;  %v7891_v23 = vadd.f32 %v13581_v20, %v13555_v39 }
 0x6b5   : > { %v8038_v13 = vadd.f32 %v7975_v53, %v7194_v62  ;;  %v5302_v46 = vrot.slane %v5301_v41, 4  ;;  %v8434_v37 = vmax.f32 %v8402_v50, 0.0  ;;  %5685 = vst [vmem:[#allocation4 + $0x1ac] sm:$0xf] %v5613_v17  ;;  %v8310_v41 = vrot.slane %v11015_v44, 1 }
 0x6b6   : > { %v5297_v12 = vsel %vm11614_vm2, %v5292_v15, %v5296_v10  ;;  %v7199_v50 = vadd.f32 %v13558_v63, %v13395_v54  ;;  %v10399_v15 = vld [vmem:[#allocation4 + $0x1a0] sm:$0xf] }
 0x6b7   : > { %v8074_v60 = vmul.f32 %v13471_v47, %v8038_v13  ;;  %8016 = vmatmul.bf16.gmra.mxu2 %v10388_v52  ;;  %v10974_v52 = vld [vmem:[#allocation4 + $0x1a0] sm:$0xf0]  ;;  %v5307_v45 = vsel %vm11614_vm2, %v5302_v46, %v5306_v0  ;;  %5378 = vst [vmem:[#allocation4 + $0x19c] sm:$0xf] %v5297_v12 }
 0x6b8   : > { %v10392_v48 = vor.u32 %v10974_v52, %v10391_v14  ;;  %5379 = vst [vmem:[#allocation4 + $0x1a8] sm:$0xf] %v5307_v45  ;;  %v7202_v45 = vadd.f32 %v13573_v18, %v13399_v8 }
 0x6b9   : > { %v8110_v62 = vadd.f32 %v13481_v24, %v8074_v60  ;;  %v8203_v60 = vunpack.c.l.bf16 %v10517_v9 }
 0x6ba   : > { %v7977_v29 = vpop.f32.mrf.mxu2  ;;  %7843 = vmatmul.bf16.gmra.mxu0 %v10392_v48  ;;  %v7894_v48 = vadd.f32 %v13592_v56, %v13569_v1 }
 0x6bb   : > { %v8403_v31 = vadd.f32 %v8309_v22, %v8110_v62  ;;  %v7978_v35 = vadd.f32 %v7977_v29, %v7889_v25  ;;  %v7895_v2 = vpop.f32.mrf.mxu1  ;;  %v11016_v25 = vunpack.c.h.bf16 %v11116_v55  ;;  %v8313_v11 = vrot.slane %v8203_v60, 1 }
 0x6bc   : > { %v10975_v20 = vld [vmem:[#allocation4 + $0x1a8] sm:$0xf0] }
 0x6bd   : > { %v8435_v38 = vmax.f32 %v8403_v31, 0.0  ;;  %v8039_v22 = vadd.f32 %v7978_v35, %v7197_v28  ;;  %v8311_v0 = vrot.slane %v11016_v25, 1  ;;  %v13623_v28 = vpop.f32.mrf.mxu0  ;;  %v10400_v31 = vor.u32 %v10975_v20, %v10399_v15  ;;  %v13627_v35 = vpop.f32.mrf.mxu3 }
 0x6be   : > { %v10973_v14 = vld [vmem:[#allocation4 + $0x19c] sm:$0xf] }
 0x6bf   : > { %v11061_v10 = vpack.c.bf16 %v8435_v38, %v8434_v37  ;;  %v8075_v6 = vmul.f32 %v13471_v47, %v8039_v22  ;;  %v10393_v19 = vld [vmem:[#allocation4 + $0x1a4] sm:$0xf0]  ;;  %v8312_v46 = vsel %vm8279_vm14, %v8310_v41, %v8311_v0  ;;  %v8314_v63 = vsel %vm8279_vm14, %v8311_v0, %v8313_v11  ;;  %v10518_v38 = vld [vmem:[%s11589_s23 + $0x6c] sm:$0xff]  }
 0x6c0   : > { %v10396_v39 = vor.u32 %v10973_v14, %v10393_v19  ;;  %v8204_v60 = vunpack.c.l.bf16 %v10518_v38  ;;  %v7896_v0 = vadd.f32 %v7895_v2, %v13584_v7 }
 0x6c1   : > { %11125 = vst [vmem:[%s13498_s16 + $0x28] sm:$0xff] %v11061_v10   ;;  %v8111_v29 = vadd.f32 %v13481_v24, %v8075_v6  ;;  %v10520_v10 = vld [vmem:[%s11589_s23 + $0x74] sm:$0x1] }
 0x6c2   : > { %v7979_v33 = vpop.f32.mrf.mxu2  ;;  %7932 = vmatmul.bf16.gmra.mxu1 %v10396_v39  ;;  %v8206_v1 = vunpack.c.l.bf16 %v10520_v10  ;;  %v8315_v8 = vrot.slane %v8204_v60, 1 }
 0x6c3   : > { %v7980_v62 = vadd.f32 %v7979_v33, %v7891_v23  ;;  %v7898_v53 = vpop.f32.mrf.mxu1  ;;  %v8404_v55 = vadd.f32 %v8312_v46, %v8111_v29  ;;  %v8205_v23 = vunpack.c.h.bf16 %v10518_v38 }
 0x6c4   : > { %v8318_v11 = vrot.slane %v8206_v1, 1  ;;  %v7899_v46 = vadd.f32 %v7898_v53, %v13605_v43 }
 0x6c5   : > { %v8040_v52 = vadd.f32 %v7980_v62, %v7199_v50  ;;  %v8436_v9 = vmax.f32 %v8404_v55, 0.0  ;;  %v7814_v6 = vpop.f32.mrf.mxu0  ;;  %v7211_v56 = vpop.f32.mrf.mxu3  ;;  %v8316_v18 = vrot.slane %v8205_v23, 1  ;;  %v7204_v62 = vadd.f32 %v13590_v26, %v13403_v4 }
 0x6c6   : > { %v7209_v23 = vadd.f32 %v13627_v35, %v13411_v3  ;;  %v7212_v35 = vadd.f32 %v7211_v56, %v13415_v58 }
 0x6c7   : > { %v8076_v54 = vmul.f32 %v13471_v47, %v8040_v52  ;;  %8021 = vmatmul.bf16.gmra.mxu2 %v10400_v31  ;;  %v8317_v52 = vsel %vm8279_vm14, %v8315_v8, %v8316_v18  ;;  %v8319_v7 = vsel %vm8279_vm14, %v8316_v18, %v8318_v11  ;;  %v7207_v31 = vadd.f32 %v13614_v30, %v13407_v36 }
 0x6c9   : > { %v8112_v13 = vadd.f32 %v13481_v24, %v8076_v54 }
 0x6ca   : > { %v7982_v12 = vpop.f32.mrf.mxu2 }
 0x6cb   : > { %v8405_v17 = vadd.f32 %v8314_v63, %v8112_v13  ;;  %v7983_v37 = vadd.f32 %v7982_v12, %v7894_v48  ;;  %v7900_v22 = vpop.f32.mrf.mxu1  ;;  %v11117_v48 = vld [vmem:[%s11589_s23 + $0x78] sm:$0xff]  }
 0x6cc   : > { %v11019_v38 = vunpack.c.l.bf16 %v11117_v48  ;;  %v7901_v53 = vadd.f32 %v7900_v22, %v13623_v28 }
 0x6cd   : > { %v8437_v44 = vmax.f32 %v8405_v17, 0.0  ;;  %v8041_v25 = vadd.f32 %v7983_v37, %v7202_v45  ;;  %v7816_v2 = vpop.f32.mrf.mxu0  ;;  %v7213_v54 = vpop.f32.mrf.mxu3  ;;  %v10523_v37 = vld [vmem:[%s11589_s23 + $0x80] sm:$0x1] }
 0x6ce   : > { %v8209_v43 = vunpack.c.l.bf16 %v10523_v37  ;;  %v8320_v10 = vrot.slane %v11019_v38, 1 }
 0x6cf   : > { %v11066_v41 = vpack.c.bf16 %v8437_v44, %v8436_v9  ;;  %v8077_v33 = vmul.f32 %v13471_v47, %v8041_v25  ;;  %v11020_v9 = vunpack.c.h.bf16 %v11117_v48 }
 0x6d1   : > { %11126 = vst [vmem:[%s13498_s16 + $0x30] sm:$0xff] %v11066_v41   ;;  %v8113_v19 = vadd.f32 %v13481_v24, %v8077_v33  ;;  %v8321_v36 = vrot.slane %v11020_v9, 1 }
 0x6d2   : > { %v7984_v50 = vpop.f32.mrf.mxu2 }
 0x6d3   : > { %v7985_v14 = vadd.f32 %v7984_v50, %v7896_v0  ;;  %v7903_v15 = vpop.f32.mrf.mxu1  ;;  %v8406_v20 = vadd.f32 %v8317_v52, %v8113_v19  ;;  %v8323_v0 = vrot.slane %v8209_v43, 1  ;;  %v8322_v28 = vsel %vm8279_vm14, %v8320_v10, %v8321_v36  ;;  %v10524_v52 = vld [vmem:[%s11589_s23 + $0x84] sm:$0xff]  }
 0x6d5   : > { %v8042_v29 = vadd.f32 %v7985_v14, %v7204_v62  ;;  %v8438_v12 = vmax.f32 %v8406_v20, 0.0  ;;  %v7819_v60 = vpop.f32.mrf.mxu0  ;;  %v7216_v33 = vpop.f32.mrf.mxu3  ;;  %v8324_v50 = vsel %vm8279_vm14, %v8321_v36, %v8323_v0  ;;  %v7904_v14 = vadd.f32 %v7903_v15, %v7814_v6 }
 0x6d7   : > { %v8078_v39 = vmul.f32 %v13471_v47, %v8042_v29 }
 0x6d9   : > { %v8114_v4 = vadd.f32 %v13481_v24, %v8078_v39 }
 0x6da   : > { %v7987_v26 = vpop.f32.mrf.mxu2 }
 0x6db   : > { %v8407_v63 = vadd.f32 %v8319_v7, %v8114_v4  ;;  %v7988_v55 = vadd.f32 %v7987_v26, %v7899_v46  ;;  %v7905_v13 = vpop.f32.mrf.mxu1  ;;  %v10526_v4 = vld [vmem:[%s11589_s23 + $0x8c] sm:$0x1] }
 0x6dc   : > { %v8212_v6 = vunpack.c.l.bf16 %v10526_v4  ;;  %v7906_v15 = vadd.f32 %v7905_v13, %v7816_v2 }
 0x6dd   : > { %v8439_v45 = vmax.f32 %v8407_v63, 0.0  ;;  %v8043_v17 = vadd.f32 %v7988_v55, %v7207_v31  ;;  %v7821_v39 = vpop.f32.mrf.mxu0  ;;  %v8210_v31 = vunpack.c.l.bf16 %v10524_v52  ;;  %v8211_v63 = vunpack.c.h.bf16 %v10524_v52  ;;  %v7218_v55 = vpop.f32.mrf.mxu3 }
 0x6de   : > { %v8328_v38 = vrot.slane %v8212_v6, 1 }
 0x6df   : > { %v11071_v44 = vpack.c.bf16 %v8439_v45, %v8438_v12  ;;  %v8079_v25 = vmul.f32 %v13471_v47, %v8043_v17  ;;  %v8325_v45 = vrot.slane %v8210_v31, 1  ;;  %v8326_v58 = vrot.slane %v8211_v63, 1 }
 0x6e0   : > { %v7214_v17 = vadd.f32 %v7213_v54, %v13419_v16 }
 0x6e1   : > { %11127 = vst [vmem:[%s13498_s16 + $0x38] sm:$0xff] %v11071_v44   ;;  %v8115_v8 = vadd.f32 %v13481_v24, %v8079_v25  ;;  %v8327_v43 = vsel %vm8279_vm14, %v8325_v45, %v8326_v58  ;;  %v8329_v13 = vsel %vm8279_vm14, %v8326_v58, %v8328_v38 }
 0x6e2   : > { %v7989_v30 = vpop.f32.mrf.mxu2 }
 0x6e3   : > { %v7990_v41 = vadd.f32 %v7989_v30, %v7901_v53  ;;  %v7908_v1 = vpop.f32.mrf.mxu1  ;;  %v8408_v62 = vadd.f32 %v8322_v28, %v8115_v8  ;;  %v11118_v8 = vld [vmem:[%s11589_s23 + $0x90] sm:$0xff]  }
 0x6e4   : > { %v7909_v30 = vadd.f32 %v7908_v1, %v7819_v60 }
 0x6e5   : > { %v8044_v18 = vadd.f32 %v7990_v41, %v7209_v23  ;;  %v8440_v7 = vmax.f32 %v8408_v62, 0.0  ;;  %v7824_v53 = vpop.f32.mrf.mxu0  ;;  %v7221_v10 = vpop.f32.mrf.mxu3  ;;  %v7217_v23 = vadd.f32 %v7216_v33, %v13423_v49  ;;  %v11023_v62 = vunpack.c.l.bf16 %v11118_v8 }
 0x6e6   : > { %v7219_v33 = vadd.f32 %v7218_v55, %v13427_v51  ;;  %v7222_v55 = vadd.f32 %v7221_v10, %v13431_v5 }
 0x6e7   : > { %v8080_v22 = vmul.f32 %v13471_v47, %v8044_v18 }
 0x6e9   : > { %v8116_v11 = vadd.f32 %v13481_v24, %v8080_v22 }
 0x6ea   : > { %v7992_v3 = vpop.f32.mrf.mxu2 }
 0x6eb   : > { %v8409_v19 = vadd.f32 %v8324_v50, %v8116_v11  ;;  %v7993_v29 = vadd.f32 %v7992_v3, %v7904_v14  ;;  %v7910_v26 = vpop.f32.mrf.mxu1  ;;  %v10529_v50 = vld [vmem:[%s11589_s23 + $0x98] sm:$0x1]  ;;  %v11024_v14 = vunpack.c.h.bf16 %v11118_v8 }
 0x6ec   : > { %v8215_v3 = vunpack.c.l.bf16 %v10529_v50  ;;  %v7911_v60 = vadd.f32 %v7910_v26, %v7821_v39 }
 0x6ed   : > { %v8441_v20 = vmax.f32 %v8409_v19, 0.0  ;;  %v8045_v46 = vadd.f32 %v7993_v29, %v7212_v35  ;;  %v7826_v35 = vpop.f32.mrf.mxu0  ;;  %v8330_v29 = vrot.slane %v11023_v62, 1  ;;  %v8331_v52 = vrot.slane %v11024_v14, 1 }
 0x6ef   : > { %v11076_v48 = vpack.c.bf16 %v8441_v20, %v8440_v7  ;;  %v8081_v12 = vmul.f32 %v13471_v47, %v8045_v46  ;;  %v7223_v7 = vpop.f32.mrf.mxu3  ;;  %v8333_v46 = vrot.slane %v8215_v3, 1  ;;  %v8332_v63 = vsel %vm8279_vm14, %v8330_v29, %v8331_v52  ;;  %v11119_v29 = vld [vmem:[%s11589_s23 + $0xa8] sm:$0xff]  }
 0x6f0   : > { %v7224_v10 = vadd.f32 %v7223_v7, %v13435_v57  ;;  %v10535_v7 = vld [vmem:[%s11589_s23 + $0xb0] sm:$0x1] }
 0x6f1   : > { %11128 = vst [vmem:[%s13498_s16 + $0x40] sm:$0xff] %v11076_v48   ;;  %v8117_v9 = vadd.f32 %v13481_v24, %v8081_v12  ;;  %v8334_v39 = vsel %vm8279_vm14, %v8331_v52, %v8333_v46  ;;  %v11028_v46 = vunpack.c.h.bf16 %v11119_v29 }
 0x6f2   : > { %v7994_v56 = vpop.f32.mrf.mxu2 }
 0x6f3   : > { %v7995_v37 = vadd.f32 %v7994_v56, %v7906_v15  ;;  %v7913_v2 = vpop.f32.mrf.mxu1  ;;  %v8410_v36 = vadd.f32 %v8327_v43, %v8117_v9  ;;  %v10530_v56 = vld [vmem:[%s11589_s23 + $0x9c] sm:$0xff]   ;;  %v10532_v43 = vld [vmem:[%s11589_s23 + $0xa4] sm:$0x1] }
 0x6f4   : > { %v7914_v6 = vadd.f32 %v7913_v2, %v7824_v53  ;;  %v8218_v53 = vunpack.c.l.bf16 %v10532_v43 }
 0x6f5   : > { %v8046_v44 = vadd.f32 %v7995_v37, %v7214_v17  ;;  %v8442_v18 = vmax.f32 %v8410_v36, 0.0  ;;  %v7829_v51 = vpop.f32.mrf.mxu0 }
 0x6f7   : > { %v8082_v25 = vmul.f32 %v13471_v47, %v8046_v44  ;;  %v7226_v37 = vpop.f32.mrf.mxu3 }
 0x6f9   : > { %v8118_v16 = vadd.f32 %v13481_v24, %v8082_v25  ;;  %v8216_v25 = vunpack.c.l.bf16 %v10530_v56 }
 0x6fa   : > { %v7997_v54 = vpop.f32.mrf.mxu2 }
 0x6fb   : > { %v8411_v41 = vadd.f32 %v8329_v13, %v8118_v16  ;;  %v7998_v0 = vadd.f32 %v7997_v54, %v7909_v30  ;;  %v7915_v19 = vpop.f32.mrf.mxu1  ;;  %v8217_v13 = vunpack.c.h.bf16 %v10530_v56  ;;  %v8335_v16 = vrot.slane %v8216_v25, 1 }
 0x6fc   : > { %v7916_v2 = vadd.f32 %v7915_v19, %v7826_v35 }
 0x6fd   : > { %v8443_v28 = vmax.f32 %v8411_v41, 0.0  ;;  %v8047_v22 = vadd.f32 %v7998_v0, %v7217_v23  ;;  %v8336_v54 = vrot.slane %v8217_v13, 1  ;;  %v8338_v41 = vrot.slane %v8218_v53, 1  ;;  %v7831_v0 = vpop.f32.mrf.mxu0 }
 0x6ff   : > { %v11081_v11 = vpack.c.bf16 %v8443_v28, %v8442_v18  ;;  %v8083_v1 = vmul.f32 %v13471_v47, %v8047_v22  ;;  %v8337_v22 = vsel %vm8279_vm14, %v8335_v16, %v8336_v54  ;;  %v7228_v50 = vpop.f32.mrf.mxu3  ;;  %v8339_v14 = vsel %vm8279_vm14, %v8336_v54, %v8338_v41  ;;  %v10536_v16 = vld [vmem:[%s11589_s23 + $0xb4] sm:$0xff]  }
 0x700   : > { %v8222_v41 = vunpack.c.l.bf16 %v10536_v16 }
 0x701   : > { %11129 = vst [vmem:[%s13498_s16 + $0x48] sm:$0xff] %v11081_v11   ;;  %v8119_v4 = vadd.f32 %v13481_v24, %v8083_v1 }
 0x702   : > { %v7999_v49 = vpop.f32.mrf.mxu2 }
 0x703   : > { %v8000_v20 = vadd.f32 %v7999_v49, %v7911_v60  ;;  %v8412_v26 = vadd.f32 %v8332_v63, %v8119_v4  ;;  %v7918_v17 = vpop.f32.mrf.mxu1  ;;  %v7227_v60 = vadd.f32 %v7226_v37, %v13439_v42  ;;  %v8221_v63 = vunpack.c.l.bf16 %v10535_v7  ;;  %v13703_v42 = vld [vmem:[%s13795_s5] ss:$0 sm:$0xff] }
 0x704   : > { %v7919_v3 = vadd.f32 %v7918_v17, %v7829_v51 }
 0x705   : > { %v8048_v31 = vadd.f32 %v8000_v20, %v7219_v33  ;;  %v8444_v38 = vmax.f32 %v8412_v26, 0.0  ;;  %v11027_v20 = vunpack.c.l.bf16 %v11119_v29 }
 0x707   : > { %v8084_v48 = vmul.f32 %v13471_v47, %v8048_v31  ;;  %v8340_v26 = vrot.slane %v11027_v20, 1 }
 0x709   : > { %v8120_v15 = vadd.f32 %v13481_v24, %v8084_v48  ;;  %v7231_v48 = vpop.f32.mrf.mxu3 }
 0x70a   : > { %v8002_v12 = vpop.f32.mrf.mxu2 }
 0x70b   : > { %v8413_v45 = vadd.f32 %v8334_v39, %v8120_v15  ;;  %v8003_v58 = vadd.f32 %v8002_v12, %v7914_v6  ;;  %v7920_v28 = vpop.f32.mrf.mxu1  ;;  %v8341_v6 = vrot.slane %v11028_v46, 1  ;;  %v7229_v12 = vadd.f32 %v7228_v50, %v13443_v61 }
 0x70c   : > { %v8345_v50 = vrot.slane %v8222_v41, 1 }
 0x70d   : > { %v8445_v9 = vmax.f32 %v8413_v45, 0.0  ;;  %v8049_v44 = vadd.f32 %v8003_v58, %v7222_v55  ;;  %v8343_v55 = vrot.slane %v8221_v63, 1  ;;  %v13710_v45 = vld [vmem:[%s13796_s6] ss:$0 sm:$0xff]  ;;  %v8342_v17 = vsel %vm8279_vm14, %v8340_v26, %v8341_v6 }
 0x70f   : > { %v11086_v36 = vpack.c.bf16 %v8445_v9, %v8444_v38  ;;  %v8085_v30 = vmul.f32 %v13471_v47, %v8049_v44  ;;  %v8344_v38 = vsel %vm8279_vm14, %v8341_v6, %v8343_v55  ;;  %v10541_v6 = vld [vmem:[%s11589_s23 + $0xc8] sm:$0x1] }
 0x711   : > { %11130 = vst [vmem:[%s13498_s16 + $0x50] sm:$0xff] %v11086_v36   ;;  %v8121_v8 = vadd.f32 %v13481_v24, %v8085_v30  ;;  %v7232_v36 = vadd.f32 %v7231_v48, %v13447_v21  ;;  %v7233_v53 = vpop.f32.mrf.mxu3 }
 0x712   : > { %v8004_v5 = vpop.f32.mrf.mxu2 }
 0x713   : > { %v8005_v23 = vadd.f32 %v8004_v5, %v7916_v2  ;;  %v8414_v11 = vadd.f32 %v8337_v22, %v8121_v8  ;;  %v7923_v31 = vpop.f32.mrf.mxu1 }
 0x715   : > { %v8050_v18 = vadd.f32 %v8005_v23, %v7224_v10  ;;  %v8446_v52 = vmax.f32 %v8414_v11, 0.0  ;;  %v10538_v23 = vld [vmem:[%s11589_s23 + $0xbc] sm:$0x1]  ;;  %v7234_v11 = vadd.f32 %v7233_v53, %v13451_v59 }
 0x717   : > { %v8086_v62 = vmul.f32 %v13471_v47, %v8050_v18  ;;  %v7834_v47 = vpop.f32.mrf.mxu0  ;;  %v8224_v18 = vunpack.c.l.bf16 %v10538_v23 }
 0x718   : > { %v7924_v44 = vadd.f32 %v7923_v31, %v7834_v47  ;;  %v11120_v31 = vld [vmem:[%s11589_s23 + $0xc0] sm:$0xff]  }
 0x719   : > { %v8122_v57 = vadd.f32 %v13481_v24, %v8086_v62  ;;  %v7921_v24 = vadd.f32 %v7920_v28, %v7831_v0  ;;  %v8223_v0 = vunpack.c.h.bf16 %v10536_v16 }
 0x71a   : > { %v8007_v35 = vpop.f32.mrf.mxu2 }
 0x71b   : > { %v8415_v1 = vadd.f32 %v8339_v14, %v8122_v57  ;;  %v8008_v19 = vadd.f32 %v8007_v35, %v7919_v3  ;;  %v7925_v25 = vpop.f32.mrf.mxu1  ;;  %v8346_v62 = vrot.slane %v8223_v0, 1  ;;  %v8348_v35 = vrot.slane %v8224_v18, 1 }
 0x71d   : > { %v8447_v49 = vmax.f32 %v8415_v1, 0.0  ;;  %v8051_v33 = vadd.f32 %v8008_v19, %v7227_v60  ;;  %v7236_v60 = vpop.f32.mrf.mxu3  ;;  %v8347_v29 = vsel %vm8279_vm14, %v8345_v50, %v8346_v62  ;;  %v10544_v50 = vld [vmem:[%s11589_s23 + $0xd4] sm:$0x1] }
 0x71e   : > { %v7237_v46 = vadd.f32 %v7236_v60, %v13455_v34 }
 0x71f   : > { %v11091_v4 = vpack.c.bf16 %v8447_v49, %v8446_v52  ;;  %v8087_v39 = vmul.f32 %v13703_v42, %v8051_v33  ;;  %v7836_v9 = vpop.f32.mrf.mxu0  ;;  %v8349_v49 = vsel %vm8279_vm14, %v8346_v62, %v8348_v35 }
 0x720   : > { %v7926_v28 = vadd.f32 %v7925_v25, %v7836_v9 }
 0x721   : > { %11131 = vst [vmem:[%s13498_s16 + $0x58] sm:$0xff] %v11091_v4   ;;  %v8123_v58 = vadd.f32 %v13710_v45, %v8087_v39 }
 0x722   : > { %v8009_v15 = vpop.f32.mrf.mxu2 }
 0x723   : > { %v8010_v51 = vadd.f32 %v8009_v15, %v7921_v24  ;;  %v8416_v61 = vadd.f32 %v8342_v17, %v8123_v58  ;;  %v7928_v3 = vpop.f32.mrf.mxu1  ;;  %v11031_v15 = vunpack.c.l.bf16 %v11120_v31  ;;  %v8227_v58 = vunpack.c.l.bf16 %v10541_v6 }
 0x725   : > { %v8052_v56 = vadd.f32 %v8010_v51, %v7229_v12  ;;  %v8448_v54 = vmax.f32 %v8416_v61, 0.0  ;;  %v11032_v12 = vunpack.c.h.bf16 %v11120_v31  ;;  %v7238_v51 = vpop.f32.mrf.mxu3 }
 0x726   : > { %v7239_v9 = vadd.f32 %v7238_v51, %v13457_v40 }
 0x727   : > { %v8088_v37 = vmul.f32 %v13703_v42, %v8052_v56  ;;  %v7839_v21 = vpop.f32.mrf.mxu0  ;;  %v8351_v34 = vrot.slane %v11032_v12, 1 }
 0x728   : > { %v7929_v7 = vadd.f32 %v7928_v3, %v7839_v21 }
 0x729   : > { %v8124_v43 = vadd.f32 %v13710_v45, %v8088_v37  ;;  %v8350_v37 = vrot.slane %v11031_v15, 1 }
 0x72a   : > { %v8012_v13 = vpop.f32.mrf.mxu2 }
 0x72b   : > { %v8417_v2 = vadd.f32 %v8344_v38, %v8124_v43  ;;  %v8013_v30 = vadd.f32 %v8012_v13, %v7924_v44  ;;  %v7930_v39 = vpop.f32.mrf.mxu1  ;;  %v8353_v44 = vrot.slane %v8227_v58, 1  ;;  %v8352_v53 = vsel %vm8279_vm14, %v8350_v37, %v8351_v34 }
 0x72d   : > { %v8449_v5 = vmax.f32 %v8417_v2, 0.0  ;;  %v8053_v10 = vadd.f32 %v8013_v30, %v7232_v36  ;;  %v8354_v16 = vsel %vm8279_vm14, %v8351_v34, %v8353_v44 }
 0x72f   : > { %v11096_v8 = vpack.c.bf16 %v8449_v5, %v8448_v54  ;;  %v8089_v22 = vmul.f32 %v13703_v42, %v8053_v10  ;;  %v7841_v63 = vpop.f32.mrf.mxu0  ;;  %v7241_v54 = vpop.f32.mrf.mxu3 }
 0x730   : > { %v7931_v56 = vadd.f32 %v7930_v39, %v7841_v63  ;;  %v7242_v41 = vadd.f32 %v7241_v54, %v13459_v27 }
 0x731   : > { %11132 = vst [vmem:[%s13498_s16 + $0x60] sm:$0xff] %v11096_v8   ;;  %v8125_v1 = vadd.f32 %v13710_v45, %v8089_v22  ;;  %v10542_v8 = vld [vmem:[%s11589_s23 + $0xcc] sm:$0xff]   ;;  %s11000_s23 = sshll.u32 %s11423_s27, 7  ;;  %s8521_s27 = scalar_lea.sflag [#allocation7], %s11585_s14 }
 0x732   : > { %v8014_v14 = vpop.f32.mrf.mxu2  ;;  %v8229_v3 = vunpack.c.h.bf16 %v10542_v8  ;;  %s8535_s17 = scalar_lea.hbm %s13797_s7, %s11000_s23 }
 0x733   : > { %v8015_v57 = vadd.f32 %v8014_v14, %v7926_v28  ;;  %v8418_v33 = vadd.f32 %v8347_v29, %v8125_v1  ;;  %s8538_s1 = sshll.u32 %s8535_s17, 4  ;;  %s8539_s1 = int_to_ptr.hbm [resolvable:$true] %s8538_s1 }
 0x734   : > { %v8356_v27 = vrot.slane %v8229_v3, 1  ;;  %s11359_s4 = sshra.s32 %s8539_s1, 4  ;;  %s11360_s4 = int_to_ptr.hbm [resolvable:$true] %s11359_s4 }
 0x735   : > { %v8054_v19 = vadd.f32 %v8015_v57, %v7234_v11  ;;  %v8450_v48 = vmax.f32 %v8418_v33, 0.0  ;;  %v8228_v11 = vunpack.c.l.bf16 %v10542_v8  ;;  %v8230_v57 = vunpack.c.l.bf16 %v10544_v50  ;;  %s11361_s29 = scalar_lea.hbm %s11360_s4, 128  ;;  %p11366_p8 = scmp.lt.s32.totalorder %s11360_s4, %s13797_s7 }
 0x736   : > { %p11362_p1 = scmp.ne.s32.totalorder %s11360_s4, %s11361_s29  ;;  %p11367_p12 = scmp.lt.s32.totalorder %s11365_s12, %s11361_s29 }
 0x737   : > { %v8090_v52 = vmul.f32 %v13703_v42, %v8054_v19  ;;  %v7844_v25 = vpop.f32.mrf.mxu0  ;;  %v7243_v1 = vpop.f32.mrf.mxu3  ;;  %v8355_v19 = vrot.slane %v8228_v11, 1  ;;  %v8358_v33 = vrot.slane %v8230_v57, 1 }
 0x738   : > { %p11363_p2 = pnand %p11362_p1, %p11565_p7  ;;  %p11368_p13 = por %p11367_p12, %p11366_p8 }
 0x739   : > { %v8126_v20 = vadd.f32 %v13710_v45, %v8090_v52  ;;  %v7244_v52 = vadd.f32 %v7243_v1, %v13461_v32 }
 0x73a   : > { %v8017_v59 = vpop.f32.mrf.mxu2  ;;  %p11364_p4 = pneg %p11363_p2 }
 0x73b   : > { %v8419_v47 = vadd.f32 %v8349_v49, %v8126_v20  ;;  %v8018_v4 = vadd.f32 %v8017_v59, %v7929_v7  ;;  %v8357_v59 = vsel %vm8279_vm14, %v8355_v19, %v8356_v27 }
 0x73c   : > { %p11369_p0 = pnand %p11368_p13, %p11364_p4 }
 0x73d   : > { %v8451_v24 = vmax.f32 %v8419_v47, 0.0  ;;  %v8055_v26 = vadd.f32 %v8018_v4, %v7237_v46  ;;  %v8359_v47 = vsel %vm8279_vm14, %v8356_v27, %v8358_v33 }
 0x73f   : > { %v11101_v55 = vpack.c.bf16 %v8451_v24, %v8450_v48  ;;  %v8091_v17 = vmul.f32 %v13703_v42, %v8055_v26  ;;  %v7933_v13 = vpop.f32.mrf.mxu1  ;;  %v7846_v14 = vpop.f32.mrf.mxu0 }
 0x740   : > { %v7934_v30 = vadd.f32 %v7933_v13, %v7844_v25 }
 0x741   : > { %11133 = vst [vmem:[%s13498_s16 + $0x68] sm:$0xff] %v11101_v55   ;;  %v8127_v43 = vadd.f32 %v13710_v45, %v8091_v17 }
 0x742   : > { %v8019_v38 = vpop.f32.mrf.mxu2 }
 0x743   : > { %v8020_v61 = vadd.f32 %v8019_v38, %v7931_v56  ;;  %v8420_v5 = vadd.f32 %v8352_v53, %v8127_v43 }
 0x745   : > { %v8056_v36 = vadd.f32 %v8020_v61, %v7239_v9  ;;  %v8452_v18 = vmax.f32 %v8420_v5, 0.0 }
 0x747   : > { %v8092_v2 = vmul.f32 %v13703_v42, %v8056_v36  ;;  %v7935_v21 = vpop.f32.mrf.mxu1 }
 0x748   : > { %v7936_v35 = vadd.f32 %v7935_v21, %v7846_v14 }
 0x749   : > { %v8128_v40 = vadd.f32 %v13710_v45, %v8092_v2 }
 0x74a   : > { %v8022_v23 = vpop.f32.mrf.mxu2 }
 0x74b   : > { %v8421_v10 = vadd.f32 %v8354_v16, %v8128_v40  ;;  %v8023_v0 = vadd.f32 %v8022_v23, %v7934_v30 }
 0x74d   : > { %v8453_v28 = vmax.f32 %v8421_v10, 0.0  ;;  %v8057_v22 = vadd.f32 %v8023_v0, %v7242_v41 }
 0x74f   : > { %v11106_v62 = vpack.c.bf16 %v8453_v28, %v8452_v18  ;;  %v8093_v60 = vmul.f32 %v13703_v42, %v8057_v22 }
 0x751   : > { %11134 = vst [vmem:[%s13498_s16 + $0x70] sm:$0xff] %v11106_v62   ;;  %v8129_v7 = vadd.f32 %v13710_v45, %v8093_v60 }
 0x752   : > { %v8024_v29 = vpop.f32.mrf.mxu2 }
 0x753   : > { %v8025_v49 = vadd.f32 %v8024_v29, %v7936_v35  ;;  %v8422_v4 = vadd.f32 %v8357_v59, %v8129_v7 }
 0x755   : > { %v8058_v20 = vadd.f32 %v8025_v49, %v7244_v52  ;;  %v8454_v63 = vmax.f32 %v8422_v4, 0.0 }
 0x757   : > { %v8094_v46 = vmul.f32 %v13703_v42, %v8058_v20 }
 0x759   : > { %v8130_v32 = vadd.f32 %v13710_v45, %v8094_v46 }
 0x75b   : > { %v8423_v31 = vadd.f32 %v8359_v47, %v8130_v32 }
 0x75d   : > { %v8455_v48 = vmax.f32 %v8423_v31, 0.0 }
 0x75f   : > { %v11111_v24 = vpack.c.bf16 %v8455_v48, %v8454_v63 }
 0x761   : > { %11135 = vst [vmem:[%s13498_s16 + $0x78] sm:$0xff] %v11111_v24  }
 0x762   : > { %11372 = shalt.err (!%p11369_p0)
}
 0x763   : > { %s11438_s14 = smov 64   ;;  %s11439_s16 = smov 4  }
 0x764   : > { %11165 = dma.vmem_to_hbm [thread:$0]  (%p11565_p7), %s8537_s22, 2048, %s8539_s1, %s8521_s27, %s11438_s14, %s11438_s14, %s11439_s16  }
 0x765 PF: > { %s14035_s30 = sld [smem:[#allocation15_spill]]  ;;  %s8553_s23 = sand.u32 1, %s11411_s24  }
 0x766   : > { %p11179_p3 = pnand %p8653_p11, %p11529_p6  ;;  %s8554_s8 = scalar_lea.sflag [#allocation7], %s8553_s23 }
 0x768   : > { %p11180_p5 = pneg %p11179_p3 }
 0x76a   : > { %11406 = dma.done.wait (%p11180_p5), %s8554_s8, 2048  }
 0x76b   : > { %11408 = vsyncadd (%p11180_p5), %s8554_s8, 4294965248  ;;  %s24_s29 = sadd.s32 1, %s14035_s30   ;;  %s14036_s24 = smov %s11415_s25 }
 0x76c   : > { %p21_p9 = scmp.ge.s32.totalorder %s24_s29, 4   ;;  %s14037_s25 = smov %s11419_s26 }
 0x76d   : > { %s14038_s26 = smov %s11573_s20  ;;  %s14039_s27 = smov %s11427_s28 }
 0x76e   : > { %s14040_s28 = smov %s14042_s13  ;;  %23 = sbr.rel (!%p21_p9) target bundleno = 10 (0xa), region = 116 }
 0x773   :  { %8560 = vsyncpa [#allocation6], 1 }
 0x774   :  { %8562 = vsyncpa [#allocation6 + $0x1], 1 }
 0x775   :  { %8563 = vsyncpa [#allocation9], 1 }
 0x776   :  { %8564 = vsyncpa [#allocation7], 1 }
 0x777   :  { %8566 = vsyncpa [#allocation7 + $0x1], 1 }

</bundles_post_ra>
